<compile_context>
chip_gen: v7x
topology: tpu7x:2x2x1
jax: 0.10.0
libtpu: 0.0.40
codegen_flags: <defaults>
</compile_context>

<pallas_src>
import functools
import math

import jax
import jax.numpy as jnp
from jax.experimental import pallas as pl
from jax.experimental.pallas import tpu as pltpu


# ----------------------------- in-kernel helpers -----------------------------

def _layer_norm(x, gamma, beta, eps=1e-5):
    mean = jnp.mean(x, axis=-1, keepdims=True)
    xc = x - mean
    var = jnp.mean(xc * xc, axis=-1, keepdims=True)
    return xc * jax.lax.rsqrt(var + eps) * gamma + beta


def _mha(x_q, x_kv, aw, bq, bk, bv, bo, mask, *, batch, q_len, kv_len, nhead):
    """Multi-head attention on batch-major 2-D activations (batch*len, E).

    aw: (4*nhead, dh, E) bf16 packed per-head weights where
        aw[0*nhead + h] = Wq[:, h*dh:(h+1)*dh].T   (dh, E)
        aw[1*nhead + h] = Wk[:, h*dh:(h+1)*dh].T
        aw[2*nhead + h] = Wv[:, h*dh:(h+1)*dh].T
        aw[3*nhead + h] = Wo[h*dh:(h+1)*dh, :]
    so all per-head weight selection is a static leading-axis index (no lane slicing of any
    computed activation) and the head outputs are accumulated instead of concatenated.
    mask is a (q_len, kv_len) additive mask; biases are (1, E) f32 rows.
    """
    dh = aw.shape[1]
    scale = 1.0 / math.sqrt(dh)

    xq16 = x_q.astype(jnp.bfloat16)
    xkv16 = xq16 if x_kv is x_q else x_kv.astype(jnp.bfloat16)

    out = None
    for h in range(nhead):                       # statically unrolled, nhead is tiny
        lo = h * dh
        wq_t = aw[0 * nhead + h]
        wk_t = aw[1 * nhead + h]
        wv_t = aw[2 * nhead + h]
        wo_h = aw[3 * nhead + h]
        # projections: bf16 x bf16 -> f32 accumulate on the MXU
        q = jnp.einsum("re,de->rd", xq16, wq_t,
                       preferred_element_type=jnp.float32) + bq[:, lo:lo + dh]
        k = jnp.einsum("re,de->rd", xkv16, wk_t,
                       preferred_element_type=jnp.float32) + bk[:, lo:lo + dh]
        v = jnp.einsum("re,de->rd", xkv16, wv_t,
                       preferred_element_type=jnp.float32) + bv[:, lo:lo + dh]
        q3 = q.reshape(batch, q_len, dh)
        k3 = k.reshape(batch, kv_len, dh)
        v3 = v.reshape(batch, kv_len, dh)
        s = jnp.einsum("bqd,bkd->bqk", q3, k3,
                       preferred_element_type=jnp.float32) * scale + mask
        m = jnp.max(s, axis=-1, keepdims=True)
        p = jnp.exp(s - m)
        p = p * pl.reciprocal(jnp.sum(p, axis=-1, keepdims=True), approx=True)
        o = jnp.einsum("bqk,bkd->bqd", p, v3, preferred_element_type=jnp.float32)
        o2 = o.reshape(batch * q_len, dh).astype(jnp.bfloat16)
        contrib = jnp.dot(o2, wo_h, preferred_element_type=jnp.float32)
        out = contrib if out is None else out + contrib
    return out + bo


# ----------------------------- fused encoder-stack kernel -----------------------------

def _encoder_stack_kernel(
        src_ref, dw_ref, db_ref, pe_ref, mask_ref, ng_ref, nb_ref,         # constants
        aw_ref, ff1w_ref, ff2w_ref, vec_ref, ff1b_ref,                     # per-layer
        o_ref,                                                             # resident activation
        *, batch, seq, nhead):
    layer = pl.program_id(0)

    @pl.when(layer == 0)
    def _init():
        # fused dense_shape + positional-encoding add (pe indexed by batch: reference quirk)
        o_ref[...] = (jnp.dot(src_ref[...], dw_ref[...],
                              preferred_element_type=jnp.float32)
                      + db_ref[...] + pe_ref[...])

    # unpack the per-layer packed vector slab (one DMA instead of ~8 tiny ones)
    vec = vec_ref[0]                               # (9, E) f32
    bq, bk, bv, bo = vec[0:1], vec[1:2], vec[2:3], vec[3:4]
    ln1_g, ln1_b = vec[4:5], vec[5:6]
    ff2_b = vec[6:7]
    ln2_g, ln2_b = vec[7:8], vec[8:9]

    aw = aw_ref[0]                                 # (4*nhead, dh, E) bf16

    x = o_ref[...]
    sa = _mha(x, x, aw, bq, bk, bv, bo, mask_ref[...],
              batch=batch, q_len=seq, kv_len=seq, nhead=nhead)
    x = _layer_norm(x + sa, ln1_g, ln1_b)
    h = jnp.dot(x.astype(jnp.bfloat16), ff1w_ref[0],
                preferred_element_type=jnp.float32) + ff1b_ref[0]
    h = jnp.maximum(h, 0.0)
    h = jnp.dot(h.astype(jnp.bfloat16), ff2w_ref[0],
                preferred_element_type=jnp.float32) + ff2_b
    x = _layer_norm(x + h, ln2_g, ln2_b)
    o_ref[...] = x

    @pl.when(layer == pl.num_programs(0) - 1)
    def _final_norm():
        o_ref[...] = _layer_norm(o_ref[...], ng_ref[...], nb_ref[...])


def encoder_stack(src2d, pe2d, mask, params, *, batch, seq, nhead):
    rows, nf = src2d.shape
    e = params["dense_w"].shape[1]
    enc = params["enc"]
    n_layers = enc["attn_w"].shape[0]
    ff = enc["ff1_w"].shape[-1]
    n_vec = enc["vecs"].shape[1]
    dh = e // nhead

    def const(*shape):
        return pl.BlockSpec(shape, lambda l: (0,) * len(shape))

    def per_layer(*shape):
        return pl.BlockSpec((1,) + shape, lambda l: (l,) + (0,) * len(shape))

    kernel = functools.partial(_encoder_stack_kernel, batch=batch, seq=seq, nhead=nhead)
    return pl.pallas_call(
        kernel,
        out_shape=jax.ShapeDtypeStruct((rows, e), jnp.float32),
        grid=(n_layers,),
        in_specs=[
            const(rows, nf),              # src rows
            const(nf, e),                 # dense_w
            const(1, e),                  # dense_b
            const(rows, e),               # positional-encoding rows
            const(seq, seq),              # src self-attention mask
            const(1, e),                  # final encoder norm gamma
            const(1, e),                  # final encoder norm beta
            per_layer(4 * nhead, dh, e),  # packed per-head attn weights (bf16)
            # NOTE(v5e sweep): pipeline_mode=pl.Buffered(3) on the two FF-weight specs below is
            # the suggested deeper-prefetch experiment; left at the default double buffering.
            per_layer(e, ff),             # ff1 weight (bf16)
            per_layer(ff, e),             # ff2 weight (bf16)
            per_layer(n_vec, e),          # packed biases + LN affine params (f32)
            per_layer(1, ff),             # ff1 bias (f32)
        ],
        out_specs=pl.BlockSpec((rows, e), lambda l: (0, 0)),
        compiler_params=pltpu.CompilerParams(
            dimension_semantics=("arbitrary",),
            vmem_limit_bytes=32 * 1024 * 1024),
    )(src2d, params["dense_w"], params["dense_b"], pe2d, mask,
      params["enc_norm_g"], params["enc_norm_b"],
      enc["attn_w"], enc["ff1_w"], enc["ff2_w"], enc["vecs"], enc["ff1_b"])


# ----------------------------- fused decoder-stack kernel -----------------------------

def _decoder_stack_kernel(
        tgt_ref, dw_ref, db_ref, pe_ref, mem_ref, tmask_ref, mmask_ref,
        ng_ref, nb_ref,                                                    # constants
        sa_ref, ca_ref, ff1w_ref, ff2w_ref, vec_ref, ff1b_ref,             # per-layer
        o_ref,                                                             # resident activation
        *, batch, tgt_len, src_len, nhead):
    layer = pl.program_id(0)

    @pl.when(layer == 0)
    def _init():
        o_ref[...] = (jnp.dot(tgt_ref[...], dw_ref[...],
                              preferred_element_type=jnp.float32)
                      + db_ref[...] + pe_ref[...])

    vec = vec_ref[0]                               # (15, E) f32
    sbq, sbk, sbv, sbo, ln1_g, ln1_b = (vec[i:i + 1] for i in range(6))
    cbq, cbk, cbv, cbo, ln2_g, ln2_b = (vec[i:i + 1] for i in range(6, 12))
    ff2_b, ln3_g, ln3_b = vec[12:13], vec[13:14], vec[14:15]

    sa_w = sa_ref[0]                               # (4*nhead, dh, E) bf16
    ca_w = ca_ref[0]

    x = o_ref[...]
    sa = _mha(x, x, sa_w, sbq, sbk, sbv, sbo, tmask_ref[...],
              batch=batch, q_len=tgt_len, kv_len=tgt_len, nhead=nhead)
    x = _layer_norm(x + sa, ln1_g, ln1_b)
    ca = _mha(x, mem_ref[...], ca_w, cbq, cbk, cbv, cbo, mmask_ref[...],
              batch=batch, q_len=tgt_len, kv_len=src_len, nhead=nhead)
    x = _layer_norm(x + ca, ln2_g, ln2_b)
    h = jnp.dot(x.astype(jnp.bfloat16), ff1w_ref[0],
                preferred_element_type=jnp.float32) + ff1b_ref[0]
    h = jnp.maximum(h, 0.0)
    h = jnp.dot(h.astype(jnp.bfloat16), ff2w_ref[0],
                preferred_element_type=jnp.float32) + ff2_b
    x = _layer_norm(x + h, ln3_g, ln3_b)
    o_ref[...] = x

    @pl.when(layer == pl.num_programs(0) - 1)
    def _final_norm():
        # final decoder LayerNorm; the Linear(d_model, 1) (+ sigmoid) is done lane-dense in the
        # wrapper so this kernel emits a (rows, E) slab instead of a 1-lane masked store.
        o_ref[...] = _layer_norm(o_ref[...], ng_ref[...], nb_ref[...])


def decoder_stack(tgt2d, pe2d, memory, tgt_mask, mem_mask, params, *,
                  batch, tgt_len, src_len, nhead):
    rows, nf = tgt2d.shape
    e = params["dense_w"].shape[1]
    dec = params["dec"]
    n_layers = dec["sa_w"].shape[0]
    ff = dec["ff1_w"].shape[-1]
    n_vec = dec["vecs"].shape[1]
    dh = e // nhead
    mem_rows = memory.shape[0]

    def const(*shape):
        return pl.BlockSpec(shape, lambda l: (0,) * len(shape))

    def per_layer(*shape):
        return pl.BlockSpec((1,) + shape, lambda l: (l,) + (0,) * len(shape))

    kernel = functools.partial(
        _decoder_stack_kernel, batch=batch, tgt_len=tgt_len, src_len=src_len, nhead=nhead)
    return pl.pallas_call(
        kernel,
        out_shape=jax.ShapeDtypeStruct((rows, e), jnp.float32),
        grid=(n_layers,),
        in_specs=[
            const(rows, nf),              # tgt rows
            const(nf, e),                 # dense_w
            const(1, e),                  # dense_b
            const(rows, e),               # positional-encoding rows
            const(mem_rows, e),           # encoder memory
            const(tgt_len, tgt_len),      # tgt self-attention mask
            const(tgt_len, src_len),      # cross-attention (padding) mask
            const(1, e),                  # final decoder norm gamma
            const(1, e),                  # final decoder norm beta
            per_layer(4 * nhead, dh, e),  # self-attn packed per-head weights (bf16)
            per_layer(4 * nhead, dh, e),  # cross-attn packed per-head weights (bf16)
            per_layer(e, ff),             # ff1 weight (bf16)
            per_layer(ff, e),             # ff2 weight (bf16)
            per_layer(n_vec, e),          # packed biases + LN affine params (f32)
            per_layer(1, ff),             # ff1 bias (f32)
        ],
        out_specs=pl.BlockSpec((rows, e), lambda l: (0, 0)),
        compiler_params=pltpu.CompilerParams(
            dimension_semantics=("arbitrary",),
            vmem_limit_bytes=32 * 1024 * 1024),
    )(tgt2d, params["dense_w"], params["dense_b"], pe2d, memory, tgt_mask, mem_mask,
      params["dec_norm_g"], params["dec_norm_b"],
      dec["sa_w"], dec["ca_w"], dec["ff1_w"], dec["ff2_w"], dec["vecs"], dec["ff1_b"])


# ----------------------------- wrapper / glue -----------------------------

def generate_square_subsequent_mask(sz):
    lower = jnp.tril(jnp.ones((sz, sz), jnp.float32))
    return jnp.where(lower == 1.0, 0.0, -jnp.inf).astype(jnp.float32)


def make_positional_encoding(d_model, max_len=5000):
    position = jnp.arange(max_len, dtype=jnp.float32)[:, None]
    div_term = jnp.exp(jnp.arange(0, d_model, 2, dtype=jnp.float32)
                       * (-math.log(10000.0) / d_model))
    pe = jnp.zeros((max_len, d_model), jnp.float32)
    pe = pe.at[:, 0::2].set(jnp.sin(position * div_term))
    pe = pe.at[:, 1::2].set(jnp.cos(position * div_term))
    return pe                                          # (max_len, d_model)


def _round_up(n, m):
    return ((n + m - 1) // m) * m


def _pad_seq(x, target_len):
    """Zero-pad (B, S, F) along axis 1 up to target_len."""
    b, s, f = x.shape
    if target_len == s:
        return x
    return jnp.concatenate([x, jnp.zeros((b, target_len - s, f), x.dtype)], axis=1)


def _pad_self_mask(mask, n_pad):
    n = mask.shape[0]
    if n_pad == n:
        return mask
    m = jnp.full((n_pad, n_pad), -jnp.inf, jnp.float32)
    m = m.at[:n, :n].set(mask)
    m = m.at[n:, :].set(0.0)        # padded query rows attend somewhere finite (discarded later)
    return m


def _cross_mask(t_pad, s, s_pad):
    if s_pad == s:
        return jnp.zeros((t_pad, s_pad), jnp.float32)
    return jnp.concatenate(
        [jnp.zeros((t_pad, s), jnp.float32),
         jnp.full((t_pad, s_pad - s), -jnp.inf, jnp.float32)], axis=1)


def model_forward(params, x, t, src_mask, tgt_mask, *, nhead, out_seq_len, use_sigmoid):
    # x: (B, seq_length+1, n_features),  t: (B, out_seq_len, n_features)
    batch = x.shape[0]
    src = x[:, :-1, :]
    s_len, n_feat = src.shape[1], src.shape[2]
    t_len = t.shape[1]
    s_pad = _round_up(s_len, 8)
    t_pad = _round_up(t_len, 8)

    src2d = _pad_seq(src, s_pad).reshape(batch * s_pad, n_feat)
    tgt2d = _pad_seq(t, t_pad).reshape(batch * t_pad, n_feat)

    # NOTE: reproduces the reference quirk -- pe is indexed by x.size(0), i.e. the batch dim.
    pe_b = params["pe"][:batch]                             # (B, E)
    pe_src = jnp.repeat(pe_b, s_pad, axis=0)                # (B*S_pad, E), row b*S_pad+s -> pe[b]
    pe_tgt = jnp.repeat(pe_b, t_pad, axis=0)
    # TODO(synk): dropout(p=0.1) is eval-mode identity here (stochastic dropout omitted).

    src_mask_p = _pad_self_mask(src_mask, s_pad)
    tgt_mask_p = _pad_self_mask(tgt_mask, t_pad)
    mem_mask_p = _cross_mask(t_pad, s_len, s_pad)

    memory = encoder_stack(src2d, pe_src, src_mask_p, params,
                           batch=batch, seq=s_pad, nhead=nhead)
    dec_act = decoder_stack(tgt2d, pe_tgt, memory, tgt_mask_p, mem_mask_p, params,
                            batch=batch, tgt_len=t_pad, src_len=s_pad,
                            nhead=nhead)                                   # (B*T_pad, E)

    # lane-dense final Linear(d_model, 1) (+ optional sigmoid) in the wrapper
    y = jnp.dot(dec_act, params["final_w"]) + params["final_b"]            # (B*T_pad, 1)
    if use_sigmoid:
        y = jax.nn.sigmoid(y)

    out_bt = y.reshape(batch, t_pad)[:, :t_len]              # drop padded rows -> (B, T)
    # reference flattens the (T, B, 1) tensor t-major: reproduce with a transpose before view.
    return out_bt.T.reshape(-1, out_seq_len)


# ----------------------------- deterministic parameter init -----------------------------

def _init_linear(key, fan_in, fan_out, scale=0.02):
    kw, kb = jax.random.split(key)
    w = scale * jax.random.normal(kw, (fan_in, fan_out), jnp.float32)
    b = scale * jax.random.normal(kb, (fan_out,), jnp.float32)
    return w, b


def _init_attn_packed(key, e, nhead):
    """Returns packed (4*nhead, dh, e) bf16 weights + f32 biases bq, bk, bv, bo (each (e,))."""
    ks = jax.random.split(key, 4)
    wq, bq = _init_linear(ks[0], e, e)
    wk, bk = _init_linear(ks[1], e, e)
    wv, bv = _init_linear(ks[2], e, e)
    wo, bo = _init_linear(ks[3], e, e)
    dh = e // nhead
    slabs = []
    for w, is_proj in ((wq, True), (wk, True), (wv, True), (wo, False)):
        for h in range(nhead):
            if is_proj:
                slabs.append(w[:, h * dh:(h + 1) * dh].T)   # (dh, e)
            else:
                slabs.append(w[h * dh:(h + 1) * dh, :])      # (dh, e)
    aw = jnp.stack(slabs).astype(jnp.bfloat16)                # (4*nhead, dh, e)
    return aw, bq, bk, bv, bo


def _init_enc_layer(key, e, ff, nhead):
    ks = jax.random.split(key, 3)
    aw, bq, bk, bv, bo = _init_attn_packed(ks[0], e, nhead)
    w1, b1 = _init_linear(ks[1], e, ff)
    w2, b2 = _init_linear(ks[2], ff, e)
    ones, zeros = jnp.ones((e,), jnp.float32), jnp.zeros((e,), jnp.float32)
    vecs = jnp.stack([bq, bk, bv, bo, ones, zeros, b2, ones, zeros])      # (9, e) f32
    return dict(attn_w=aw,
                ff1_w=w1.astype(jnp.bfloat16), ff2_w=w2.astype(jnp.bfloat16),
                vecs=vecs, ff1_b=b1.reshape(1, ff))


def _init_dec_layer(key, e, ff, nhead):
    ks = jax.random.split(key, 4)
    sa_w, sbq, sbk, sbv, sbo = _init_attn_packed(ks[0], e, nhead)
    ca_w, cbq, cbk, cbv, cbo = _init_attn_packed(ks[1], e, nhead)
    w1, b1 = _init_linear(ks[2], e, ff)
    w2, b2 = _init_linear(ks[3], ff, e)
    ones, zeros = jnp.ones((e,), jnp.float32), jnp.zeros((e,), jnp.float32)
    vecs = jnp.stack([sbq, sbk, sbv, sbo, ones, zeros,
                      cbq, cbk, cbv, cbo, ones, zeros,
                      b2, ones, zeros])                                   # (15, e) f32
    return dict(sa_w=sa_w, ca_w=ca_w,
                ff1_w=w1.astype(jnp.bfloat16), ff2_w=w2.astype(jnp.bfloat16),
                vecs=vecs, ff1_b=b1.reshape(1, ff))


def init_params(key, cfg):
    e, ff, nhead = cfg["d_model"], cfg["dim_feedforward"], cfg["n_heads"]
    n_enc, n_dec = cfg["num_encoder_layers"], cfg["num_decoder_layers"]
    ks = jax.random.split(key, 2 + n_enc + n_dec)
    dense_w, dense_b = _init_linear(ks[0], cfg["number_time_series"], e)
    final_w, final_b = _init_linear(ks[1], e, 1)
    enc_layers = [_init_enc_layer(ks[2 + i], e, ff, nhead) for i in range(n_enc)]
    dec_layers = [_init_dec_layer(ks[2 + n_enc + i], e, ff, nhead) for i in range(n_dec)]
    stack = lambda layers: jax.tree_util.tree_map(lambda *xs: jnp.stack(xs), *layers)
    return dict(
        dense_w=dense_w, dense_b=dense_b.reshape(1, e),
        final_w=final_w, final_b=final_b,
        pe=make_positional_encoding(e),
        enc=stack(enc_layers), dec=stack(dec_layers),
        enc_norm_g=jnp.ones((1, e), jnp.float32), enc_norm_b=jnp.zeros((1, e), jnp.float32),
        dec_norm_g=jnp.ones((1, e), jnp.float32), dec_norm_b=jnp.zeros((1, e), jnp.float32),
    )


# ----------------------------- main -----------------------------

if __name__ == "__main__":
    cfg = dict(
        number_time_series=3,
        seq_length=8,
        output_seq_len=6,
        d_model=32,
        n_heads=4,
        dim_feedforward=2048,     # nn.Transformer default
        num_encoder_layers=6,     # nn.Transformer default
        num_decoder_layers=6,     # nn.Transformer default
        sigmoid=False,
    )

    params = init_params(jax.random.PRNGKey(42), cfg)
    src_mask = generate_square_subsequent_mask(cfg["seq_length"])       # passed explicitly
    tgt_mask = generate_square_subsequent_mask(cfg["output_seq_len"])   # == self.tgt_mask

    kx, kt = jax.random.split(jax.random.PRNGKey(0))
    batch = 2
    x = jax.random.normal(kx, (batch, cfg["seq_length"] + 1, cfg["number_time_series"]),
                          jnp.float32)
    t = jax.random.normal(kt, (batch, cfg["output_seq_len"], cfg["number_time_series"]),
                          jnp.float32)

    fwd = jax.jit(functools.partial(
        model_forward,
        nhead=cfg["n_heads"],
        out_seq_len=cfg["output_seq_len"],
        use_sigmoid=cfg["sigmoid"],
    ))

    out = jax.block_until_ready(fwd(params, x, t, src_mask, tgt_mask))

    assert out.shape == (batch, cfg["output_seq_len"]), out.shape
    assert bool(jnp.all(jnp.isfinite(out)))
    print("KERNEL_OK")
</pallas_src>

<mosaic_0001>
module attributes {stable_mosaic.version = 11 : i64} {
  func.func @_encoder_stack_kernel(%arg0: i32, %arg1: memref<16x3xf32, #tpu.memory_space<vmem>>, %arg2: memref<3x32xf32, #tpu.memory_space<vmem>>, %arg3: memref<1x32xf32, #tpu.memory_space<vmem>>, %arg4: memref<16x32xf32, #tpu.memory_space<vmem>>, %arg5: memref<8x8xf32, #tpu.memory_space<vmem>>, %arg6: memref<1x32xf32, #tpu.memory_space<vmem>>, %arg7: memref<1x32xf32, #tpu.memory_space<vmem>>, %arg8: memref<1x16x8x32xbf16, #tpu.memory_space<vmem>>, %arg9: memref<1x32x2048xbf16, #tpu.memory_space<vmem>>, %arg10: memref<1x2048x32xbf16, #tpu.memory_space<vmem>>, %arg11: memref<1x9x32xf32, #tpu.memory_space<vmem>>, %arg12: memref<1x1x2048xf32, #tpu.memory_space<vmem>>, %arg13: memref<16x32xf32, #tpu.memory_space<vmem>>) attributes {dimension_semantics = [#tpu.dimension_semantics<arbitrary>], iteration_bounds = array<i64: 6>, scalar_prefetch = 0 : i64, scratch_operands = 0 : i64, tpu.core_type = #tpu.core_type<tc>, window_params = [{pipeline_mode = #tpu.pipeline_mode<synchronous>, transform_indices = @transform_0, window_bounds = array<i64: 16, 3>}, {pipeline_mode = #tpu.pipeline_mode<synchronous>, transform_indices = @transform_1, window_bounds = array<i64: 3, 32>}, {pipeline_mode = #tpu.pipeline_mode<synchronous>, transform_indices = @transform_2, window_bounds = array<i64: 1, 32>}, {pipeline_mode = #tpu.pipeline_mode<synchronous>, transform_indices = @transform_3, window_bounds = array<i64: 16, 32>}, {pipeline_mode = #tpu.pipeline_mode<synchronous>, transform_indices = @transform_4, window_bounds = array<i64: 8, 8>}, {pipeline_mode = #tpu.pipeline_mode<synchronous>, transform_indices = @transform_5, window_bounds = array<i64: 1, 32>}, {pipeline_mode = #tpu.pipeline_mode<synchronous>, transform_indices = @transform_6, window_bounds = array<i64: 1, 32>}, {transform_indices = @transform_7, window_bounds = array<i64: 1, 16, 8, 32>}, {transform_indices = @transform_8, window_bounds = array<i64: 1, 32, 2048>}, {transform_indices = @transform_9, window_bounds = array<i64: 1, 2048, 32>}, {transform_indices = @transform_10, window_bounds = array<i64: 1, 9, 32>}, {transform_indices = @transform_11, window_bounds = array<i64: 1, 1, 2048>}, {pipeline_mode = #tpu.pipeline_mode<synchronous>, transform_indices = @transform_12, window_bounds = array<i64: 16, 32>}]} {
    %c0_i32 = arith.constant 0 : i32
    %0 = arith.cmpi eq, %arg0, %c0_i32 : i32
    %1 = arith.extui %0 : i1 to i32
    %c0_i32_0 = arith.constant 0 : i32
    %2 = arith.cmpi ne, %1, %c0_i32_0 : i32
    scf.if %2 {
      %c0_71 = arith.constant 0 : index
      %c0_72 = arith.constant 0 : index
      %258 = vector.load %arg1[%c0_71, %c0_72] : memref<16x3xf32, #tpu.memory_space<vmem>>, vector<16x3xf32>
      %c0_73 = arith.constant 0 : index
      %c0_74 = arith.constant 0 : index
      %259 = vector.load %arg2[%c0_73, %c0_74] : memref<3x32xf32, #tpu.memory_space<vmem>>, vector<3x32xf32>
      %cst_75 = arith.constant dense<0.000000e+00> : vector<16x32xf32>
      %260 = tpu.matmul %258, %259, %cst_75 {dimension_numbers = #tpu.dot_dimension_numbers<[1], [0], [0], [1], [0, 0, 1, 1], [], []>} : vector<16x3xf32>, vector<3x32xf32>, vector<16x32xf32> -> vector<16x32xf32>
      %c0_76 = arith.constant 0 : index
      %c0_77 = arith.constant 0 : index
      %261 = vector.load %arg3[%c0_76, %c0_77] : memref<1x32xf32, #tpu.memory_space<vmem>>, vector<1x32xf32>
      %262 = vector.broadcast %261 : vector<1x32xf32> to vector<16x32xf32>
      %263 = arith.addf %260, %262 : vector<16x32xf32>
      %c0_78 = arith.constant 0 : index
      %c0_79 = arith.constant 0 : index
      %264 = vector.load %arg4[%c0_78, %c0_79] : memref<16x32xf32, #tpu.memory_space<vmem>>, vector<16x32xf32>
      %265 = arith.addf %263, %264 : vector<16x32xf32>
      %c0_80 = arith.constant 0 : index
      %c0_81 = arith.constant 0 : index
      %266 = vector.load %arg13[%c0_80, %c0_81] : memref<16x32xf32, #tpu.memory_space<vmem>>, vector<16x32xf32>
      tpu.vector_store %arg13[%c0_80, %c0_81], %265 {strides = array<i32>} : memref<16x32xf32, #tpu.memory_space<vmem>>, vector<16x32xf32>,
    } else {
    }
    %c0 = arith.constant 0 : index
    %c0_1 = arith.constant 0 : index
    %c0_2 = arith.constant 0 : index
    %3 = vector.load %arg11[%c0, %c0_1, %c0_2] : memref<1x9x32xf32, #tpu.memory_space<vmem>>, vector<1x9x32xf32>
    %4 = vector.shape_cast %3 : vector<1x9x32xf32> to vector<9x32xf32>
    %5 = vector.extract_strided_slice %4 {offsets = [0, 0], sizes = [1, 32], strides = [1, 1]} : vector<9x32xf32> to vector<1x32xf32>
    %6 = vector.extract_strided_slice %4 {offsets = [1, 0], sizes = [1, 32], strides = [1, 1]} : vector<9x32xf32> to vector<1x32xf32>
    %7 = vector.extract_strided_slice %4 {offsets = [2, 0], sizes = [1, 32], strides = [1, 1]} : vector<9x32xf32> to vector<1x32xf32>
    %8 = vector.extract_strided_slice %4 {offsets = [3, 0], sizes = [1, 32], strides = [1, 1]} : vector<9x32xf32> to vector<1x32xf32>
    %9 = vector.extract_strided_slice %4 {offsets = [4, 0], sizes = [1, 32], strides = [1, 1]} : vector<9x32xf32> to vector<1x32xf32>
    %10 = vector.extract_strided_slice %4 {offsets = [5, 0], sizes = [1, 32], strides = [1, 1]} : vector<9x32xf32> to vector<1x32xf32>
    %11 = vector.extract_strided_slice %4 {offsets = [6, 0], sizes = [1, 32], strides = [1, 1]} : vector<9x32xf32> to vector<1x32xf32>
    %12 = vector.extract_strided_slice %4 {offsets = [7, 0], sizes = [1, 32], strides = [1, 1]} : vector<9x32xf32> to vector<1x32xf32>
    %13 = vector.extract_strided_slice %4 {offsets = [8, 0], sizes = [1, 32], strides = [1, 1]} : vector<9x32xf32> to vector<1x32xf32>
    %c0_3 = arith.constant 0 : index
    %c0_4 = arith.constant 0 : index
    %c0_5 = arith.constant 0 : index
    %c0_6 = arith.constant 0 : index
    %14 = vector.load %arg8[%c0_3, %c0_4, %c0_5, %c0_6] : memref<1x16x8x32xbf16, #tpu.memory_space<vmem>>, vector<1x16x8x32xbf16>
    %15 = vector.shape_cast %14 : vector<1x16x8x32xbf16> to vector<16x8x32xbf16>
    %c0_7 = arith.constant 0 : index
    %c0_8 = arith.constant 0 : index
    %16 = vector.load %arg13[%c0_7, %c0_8] : memref<16x32xf32, #tpu.memory_space<vmem>>, vector<16x32xf32>
    %c0_9 = arith.constant 0 : index
    %c0_10 = arith.constant 0 : index
    %17 = vector.load %arg5[%c0_9, %c0_10] : memref<8x8xf32, #tpu.memory_space<vmem>>, vector<8x8xf32>
    %18 = arith.truncf %16 : vector<16x32xf32> to vector<16x32xbf16>
    %19 = vector.extract_strided_slice %15 {offsets = [0, 0, 0], sizes = [1, 8, 32], strides = [1, 1, 1]} : vector<16x8x32xbf16> to vector<1x8x32xbf16>
    %20 = vector.shape_cast %19 : vector<1x8x32xbf16> to vector<8x32xbf16>
    %21 = vector.extract_strided_slice %15 {offsets = [4, 0, 0], sizes = [1, 8, 32], strides = [1, 1, 1]} : vector<16x8x32xbf16> to vector<1x8x32xbf16>
    %22 = vector.shape_cast %21 : vector<1x8x32xbf16> to vector<8x32xbf16>
    %23 = vector.extract_strided_slice %15 {offsets = [8, 0, 0], sizes = [1, 8, 32], strides = [1, 1, 1]} : vector<16x8x32xbf16> to vector<1x8x32xbf16>
    %24 = vector.shape_cast %23 : vector<1x8x32xbf16> to vector<8x32xbf16>
    %25 = vector.extract_strided_slice %15 {offsets = [12, 0, 0], sizes = [1, 8, 32], strides = [1, 1, 1]} : vector<16x8x32xbf16> to vector<1x8x32xbf16>
    %26 = vector.shape_cast %25 : vector<1x8x32xbf16> to vector<8x32xbf16>
    "tpu.trace_start"() <{level = 10 : i32, message = "re,de->rd"}> : () -> ()
    %cst = arith.constant dense<0.000000e+00> : vector<16x8xf32>
    %27 = tpu.matmul %18, %20, %cst {dimension_numbers = #tpu.dot_dimension_numbers<[1], [1], [0], [0], [0, 0, 1, 0], [], []>} : vector<16x32xbf16>, vector<8x32xbf16>, vector<16x8xf32> -> vector<16x8xf32>
    "tpu.trace_stop"() : () -> ()
    %28 = vector.extract_strided_slice %5 {offsets = [0, 0], sizes = [1, 8], strides = [1, 1]} : vector<1x32xf32> to vector<1x8xf32>
    %29 = vector.broadcast %28 : vector<1x8xf32> to vector<16x8xf32>
    %30 = arith.addf %27, %29 : vector<16x8xf32>
    "tpu.trace_start"() <{level = 10 : i32, message = "re,de->rd"}> : () -> ()
    %cst_11 = arith.constant dense<0.000000e+00> : vector<16x8xf32>
    %31 = tpu.matmul %18, %22, %cst_11 {dimension_numbers = #tpu.dot_dimension_numbers<[1], [1], [0], [0], [0, 0, 1, 0], [], []>} : vector<16x32xbf16>, vector<8x32xbf16>, vector<16x8xf32> -> vector<16x8xf32>
    "tpu.trace_stop"() : () -> ()
    %32 = vector.extract_strided_slice %6 {offsets = [0, 0], sizes = [1, 8], strides = [1, 1]} : vector<1x32xf32> to vector<1x8xf32>
    %33 = vector.broadcast %32 : vector<1x8xf32> to vector<16x8xf32>
    %34 = arith.addf %31, %33 : vector<16x8xf32>
    "tpu.trace_start"() <{level = 10 : i32, message = "re,de->rd"}> : () -> ()
    %cst_12 = arith.constant dense<0.000000e+00> : vector<16x8xf32>
    %35 = tpu.matmul %18, %24, %cst_12 {dimension_numbers = #tpu.dot_dimension_numbers<[1], [1], [0], [0], [0, 0, 1, 0], [], []>} : vector<16x32xbf16>, vector<8x32xbf16>, vector<16x8xf32> -> vector<16x8xf32>
    "tpu.trace_stop"() : () -> ()
    %36 = vector.extract_strided_slice %7 {offsets = [0, 0], sizes = [1, 8], strides = [1, 1]} : vector<1x32xf32> to vector<1x8xf32>
    %37 = vector.broadcast %36 : vector<1x8xf32> to vector<16x8xf32>
    %38 = arith.addf %35, %37 : vector<16x8xf32>
    %39 = vector.shape_cast %30 : vector<16x8xf32> to vector<2x8x8xf32>
    %40 = vector.shape_cast %34 : vector<16x8xf32> to vector<2x8x8xf32>
    %41 = vector.shape_cast %38 : vector<16x8xf32> to vector<2x8x8xf32>
    "tpu.trace_start"() <{level = 10 : i32, message = "bqd,bkd->bqk"}> : () -> ()
    %cst_13 = arith.constant dense<0.000000e+00> : vector<2x8x8xf32>
    %42 = tpu.matmul %39, %40, %cst_13 {dimension_numbers = #tpu.dot_dimension_numbers<[2], [2], [1], [1], [0, 0, 0, 1, 1, 1], [0], [0]>} : vector<2x8x8xf32>, vector<2x8x8xf32>, vector<2x8x8xf32> -> vector<2x8x8xf32>
    "tpu.trace_stop"() : () -> ()
    %cst_14 = arith.constant 0.353553385 : f32
    %43 = vector.broadcast %cst_14 : f32 to vector<2x8x8xf32>
    %44 = arith.mulf %42, %43 : vector<2x8x8xf32>
    %45 = vector.shape_cast %17 : vector<8x8xf32> to vector<1x8x8xf32>
    %46 = vector.broadcast %45 : vector<1x8x8xf32> to vector<2x8x8xf32>
    %47 = arith.addf %44, %46 : vector<2x8x8xf32>
    %cst_15 = arith.constant dense<0xFF800000> : vector<2x8xf32>
    %48 = vector.multi_reduction <maximumf>, %47, %cst_15 [2] : vector<2x8x8xf32> to vector<2x8xf32>
    %49 = vector.shape_cast %48 : vector<2x8xf32> to vector<2x8x1xf32>
    %50 = vector.broadcast %49 : vector<2x8x1xf32> to vector<2x8x8xf32>
    %51 = arith.subf %47, %50 : vector<2x8x8xf32>
    %52 = math.exp %51 : vector<2x8x8xf32>
    %cst_16 = arith.constant dense<0.000000e+00> : vector<2x8xf32>
    %53 = vector.multi_reduction <add>, %52, %cst_16 [2] : vector<2x8x8xf32> to vector<2x8xf32>
    %54 = vector.shape_cast %53 : vector<2x8xf32> to vector<2x8x1xf32>
    %55 = tpu.reciprocal %54 {approx = true} : vector<2x8x1xf32> -> vector<2x8x1xf32>
    %56 = vector.broadcast %55 : vector<2x8x1xf32> to vector<2x8x8xf32>
    %57 = arith.mulf %52, %56 : vector<2x8x8xf32>
    "tpu.trace_start"() <{level = 10 : i32, message = "bqk,bkd->bqd"}> : () -> ()
    %cst_17 = arith.constant dense<0.000000e+00> : vector<2x8x8xf32>
    %58 = tpu.matmul %57, %41, %cst_17 {dimension_numbers = #tpu.dot_dimension_numbers<[2], [1], [1], [2], [0, 0, 0, 1, 1, 2], [0], [0]>} : vector<2x8x8xf32>, vector<2x8x8xf32>, vector<2x8x8xf32> -> vector<2x8x8xf32>
    "tpu.trace_stop"() : () -> ()
    %59 = vector.shape_cast %58 : vector<2x8x8xf32> to vector<16x8xf32>
    %60 = arith.truncf %59 : vector<16x8xf32> to vector<16x8xbf16>
    %cst_18 = arith.constant dense<0.000000e+00> : vector<16x32xf32>
    %61 = tpu.matmul %60, %26, %cst_18 {dimension_numbers = #tpu.dot_dimension_numbers<[1], [0], [0], [1], [0, 0, 1, 1], [], []>} : vector<16x8xbf16>, vector<8x32xbf16>, vector<16x32xf32> -> vector<16x32xf32>
    %62 = vector.extract_strided_slice %15 {offsets = [1, 0, 0], sizes = [1, 8, 32], strides = [1, 1, 1]} : vector<16x8x32xbf16> to vector<1x8x32xbf16>
    %63 = vector.shape_cast %62 : vector<1x8x32xbf16> to vector<8x32xbf16>
    %64 = vector.extract_strided_slice %15 {offsets = [5, 0, 0], sizes = [1, 8, 32], strides = [1, 1, 1]} : vector<16x8x32xbf16> to vector<1x8x32xbf16>
    %65 = vector.shape_cast %64 : vector<1x8x32xbf16> to vector<8x32xbf16>
    %66 = vector.extract_strided_slice %15 {offsets = [9, 0, 0], sizes = [1, 8, 32], strides = [1, 1, 1]} : vector<16x8x32xbf16> to vector<1x8x32xbf16>
    %67 = vector.shape_cast %66 : vector<1x8x32xbf16> to vector<8x32xbf16>
    %68 = vector.extract_strided_slice %15 {offsets = [13, 0, 0], sizes = [1, 8, 32], strides = [1, 1, 1]} : vector<16x8x32xbf16> to vector<1x8x32xbf16>
    %69 = vector.shape_cast %68 : vector<1x8x32xbf16> to vector<8x32xbf16>
    "tpu.trace_start"() <{level = 10 : i32, message = "re,de->rd"}> : () -> ()
    %cst_19 = arith.constant dense<0.000000e+00> : vector<16x8xf32>
    %70 = tpu.matmul %18, %63, %cst_19 {dimension_numbers = #tpu.dot_dimension_numbers<[1], [1], [0], [0], [0, 0, 1, 0], [], []>} : vector<16x32xbf16>, vector<8x32xbf16>, vector<16x8xf32> -> vector<16x8xf32>
    "tpu.trace_stop"() : () -> ()
    %71 = vector.extract_strided_slice %5 {offsets = [0, 8], sizes = [1, 8], strides = [1, 1]} : vector<1x32xf32> to vector<1x8xf32>
    %72 = vector.broadcast %71 : vector<1x8xf32> to vector<16x8xf32>
    %73 = arith.addf %70, %72 : vector<16x8xf32>
    "tpu.trace_start"() <{level = 10 : i32, message = "re,de->rd"}> : () -> ()
    %cst_20 = arith.constant dense<0.000000e+00> : vector<16x8xf32>
    %74 = tpu.matmul %18, %65, %cst_20 {dimension_numbers = #tpu.dot_dimension_numbers<[1], [1], [0], [0], [0, 0, 1, 0], [], []>} : vector<16x32xbf16>, vector<8x32xbf16>, vector<16x8xf32> -> vector<16x8xf32>
    "tpu.trace_stop"() : () -> ()
    %75 = vector.extract_strided_slice %6 {offsets = [0, 8], sizes = [1, 8], strides = [1, 1]} : vector<1x32xf32> to vector<1x8xf32>
    %76 = vector.broadcast %75 : vector<1x8xf32> to vector<16x8xf32>
    %77 = arith.addf %74, %76 : vector<16x8xf32>
    "tpu.trace_start"() <{level = 10 : i32, message = "re,de->rd"}> : () -> ()
    %cst_21 = arith.constant dense<0.000000e+00> : vector<16x8xf32>
    %78 = tpu.matmul %18, %67, %cst_21 {dimension_numbers = #tpu.dot_dimension_numbers<[1], [1], [0], [0], [0, 0, 1, 0], [], []>} : vector<16x32xbf16>, vector<8x32xbf16>, vector<16x8xf32> -> vector<16x8xf32>
    "tpu.trace_stop"() : () -> ()
    %79 = vector.extract_strided_slice %7 {offsets = [0, 8], sizes = [1, 8], strides = [1, 1]} : vector<1x32xf32> to vector<1x8xf32>
    %80 = vector.broadcast %79 : vector<1x8xf32> to vector<16x8xf32>
    %81 = arith.addf %78, %80 : vector<16x8xf32>
    %82 = vector.shape_cast %73 : vector<16x8xf32> to vector<2x8x8xf32>
    %83 = vector.shape_cast %77 : vector<16x8xf32> to vector<2x8x8xf32>
    %84 = vector.shape_cast %81 : vector<16x8xf32> to vector<2x8x8xf32>
    "tpu.trace_start"() <{level = 10 : i32, message = "bqd,bkd->bqk"}> : () -> ()
    %cst_22 = arith.constant dense<0.000000e+00> : vector<2x8x8xf32>
    %85 = tpu.matmul %82, %83, %cst_22 {dimension_numbers = #tpu.dot_dimension_numbers<[2], [2], [1], [1], [0, 0, 0, 1, 1, 1], [0], [0]>} : vector<2x8x8xf32>, vector<2x8x8xf32>, vector<2x8x8xf32> -> vector<2x8x8xf32>
    "tpu.trace_stop"() : () -> ()
    %cst_23 = arith.constant 0.353553385 : f32
    %86 = vector.broadcast %cst_23 : f32 to vector<2x8x8xf32>
    %87 = arith.mulf %85, %86 : vector<2x8x8xf32>
    %88 = vector.shape_cast %17 : vector<8x8xf32> to vector<1x8x8xf32>
    %89 = vector.broadcast %88 : vector<1x8x8xf32> to vector<2x8x8xf32>
    %90 = arith.addf %87, %89 : vector<2x8x8xf32>
    %cst_24 = arith.constant dense<0xFF800000> : vector<2x8xf32>
    %91 = vector.multi_reduction <maximumf>, %90, %cst_24 [2] : vector<2x8x8xf32> to vector<2x8xf32>
    %92 = vector.shape_cast %91 : vector<2x8xf32> to vector<2x8x1xf32>
    %93 = vector.broadcast %92 : vector<2x8x1xf32> to vector<2x8x8xf32>
    %94 = arith.subf %90, %93 : vector<2x8x8xf32>
    %95 = math.exp %94 : vector<2x8x8xf32>
    %cst_25 = arith.constant dense<0.000000e+00> : vector<2x8xf32>
    %96 = vector.multi_reduction <add>, %95, %cst_25 [2] : vector<2x8x8xf32> to vector<2x8xf32>
    %97 = vector.shape_cast %96 : vector<2x8xf32> to vector<2x8x1xf32>
    %98 = tpu.reciprocal %97 {approx = true} : vector<2x8x1xf32> -> vector<2x8x1xf32>
    %99 = vector.broadcast %98 : vector<2x8x1xf32> to vector<2x8x8xf32>
    %100 = arith.mulf %95, %99 : vector<2x8x8xf32>
    "tpu.trace_start"() <{level = 10 : i32, message = "bqk,bkd->bqd"}> : () -> ()
    %cst_26 = arith.constant dense<0.000000e+00> : vector<2x8x8xf32>
    %101 = tpu.matmul %100, %84, %cst_26 {dimension_numbers = #tpu.dot_dimension_numbers<[2], [1], [1], [2], [0, 0, 0, 1, 1, 2], [0], [0]>} : vector<2x8x8xf32>, vector<2x8x8xf32>, vector<2x8x8xf32> -> vector<2x8x8xf32>
    "tpu.trace_stop"() : () -> ()
    %102 = vector.shape_cast %101 : vector<2x8x8xf32> to vector<16x8xf32>
    %103 = arith.truncf %102 : vector<16x8xf32> to vector<16x8xbf16>
    %cst_27 = arith.constant dense<0.000000e+00> : vector<16x32xf32>
    %104 = tpu.matmul %103, %69, %cst_27 {dimension_numbers = #tpu.dot_dimension_numbers<[1], [0], [0], [1], [0, 0, 1, 1], [], []>} : vector<16x8xbf16>, vector<8x32xbf16>, vector<16x32xf32> -> vector<16x32xf32>
    %105 = arith.addf %61, %104 : vector<16x32xf32>
    %106 = vector.extract_strided_slice %15 {offsets = [2, 0, 0], sizes = [1, 8, 32], strides = [1, 1, 1]} : vector<16x8x32xbf16> to vector<1x8x32xbf16>
    %107 = vector.shape_cast %106 : vector<1x8x32xbf16> to vector<8x32xbf16>
    %108 = vector.extract_strided_slice %15 {offsets = [6, 0, 0], sizes = [1, 8, 32], strides = [1, 1, 1]} : vector<16x8x32xbf16> to vector<1x8x32xbf16>
    %109 = vector.shape_cast %108 : vector<1x8x32xbf16> to vector<8x32xbf16>
    %110 = vector.extract_strided_slice %15 {offsets = [10, 0, 0], sizes = [1, 8, 32], strides = [1, 1, 1]} : vector<16x8x32xbf16> to vector<1x8x32xbf16>
    %111 = vector.shape_cast %110 : vector<1x8x32xbf16> to vector<8x32xbf16>
    %112 = vector.extract_strided_slice %15 {offsets = [14, 0, 0], sizes = [1, 8, 32], strides = [1, 1, 1]} : vector<16x8x32xbf16> to vector<1x8x32xbf16>
    %113 = vector.shape_cast %112 : vector<1x8x32xbf16> to vector<8x32xbf16>
    "tpu.trace_start"() <{level = 10 : i32, message = "re,de->rd"}> : () -> ()
    %cst_28 = arith.constant dense<0.000000e+00> : vector<16x8xf32>
    %114 = tpu.matmul %18, %107, %cst_28 {dimension_numbers = #tpu.dot_dimension_numbers<[1], [1], [0], [0], [0, 0, 1, 0], [], []>} : vector<16x32xbf16>, vector<8x32xbf16>, vector<16x8xf32> -> vector<16x8xf32>
    "tpu.trace_stop"() : () -> ()
    %115 = vector.extract_strided_slice %5 {offsets = [0, 16], sizes = [1, 8], strides = [1, 1]} : vector<1x32xf32> to vector<1x8xf32>
    %116 = vector.broadcast %115 : vector<1x8xf32> to vector<16x8xf32>
    %117 = arith.addf %114, %116 : vector<16x8xf32>
    "tpu.trace_start"() <{level = 10 : i32, message = "re,de->rd"}> : () -> ()
    %cst_29 = arith.constant dense<0.000000e+00> : vector<16x8xf32>
    %118 = tpu.matmul %18, %109, %cst_29 {dimension_numbers = #tpu.dot_dimension_numbers<[1], [1], [0], [0], [0, 0, 1, 0], [], []>} : vector<16x32xbf16>, vector<8x32xbf16>, vector<16x8xf32> -> vector<16x8xf32>
    "tpu.trace_stop"() : () -> ()
    %119 = vector.extract_strided_slice %6 {offsets = [0, 16], sizes = [1, 8], strides = [1, 1]} : vector<1x32xf32> to vector<1x8xf32>
    %120 = vector.broadcast %119 : vector<1x8xf32> to vector<16x8xf32>
    %121 = arith.addf %118, %120 : vector<16x8xf32>
    "tpu.trace_start"() <{level = 10 : i32, message = "re,de->rd"}> : () -> ()
    %cst_30 = arith.constant dense<0.000000e+00> : vector<16x8xf32>
    %122 = tpu.matmul %18, %111, %cst_30 {dimension_numbers = #tpu.dot_dimension_numbers<[1], [1], [0], [0], [0, 0, 1, 0], [], []>} : vector<16x32xbf16>, vector<8x32xbf16>, vector<16x8xf32> -> vector<16x8xf32>
    "tpu.trace_stop"() : () -> ()
    %123 = vector.extract_strided_slice %7 {offsets = [0, 16], sizes = [1, 8], strides = [1, 1]} : vector<1x32xf32> to vector<1x8xf32>
    %124 = vector.broadcast %123 : vector<1x8xf32> to vector<16x8xf32>
    %125 = arith.addf %122, %124 : vector<16x8xf32>
    %126 = vector.shape_cast %117 : vector<16x8xf32> to vector<2x8x8xf32>
    %127 = vector.shape_cast %121 : vector<16x8xf32> to vector<2x8x8xf32>
    %128 = vector.shape_cast %125 : vector<16x8xf32> to vector<2x8x8xf32>
    "tpu.trace_start"() <{level = 10 : i32, message = "bqd,bkd->bqk"}> : () -> ()
    %cst_31 = arith.constant dense<0.000000e+00> : vector<2x8x8xf32>
    %129 = tpu.matmul %126, %127, %cst_31 {dimension_numbers = #tpu.dot_dimension_numbers<[2], [2], [1], [1], [0, 0, 0, 1, 1, 1], [0], [0]>} : vector<2x8x8xf32>, vector<2x8x8xf32>, vector<2x8x8xf32> -> vector<2x8x8xf32>
    "tpu.trace_stop"() : () -> ()
    %cst_32 = arith.constant 0.353553385 : f32
    %130 = vector.broadcast %cst_32 : f32 to vector<2x8x8xf32>
    %131 = arith.mulf %129, %130 : vector<2x8x8xf32>
    %132 = vector.shape_cast %17 : vector<8x8xf32> to vector<1x8x8xf32>
    %133 = vector.broadcast %132 : vector<1x8x8xf32> to vector<2x8x8xf32>
    %134 = arith.addf %131, %133 : vector<2x8x8xf32>
    %cst_33 = arith.constant dense<0xFF800000> : vector<2x8xf32>
    %135 = vector.multi_reduction <maximumf>, %134, %cst_33 [2] : vector<2x8x8xf32> to vector<2x8xf32>
    %136 = vector.shape_cast %135 : vector<2x8xf32> to vector<2x8x1xf32>
    %137 = vector.broadcast %136 : vector<2x8x1xf32> to vector<2x8x8xf32>
    %138 = arith.subf %134, %137 : vector<2x8x8xf32>
    %139 = math.exp %138 : vector<2x8x8xf32>
    %cst_34 = arith.constant dense<0.000000e+00> : vector<2x8xf32>
    %140 = vector.multi_reduction <add>, %139, %cst_34 [2] : vector<2x8x8xf32> to vector<2x8xf32>
    %141 = vector.shape_cast %140 : vector<2x8xf32> to vector<2x8x1xf32>
    %142 = tpu.reciprocal %141 {approx = true} : vector<2x8x1xf32> -> vector<2x8x1xf32>
    %143 = vector.broadcast %142 : vector<2x8x1xf32> to vector<2x8x8xf32>
    %144 = arith.mulf %139, %143 : vector<2x8x8xf32>
    "tpu.trace_start"() <{level = 10 : i32, message = "bqk,bkd->bqd"}> : () -> ()
    %cst_35 = arith.constant dense<0.000000e+00> : vector<2x8x8xf32>
    %145 = tpu.matmul %144, %128, %cst_35 {dimension_numbers = #tpu.dot_dimension_numbers<[2], [1], [1], [2], [0, 0, 0, 1, 1, 2], [0], [0]>} : vector<2x8x8xf32>, vector<2x8x8xf32>, vector<2x8x8xf32> -> vector<2x8x8xf32>
    "tpu.trace_stop"() : () -> ()
    %146 = vector.shape_cast %145 : vector<2x8x8xf32> to vector<16x8xf32>
    %147 = arith.truncf %146 : vector<16x8xf32> to vector<16x8xbf16>
    %cst_36 = arith.constant dense<0.000000e+00> : vector<16x32xf32>
    %148 = tpu.matmul %147, %113, %cst_36 {dimension_numbers = #tpu.dot_dimension_numbers<[1], [0], [0], [1], [0, 0, 1, 1], [], []>} : vector<16x8xbf16>, vector<8x32xbf16>, vector<16x32xf32> -> vector<16x32xf32>
    %149 = arith.addf %105, %148 : vector<16x32xf32>
    %150 = vector.extract_strided_slice %15 {offsets = [3, 0, 0], sizes = [1, 8, 32], strides = [1, 1, 1]} : vector<16x8x32xbf16> to vector<1x8x32xbf16>
    %151 = vector.shape_cast %150 : vector<1x8x32xbf16> to vector<8x32xbf16>
    %152 = vector.extract_strided_slice %15 {offsets = [7, 0, 0], sizes = [1, 8, 32], strides = [1, 1, 1]} : vector<16x8x32xbf16> to vector<1x8x32xbf16>
    %153 = vector.shape_cast %152 : vector<1x8x32xbf16> to vector<8x32xbf16>
    %154 = vector.extract_strided_slice %15 {offsets = [11, 0, 0], sizes = [1, 8, 32], strides = [1, 1, 1]} : vector<16x8x32xbf16> to vector<1x8x32xbf16>
    %155 = vector.shape_cast %154 : vector<1x8x32xbf16> to vector<8x32xbf16>
    %156 = vector.extract_strided_slice %15 {offsets = [15, 0, 0], sizes = [1, 8, 32], strides = [1, 1, 1]} : vector<16x8x32xbf16> to vector<1x8x32xbf16>
    %157 = vector.shape_cast %156 : vector<1x8x32xbf16> to vector<8x32xbf16>
    "tpu.trace_start"() <{level = 10 : i32, message = "re,de->rd"}> : () -> ()
    %cst_37 = arith.constant dense<0.000000e+00> : vector<16x8xf32>
    %158 = tpu.matmul %18, %151, %cst_37 {dimension_numbers = #tpu.dot_dimension_numbers<[1], [1], [0], [0], [0, 0, 1, 0], [], []>} : vector<16x32xbf16>, vector<8x32xbf16>, vector<16x8xf32> -> vector<16x8xf32>
    "tpu.trace_stop"() : () -> ()
    %159 = vector.extract_strided_slice %5 {offsets = [0, 24], sizes = [1, 8], strides = [1, 1]} : vector<1x32xf32> to vector<1x8xf32>
    %160 = vector.broadcast %159 : vector<1x8xf32> to vector<16x8xf32>
    %161 = arith.addf %158, %160 : vector<16x8xf32>
    "tpu.trace_start"() <{level = 10 : i32, message = "re,de->rd"}> : () -> ()
    %cst_38 = arith.constant dense<0.000000e+00> : vector<16x8xf32>
    %162 = tpu.matmul %18, %153, %cst_38 {dimension_numbers = #tpu.dot_dimension_numbers<[1], [1], [0], [0], [0, 0, 1, 0], [], []>} : vector<16x32xbf16>, vector<8x32xbf16>, vector<16x8xf32> -> vector<16x8xf32>
    "tpu.trace_stop"() : () -> ()
    %163 = vector.extract_strided_slice %6 {offsets = [0, 24], sizes = [1, 8], strides = [1, 1]} : vector<1x32xf32> to vector<1x8xf32>
    %164 = vector.broadcast %163 : vector<1x8xf32> to vector<16x8xf32>
    %165 = arith.addf %162, %164 : vector<16x8xf32>
    "tpu.trace_start"() <{level = 10 : i32, message = "re,de->rd"}> : () -> ()
    %cst_39 = arith.constant dense<0.000000e+00> : vector<16x8xf32>
    %166 = tpu.matmul %18, %155, %cst_39 {dimension_numbers = #tpu.dot_dimension_numbers<[1], [1], [0], [0], [0, 0, 1, 0], [], []>} : vector<16x32xbf16>, vector<8x32xbf16>, vector<16x8xf32> -> vector<16x8xf32>
    "tpu.trace_stop"() : () -> ()
    %167 = vector.extract_strided_slice %7 {offsets = [0, 24], sizes = [1, 8], strides = [1, 1]} : vector<1x32xf32> to vector<1x8xf32>
    %168 = vector.broadcast %167 : vector<1x8xf32> to vector<16x8xf32>
    %169 = arith.addf %166, %168 : vector<16x8xf32>
    %170 = vector.shape_cast %161 : vector<16x8xf32> to vector<2x8x8xf32>
    %171 = vector.shape_cast %165 : vector<16x8xf32> to vector<2x8x8xf32>
    %172 = vector.shape_cast %169 : vector<16x8xf32> to vector<2x8x8xf32>
    "tpu.trace_start"() <{level = 10 : i32, message = "bqd,bkd->bqk"}> : () -> ()
    %cst_40 = arith.constant dense<0.000000e+00> : vector<2x8x8xf32>
    %173 = tpu.matmul %170, %171, %cst_40 {dimension_numbers = #tpu.dot_dimension_numbers<[2], [2], [1], [1], [0, 0, 0, 1, 1, 1], [0], [0]>} : vector<2x8x8xf32>, vector<2x8x8xf32>, vector<2x8x8xf32> -> vector<2x8x8xf32>
    "tpu.trace_stop"() : () -> ()
    %cst_41 = arith.constant 0.353553385 : f32
    %174 = vector.broadcast %cst_41 : f32 to vector<2x8x8xf32>
    %175 = arith.mulf %173, %174 : vector<2x8x8xf32>
    %176 = vector.shape_cast %17 : vector<8x8xf32> to vector<1x8x8xf32>
    %177 = vector.broadcast %176 : vector<1x8x8xf32> to vector<2x8x8xf32>
    %178 = arith.addf %175, %177 : vector<2x8x8xf32>
    %cst_42 = arith.constant dense<0xFF800000> : vector<2x8xf32>
    %179 = vector.multi_reduction <maximumf>, %178, %cst_42 [2] : vector<2x8x8xf32> to vector<2x8xf32>
    %180 = vector.shape_cast %179 : vector<2x8xf32> to vector<2x8x1xf32>
    %181 = vector.broadcast %180 : vector<2x8x1xf32> to vector<2x8x8xf32>
    %182 = arith.subf %178, %181 : vector<2x8x8xf32>
    %183 = math.exp %182 : vector<2x8x8xf32>
    %cst_43 = arith.constant dense<0.000000e+00> : vector<2x8xf32>
    %184 = vector.multi_reduction <add>, %183, %cst_43 [2] : vector<2x8x8xf32> to vector<2x8xf32>
    %185 = vector.shape_cast %184 : vector<2x8xf32> to vector<2x8x1xf32>
    %186 = tpu.reciprocal %185 {approx = true} : vector<2x8x1xf32> -> vector<2x8x1xf32>
    %187 = vector.broadcast %186 : vector<2x8x1xf32> to vector<2x8x8xf32>
    %188 = arith.mulf %183, %187 : vector<2x8x8xf32>
    "tpu.trace_start"() <{level = 10 : i32, message = "bqk,bkd->bqd"}> : () -> ()
    %cst_44 = arith.constant dense<0.000000e+00> : vector<2x8x8xf32>
    %189 = tpu.matmul %188, %172, %cst_44 {dimension_numbers = #tpu.dot_dimension_numbers<[2], [1], [1], [2], [0, 0, 0, 1, 1, 2], [0], [0]>} : vector<2x8x8xf32>, vector<2x8x8xf32>, vector<2x8x8xf32> -> vector<2x8x8xf32>
    "tpu.trace_stop"() : () -> ()
    %190 = vector.shape_cast %189 : vector<2x8x8xf32> to vector<16x8xf32>
    %191 = arith.truncf %190 : vector<16x8xf32> to vector<16x8xbf16>
    %cst_45 = arith.constant dense<0.000000e+00> : vector<16x32xf32>
    %192 = tpu.matmul %191, %157, %cst_45 {dimension_numbers = #tpu.dot_dimension_numbers<[1], [0], [0], [1], [0, 0, 1, 1], [], []>} : vector<16x8xbf16>, vector<8x32xbf16>, vector<16x32xf32> -> vector<16x32xf32>
    %193 = arith.addf %149, %192 : vector<16x32xf32>
    %194 = vector.broadcast %8 : vector<1x32xf32> to vector<16x32xf32>
    %195 = arith.addf %193, %194 : vector<16x32xf32>
    %196 = arith.addf %16, %195 : vector<16x32xf32>
    %cst_46 = arith.constant dense<0.000000e+00> : vector<16xf32>
    %197 = vector.multi_reduction <add>, %196, %cst_46 [1] : vector<16x32xf32> to vector<16xf32>
    %198 = vector.shape_cast %197 : vector<16xf32> to vector<16x1xf32>
    %cst_47 = arith.constant 3.200000e+01 : f32
    %199 = vector.broadcast %cst_47 : f32 to vector<16x1xf32>
    %200 = arith.divf %198, %199 : vector<16x1xf32>
    %201 = vector.broadcast %200 : vector<16x1xf32> to vector<16x32xf32>
    %202 = arith.subf %196, %201 : vector<16x32xf32>
    %203 = arith.mulf %202, %202 : vector<16x32xf32>
    %cst_48 = arith.constant dense<0.000000e+00> : vector<16xf32>
    %204 = vector.multi_reduction <add>, %203, %cst_48 [1] : vector<16x32xf32> to vector<16xf32>
    %205 = vector.shape_cast %204 : vector<16xf32> to vector<16x1xf32>
    %cst_49 = arith.constant 3.200000e+01 : f32
    %206 = vector.broadcast %cst_49 : f32 to vector<16x1xf32>
    %207 = arith.divf %205, %206 : vector<16x1xf32>
    %cst_50 = arith.constant 9.99999974E-6 : f32
    %208 = vector.broadcast %cst_50 : f32 to vector<16x1xf32>
    %209 = arith.addf %207, %208 : vector<16x1xf32>
    %210 = math.rsqrt %209 : vector<16x1xf32>
    %211 = vector.broadcast %210 : vector<16x1xf32> to vector<16x32xf32>
    %212 = arith.mulf %202, %211 : vector<16x32xf32>
    %213 = vector.broadcast %9 : vector<1x32xf32> to vector<16x32xf32>
    %214 = arith.mulf %212, %213 : vector<16x32xf32>
    %215 = vector.broadcast %10 : vector<1x32xf32> to vector<16x32xf32>
    %216 = arith.addf %214, %215 : vector<16x32xf32>
    %217 = arith.truncf %216 : vector<16x32xf32> to vector<16x32xbf16>
    %c0_51 = arith.constant 0 : index
    %c0_52 = arith.constant 0 : index
    %c0_53 = arith.constant 0 : index
    %218 = vector.load %arg9[%c0_51, %c0_52, %c0_53] : memref<1x32x2048xbf16, #tpu.memory_space<vmem>>, vector<1x32x2048xbf16>
    %219 = vector.shape_cast %218 : vector<1x32x2048xbf16> to vector<32x2048xbf16>
    %cst_54 = arith.constant dense<0.000000e+00> : vector<16x2048xf32>
    %220 = tpu.matmul %217, %219, %cst_54 {dimension_numbers = #tpu.dot_dimension_numbers<[1], [0], [0], [1], [0, 0, 1, 1], [], []>} : vector<16x32xbf16>, vector<32x2048xbf16>, vector<16x2048xf32> -> vector<16x2048xf32>
    %c0_55 = arith.constant 0 : index
    %c0_56 = arith.constant 0 : index
    %c0_57 = arith.constant 0 : index
    %221 = vector.load %arg12[%c0_55, %c0_56, %c0_57] : memref<1x1x2048xf32, #tpu.memory_space<vmem>>, vector<1x1x2048xf32>
    %222 = vector.shape_cast %221 : vector<1x1x2048xf32> to vector<1x2048xf32>
    %223 = vector.broadcast %222 : vector<1x2048xf32> to vector<16x2048xf32>
    %224 = arith.addf %220, %223 : vector<16x2048xf32>
    %cst_58 = arith.constant 0.000000e+00 : f32
    %225 = vector.broadcast %cst_58 : f32 to vector<16x2048xf32>
    %226 = arith.maximumf %224, %225 : vector<16x2048xf32>
    %227 = arith.truncf %226 : vector<16x2048xf32> to vector<16x2048xbf16>
    %c0_59 = arith.constant 0 : index
    %c0_60 = arith.constant 0 : index
    %c0_61 = arith.constant 0 : index
    %228 = vector.load %arg10[%c0_59, %c0_60, %c0_61] : memref<1x2048x32xbf16, #tpu.memory_space<vmem>>, vector<1x2048x32xbf16>
    %229 = vector.shape_cast %228 : vector<1x2048x32xbf16> to vector<2048x32xbf16>
    %cst_62 = arith.constant dense<0.000000e+00> : vector<16x32xf32>
    %230 = tpu.matmul %227, %229, %cst_62 {dimension_numbers = #tpu.dot_dimension_numbers<[1], [0], [0], [1], [0, 0, 1, 1], [], []>} : vector<16x2048xbf16>, vector<2048x32xbf16>, vector<16x32xf32> -> vector<16x32xf32>
    %231 = vector.broadcast %11 : vector<1x32xf32> to vector<16x32xf32>
    %232 = arith.addf %230, %231 : vector<16x32xf32>
    %233 = arith.addf %216, %232 : vector<16x32xf32>
    %cst_63 = arith.constant dense<0.000000e+00> : vector<16xf32>
    %234 = vector.multi_reduction <add>, %233, %cst_63 [1] : vector<16x32xf32> to vector<16xf32>
    %235 = vector.shape_cast %234 : vector<16xf32> to vector<16x1xf32>
    %cst_64 = arith.constant 3.200000e+01 : f32
    %236 = vector.broadcast %cst_64 : f32 to vector<16x1xf32>
    %237 = arith.divf %235, %236 : vector<16x1xf32>
    %238 = vector.broadcast %237 : vector<16x1xf32> to vector<16x32xf32>
    %239 = arith.subf %233, %238 : vector<16x32xf32>
    %240 = arith.mulf %239, %239 : vector<16x32xf32>
    %cst_65 = arith.constant dense<0.000000e+00> : vector<16xf32>
    %241 = vector.multi_reduction <add>, %240, %cst_65 [1] : vector<16x32xf32> to vector<16xf32>
    %242 = vector.shape_cast %241 : vector<16xf32> to vector<16x1xf32>
    %cst_66 = arith.constant 3.200000e+01 : f32
    %243 = vector.broadcast %cst_66 : f32 to vector<16x1xf32>
    %244 = arith.divf %242, %243 : vector<16x1xf32>
    %cst_67 = arith.constant 9.99999974E-6 : f32
    %245 = vector.broadcast %cst_67 : f32 to vector<16x1xf32>
    %246 = arith.addf %244, %245 : vector<16x1xf32>
    %247 = math.rsqrt %246 : vector<16x1xf32>
    %248 = vector.broadcast %247 : vector<16x1xf32> to vector<16x32xf32>
    %249 = arith.mulf %239, %248 : vector<16x32xf32>
    %250 = vector.broadcast %12 : vector<1x32xf32> to vector<16x32xf32>
    %251 = arith.mulf %249, %250 : vector<16x32xf32>
    %252 = vector.broadcast %13 : vector<1x32xf32> to vector<16x32xf32>
    %253 = arith.addf %251, %252 : vector<16x32xf32>
    %c0_68 = arith.constant 0 : index
    %c0_69 = arith.constant 0 : index
    %254 = vector.load %arg13[%c0_68, %c0_69] : memref<16x32xf32, #tpu.memory_space<vmem>>, vector<16x32xf32>
    tpu.vector_store %arg13[%c0_68, %c0_69], %253 {strides = array<i32>} : memref<16x32xf32, #tpu.memory_space<vmem>>, vector<16x32xf32>,
    %c5_i32 = arith.constant 5 : i32
    %255 = arith.cmpi eq, %arg0, %c5_i32 : i32
    %256 = arith.extui %255 : i1 to i32
    %c0_i32_70 = arith.constant 0 : i32
    %257 = arith.cmpi ne, %256, %c0_i32_70 : i32
    scf.if %257 {
      %c0_71 = arith.constant 0 : index
      %c0_72 = arith.constant 0 : index
      %258 = vector.load %arg13[%c0_71, %c0_72] : memref<16x32xf32, #tpu.memory_space<vmem>>, vector<16x32xf32>
      %c0_73 = arith.constant 0 : index
      %c0_74 = arith.constant 0 : index
      %259 = vector.load %arg6[%c0_73, %c0_74] : memref<1x32xf32, #tpu.memory_space<vmem>>, vector<1x32xf32>
      %c0_75 = arith.constant 0 : index
      %c0_76 = arith.constant 0 : index
      %260 = vector.load %arg7[%c0_75, %c0_76] : memref<1x32xf32, #tpu.memory_space<vmem>>, vector<1x32xf32>
      %cst_77 = arith.constant dense<0.000000e+00> : vector<16xf32>
      %261 = vector.multi_reduction <add>, %258, %cst_77 [1] : vector<16x32xf32> to vector<16xf32>
      %262 = vector.shape_cast %261 : vector<16xf32> to vector<16x1xf32>
      %cst_78 = arith.constant 3.200000e+01 : f32
      %263 = vector.broadcast %cst_78 : f32 to vector<16x1xf32>
      %264 = arith.divf %262, %263 : vector<16x1xf32>
      %265 = vector.broadcast %264 : vector<16x1xf32> to vector<16x32xf32>
      %266 = arith.subf %258, %265 : vector<16x32xf32>
      %267 = arith.mulf %266, %266 : vector<16x32xf32>
      %cst_79 = arith.constant dense<0.000000e+00> : vector<16xf32>
      %268 = vector.multi_reduction <add>, %267, %cst_79 [1] : vector<16x32xf32> to vector<16xf32>
      %269 = vector.shape_cast %268 : vector<16xf32> to vector<16x1xf32>
      %cst_80 = arith.constant 3.200000e+01 : f32
      %270 = vector.broadcast %cst_80 : f32 to vector<16x1xf32>
      %271 = arith.divf %269, %270 : vector<16x1xf32>
      %cst_81 = arith.constant 9.99999974E-6 : f32
      %272 = vector.broadcast %cst_81 : f32 to vector<16x1xf32>
      %273 = arith.addf %271, %272 : vector<16x1xf32>
      %274 = math.rsqrt %273 : vector<16x1xf32>
      %275 = vector.broadcast %274 : vector<16x1xf32> to vector<16x32xf32>
      %276 = arith.mulf %266, %275 : vector<16x32xf32>
      %277 = vector.broadcast %259 : vector<1x32xf32> to vector<16x32xf32>
      %278 = arith.mulf %276, %277 : vector<16x32xf32>
      %279 = vector.broadcast %260 : vector<1x32xf32> to vector<16x32xf32>
      %280 = arith.addf %278, %279 : vector<16x32xf32>
      %c0_82 = arith.constant 0 : index
      %c0_83 = arith.constant 0 : index
      %281 = vector.load %arg13[%c0_82, %c0_83] : memref<16x32xf32, #tpu.memory_space<vmem>>, vector<16x32xf32>
      tpu.vector_store %arg13[%c0_82, %c0_83], %280 {strides = array<i32>} : memref<16x32xf32, #tpu.memory_space<vmem>>, vector<16x32xf32>,
    } else {
    }
    return
  }
  func.func @transform_0(%arg0: i32) -> (i32, i32) {
    %c0_i32 = arith.constant 0 : i32
    %c0_i32_0 = arith.constant 0 : i32
    %c0_i32_1 = arith.constant 0 : i32
    return %c0_i32, %c0_i32_0 : i32, i32
  }
  func.func @transform_1(%arg0: i32) -> (i32, i32) {
    %c0_i32 = arith.constant 0 : i32
    %c0_i32_0 = arith.constant 0 : i32
    %c0_i32_1 = arith.constant 0 : i32
    return %c0_i32, %c0_i32_0 : i32, i32
  }
  func.func @transform_2(%arg0: i32) -> (i32, i32) {
    %c0_i32 = arith.constant 0 : i32
    %c0_i32_0 = arith.constant 0 : i32
    %c0_i32_1 = arith.constant 0 : i32
    return %c0_i32, %c0_i32_0 : i32, i32
  }
  func.func @transform_3(%arg0: i32) -> (i32, i32) {
    %c0_i32 = arith.constant 0 : i32
    %c0_i32_0 = arith.constant 0 : i32
    %c0_i32_1 = arith.constant 0 : i32
    return %c0_i32, %c0_i32_0 : i32, i32
  }
  func.func @transform_4(%arg0: i32) -> (i32, i32) {
    %c0_i32 = arith.constant 0 : i32
    %c0_i32_0 = arith.constant 0 : i32
    %c0_i32_1 = arith.constant 0 : i32
    return %c0_i32, %c0_i32_0 : i32, i32
  }
  func.func @transform_5(%arg0: i32) -> (i32, i32) {
    %c0_i32 = arith.constant 0 : i32
    %c0_i32_0 = arith.constant 0 : i32
    %c0_i32_1 = arith.constant 0 : i32
    return %c0_i32, %c0_i32_0 : i32, i32
  }
  func.func @transform_6(%arg0: i32) -> (i32, i32) {
    %c0_i32 = arith.constant 0 : i32
    %c0_i32_0 = arith.constant 0 : i32
    %c0_i32_1 = arith.constant 0 : i32
    return %c0_i32, %c0_i32_0 : i32, i32
  }
  func.func @transform_7(%arg0: i32) -> (i32, i32, i32, i32) {
    %c0_i32 = arith.constant 0 : i32
    %c0_i32_0 = arith.constant 0 : i32
    %c0_i32_1 = arith.constant 0 : i32
    %c0_i32_2 = arith.constant 0 : i32
    return %arg0, %c0_i32, %c0_i32_0, %c0_i32_1 : i32, i32, i32, i32
  }
  func.func @transform_8(%arg0: i32) -> (i32, i32, i32) {
    %c0_i32 = arith.constant 0 : i32
    %c0_i32_0 = arith.constant 0 : i32
    %c0_i32_1 = arith.constant 0 : i32
    return %arg0, %c0_i32, %c0_i32_0 : i32, i32, i32
  }
  func.func @transform_9(%arg0: i32) -> (i32, i32, i32) {
    %c0_i32 = arith.constant 0 : i32
    %c0_i32_0 = arith.constant 0 : i32
    %c0_i32_1 = arith.constant 0 : i32
    return %arg0, %c0_i32, %c0_i32_0 : i32, i32, i32
  }
  func.func @transform_10(%arg0: i32) -> (i32, i32, i32) {
    %c0_i32 = arith.constant 0 : i32
    %c0_i32_0 = arith.constant 0 : i32
    %c0_i32_1 = arith.constant 0 : i32
    return %arg0, %c0_i32, %c0_i32_0 : i32, i32, i32
  }
  func.func @transform_11(%arg0: i32) -> (i32, i32, i32) {
    %c0_i32 = arith.constant 0 : i32
    %c0_i32_0 = arith.constant 0 : i32
    %c0_i32_1 = arith.constant 0 : i32
    return %arg0, %c0_i32, %c0_i32_0 : i32, i32, i32
  }
  func.func @transform_12(%arg0: i32) -> (i32, i32) {
    %c0_i32 = arith.constant 0 : i32
    %c0_i32_0 = arith.constant 0 : i32
    %c0_i32_1 = arith.constant 0 : i32
    return %c0_i32, %c0_i32_0 : i32, i32
  }
}

module attributes {stable_mosaic.version = 11 : i64} {
  func.func @_decoder_stack_kernel(%arg0: i32, %arg1: memref<16x3xf32, #tpu.memory_space<vmem>>, %arg2: memref<3x32xf32, #tpu.memory_space<vmem>>, %arg3: memref<1x32xf32, #tpu.memory_space<vmem>>, %arg4: memref<16x32xf32, #tpu.memory_space<vmem>>, %arg5: memref<16x32xf32, #tpu.memory_space<vmem>>, %arg6: memref<8x8xf32, #tpu.memory_space<vmem>>, %arg7: memref<8x8xf32, #tpu.memory_space<vmem>>, %arg8: memref<1x32xf32, #tpu.memory_space<vmem>>, %arg9: memref<1x32xf32, #tpu.memory_space<vmem>>, %arg10: memref<1x16x8x32xbf16, #tpu.memory_space<vmem>>, %arg11: memref<1x16x8x32xbf16, #tpu.memory_space<vmem>>, %arg12: memref<1x32x2048xbf16, #tpu.memory_space<vmem>>, %arg13: memref<1x2048x32xbf16, #tpu.memory_space<vmem>>, %arg14: memref<1x15x32xf32, #tpu.memory_space<vmem>>, %arg15: memref<1x1x2048xf32, #tpu.memory_space<vmem>>, %arg16: memref<16x32xf32, #tpu.memory_space<vmem>>) attributes {dimension_semantics = [#tpu.dimension_semantics<arbitrary>], iteration_bounds = array<i64: 6>, scalar_prefetch = 0 : i64, scratch_operands = 0 : i64, tpu.core_type = #tpu.core_type<tc>, window_params = [{pipeline_mode = #tpu.pipeline_mode<synchronous>, transform_indices = @transform_0, window_bounds = array<i64: 16, 3>}, {pipeline_mode = #tpu.pipeline_mode<synchronous>, transform_indices = @transform_1, window_bounds = array<i64: 3, 32>}, {pipeline_mode = #tpu.pipeline_mode<synchronous>, transform_indices = @transform_2, window_bounds = array<i64: 1, 32>}, {pipeline_mode = #tpu.pipeline_mode<synchronous>, transform_indices = @transform_3, window_bounds = array<i64: 16, 32>}, {pipeline_mode = #tpu.pipeline_mode<synchronous>, transform_indices = @transform_4, window_bounds = array<i64: 16, 32>}, {pipeline_mode = #tpu.pipeline_mode<synchronous>, transform_indices = @transform_5, window_bounds = array<i64: 8, 8>}, {pipeline_mode = #tpu.pipeline_mode<synchronous>, transform_indices = @transform_6, window_bounds = array<i64: 8, 8>}, {pipeline_mode = #tpu.pipeline_mode<synchronous>, transform_indices = @transform_7, window_bounds = array<i64: 1, 32>}, {pipeline_mode = #tpu.pipeline_mode<synchronous>, transform_indices = @transform_8, window_bounds = array<i64: 1, 32>}, {transform_indices = @transform_9, window_bounds = array<i64: 1, 16, 8, 32>}, {transform_indices = @transform_10, window_bounds = array<i64: 1, 16, 8, 32>}, {transform_indices = @transform_11, window_bounds = array<i64: 1, 32, 2048>}, {transform_indices = @transform_12, window_bounds = array<i64: 1, 2048, 32>}, {transform_indices = @transform_13, window_bounds = array<i64: 1, 15, 32>}, {transform_indices = @transform_14, window_bounds = array<i64: 1, 1, 2048>}, {pipeline_mode = #tpu.pipeline_mode<synchronous>, transform_indices = @transform_15, window_bounds = array<i64: 16, 32>}]} {
    %c0_i32 = arith.constant 0 : i32
    %0 = arith.cmpi eq, %arg0, %c0_i32 : i32
    %1 = arith.extui %0 : i1 to i32
    %c0_i32_0 = arith.constant 0 : i32
    %2 = arith.cmpi ne, %1, %c0_i32_0 : i32
    scf.if %2 {
      %c0_120 = arith.constant 0 : index
      %c0_121 = arith.constant 0 : index
      %468 = vector.load %arg1[%c0_120, %c0_121] : memref<16x3xf32, #tpu.memory_space<vmem>>, vector<16x3xf32>
      %c0_122 = arith.constant 0 : index
      %c0_123 = arith.constant 0 : index
      %469 = vector.load %arg2[%c0_122, %c0_123] : memref<3x32xf32, #tpu.memory_space<vmem>>, vector<3x32xf32>
      %cst_124 = arith.constant dense<0.000000e+00> : vector<16x32xf32>
      %470 = tpu.matmul %468, %469, %cst_124 {dimension_numbers = #tpu.dot_dimension_numbers<[1], [0], [0], [1], [0, 0, 1, 1], [], []>} : vector<16x3xf32>, vector<3x32xf32>, vector<16x32xf32> -> vector<16x32xf32>
      %c0_125 = arith.constant 0 : index
      %c0_126 = arith.constant 0 : index
      %471 = vector.load %arg3[%c0_125, %c0_126] : memref<1x32xf32, #tpu.memory_space<vmem>>, vector<1x32xf32>
      %472 = vector.broadcast %471 : vector<1x32xf32> to vector<16x32xf32>
      %473 = arith.addf %470, %472 : vector<16x32xf32>
      %c0_127 = arith.constant 0 : index
      %c0_128 = arith.constant 0 : index
      %474 = vector.load %arg4[%c0_127, %c0_128] : memref<16x32xf32, #tpu.memory_space<vmem>>, vector<16x32xf32>
      %475 = arith.addf %473, %474 : vector<16x32xf32>
      %c0_129 = arith.constant 0 : index
      %c0_130 = arith.constant 0 : index
      %476 = vector.load %arg16[%c0_129, %c0_130] : memref<16x32xf32, #tpu.memory_space<vmem>>, vector<16x32xf32>
      tpu.vector_store %arg16[%c0_129, %c0_130], %475 {strides = array<i32>} : memref<16x32xf32, #tpu.memory_space<vmem>>, vector<16x32xf32>,
    } else {
    }
    %c0 = arith.constant 0 : index
    %c0_1 = arith.constant 0 : index
    %c0_2 = arith.constant 0 : index
    %3 = vector.load %arg14[%c0, %c0_1, %c0_2] : memref<1x15x32xf32, #tpu.memory_space<vmem>>, vector<1x15x32xf32>
    %4 = vector.shape_cast %3 : vector<1x15x32xf32> to vector<15x32xf32>
    %5 = vector.extract_strided_slice %4 {offsets = [0, 0], sizes = [1, 32], strides = [1, 1]} : vector<15x32xf32> to vector<1x32xf32>
    %6 = vector.extract_strided_slice %4 {offsets = [1, 0], sizes = [1, 32], strides = [1, 1]} : vector<15x32xf32> to vector<1x32xf32>
    %7 = vector.extract_strided_slice %4 {offsets = [2, 0], sizes = [1, 32], strides = [1, 1]} : vector<15x32xf32> to vector<1x32xf32>
    %8 = vector.extract_strided_slice %4 {offsets = [3, 0], sizes = [1, 32], strides = [1, 1]} : vector<15x32xf32> to vector<1x32xf32>
    %9 = vector.extract_strided_slice %4 {offsets = [4, 0], sizes = [1, 32], strides = [1, 1]} : vector<15x32xf32> to vector<1x32xf32>
    %10 = vector.extract_strided_slice %4 {offsets = [5, 0], sizes = [1, 32], strides = [1, 1]} : vector<15x32xf32> to vector<1x32xf32>
    %11 = vector.extract_strided_slice %4 {offsets = [6, 0], sizes = [1, 32], strides = [1, 1]} : vector<15x32xf32> to vector<1x32xf32>
    %12 = vector.extract_strided_slice %4 {offsets = [7, 0], sizes = [1, 32], strides = [1, 1]} : vector<15x32xf32> to vector<1x32xf32>
    %13 = vector.extract_strided_slice %4 {offsets = [8, 0], sizes = [1, 32], strides = [1, 1]} : vector<15x32xf32> to vector<1x32xf32>
    %14 = vector.extract_strided_slice %4 {offsets = [9, 0], sizes = [1, 32], strides = [1, 1]} : vector<15x32xf32> to vector<1x32xf32>
    %15 = vector.extract_strided_slice %4 {offsets = [10, 0], sizes = [1, 32], strides = [1, 1]} : vector<15x32xf32> to vector<1x32xf32>
    %16 = vector.extract_strided_slice %4 {offsets = [11, 0], sizes = [1, 32], strides = [1, 1]} : vector<15x32xf32> to vector<1x32xf32>
    %17 = vector.extract_strided_slice %4 {offsets = [12, 0], sizes = [1, 32], strides = [1, 1]} : vector<15x32xf32> to vector<1x32xf32>
    %18 = vector.extract_strided_slice %4 {offsets = [13, 0], sizes = [1, 32], strides = [1, 1]} : vector<15x32xf32> to vector<1x32xf32>
    %19 = vector.extract_strided_slice %4 {offsets = [14, 0], sizes = [1, 32], strides = [1, 1]} : vector<15x32xf32> to vector<1x32xf32>
    %c0_3 = arith.constant 0 : index
    %c0_4 = arith.constant 0 : index
    %c0_5 = arith.constant 0 : index
    %c0_6 = arith.constant 0 : index
    %20 = vector.load %arg10[%c0_3, %c0_4, %c0_5, %c0_6] : memref<1x16x8x32xbf16, #tpu.memory_space<vmem>>, vector<1x16x8x32xbf16>
    %21 = vector.shape_cast %20 : vector<1x16x8x32xbf16> to vector<16x8x32xbf16>
    %c0_7 = arith.constant 0 : index
    %c0_8 = arith.constant 0 : index
    %c0_9 = arith.constant 0 : index
    %c0_10 = arith.constant 0 : index
    %22 = vector.load %arg11[%c0_7, %c0_8, %c0_9, %c0_10] : memref<1x16x8x32xbf16, #tpu.memory_space<vmem>>, vector<1x16x8x32xbf16>
    %23 = vector.shape_cast %22 : vector<1x16x8x32xbf16> to vector<16x8x32xbf16>
    %c0_11 = arith.constant 0 : index
    %c0_12 = arith.constant 0 : index
    %24 = vector.load %arg16[%c0_11, %c0_12] : memref<16x32xf32, #tpu.memory_space<vmem>>, vector<16x32xf32>
    %c0_13 = arith.constant 0 : index
    %c0_14 = arith.constant 0 : index
    %25 = vector.load %arg6[%c0_13, %c0_14] : memref<8x8xf32, #tpu.memory_space<vmem>>, vector<8x8xf32>
    %26 = arith.truncf %24 : vector<16x32xf32> to vector<16x32xbf16>
    %27 = vector.extract_strided_slice %21 {offsets = [0, 0, 0], sizes = [1, 8, 32], strides = [1, 1, 1]} : vector<16x8x32xbf16> to vector<1x8x32xbf16>
    %28 = vector.shape_cast %27 : vector<1x8x32xbf16> to vector<8x32xbf16>
    %29 = vector.extract_strided_slice %21 {offsets = [4, 0, 0], sizes = [1, 8, 32], strides = [1, 1, 1]} : vector<16x8x32xbf16> to vector<1x8x32xbf16>
    %30 = vector.shape_cast %29 : vector<1x8x32xbf16> to vector<8x32xbf16>
    %31 = vector.extract_strided_slice %21 {offsets = [8, 0, 0], sizes = [1, 8, 32], strides = [1, 1, 1]} : vector<16x8x32xbf16> to vector<1x8x32xbf16>
    %32 = vector.shape_cast %31 : vector<1x8x32xbf16> to vector<8x32xbf16>
    %33 = vector.extract_strided_slice %21 {offsets = [12, 0, 0], sizes = [1, 8, 32], strides = [1, 1, 1]} : vector<16x8x32xbf16> to vector<1x8x32xbf16>
    %34 = vector.shape_cast %33 : vector<1x8x32xbf16> to vector<8x32xbf16>
    "tpu.trace_start"() <{level = 10 : i32, message = "re,de->rd"}> : () -> ()
    %cst = arith.constant dense<0.000000e+00> : vector<16x8xf32>
    %35 = tpu.matmul %26, %28, %cst {dimension_numbers = #tpu.dot_dimension_numbers<[1], [1], [0], [0], [0, 0, 1, 0], [], []>} : vector<16x32xbf16>, vector<8x32xbf16>, vector<16x8xf32> -> vector<16x8xf32>
    "tpu.trace_stop"() : () -> ()
    %36 = vector.extract_strided_slice %5 {offsets = [0, 0], sizes = [1, 8], strides = [1, 1]} : vector<1x32xf32> to vector<1x8xf32>
    %37 = vector.broadcast %36 : vector<1x8xf32> to vector<16x8xf32>
    %38 = arith.addf %35, %37 : vector<16x8xf32>
    "tpu.trace_start"() <{level = 10 : i32, message = "re,de->rd"}> : () -> ()
    %cst_15 = arith.constant dense<0.000000e+00> : vector<16x8xf32>
    %39 = tpu.matmul %26, %30, %cst_15 {dimension_numbers = #tpu.dot_dimension_numbers<[1], [1], [0], [0], [0, 0, 1, 0], [], []>} : vector<16x32xbf16>, vector<8x32xbf16>, vector<16x8xf32> -> vector<16x8xf32>
    "tpu.trace_stop"() : () -> ()
    %40 = vector.extract_strided_slice %6 {offsets = [0, 0], sizes = [1, 8], strides = [1, 1]} : vector<1x32xf32> to vector<1x8xf32>
    %41 = vector.broadcast %40 : vector<1x8xf32> to vector<16x8xf32>
    %42 = arith.addf %39, %41 : vector<16x8xf32>
    "tpu.trace_start"() <{level = 10 : i32, message = "re,de->rd"}> : () -> ()
    %cst_16 = arith.constant dense<0.000000e+00> : vector<16x8xf32>
    %43 = tpu.matmul %26, %32, %cst_16 {dimension_numbers = #tpu.dot_dimension_numbers<[1], [1], [0], [0], [0, 0, 1, 0], [], []>} : vector<16x32xbf16>, vector<8x32xbf16>, vector<16x8xf32> -> vector<16x8xf32>
    "tpu.trace_stop"() : () -> ()
    %44 = vector.extract_strided_slice %7 {offsets = [0, 0], sizes = [1, 8], strides = [1, 1]} : vector<1x32xf32> to vector<1x8xf32>
    %45 = vector.broadcast %44 : vector<1x8xf32> to vector<16x8xf32>
    %46 = arith.addf %43, %45 : vector<16x8xf32>
    %47 = vector.shape_cast %38 : vector<16x8xf32> to vector<2x8x8xf32>
    %48 = vector.shape_cast %42 : vector<16x8xf32> to vector<2x8x8xf32>
    %49 = vector.shape_cast %46 : vector<16x8xf32> to vector<2x8x8xf32>
    "tpu.trace_start"() <{level = 10 : i32, message = "bqd,bkd->bqk"}> : () -> ()
    %cst_17 = arith.constant dense<0.000000e+00> : vector<2x8x8xf32>
    %50 = tpu.matmul %47, %48, %cst_17 {dimension_numbers = #tpu.dot_dimension_numbers<[2], [2], [1], [1], [0, 0, 0, 1, 1, 1], [0], [0]>} : vector<2x8x8xf32>, vector<2x8x8xf32>, vector<2x8x8xf32> -> vector<2x8x8xf32>
    "tpu.trace_stop"() : () -> ()
    %cst_18 = arith.constant 0.353553385 : f32
    %51 = vector.broadcast %cst_18 : f32 to vector<2x8x8xf32>
    %52 = arith.mulf %50, %51 : vector<2x8x8xf32>
    %53 = vector.shape_cast %25 : vector<8x8xf32> to vector<1x8x8xf32>
    %54 = vector.broadcast %53 : vector<1x8x8xf32> to vector<2x8x8xf32>
    %55 = arith.addf %52, %54 : vector<2x8x8xf32>
    %cst_19 = arith.constant dense<0xFF800000> : vector<2x8xf32>
    %56 = vector.multi_reduction <maximumf>, %55, %cst_19 [2] : vector<2x8x8xf32> to vector<2x8xf32>
    %57 = vector.shape_cast %56 : vector<2x8xf32> to vector<2x8x1xf32>
    %58 = vector.broadcast %57 : vector<2x8x1xf32> to vector<2x8x8xf32>
    %59 = arith.subf %55, %58 : vector<2x8x8xf32>
    %60 = math.exp %59 : vector<2x8x8xf32>
    %cst_20 = arith.constant dense<0.000000e+00> : vector<2x8xf32>
    %61 = vector.multi_reduction <add>, %60, %cst_20 [2] : vector<2x8x8xf32> to vector<2x8xf32>
    %62 = vector.shape_cast %61 : vector<2x8xf32> to vector<2x8x1xf32>
    %63 = tpu.reciprocal %62 {approx = true} : vector<2x8x1xf32> -> vector<2x8x1xf32>
    %64 = vector.broadcast %63 : vector<2x8x1xf32> to vector<2x8x8xf32>
    %65 = arith.mulf %60, %64 : vector<2x8x8xf32>
    "tpu.trace_start"() <{level = 10 : i32, message = "bqk,bkd->bqd"}> : () -> ()
    %cst_21 = arith.constant dense<0.000000e+00> : vector<2x8x8xf32>
    %66 = tpu.matmul %65, %49, %cst_21 {dimension_numbers = #tpu.dot_dimension_numbers<[2], [1], [1], [2], [0, 0, 0, 1, 1, 2], [0], [0]>} : vector<2x8x8xf32>, vector<2x8x8xf32>, vector<2x8x8xf32> -> vector<2x8x8xf32>
    "tpu.trace_stop"() : () -> ()
    %67 = vector.shape_cast %66 : vector<2x8x8xf32> to vector<16x8xf32>
    %68 = arith.truncf %67 : vector<16x8xf32> to vector<16x8xbf16>
    %cst_22 = arith.constant dense<0.000000e+00> : vector<16x32xf32>
    %69 = tpu.matmul %68, %34, %cst_22 {dimension_numbers = #tpu.dot_dimension_numbers<[1], [0], [0], [1], [0, 0, 1, 1], [], []>} : vector<16x8xbf16>, vector<8x32xbf16>, vector<16x32xf32> -> vector<16x32xf32>
    %70 = vector.extract_strided_slice %21 {offsets = [1, 0, 0], sizes = [1, 8, 32], strides = [1, 1, 1]} : vector<16x8x32xbf16> to vector<1x8x32xbf16>
    %71 = vector.shape_cast %70 : vector<1x8x32xbf16> to vector<8x32xbf16>
    %72 = vector.extract_strided_slice %21 {offsets = [5, 0, 0], sizes = [1, 8, 32], strides = [1, 1, 1]} : vector<16x8x32xbf16> to vector<1x8x32xbf16>
    %73 = vector.shape_cast %72 : vector<1x8x32xbf16> to vector<8x32xbf16>
    %74 = vector.extract_strided_slice %21 {offsets = [9, 0, 0], sizes = [1, 8, 32], strides = [1, 1, 1]} : vector<16x8x32xbf16> to vector<1x8x32xbf16>
    %75 = vector.shape_cast %74 : vector<1x8x32xbf16> to vector<8x32xbf16>
    %76 = vector.extract_strided_slice %21 {offsets = [13, 0, 0], sizes = [1, 8, 32], strides = [1, 1, 1]} : vector<16x8x32xbf16> to vector<1x8x32xbf16>
    %77 = vector.shape_cast %76 : vector<1x8x32xbf16> to vector<8x32xbf16>
    "tpu.trace_start"() <{level = 10 : i32, message = "re,de->rd"}> : () -> ()
    %cst_23 = arith.constant dense<0.000000e+00> : vector<16x8xf32>
    %78 = tpu.matmul %26, %71, %cst_23 {dimension_numbers = #tpu.dot_dimension_numbers<[1], [1], [0], [0], [0, 0, 1, 0], [], []>} : vector<16x32xbf16>, vector<8x32xbf16>, vector<16x8xf32> -> vector<16x8xf32>
    "tpu.trace_stop"() : () -> ()
    %79 = vector.extract_strided_slice %5 {offsets = [0, 8], sizes = [1, 8], strides = [1, 1]} : vector<1x32xf32> to vector<1x8xf32>
    %80 = vector.broadcast %79 : vector<1x8xf32> to vector<16x8xf32>
    %81 = arith.addf %78, %80 : vector<16x8xf32>
    "tpu.trace_start"() <{level = 10 : i32, message = "re,de->rd"}> : () -> ()
    %cst_24 = arith.constant dense<0.000000e+00> : vector<16x8xf32>
    %82 = tpu.matmul %26, %73, %cst_24 {dimension_numbers = #tpu.dot_dimension_numbers<[1], [1], [0], [0], [0, 0, 1, 0], [], []>} : vector<16x32xbf16>, vector<8x32xbf16>, vector<16x8xf32> -> vector<16x8xf32>
    "tpu.trace_stop"() : () -> ()
    %83 = vector.extract_strided_slice %6 {offsets = [0, 8], sizes = [1, 8], strides = [1, 1]} : vector<1x32xf32> to vector<1x8xf32>
    %84 = vector.broadcast %83 : vector<1x8xf32> to vector<16x8xf32>
    %85 = arith.addf %82, %84 : vector<16x8xf32>
    "tpu.trace_start"() <{level = 10 : i32, message = "re,de->rd"}> : () -> ()
    %cst_25 = arith.constant dense<0.000000e+00> : vector<16x8xf32>
    %86 = tpu.matmul %26, %75, %cst_25 {dimension_numbers = #tpu.dot_dimension_numbers<[1], [1], [0], [0], [0, 0, 1, 0], [], []>} : vector<16x32xbf16>, vector<8x32xbf16>, vector<16x8xf32> -> vector<16x8xf32>
    "tpu.trace_stop"() : () -> ()
    %87 = vector.extract_strided_slice %7 {offsets = [0, 8], sizes = [1, 8], strides = [1, 1]} : vector<1x32xf32> to vector<1x8xf32>
    %88 = vector.broadcast %87 : vector<1x8xf32> to vector<16x8xf32>
    %89 = arith.addf %86, %88 : vector<16x8xf32>
    %90 = vector.shape_cast %81 : vector<16x8xf32> to vector<2x8x8xf32>
    %91 = vector.shape_cast %85 : vector<16x8xf32> to vector<2x8x8xf32>
    %92 = vector.shape_cast %89 : vector<16x8xf32> to vector<2x8x8xf32>
    "tpu.trace_start"() <{level = 10 : i32, message = "bqd,bkd->bqk"}> : () -> ()
    %cst_26 = arith.constant dense<0.000000e+00> : vector<2x8x8xf32>
    %93 = tpu.matmul %90, %91, %cst_26 {dimension_numbers = #tpu.dot_dimension_numbers<[2], [2], [1], [1], [0, 0, 0, 1, 1, 1], [0], [0]>} : vector<2x8x8xf32>, vector<2x8x8xf32>, vector<2x8x8xf32> -> vector<2x8x8xf32>
    "tpu.trace_stop"() : () -> ()
    %cst_27 = arith.constant 0.353553385 : f32
    %94 = vector.broadcast %cst_27 : f32 to vector<2x8x8xf32>
    %95 = arith.mulf %93, %94 : vector<2x8x8xf32>
    %96 = vector.shape_cast %25 : vector<8x8xf32> to vector<1x8x8xf32>
    %97 = vector.broadcast %96 : vector<1x8x8xf32> to vector<2x8x8xf32>
    %98 = arith.addf %95, %97 : vector<2x8x8xf32>
    %cst_28 = arith.constant dense<0xFF800000> : vector<2x8xf32>
    %99 = vector.multi_reduction <maximumf>, %98, %cst_28 [2] : vector<2x8x8xf32> to vector<2x8xf32>
    %100 = vector.shape_cast %99 : vector<2x8xf32> to vector<2x8x1xf32>
    %101 = vector.broadcast %100 : vector<2x8x1xf32> to vector<2x8x8xf32>
    %102 = arith.subf %98, %101 : vector<2x8x8xf32>
    %103 = math.exp %102 : vector<2x8x8xf32>
    %cst_29 = arith.constant dense<0.000000e+00> : vector<2x8xf32>
    %104 = vector.multi_reduction <add>, %103, %cst_29 [2] : vector<2x8x8xf32> to vector<2x8xf32>
    %105 = vector.shape_cast %104 : vector<2x8xf32> to vector<2x8x1xf32>
    %106 = tpu.reciprocal %105 {approx = true} : vector<2x8x1xf32> -> vector<2x8x1xf32>
    %107 = vector.broadcast %106 : vector<2x8x1xf32> to vector<2x8x8xf32>
    %108 = arith.mulf %103, %107 : vector<2x8x8xf32>
    "tpu.trace_start"() <{level = 10 : i32, message = "bqk,bkd->bqd"}> : () -> ()
    %cst_30 = arith.constant dense<0.000000e+00> : vector<2x8x8xf32>
    %109 = tpu.matmul %108, %92, %cst_30 {dimension_numbers = #tpu.dot_dimension_numbers<[2], [1], [1], [2], [0, 0, 0, 1, 1, 2], [0], [0]>} : vector<2x8x8xf32>, vector<2x8x8xf32>, vector<2x8x8xf32> -> vector<2x8x8xf32>
    "tpu.trace_stop"() : () -> ()
    %110 = vector.shape_cast %109 : vector<2x8x8xf32> to vector<16x8xf32>
    %111 = arith.truncf %110 : vector<16x8xf32> to vector<16x8xbf16>
    %cst_31 = arith.constant dense<0.000000e+00> : vector<16x32xf32>
    %112 = tpu.matmul %111, %77, %cst_31 {dimension_numbers = #tpu.dot_dimension_numbers<[1], [0], [0], [1], [0, 0, 1, 1], [], []>} : vector<16x8xbf16>, vector<8x32xbf16>, vector<16x32xf32> -> vector<16x32xf32>
    %113 = arith.addf %69, %112 : vector<16x32xf32>
    %114 = vector.extract_strided_slice %21 {offsets = [2, 0, 0], sizes = [1, 8, 32], strides = [1, 1, 1]} : vector<16x8x32xbf16> to vector<1x8x32xbf16>
    %115 = vector.shape_cast %114 : vector<1x8x32xbf16> to vector<8x32xbf16>
    %116 = vector.extract_strided_slice %21 {offsets = [6, 0, 0], sizes = [1, 8, 32], strides = [1, 1, 1]} : vector<16x8x32xbf16> to vector<1x8x32xbf16>
    %117 = vector.shape_cast %116 : vector<1x8x32xbf16> to vector<8x32xbf16>
    %118 = vector.extract_strided_slice %21 {offsets = [10, 0, 0], sizes = [1, 8, 32], strides = [1, 1, 1]} : vector<16x8x32xbf16> to vector<1x8x32xbf16>
    %119 = vector.shape_cast %118 : vector<1x8x32xbf16> to vector<8x32xbf16>
    %120 = vector.extract_strided_slice %21 {offsets = [14, 0, 0], sizes = [1, 8, 32], strides = [1, 1, 1]} : vector<16x8x32xbf16> to vector<1x8x32xbf16>
    %121 = vector.shape_cast %120 : vector<1x8x32xbf16> to vector<8x32xbf16>
    "tpu.trace_start"() <{level = 10 : i32, message = "re,de->rd"}> : () -> ()
    %cst_32 = arith.constant dense<0.000000e+00> : vector<16x8xf32>
    %122 = tpu.matmul %26, %115, %cst_32 {dimension_numbers = #tpu.dot_dimension_numbers<[1], [1], [0], [0], [0, 0, 1, 0], [], []>} : vector<16x32xbf16>, vector<8x32xbf16>, vector<16x8xf32> -> vector<16x8xf32>
    "tpu.trace_stop"() : () -> ()
    %123 = vector.extract_strided_slice %5 {offsets = [0, 16], sizes = [1, 8], strides = [1, 1]} : vector<1x32xf32> to vector<1x8xf32>
    %124 = vector.broadcast %123 : vector<1x8xf32> to vector<16x8xf32>
    %125 = arith.addf %122, %124 : vector<16x8xf32>
    "tpu.trace_start"() <{level = 10 : i32, message = "re,de->rd"}> : () -> ()
    %cst_33 = arith.constant dense<0.000000e+00> : vector<16x8xf32>
    %126 = tpu.matmul %26, %117, %cst_33 {dimension_numbers = #tpu.dot_dimension_numbers<[1], [1], [0], [0], [0, 0, 1, 0], [], []>} : vector<16x32xbf16>, vector<8x32xbf16>, vector<16x8xf32> -> vector<16x8xf32>
    "tpu.trace_stop"() : () -> ()
    %127 = vector.extract_strided_slice %6 {offsets = [0, 16], sizes = [1, 8], strides = [1, 1]} : vector<1x32xf32> to vector<1x8xf32>
    %128 = vector.broadcast %127 : vector<1x8xf32> to vector<16x8xf32>
    %129 = arith.addf %126, %128 : vector<16x8xf32>
    "tpu.trace_start"() <{level = 10 : i32, message = "re,de->rd"}> : () -> ()
    %cst_34 = arith.constant dense<0.000000e+00> : vector<16x8xf32>
    %130 = tpu.matmul %26, %119, %cst_34 {dimension_numbers = #tpu.dot_dimension_numbers<[1], [1], [0], [0], [0, 0, 1, 0], [], []>} : vector<16x32xbf16>, vector<8x32xbf16>, vector<16x8xf32> -> vector<16x8xf32>
    "tpu.trace_stop"() : () -> ()
    %131 = vector.extract_strided_slice %7 {offsets = [0, 16], sizes = [1, 8], strides = [1, 1]} : vector<1x32xf32> to vector<1x8xf32>
    %132 = vector.broadcast %131 : vector<1x8xf32> to vector<16x8xf32>
    %133 = arith.addf %130, %132 : vector<16x8xf32>
    %134 = vector.shape_cast %125 : vector<16x8xf32> to vector<2x8x8xf32>
    %135 = vector.shape_cast %129 : vector<16x8xf32> to vector<2x8x8xf32>
    %136 = vector.shape_cast %133 : vector<16x8xf32> to vector<2x8x8xf32>
    "tpu.trace_start"() <{level = 10 : i32, message = "bqd,bkd->bqk"}> : () -> ()
    %cst_35 = arith.constant dense<0.000000e+00> : vector<2x8x8xf32>
    %137 = tpu.matmul %134, %135, %cst_35 {dimension_numbers = #tpu.dot_dimension_numbers<[2], [2], [1], [1], [0, 0, 0, 1, 1, 1], [0], [0]>} : vector<2x8x8xf32>, vector<2x8x8xf32>, vector<2x8x8xf32> -> vector<2x8x8xf32>
    "tpu.trace_stop"() : () -> ()
    %cst_36 = arith.constant 0.353553385 : f32
    %138 = vector.broadcast %cst_36 : f32 to vector<2x8x8xf32>
    %139 = arith.mulf %137, %138 : vector<2x8x8xf32>
    %140 = vector.shape_cast %25 : vector<8x8xf32> to vector<1x8x8xf32>
    %141 = vector.broadcast %140 : vector<1x8x8xf32> to vector<2x8x8xf32>
    %142 = arith.addf %139, %141 : vector<2x8x8xf32>
    %cst_37 = arith.constant dense<0xFF800000> : vector<2x8xf32>
    %143 = vector.multi_reduction <maximumf>, %142, %cst_37 [2] : vector<2x8x8xf32> to vector<2x8xf32>
    %144 = vector.shape_cast %143 : vector<2x8xf32> to vector<2x8x1xf32>
    %145 = vector.broadcast %144 : vector<2x8x1xf32> to vector<2x8x8xf32>
    %146 = arith.subf %142, %145 : vector<2x8x8xf32>
    %147 = math.exp %146 : vector<2x8x8xf32>
    %cst_38 = arith.constant dense<0.000000e+00> : vector<2x8xf32>
    %148 = vector.multi_reduction <add>, %147, %cst_38 [2] : vector<2x8x8xf32> to vector<2x8xf32>
    %149 = vector.shape_cast %148 : vector<2x8xf32> to vector<2x8x1xf32>
    %150 = tpu.reciprocal %149 {approx = true} : vector<2x8x1xf32> -> vector<2x8x1xf32>
    %151 = vector.broadcast %150 : vector<2x8x1xf32> to vector<2x8x8xf32>
    %152 = arith.mulf %147, %151 : vector<2x8x8xf32>
    "tpu.trace_start"() <{level = 10 : i32, message = "bqk,bkd->bqd"}> : () -> ()
    %cst_39 = arith.constant dense<0.000000e+00> : vector<2x8x8xf32>
    %153 = tpu.matmul %152, %136, %cst_39 {dimension_numbers = #tpu.dot_dimension_numbers<[2], [1], [1], [2], [0, 0, 0, 1, 1, 2], [0], [0]>} : vector<2x8x8xf32>, vector<2x8x8xf32>, vector<2x8x8xf32> -> vector<2x8x8xf32>
    "tpu.trace_stop"() : () -> ()
    %154 = vector.shape_cast %153 : vector<2x8x8xf32> to vector<16x8xf32>
    %155 = arith.truncf %154 : vector<16x8xf32> to vector<16x8xbf16>
    %cst_40 = arith.constant dense<0.000000e+00> : vector<16x32xf32>
    %156 = tpu.matmul %155, %121, %cst_40 {dimension_numbers = #tpu.dot_dimension_numbers<[1], [0], [0], [1], [0, 0, 1, 1], [], []>} : vector<16x8xbf16>, vector<8x32xbf16>, vector<16x32xf32> -> vector<16x32xf32>
    %157 = arith.addf %113, %156 : vector<16x32xf32>
    %158 = vector.extract_strided_slice %21 {offsets = [3, 0, 0], sizes = [1, 8, 32], strides = [1, 1, 1]} : vector<16x8x32xbf16> to vector<1x8x32xbf16>
    %159 = vector.shape_cast %158 : vector<1x8x32xbf16> to vector<8x32xbf16>
    %160 = vector.extract_strided_slice %21 {offsets = [7, 0, 0], sizes = [1, 8, 32], strides = [1, 1, 1]} : vector<16x8x32xbf16> to vector<1x8x32xbf16>
    %161 = vector.shape_cast %160 : vector<1x8x32xbf16> to vector<8x32xbf16>
    %162 = vector.extract_strided_slice %21 {offsets = [11, 0, 0], sizes = [1, 8, 32], strides = [1, 1, 1]} : vector<16x8x32xbf16> to vector<1x8x32xbf16>
    %163 = vector.shape_cast %162 : vector<1x8x32xbf16> to vector<8x32xbf16>
    %164 = vector.extract_strided_slice %21 {offsets = [15, 0, 0], sizes = [1, 8, 32], strides = [1, 1, 1]} : vector<16x8x32xbf16> to vector<1x8x32xbf16>
    %165 = vector.shape_cast %164 : vector<1x8x32xbf16> to vector<8x32xbf16>
    "tpu.trace_start"() <{level = 10 : i32, message = "re,de->rd"}> : () -> ()
    %cst_41 = arith.constant dense<0.000000e+00> : vector<16x8xf32>
    %166 = tpu.matmul %26, %159, %cst_41 {dimension_numbers = #tpu.dot_dimension_numbers<[1], [1], [0], [0], [0, 0, 1, 0], [], []>} : vector<16x32xbf16>, vector<8x32xbf16>, vector<16x8xf32> -> vector<16x8xf32>
    "tpu.trace_stop"() : () -> ()
    %167 = vector.extract_strided_slice %5 {offsets = [0, 24], sizes = [1, 8], strides = [1, 1]} : vector<1x32xf32> to vector<1x8xf32>
    %168 = vector.broadcast %167 : vector<1x8xf32> to vector<16x8xf32>
    %169 = arith.addf %166, %168 : vector<16x8xf32>
    "tpu.trace_start"() <{level = 10 : i32, message = "re,de->rd"}> : () -> ()
    %cst_42 = arith.constant dense<0.000000e+00> : vector<16x8xf32>
    %170 = tpu.matmul %26, %161, %cst_42 {dimension_numbers = #tpu.dot_dimension_numbers<[1], [1], [0], [0], [0, 0, 1, 0], [], []>} : vector<16x32xbf16>, vector<8x32xbf16>, vector<16x8xf32> -> vector<16x8xf32>
    "tpu.trace_stop"() : () -> ()
    %171 = vector.extract_strided_slice %6 {offsets = [0, 24], sizes = [1, 8], strides = [1, 1]} : vector<1x32xf32> to vector<1x8xf32>
    %172 = vector.broadcast %171 : vector<1x8xf32> to vector<16x8xf32>
    %173 = arith.addf %170, %172 : vector<16x8xf32>
    "tpu.trace_start"() <{level = 10 : i32, message = "re,de->rd"}> : () -> ()
    %cst_43 = arith.constant dense<0.000000e+00> : vector<16x8xf32>
    %174 = tpu.matmul %26, %163, %cst_43 {dimension_numbers = #tpu.dot_dimension_numbers<[1], [1], [0], [0], [0, 0, 1, 0], [], []>} : vector<16x32xbf16>, vector<8x32xbf16>, vector<16x8xf32> -> vector<16x8xf32>
    "tpu.trace_stop"() : () -> ()
    %175 = vector.extract_strided_slice %7 {offsets = [0, 24], sizes = [1, 8], strides = [1, 1]} : vector<1x32xf32> to vector<1x8xf32>
    %176 = vector.broadcast %175 : vector<1x8xf32> to vector<16x8xf32>
    %177 = arith.addf %174, %176 : vector<16x8xf32>
    %178 = vector.shape_cast %169 : vector<16x8xf32> to vector<2x8x8xf32>
    %179 = vector.shape_cast %173 : vector<16x8xf32> to vector<2x8x8xf32>
    %180 = vector.shape_cast %177 : vector<16x8xf32> to vector<2x8x8xf32>
    "tpu.trace_start"() <{level = 10 : i32, message = "bqd,bkd->bqk"}> : () -> ()
    %cst_44 = arith.constant dense<0.000000e+00> : vector<2x8x8xf32>
    %181 = tpu.matmul %178, %179, %cst_44 {dimension_numbers = #tpu.dot_dimension_numbers<[2], [2], [1], [1], [0, 0, 0, 1, 1, 1], [0], [0]>} : vector<2x8x8xf32>, vector<2x8x8xf32>, vector<2x8x8xf32> -> vector<2x8x8xf32>
    "tpu.trace_stop"() : () -> ()
    %cst_45 = arith.constant 0.353553385 : f32
    %182 = vector.broadcast %cst_45 : f32 to vector<2x8x8xf32>
    %183 = arith.mulf %181, %182 : vector<2x8x8xf32>
    %184 = vector.shape_cast %25 : vector<8x8xf32> to vector<1x8x8xf32>
    %185 = vector.broadcast %184 : vector<1x8x8xf32> to vector<2x8x8xf32>
    %186 = arith.addf %183, %185 : vector<2x8x8xf32>
    %cst_46 = arith.constant dense<0xFF800000> : vector<2x8xf32>
    %187 = vector.multi_reduction <maximumf>, %186, %cst_46 [2] : vector<2x8x8xf32> to vector<2x8xf32>
    %188 = vector.shape_cast %187 : vector<2x8xf32> to vector<2x8x1xf32>
    %189 = vector.broadcast %188 : vector<2x8x1xf32> to vector<2x8x8xf32>
    %190 = arith.subf %186, %189 : vector<2x8x8xf32>
    %191 = math.exp %190 : vector<2x8x8xf32>
    %cst_47 = arith.constant dense<0.000000e+00> : vector<2x8xf32>
    %192 = vector.multi_reduction <add>, %191, %cst_47 [2] : vector<2x8x8xf32> to vector<2x8xf32>
    %193 = vector.shape_cast %192 : vector<2x8xf32> to vector<2x8x1xf32>
    %194 = tpu.reciprocal %193 {approx = true} : vector<2x8x1xf32> -> vector<2x8x1xf32>
    %195 = vector.broadcast %194 : vector<2x8x1xf32> to vector<2x8x8xf32>
    %196 = arith.mulf %191, %195 : vector<2x8x8xf32>
    "tpu.trace_start"() <{level = 10 : i32, message = "bqk,bkd->bqd"}> : () -> ()
    %cst_48 = arith.constant dense<0.000000e+00> : vector<2x8x8xf32>
    %197 = tpu.matmul %196, %180, %cst_48 {dimension_numbers = #tpu.dot_dimension_numbers<[2], [1], [1], [2], [0, 0, 0, 1, 1, 2], [0], [0]>} : vector<2x8x8xf32>, vector<2x8x8xf32>, vector<2x8x8xf32> -> vector<2x8x8xf32>
    "tpu.trace_stop"() : () -> ()
    %198 = vector.shape_cast %197 : vector<2x8x8xf32> to vector<16x8xf32>
    %199 = arith.truncf %198 : vector<16x8xf32> to vector<16x8xbf16>
    %cst_49 = arith.constant dense<0.000000e+00> : vector<16x32xf32>
    %200 = tpu.matmul %199, %165, %cst_49 {dimension_numbers = #tpu.dot_dimension_numbers<[1], [0], [0], [1], [0, 0, 1, 1], [], []>} : vector<16x8xbf16>, vector<8x32xbf16>, vector<16x32xf32> -> vector<16x32xf32>
    %201 = arith.addf %157, %200 : vector<16x32xf32>
    %202 = vector.broadcast %8 : vector<1x32xf32> to vector<16x32xf32>
    %203 = arith.addf %201, %202 : vector<16x32xf32>
    %204 = arith.addf %24, %203 : vector<16x32xf32>
    %cst_50 = arith.constant dense<0.000000e+00> : vector<16xf32>
    %205 = vector.multi_reduction <add>, %204, %cst_50 [1] : vector<16x32xf32> to vector<16xf32>
    %206 = vector.shape_cast %205 : vector<16xf32> to vector<16x1xf32>
    %cst_51 = arith.constant 3.200000e+01 : f32
    %207 = vector.broadcast %cst_51 : f32 to vector<16x1xf32>
    %208 = arith.divf %206, %207 : vector<16x1xf32>
    %209 = vector.broadcast %208 : vector<16x1xf32> to vector<16x32xf32>
    %210 = arith.subf %204, %209 : vector<16x32xf32>
    %211 = arith.mulf %210, %210 : vector<16x32xf32>
    %cst_52 = arith.constant dense<0.000000e+00> : vector<16xf32>
    %212 = vector.multi_reduction <add>, %211, %cst_52 [1] : vector<16x32xf32> to vector<16xf32>
    %213 = vector.shape_cast %212 : vector<16xf32> to vector<16x1xf32>
    %cst_53 = arith.constant 3.200000e+01 : f32
    %214 = vector.broadcast %cst_53 : f32 to vector<16x1xf32>
    %215 = arith.divf %213, %214 : vector<16x1xf32>
    %cst_54 = arith.constant 9.99999974E-6 : f32
    %216 = vector.broadcast %cst_54 : f32 to vector<16x1xf32>
    %217 = arith.addf %215, %216 : vector<16x1xf32>
    %218 = math.rsqrt %217 : vector<16x1xf32>
    %219 = vector.broadcast %218 : vector<16x1xf32> to vector<16x32xf32>
    %220 = arith.mulf %210, %219 : vector<16x32xf32>
    %221 = vector.broadcast %9 : vector<1x32xf32> to vector<16x32xf32>
    %222 = arith.mulf %220, %221 : vector<16x32xf32>
    %223 = vector.broadcast %10 : vector<1x32xf32> to vector<16x32xf32>
    %224 = arith.addf %222, %223 : vector<16x32xf32>
    %c0_55 = arith.constant 0 : index
    %c0_56 = arith.constant 0 : index
    %225 = vector.load %arg5[%c0_55, %c0_56] : memref<16x32xf32, #tpu.memory_space<vmem>>, vector<16x32xf32>
    %c0_57 = arith.constant 0 : index
    %c0_58 = arith.constant 0 : index
    %226 = vector.load %arg7[%c0_57, %c0_58] : memref<8x8xf32, #tpu.memory_space<vmem>>, vector<8x8xf32>
    %227 = arith.truncf %224 : vector<16x32xf32> to vector<16x32xbf16>
    %228 = arith.truncf %225 : vector<16x32xf32> to vector<16x32xbf16>
    %229 = vector.extract_strided_slice %23 {offsets = [0, 0, 0], sizes = [1, 8, 32], strides = [1, 1, 1]} : vector<16x8x32xbf16> to vector<1x8x32xbf16>
    %230 = vector.shape_cast %229 : vector<1x8x32xbf16> to vector<8x32xbf16>
    %231 = vector.extract_strided_slice %23 {offsets = [4, 0, 0], sizes = [1, 8, 32], strides = [1, 1, 1]} : vector<16x8x32xbf16> to vector<1x8x32xbf16>
    %232 = vector.shape_cast %231 : vector<1x8x32xbf16> to vector<8x32xbf16>
    %233 = vector.extract_strided_slice %23 {offsets = [8, 0, 0], sizes = [1, 8, 32], strides = [1, 1, 1]} : vector<16x8x32xbf16> to vector<1x8x32xbf16>
    %234 = vector.shape_cast %233 : vector<1x8x32xbf16> to vector<8x32xbf16>
    %235 = vector.extract_strided_slice %23 {offsets = [12, 0, 0], sizes = [1, 8, 32], strides = [1, 1, 1]} : vector<16x8x32xbf16> to vector<1x8x32xbf16>
    %236 = vector.shape_cast %235 : vector<1x8x32xbf16> to vector<8x32xbf16>
    "tpu.trace_start"() <{level = 10 : i32, message = "re,de->rd"}> : () -> ()
    %cst_59 = arith.constant dense<0.000000e+00> : vector<16x8xf32>
    %237 = tpu.matmul %227, %230, %cst_59 {dimension_numbers = #tpu.dot_dimension_numbers<[1], [1], [0], [0], [0, 0, 1, 0], [], []>} : vector<16x32xbf16>, vector<8x32xbf16>, vector<16x8xf32> -> vector<16x8xf32>
    "tpu.trace_stop"() : () -> ()
    %238 = vector.extract_strided_slice %11 {offsets = [0, 0], sizes = [1, 8], strides = [1, 1]} : vector<1x32xf32> to vector<1x8xf32>
    %239 = vector.broadcast %238 : vector<1x8xf32> to vector<16x8xf32>
    %240 = arith.addf %237, %239 : vector<16x8xf32>
    "tpu.trace_start"() <{level = 10 : i32, message = "re,de->rd"}> : () -> ()
    %cst_60 = arith.constant dense<0.000000e+00> : vector<16x8xf32>
    %241 = tpu.matmul %228, %232, %cst_60 {dimension_numbers = #tpu.dot_dimension_numbers<[1], [1], [0], [0], [0, 0, 1, 0], [], []>} : vector<16x32xbf16>, vector<8x32xbf16>, vector<16x8xf32> -> vector<16x8xf32>
    "tpu.trace_stop"() : () -> ()
    %242 = vector.extract_strided_slice %12 {offsets = [0, 0], sizes = [1, 8], strides = [1, 1]} : vector<1x32xf32> to vector<1x8xf32>
    %243 = vector.broadcast %242 : vector<1x8xf32> to vector<16x8xf32>
    %244 = arith.addf %241, %243 : vector<16x8xf32>
    "tpu.trace_start"() <{level = 10 : i32, message = "re,de->rd"}> : () -> ()
    %cst_61 = arith.constant dense<0.000000e+00> : vector<16x8xf32>
    %245 = tpu.matmul %228, %234, %cst_61 {dimension_numbers = #tpu.dot_dimension_numbers<[1], [1], [0], [0], [0, 0, 1, 0], [], []>} : vector<16x32xbf16>, vector<8x32xbf16>, vector<16x8xf32> -> vector<16x8xf32>
    "tpu.trace_stop"() : () -> ()
    %246 = vector.extract_strided_slice %13 {offsets = [0, 0], sizes = [1, 8], strides = [1, 1]} : vector<1x32xf32> to vector<1x8xf32>
    %247 = vector.broadcast %246 : vector<1x8xf32> to vector<16x8xf32>
    %248 = arith.addf %245, %247 : vector<16x8xf32>
    %249 = vector.shape_cast %240 : vector<16x8xf32> to vector<2x8x8xf32>
    %250 = vector.shape_cast %244 : vector<16x8xf32> to vector<2x8x8xf32>
    %251 = vector.shape_cast %248 : vector<16x8xf32> to vector<2x8x8xf32>
    "tpu.trace_start"() <{level = 10 : i32, message = "bqd,bkd->bqk"}> : () -> ()
    %cst_62 = arith.constant dense<0.000000e+00> : vector<2x8x8xf32>
    %252 = tpu.matmul %249, %250, %cst_62 {dimension_numbers = #tpu.dot_dimension_numbers<[2], [2], [1], [1], [0, 0, 0, 1, 1, 1], [0], [0]>} : vector<2x8x8xf32>, vector<2x8x8xf32>, vector<2x8x8xf32> -> vector<2x8x8xf32>
    "tpu.trace_stop"() : () -> ()
    %cst_63 = arith.constant 0.353553385 : f32
    %253 = vector.broadcast %cst_63 : f32 to vector<2x8x8xf32>
    %254 = arith.mulf %252, %253 : vector<2x8x8xf32>
    %255 = vector.shape_cast %226 : vector<8x8xf32> to vector<1x8x8xf32>
    %256 = vector.broadcast %255 : vector<1x8x8xf32> to vector<2x8x8xf32>
    %257 = arith.addf %254, %256 : vector<2x8x8xf32>
    %cst_64 = arith.constant dense<0xFF800000> : vector<2x8xf32>
    %258 = vector.multi_reduction <maximumf>, %257, %cst_64 [2] : vector<2x8x8xf32> to vector<2x8xf32>
    %259 = vector.shape_cast %258 : vector<2x8xf32> to vector<2x8x1xf32>
    %260 = vector.broadcast %259 : vector<2x8x1xf32> to vector<2x8x8xf32>
    %261 = arith.subf %257, %260 : vector<2x8x8xf32>
    %262 = math.exp %261 : vector<2x8x8xf32>
    %cst_65 = arith.constant dense<0.000000e+00> : vector<2x8xf32>
    %263 = vector.multi_reduction <add>, %262, %cst_65 [2] : vector<2x8x8xf32> to vector<2x8xf32>
    %264 = vector.shape_cast %263 : vector<2x8xf32> to vector<2x8x1xf32>
    %265 = tpu.reciprocal %264 {approx = true} : vector<2x8x1xf32> -> vector<2x8x1xf32>
    %266 = vector.broadcast %265 : vector<2x8x1xf32> to vector<2x8x8xf32>
    %267 = arith.mulf %262, %266 : vector<2x8x8xf32>
    "tpu.trace_start"() <{level = 10 : i32, message = "bqk,bkd->bqd"}> : () -> ()
    %cst_66 = arith.constant dense<0.000000e+00> : vector<2x8x8xf32>
    %268 = tpu.matmul %267, %251, %cst_66 {dimension_numbers = #tpu.dot_dimension_numbers<[2], [1], [1], [2], [0, 0, 0, 1, 1, 2], [0], [0]>} : vector<2x8x8xf32>, vector<2x8x8xf32>, vector<2x8x8xf32> -> vector<2x8x8xf32>
    "tpu.trace_stop"() : () -> ()
    %269 = vector.shape_cast %268 : vector<2x8x8xf32> to vector<16x8xf32>
    %270 = arith.truncf %269 : vector<16x8xf32> to vector<16x8xbf16>
    %cst_67 = arith.constant dense<0.000000e+00> : vector<16x32xf32>
    %271 = tpu.matmul %270, %236, %cst_67 {dimension_numbers = #tpu.dot_dimension_numbers<[1], [0], [0], [1], [0, 0, 1, 1], [], []>} : vector<16x8xbf16>, vector<8x32xbf16>, vector<16x32xf32> -> vector<16x32xf32>
    %272 = vector.extract_strided_slice %23 {offsets = [1, 0, 0], sizes = [1, 8, 32], strides = [1, 1, 1]} : vector<16x8x32xbf16> to vector<1x8x32xbf16>
    %273 = vector.shape_cast %272 : vector<1x8x32xbf16> to vector<8x32xbf16>
    %274 = vector.extract_strided_slice %23 {offsets = [5, 0, 0], sizes = [1, 8, 32], strides = [1, 1, 1]} : vector<16x8x32xbf16> to vector<1x8x32xbf16>
    %275 = vector.shape_cast %274 : vector<1x8x32xbf16> to vector<8x32xbf16>
    %276 = vector.extract_strided_slice %23 {offsets = [9, 0, 0], sizes = [1, 8, 32], strides = [1, 1, 1]} : vector<16x8x32xbf16> to vector<1x8x32xbf16>
    %277 = vector.shape_cast %276 : vector<1x8x32xbf16> to vector<8x32xbf16>
    %278 = vector.extract_strided_slice %23 {offsets = [13, 0, 0], sizes = [1, 8, 32], strides = [1, 1, 1]} : vector<16x8x32xbf16> to vector<1x8x32xbf16>
    %279 = vector.shape_cast %278 : vector<1x8x32xbf16> to vector<8x32xbf16>
    "tpu.trace_start"() <{level = 10 : i32, message = "re,de->rd"}> : () -> ()
    %cst_68 = arith.constant dense<0.000000e+00> : vector<16x8xf32>
    %280 = tpu.matmul %227, %273, %cst_68 {dimension_numbers = #tpu.dot_dimension_numbers<[1], [1], [0], [0], [0, 0, 1, 0], [], []>} : vector<16x32xbf16>, vector<8x32xbf16>, vector<16x8xf32> -> vector<16x8xf32>
    "tpu.trace_stop"() : () -> ()
    %281 = vector.extract_strided_slice %11 {offsets = [0, 8], sizes = [1, 8], strides = [1, 1]} : vector<1x32xf32> to vector<1x8xf32>
    %282 = vector.broadcast %281 : vector<1x8xf32> to vector<16x8xf32>
    %283 = arith.addf %280, %282 : vector<16x8xf32>
    "tpu.trace_start"() <{level = 10 : i32, message = "re,de->rd"}> : () -> ()
    %cst_69 = arith.constant dense<0.000000e+00> : vector<16x8xf32>
    %284 = tpu.matmul %228, %275, %cst_69 {dimension_numbers = #tpu.dot_dimension_numbers<[1], [1], [0], [0], [0, 0, 1, 0], [], []>} : vector<16x32xbf16>, vector<8x32xbf16>, vector<16x8xf32> -> vector<16x8xf32>
    "tpu.trace_stop"() : () -> ()
    %285 = vector.extract_strided_slice %12 {offsets = [0, 8], sizes = [1, 8], strides = [1, 1]} : vector<1x32xf32> to vector<1x8xf32>
    %286 = vector.broadcast %285 : vector<1x8xf32> to vector<16x8xf32>
    %287 = arith.addf %284, %286 : vector<16x8xf32>
    "tpu.trace_start"() <{level = 10 : i32, message = "re,de->rd"}> : () -> ()
    %cst_70 = arith.constant dense<0.000000e+00> : vector<16x8xf32>
    %288 = tpu.matmul %228, %277, %cst_70 {dimension_numbers = #tpu.dot_dimension_numbers<[1], [1], [0], [0], [0, 0, 1, 0], [], []>} : vector<16x32xbf16>, vector<8x32xbf16>, vector<16x8xf32> -> vector<16x8xf32>
    "tpu.trace_stop"() : () -> ()
    %289 = vector.extract_strided_slice %13 {offsets = [0, 8], sizes = [1, 8], strides = [1, 1]} : vector<1x32xf32> to vector<1x8xf32>
    %290 = vector.broadcast %289 : vector<1x8xf32> to vector<16x8xf32>
    %291 = arith.addf %288, %290 : vector<16x8xf32>
    %292 = vector.shape_cast %283 : vector<16x8xf32> to vector<2x8x8xf32>
    %293 = vector.shape_cast %287 : vector<16x8xf32> to vector<2x8x8xf32>
    %294 = vector.shape_cast %291 : vector<16x8xf32> to vector<2x8x8xf32>
    "tpu.trace_start"() <{level = 10 : i32, message = "bqd,bkd->bqk"}> : () -> ()
    %cst_71 = arith.constant dense<0.000000e+00> : vector<2x8x8xf32>
    %295 = tpu.matmul %292, %293, %cst_71 {dimension_numbers = #tpu.dot_dimension_numbers<[2], [2], [1], [1], [0, 0, 0, 1, 1, 1], [0], [0]>} : vector<2x8x8xf32>, vector<2x8x8xf32>, vector<2x8x8xf32> -> vector<2x8x8xf32>
    "tpu.trace_stop"() : () -> ()
    %cst_72 = arith.constant 0.353553385 : f32
    %296 = vector.broadcast %cst_72 : f32 to vector<2x8x8xf32>
    %297 = arith.mulf %295, %296 : vector<2x8x8xf32>
    %298 = vector.shape_cast %226 : vector<8x8xf32> to vector<1x8x8xf32>
    %299 = vector.broadcast %298 : vector<1x8x8xf32> to vector<2x8x8xf32>
    %300 = arith.addf %297, %299 : vector<2x8x8xf32>
    %cst_73 = arith.constant dense<0xFF800000> : vector<2x8xf32>
    %301 = vector.multi_reduction <maximumf>, %300, %cst_73 [2] : vector<2x8x8xf32> to vector<2x8xf32>
    %302 = vector.shape_cast %301 : vector<2x8xf32> to vector<2x8x1xf32>
    %303 = vector.broadcast %302 : vector<2x8x1xf32> to vector<2x8x8xf32>
    %304 = arith.subf %300, %303 : vector<2x8x8xf32>
    %305 = math.exp %304 : vector<2x8x8xf32>
    %cst_74 = arith.constant dense<0.000000e+00> : vector<2x8xf32>
    %306 = vector.multi_reduction <add>, %305, %cst_74 [2] : vector<2x8x8xf32> to vector<2x8xf32>
    %307 = vector.shape_cast %306 : vector<2x8xf32> to vector<2x8x1xf32>
    %308 = tpu.reciprocal %307 {approx = true} : vector<2x8x1xf32> -> vector<2x8x1xf32>
    %309 = vector.broadcast %308 : vector<2x8x1xf32> to vector<2x8x8xf32>
    %310 = arith.mulf %305, %309 : vector<2x8x8xf32>
    "tpu.trace_start"() <{level = 10 : i32, message = "bqk,bkd->bqd"}> : () -> ()
    %cst_75 = arith.constant dense<0.000000e+00> : vector<2x8x8xf32>
    %311 = tpu.matmul %310, %294, %cst_75 {dimension_numbers = #tpu.dot_dimension_numbers<[2], [1], [1], [2], [0, 0, 0, 1, 1, 2], [0], [0]>} : vector<2x8x8xf32>, vector<2x8x8xf32>, vector<2x8x8xf32> -> vector<2x8x8xf32>
    "tpu.trace_stop"() : () -> ()
    %312 = vector.shape_cast %311 : vector<2x8x8xf32> to vector<16x8xf32>
    %313 = arith.truncf %312 : vector<16x8xf32> to vector<16x8xbf16>
    %cst_76 = arith.constant dense<0.000000e+00> : vector<16x32xf32>
    %314 = tpu.matmul %313, %279, %cst_76 {dimension_numbers = #tpu.dot_dimension_numbers<[1], [0], [0], [1], [0, 0, 1, 1], [], []>} : vector<16x8xbf16>, vector<8x32xbf16>, vector<16x32xf32> -> vector<16x32xf32>
    %315 = arith.addf %271, %314 : vector<16x32xf32>
    %316 = vector.extract_strided_slice %23 {offsets = [2, 0, 0], sizes = [1, 8, 32], strides = [1, 1, 1]} : vector<16x8x32xbf16> to vector<1x8x32xbf16>
    %317 = vector.shape_cast %316 : vector<1x8x32xbf16> to vector<8x32xbf16>
    %318 = vector.extract_strided_slice %23 {offsets = [6, 0, 0], sizes = [1, 8, 32], strides = [1, 1, 1]} : vector<16x8x32xbf16> to vector<1x8x32xbf16>
    %319 = vector.shape_cast %318 : vector<1x8x32xbf16> to vector<8x32xbf16>
    %320 = vector.extract_strided_slice %23 {offsets = [10, 0, 0], sizes = [1, 8, 32], strides = [1, 1, 1]} : vector<16x8x32xbf16> to vector<1x8x32xbf16>
    %321 = vector.shape_cast %320 : vector<1x8x32xbf16> to vector<8x32xbf16>
    %322 = vector.extract_strided_slice %23 {offsets = [14, 0, 0], sizes = [1, 8, 32], strides = [1, 1, 1]} : vector<16x8x32xbf16> to vector<1x8x32xbf16>
    %323 = vector.shape_cast %322 : vector<1x8x32xbf16> to vector<8x32xbf16>
    "tpu.trace_start"() <{level = 10 : i32, message = "re,de->rd"}> : () -> ()
    %cst_77 = arith.constant dense<0.000000e+00> : vector<16x8xf32>
    %324 = tpu.matmul %227, %317, %cst_77 {dimension_numbers = #tpu.dot_dimension_numbers<[1], [1], [0], [0], [0, 0, 1, 0], [], []>} : vector<16x32xbf16>, vector<8x32xbf16>, vector<16x8xf32> -> vector<16x8xf32>
    "tpu.trace_stop"() : () -> ()
    %325 = vector.extract_strided_slice %11 {offsets = [0, 16], sizes = [1, 8], strides = [1, 1]} : vector<1x32xf32> to vector<1x8xf32>
    %326 = vector.broadcast %325 : vector<1x8xf32> to vector<16x8xf32>
    %327 = arith.addf %324, %326 : vector<16x8xf32>
    "tpu.trace_start"() <{level = 10 : i32, message = "re,de->rd"}> : () -> ()
    %cst_78 = arith.constant dense<0.000000e+00> : vector<16x8xf32>
    %328 = tpu.matmul %228, %319, %cst_78 {dimension_numbers = #tpu.dot_dimension_numbers<[1], [1], [0], [0], [0, 0, 1, 0], [], []>} : vector<16x32xbf16>, vector<8x32xbf16>, vector<16x8xf32> -> vector<16x8xf32>
    "tpu.trace_stop"() : () -> ()
    %329 = vector.extract_strided_slice %12 {offsets = [0, 16], sizes = [1, 8], strides = [1, 1]} : vector<1x32xf32> to vector<1x8xf32>
    %330 = vector.broadcast %329 : vector<1x8xf32> to vector<16x8xf32>
    %331 = arith.addf %328, %330 : vector<16x8xf32>
    "tpu.trace_start"() <{level = 10 : i32, message = "re,de->rd"}> : () -> ()
    %cst_79 = arith.constant dense<0.000000e+00> : vector<16x8xf32>
    %332 = tpu.matmul %228, %321, %cst_79 {dimension_numbers = #tpu.dot_dimension_numbers<[1], [1], [0], [0], [0, 0, 1, 0], [], []>} : vector<16x32xbf16>, vector<8x32xbf16>, vector<16x8xf32> -> vector<16x8xf32>
    "tpu.trace_stop"() : () -> ()
    %333 = vector.extract_strided_slice %13 {offsets = [0, 16], sizes = [1, 8], strides = [1, 1]} : vector<1x32xf32> to vector<1x8xf32>
    %334 = vector.broadcast %333 : vector<1x8xf32> to vector<16x8xf32>
    %335 = arith.addf %332, %334 : vector<16x8xf32>
    %336 = vector.shape_cast %327 : vector<16x8xf32> to vector<2x8x8xf32>
    %337 = vector.shape_cast %331 : vector<16x8xf32> to vector<2x8x8xf32>
    %338 = vector.shape_cast %335 : vector<16x8xf32> to vector<2x8x8xf32>
    "tpu.trace_start"() <{level = 10 : i32, message = "bqd,bkd->bqk"}> : () -> ()
    %cst_80 = arith.constant dense<0.000000e+00> : vector<2x8x8xf32>
    %339 = tpu.matmul %336, %337, %cst_80 {dimension_numbers = #tpu.dot_dimension_numbers<[2], [2], [1], [1], [0, 0, 0, 1, 1, 1], [0], [0]>} : vector<2x8x8xf32>, vector<2x8x8xf32>, vector<2x8x8xf32> -> vector<2x8x8xf32>
    "tpu.trace_stop"() : () -> ()
    %cst_81 = arith.constant 0.353553385 : f32
    %340 = vector.broadcast %cst_81 : f32 to vector<2x8x8xf32>
    %341 = arith.mulf %339, %340 : vector<2x8x8xf32>
    %342 = vector.shape_cast %226 : vector<8x8xf32> to vector<1x8x8xf32>
    %343 = vector.broadcast %342 : vector<1x8x8xf32> to vector<2x8x8xf32>
    %344 = arith.addf %341, %343 : vector<2x8x8xf32>
    %cst_82 = arith.constant dense<0xFF800000> : vector<2x8xf32>
    %345 = vector.multi_reduction <maximumf>, %344, %cst_82 [2] : vector<2x8x8xf32> to vector<2x8xf32>
    %346 = vector.shape_cast %345 : vector<2x8xf32> to vector<2x8x1xf32>
    %347 = vector.broadcast %346 : vector<2x8x1xf32> to vector<2x8x8xf32>
    %348 = arith.subf %344, %347 : vector<2x8x8xf32>
    %349 = math.exp %348 : vector<2x8x8xf32>
    %cst_83 = arith.constant dense<0.000000e+00> : vector<2x8xf32>
    %350 = vector.multi_reduction <add>, %349, %cst_83 [2] : vector<2x8x8xf32> to vector<2x8xf32>
    %351 = vector.shape_cast %350 : vector<2x8xf32> to vector<2x8x1xf32>
    %352 = tpu.reciprocal %351 {approx = true} : vector<2x8x1xf32> -> vector<2x8x1xf32>
    %353 = vector.broadcast %352 : vector<2x8x1xf32> to vector<2x8x8xf32>
    %354 = arith.mulf %349, %353 : vector<2x8x8xf32>
    "tpu.trace_start"() <{level = 10 : i32, message = "bqk,bkd->bqd"}> : () -> ()
    %cst_84 = arith.constant dense<0.000000e+00> : vector<2x8x8xf32>
    %355 = tpu.matmul %354, %338, %cst_84 {dimension_numbers = #tpu.dot_dimension_numbers<[2], [1], [1], [2], [0, 0, 0, 1, 1, 2], [0], [0]>} : vector<2x8x8xf32>, vector<2x8x8xf32>, vector<2x8x8xf32> -> vector<2x8x8xf32>
    "tpu.trace_stop"() : () -> ()
    %356 = vector.shape_cast %355 : vector<2x8x8xf32> to vector<16x8xf32>
    %357 = arith.truncf %356 : vector<16x8xf32> to vector<16x8xbf16>
    %cst_85 = arith.constant dense<0.000000e+00> : vector<16x32xf32>
    %358 = tpu.matmul %357, %323, %cst_85 {dimension_numbers = #tpu.dot_dimension_numbers<[1], [0], [0], [1], [0, 0, 1, 1], [], []>} : vector<16x8xbf16>, vector<8x32xbf16>, vector<16x32xf32> -> vector<16x32xf32>
    %359 = arith.addf %315, %358 : vector<16x32xf32>
    %360 = vector.extract_strided_slice %23 {offsets = [3, 0, 0], sizes = [1, 8, 32], strides = [1, 1, 1]} : vector<16x8x32xbf16> to vector<1x8x32xbf16>
    %361 = vector.shape_cast %360 : vector<1x8x32xbf16> to vector<8x32xbf16>
    %362 = vector.extract_strided_slice %23 {offsets = [7, 0, 0], sizes = [1, 8, 32], strides = [1, 1, 1]} : vector<16x8x32xbf16> to vector<1x8x32xbf16>
    %363 = vector.shape_cast %362 : vector<1x8x32xbf16> to vector<8x32xbf16>
    %364 = vector.extract_strided_slice %23 {offsets = [11, 0, 0], sizes = [1, 8, 32], strides = [1, 1, 1]} : vector<16x8x32xbf16> to vector<1x8x32xbf16>
    %365 = vector.shape_cast %364 : vector<1x8x32xbf16> to vector<8x32xbf16>
    %366 = vector.extract_strided_slice %23 {offsets = [15, 0, 0], sizes = [1, 8, 32], strides = [1, 1, 1]} : vector<16x8x32xbf16> to vector<1x8x32xbf16>
    %367 = vector.shape_cast %366 : vector<1x8x32xbf16> to vector<8x32xbf16>
    "tpu.trace_start"() <{level = 10 : i32, message = "re,de->rd"}> : () -> ()
    %cst_86 = arith.constant dense<0.000000e+00> : vector<16x8xf32>
    %368 = tpu.matmul %227, %361, %cst_86 {dimension_numbers = #tpu.dot_dimension_numbers<[1], [1], [0], [0], [0, 0, 1, 0], [], []>} : vector<16x32xbf16>, vector<8x32xbf16>, vector<16x8xf32> -> vector<16x8xf32>
    "tpu.trace_stop"() : () -> ()
    %369 = vector.extract_strided_slice %11 {offsets = [0, 24], sizes = [1, 8], strides = [1, 1]} : vector<1x32xf32> to vector<1x8xf32>
    %370 = vector.broadcast %369 : vector<1x8xf32> to vector<16x8xf32>
    %371 = arith.addf %368, %370 : vector<16x8xf32>
    "tpu.trace_start"() <{level = 10 : i32, message = "re,de->rd"}> : () -> ()
    %cst_87 = arith.constant dense<0.000000e+00> : vector<16x8xf32>
    %372 = tpu.matmul %228, %363, %cst_87 {dimension_numbers = #tpu.dot_dimension_numbers<[1], [1], [0], [0], [0, 0, 1, 0], [], []>} : vector<16x32xbf16>, vector<8x32xbf16>, vector<16x8xf32> -> vector<16x8xf32>
    "tpu.trace_stop"() : () -> ()
    %373 = vector.extract_strided_slice %12 {offsets = [0, 24], sizes = [1, 8], strides = [1, 1]} : vector<1x32xf32> to vector<1x8xf32>
    %374 = vector.broadcast %373 : vector<1x8xf32> to vector<16x8xf32>
    %375 = arith.addf %372, %374 : vector<16x8xf32>
    "tpu.trace_start"() <{level = 10 : i32, message = "re,de->rd"}> : () -> ()
    %cst_88 = arith.constant dense<0.000000e+00> : vector<16x8xf32>
    %376 = tpu.matmul %228, %365, %cst_88 {dimension_numbers = #tpu.dot_dimension_numbers<[1], [1], [0], [0], [0, 0, 1, 0], [], []>} : vector<16x32xbf16>, vector<8x32xbf16>, vector<16x8xf32> -> vector<16x8xf32>
    "tpu.trace_stop"() : () -> ()
    %377 = vector.extract_strided_slice %13 {offsets = [0, 24], sizes = [1, 8], strides = [1, 1]} : vector<1x32xf32> to vector<1x8xf32>
    %378 = vector.broadcast %377 : vector<1x8xf32> to vector<16x8xf32>
    %379 = arith.addf %376, %378 : vector<16x8xf32>
    %380 = vector.shape_cast %371 : vector<16x8xf32> to vector<2x8x8xf32>
    %381 = vector.shape_cast %375 : vector<16x8xf32> to vector<2x8x8xf32>
    %382 = vector.shape_cast %379 : vector<16x8xf32> to vector<2x8x8xf32>
    "tpu.trace_start"() <{level = 10 : i32, message = "bqd,bkd->bqk"}> : () -> ()
    %cst_89 = arith.constant dense<0.000000e+00> : vector<2x8x8xf32>
    %383 = tpu.matmul %380, %381, %cst_89 {dimension_numbers = #tpu.dot_dimension_numbers<[2], [2], [1], [1], [0, 0, 0, 1, 1, 1], [0], [0]>} : vector<2x8x8xf32>, vector<2x8x8xf32>, vector<2x8x8xf32> -> vector<2x8x8xf32>
    "tpu.trace_stop"() : () -> ()
    %cst_90 = arith.constant 0.353553385 : f32
    %384 = vector.broadcast %cst_90 : f32 to vector<2x8x8xf32>
    %385 = arith.mulf %383, %384 : vector<2x8x8xf32>
    %386 = vector.shape_cast %226 : vector<8x8xf32> to vector<1x8x8xf32>
    %387 = vector.broadcast %386 : vector<1x8x8xf32> to vector<2x8x8xf32>
    %388 = arith.addf %385, %387 : vector<2x8x8xf32>
    %cst_91 = arith.constant dense<0xFF800000> : vector<2x8xf32>
    %389 = vector.multi_reduction <maximumf>, %388, %cst_91 [2] : vector<2x8x8xf32> to vector<2x8xf32>
    %390 = vector.shape_cast %389 : vector<2x8xf32> to vector<2x8x1xf32>
    %391 = vector.broadcast %390 : vector<2x8x1xf32> to vector<2x8x8xf32>
    %392 = arith.subf %388, %391 : vector<2x8x8xf32>
    %393 = math.exp %392 : vector<2x8x8xf32>
    %cst_92 = arith.constant dense<0.000000e+00> : vector<2x8xf32>
    %394 = vector.multi_reduction <add>, %393, %cst_92 [2] : vector<2x8x8xf32> to vector<2x8xf32>
    %395 = vector.shape_cast %394 : vector<2x8xf32> to vector<2x8x1xf32>
    %396 = tpu.reciprocal %395 {approx = true} : vector<2x8x1xf32> -> vector<2x8x1xf32>
    %397 = vector.broadcast %396 : vector<2x8x1xf32> to vector<2x8x8xf32>
    %398 = arith.mulf %393, %397 : vector<2x8x8xf32>
    "tpu.trace_start"() <{level = 10 : i32, message = "bqk,bkd->bqd"}> : () -> ()
    %cst_93 = arith.constant dense<0.000000e+00> : vector<2x8x8xf32>
    %399 = tpu.matmul %398, %382, %cst_93 {dimension_numbers = #tpu.dot_dimension_numbers<[2], [1], [1], [2], [0, 0, 0, 1, 1, 2], [0], [0]>} : vector<2x8x8xf32>, vector<2x8x8xf32>, vector<2x8x8xf32> -> vector<2x8x8xf32>
    "tpu.trace_stop"() : () -> ()
    %400 = vector.shape_cast %399 : vector<2x8x8xf32> to vector<16x8xf32>
    %401 = arith.truncf %400 : vector<16x8xf32> to vector<16x8xbf16>
    %cst_94 = arith.constant dense<0.000000e+00> : vector<16x32xf32>
    %402 = tpu.matmul %401, %367, %cst_94 {dimension_numbers = #tpu.dot_dimension_numbers<[1], [0], [0], [1], [0, 0, 1, 1], [], []>} : vector<16x8xbf16>, vector<8x32xbf16>, vector<16x32xf32> -> vector<16x32xf32>
    %403 = arith.addf %359, %402 : vector<16x32xf32>
    %404 = vector.broadcast %14 : vector<1x32xf32> to vector<16x32xf32>
    %405 = arith.addf %403, %404 : vector<16x32xf32>
    %406 = arith.addf %224, %405 : vector<16x32xf32>
    %cst_95 = arith.constant dense<0.000000e+00> : vector<16xf32>
    %407 = vector.multi_reduction <add>, %406, %cst_95 [1] : vector<16x32xf32> to vector<16xf32>
    %408 = vector.shape_cast %407 : vector<16xf32> to vector<16x1xf32>
    %cst_96 = arith.constant 3.200000e+01 : f32
    %409 = vector.broadcast %cst_96 : f32 to vector<16x1xf32>
    %410 = arith.divf %408, %409 : vector<16x1xf32>
    %411 = vector.broadcast %410 : vector<16x1xf32> to vector<16x32xf32>
    %412 = arith.subf %406, %411 : vector<16x32xf32>
    %413 = arith.mulf %412, %412 : vector<16x32xf32>
    %cst_97 = arith.constant dense<0.000000e+00> : vector<16xf32>
    %414 = vector.multi_reduction <add>, %413, %cst_97 [1] : vector<16x32xf32> to vector<16xf32>
    %415 = vector.shape_cast %414 : vector<16xf32> to vector<16x1xf32>
    %cst_98 = arith.constant 3.200000e+01 : f32
    %416 = vector.broadcast %cst_98 : f32 to vector<16x1xf32>
    %417 = arith.divf %415, %416 : vector<16x1xf32>
    %cst_99 = arith.constant 9.99999974E-6 : f32
    %418 = vector.broadcast %cst_99 : f32 to vector<16x1xf32>
    %419 = arith.addf %417, %418 : vector<16x1xf32>
    %420 = math.rsqrt %419 : vector<16x1xf32>
    %421 = vector.broadcast %420 : vector<16x1xf32> to vector<16x32xf32>
    %422 = arith.mulf %412, %421 : vector<16x32xf32>
    %423 = vector.broadcast %15 : vector<1x32xf32> to vector<16x32xf32>
    %424 = arith.mulf %422, %423 : vector<16x32xf32>
    %425 = vector.broadcast %16 : vector<1x32xf32> to vector<16x32xf32>
    %426 = arith.addf %424, %425 : vector<16x32xf32>
    %427 = arith.truncf %426 : vector<16x32xf32> to vector<16x32xbf16>
    %c0_100 = arith.constant 0 : index
    %c0_101 = arith.constant 0 : index
    %c0_102 = arith.constant 0 : index
    %428 = vector.load %arg12[%c0_100, %c0_101, %c0_102] : memref<1x32x2048xbf16, #tpu.memory_space<vmem>>, vector<1x32x2048xbf16>
    %429 = vector.shape_cast %428 : vector<1x32x2048xbf16> to vector<32x2048xbf16>
    %cst_103 = arith.constant dense<0.000000e+00> : vector<16x2048xf32>
    %430 = tpu.matmul %427, %429, %cst_103 {dimension_numbers = #tpu.dot_dimension_numbers<[1], [0], [0], [1], [0, 0, 1, 1], [], []>} : vector<16x32xbf16>, vector<32x2048xbf16>, vector<16x2048xf32> -> vector<16x2048xf32>
    %c0_104 = arith.constant 0 : index
    %c0_105 = arith.constant 0 : index
    %c0_106 = arith.constant 0 : index
    %431 = vector.load %arg15[%c0_104, %c0_105, %c0_106] : memref<1x1x2048xf32, #tpu.memory_space<vmem>>, vector<1x1x2048xf32>
    %432 = vector.shape_cast %431 : vector<1x1x2048xf32> to vector<1x2048xf32>
    %433 = vector.broadcast %432 : vector<1x2048xf32> to vector<16x2048xf32>
    %434 = arith.addf %430, %433 : vector<16x2048xf32>
    %cst_107 = arith.constant 0.000000e+00 : f32
    %435 = vector.broadcast %cst_107 : f32 to vector<16x2048xf32>
    %436 = arith.maximumf %434, %435 : vector<16x2048xf32>
    %437 = arith.truncf %436 : vector<16x2048xf32> to vector<16x2048xbf16>
    %c0_108 = arith.constant 0 : index
    %c0_109 = arith.constant 0 : index
    %c0_110 = arith.constant 0 : index
    %438 = vector.load %arg13[%c0_108, %c0_109, %c0_110] : memref<1x2048x32xbf16, #tpu.memory_space<vmem>>, vector<1x2048x32xbf16>
    %439 = vector.shape_cast %438 : vector<1x2048x32xbf16> to vector<2048x32xbf16>
    %cst_111 = arith.constant dense<0.000000e+00> : vector<16x32xf32>
    %440 = tpu.matmul %437, %439, %cst_111 {dimension_numbers = #tpu.dot_dimension_numbers<[1], [0], [0], [1], [0, 0, 1, 1], [], []>} : vector<16x2048xbf16>, vector<2048x32xbf16>, vector<16x32xf32> -> vector<16x32xf32>
    %441 = vector.broadcast %17 : vector<1x32xf32> to vector<16x32xf32>
    %442 = arith.addf %440, %441 : vector<16x32xf32>
    %443 = arith.addf %426, %442 : vector<16x32xf32>
    %cst_112 = arith.constant dense<0.000000e+00> : vector<16xf32>
    %444 = vector.multi_reduction <add>, %443, %cst_112 [1] : vector<16x32xf32> to vector<16xf32>
    %445 = vector.shape_cast %444 : vector<16xf32> to vector<16x1xf32>
    %cst_113 = arith.constant 3.200000e+01 : f32
    %446 = vector.broadcast %cst_113 : f32 to vector<16x1xf32>
    %447 = arith.divf %445, %446 : vector<16x1xf32>
    %448 = vector.broadcast %447 : vector<16x1xf32> to vector<16x32xf32>
    %449 = arith.subf %443, %448 : vector<16x32xf32>
    %450 = arith.mulf %449, %449 : vector<16x32xf32>
    %cst_114 = arith.constant dense<0.000000e+00> : vector<16xf32>
    %451 = vector.multi_reduction <add>, %450, %cst_114 [1] : vector<16x32xf32> to vector<16xf32>
    %452 = vector.shape_cast %451 : vector<16xf32> to vector<16x1xf32>
    %cst_115 = arith.constant 3.200000e+01 : f32
    %453 = vector.broadcast %cst_115 : f32 to vector<16x1xf32>
    %454 = arith.divf %452, %453 : vector<16x1xf32>
    %cst_116 = arith.constant 9.99999974E-6 : f32
    %455 = vector.broadcast %cst_116 : f32 to vector<16x1xf32>
    %456 = arith.addf %454, %455 : vector<16x1xf32>
    %457 = math.rsqrt %456 : vector<16x1xf32>
    %458 = vector.broadcast %457 : vector<16x1xf32> to vector<16x32xf32>
    %459 = arith.mulf %449, %458 : vector<16x32xf32>
    %460 = vector.broadcast %18 : vector<1x32xf32> to vector<16x32xf32>
    %461 = arith.mulf %459, %460 : vector<16x32xf32>
    %462 = vector.broadcast %19 : vector<1x32xf32> to vector<16x32xf32>
    %463 = arith.addf %461, %462 : vector<16x32xf32>
    %c0_117 = arith.constant 0 : index
    %c0_118 = arith.constant 0 : index
    %464 = vector.load %arg16[%c0_117, %c0_118] : memref<16x32xf32, #tpu.memory_space<vmem>>, vector<16x32xf32>
    tpu.vector_store %arg16[%c0_117, %c0_118], %463 {strides = array<i32>} : memref<16x32xf32, #tpu.memory_space<vmem>>, vector<16x32xf32>,
    %c5_i32 = arith.constant 5 : i32
    %465 = arith.cmpi eq, %arg0, %c5_i32 : i32
    %466 = arith.extui %465 : i1 to i32
    %c0_i32_119 = arith.constant 0 : i32
    %467 = arith.cmpi ne, %466, %c0_i32_119 : i32
    scf.if %467 {
      %c0_120 = arith.constant 0 : index
      %c0_121 = arith.constant 0 : index
      %468 = vector.load %arg16[%c0_120, %c0_121] : memref<16x32xf32, #tpu.memory_space<vmem>>, vector<16x32xf32>
      %c0_122 = arith.constant 0 : index
      %c0_123 = arith.constant 0 : index
      %469 = vector.load %arg8[%c0_122, %c0_123] : memref<1x32xf32, #tpu.memory_space<vmem>>, vector<1x32xf32>
      %c0_124 = arith.constant 0 : index
      %c0_125 = arith.constant 0 : index
      %470 = vector.load %arg9[%c0_124, %c0_125] : memref<1x32xf32, #tpu.memory_space<vmem>>, vector<1x32xf32>
      %cst_126 = arith.constant dense<0.000000e+00> : vector<16xf32>
      %471 = vector.multi_reduction <add>, %468, %cst_126 [1] : vector<16x32xf32> to vector<16xf32>
      %472 = vector.shape_cast %471 : vector<16xf32> to vector<16x1xf32>
      %cst_127 = arith.constant 3.200000e+01 : f32
      %473 = vector.broadcast %cst_127 : f32 to vector<16x1xf32>
      %474 = arith.divf %472, %473 : vector<16x1xf32>
      %475 = vector.broadcast %474 : vector<16x1xf32> to vector<16x32xf32>
      %476 = arith.subf %468, %475 : vector<16x32xf32>
      %477 = arith.mulf %476, %476 : vector<16x32xf32>
      %cst_128 = arith.constant dense<0.000000e+00> : vector<16xf32>
      %478 = vector.multi_reduction <add>, %477, %cst_128 [1] : vector<16x32xf32> to vector<16xf32>
      %479 = vector.shape_cast %478 : vector<16xf32> to vector<16x1xf32>
      %cst_129 = arith.constant 3.200000e+01 : f32
      %480 = vector.broadcast %cst_129 : f32 to vector<16x1xf32>
      %481 = arith.divf %479, %480 : vector<16x1xf32>
      %cst_130 = arith.constant 9.99999974E-6 : f32
      %482 = vector.broadcast %cst_130 : f32 to vector<16x1xf32>
      %483 = arith.addf %481, %482 : vector<16x1xf32>
      %484 = math.rsqrt %483 : vector<16x1xf32>
      %485 = vector.broadcast %484 : vector<16x1xf32> to vector<16x32xf32>
      %486 = arith.mulf %476, %485 : vector<16x32xf32>
      %487 = vector.broadcast %469 : vector<1x32xf32> to vector<16x32xf32>
      %488 = arith.mulf %486, %487 : vector<16x32xf32>
      %489 = vector.broadcast %470 : vector<1x32xf32> to vector<16x32xf32>
      %490 = arith.addf %488, %489 : vector<16x32xf32>
      %c0_131 = arith.constant 0 : index
      %c0_132 = arith.constant 0 : index
      %491 = vector.load %arg16[%c0_131, %c0_132] : memref<16x32xf32, #tpu.memory_space<vmem>>, vector<16x32xf32>
      tpu.vector_store %arg16[%c0_131, %c0_132], %490 {strides = array<i32>} : memref<16x32xf32, #tpu.memory_space<vmem>>, vector<16x32xf32>,
    } else {
    }
    return
  }
  func.func @transform_0(%arg0: i32) -> (i32, i32) {
    %c0_i32 = arith.constant 0 : i32
    %c0_i32_0 = arith.constant 0 : i32
    %c0_i32_1 = arith.constant 0 : i32
    return %c0_i32, %c0_i32_0 : i32, i32
  }
  func.func @transform_1(%arg0: i32) -> (i32, i32) {
    %c0_i32 = arith.constant 0 : i32
    %c0_i32_0 = arith.constant 0 : i32
    %c0_i32_1 = arith.constant 0 : i32
    return %c0_i32, %c0_i32_0 : i32, i32
  }
  func.func @transform_2(%arg0: i32) -> (i32, i32) {
    %c0_i32 = arith.constant 0 : i32
    %c0_i32_0 = arith.constant 0 : i32
    %c0_i32_1 = arith.constant 0 : i32
    return %c0_i32, %c0_i32_0 : i32, i32
  }
  func.func @transform_3(%arg0: i32) -> (i32, i32) {
    %c0_i32 = arith.constant 0 : i32
    %c0_i32_0 = arith.constant 0 : i32
    %c0_i32_1 = arith.constant 0 : i32
    return %c0_i32, %c0_i32_0 : i32, i32
  }
  func.func @transform_4(%arg0: i32) -> (i32, i32) {
    %c0_i32 = arith.constant 0 : i32
    %c0_i32_0 = arith.constant 0 : i32
    %c0_i32_1 = arith.constant 0 : i32
    return %c0_i32, %c0_i32_0 : i32, i32
  }
  func.func @transform_5(%arg0: i32) -> (i32, i32) {
    %c0_i32 = arith.constant 0 : i32
    %c0_i32_0 = arith.constant 0 : i32
    %c0_i32_1 = arith.constant 0 : i32
    return %c0_i32, %c0_i32_0 : i32, i32
  }
  func.func @transform_6(%arg0: i32) -> (i32, i32) {
    %c0_i32 = arith.constant 0 : i32
    %c0_i32_0 = arith.constant 0 : i32
    %c0_i32_1 = arith.constant 0 : i32
    return %c0_i32, %c0_i32_0 : i32, i32
  }
  func.func @transform_7(%arg0: i32) -> (i32, i32) {
    %c0_i32 = arith.constant 0 : i32
    %c0_i32_0 = arith.constant 0 : i32
    %c0_i32_1 = arith.constant 0 : i32
    return %c0_i32, %c0_i32_0 : i32, i32
  }
  func.func @transform_8(%arg0: i32) -> (i32, i32) {
    %c0_i32 = arith.constant 0 : i32
    %c0_i32_0 = arith.constant 0 : i32
    %c0_i32_1 = arith.constant 0 : i32
    return %c0_i32, %c0_i32_0 : i32, i32
  }
  func.func @transform_9(%arg0: i32) -> (i32, i32, i32, i32) {
    %c0_i32 = arith.constant 0 : i32
    %c0_i32_0 = arith.constant 0 : i32
    %c0_i32_1 = arith.constant 0 : i32
    %c0_i32_2 = arith.constant 0 : i32
    return %arg0, %c0_i32, %c0_i32_0, %c0_i32_1 : i32, i32, i32, i32
  }
  func.func @transform_10(%arg0: i32) -> (i32, i32, i32, i32) {
    %c0_i32 = arith.constant 0 : i32
    %c0_i32_0 = arith.constant 0 : i32
    %c0_i32_1 = arith.constant 0 : i32
    %c0_i32_2 = arith.constant 0 : i32
    return %arg0, %c0_i32, %c0_i32_0, %c0_i32_1 : i32, i32, i32, i32
  }
  func.func @transform_11(%arg0: i32) -> (i32, i32, i32) {
    %c0_i32 = arith.constant 0 : i32
    %c0_i32_0 = arith.constant 0 : i32
    %c0_i32_1 = arith.constant 0 : i32
    return %arg0, %c0_i32, %c0_i32_0 : i32, i32, i32
  }
  func.func @transform_12(%arg0: i32) -> (i32, i32, i32) {
    %c0_i32 = arith.constant 0 : i32
    %c0_i32_0 = arith.constant 0 : i32
    %c0_i32_1 = arith.constant 0 : i32
    return %arg0, %c0_i32, %c0_i32_0 : i32, i32, i32
  }
  func.func @transform_13(%arg0: i32) -> (i32, i32, i32) {
    %c0_i32 = arith.constant 0 : i32
    %c0_i32_0 = arith.constant 0 : i32
    %c0_i32_1 = arith.constant 0 : i32
    return %arg0, %c0_i32, %c0_i32_0 : i32, i32, i32
  }
  func.func @transform_14(%arg0: i32) -> (i32, i32, i32) {
    %c0_i32 = arith.constant 0 : i32
    %c0_i32_0 = arith.constant 0 : i32
    %c0_i32_1 = arith.constant 0 : i32
    return %arg0, %c0_i32, %c0_i32_0 : i32, i32, i32
  }
  func.func @transform_15(%arg0: i32) -> (i32, i32) {
    %c0_i32 = arith.constant 0 : i32
    %c0_i32_0 = arith.constant 0 : i32
    %c0_i32_1 = arith.constant 0 : i32
    return %c0_i32, %c0_i32_0 : i32, i32
  }
}

</mosaic_0001>

<bundles_post_ra>
// kernel: model_forward.2
= control target key start
LH: loop header
LB: loop body
LE: loop exit
PB: predicated region body
PF: predicated region fallthrough
CT: control target
= control target key end

     0   :  { %s5847_s21 = smov 0   ;;  %s6528_s0 = inlined_call_operand.vmem [shape: f32[16,3], index: 0, kind: input, shape index: {}]   ;;  %s6529_s1 = inlined_call_operand.vmem [shape: f32[3,32], index: 1, kind: input, shape index: {}]   ;;  %s6530_s2 = inlined_call_operand.vmem [shape: f32[1,32], index: 2, kind: input, shape index: {}]   ;;  %s6531_s3 = inlined_call_operand.vmem [shape: f32[16,32], index: 3, kind: input, shape index: {}]   ;;  %s6532_s4 = inlined_call_operand.vmem [shape: f32[8,8], index: 4, kind: input, shape index: {}]   ;;  %s6533_s5 = inlined_call_operand.vmem [shape: f32[1,32], index: 5, kind: input, shape index: {}]   ;;  %s6534_s6 = inlined_call_operand.vmem [shape: f32[1,32], index: 6, kind: input, shape index: {}]   ;;  %s6535_s7 = inlined_call_operand.vmem [shape: bf16[6,16,8,32], index: 7, kind: input, shape index: {}]   ;;  %s6536_s8 = inlined_call_operand.vmem [shape: bf16[6,32,2048], index: 8, kind: input, shape index: {}]   ;;  %s6537_s9 = inlined_call_operand.vmem [shape: bf16[6,2048,32], index: 9, kind: input, shape index: {}]   ;;  %s6538_s10 = inlined_call_operand.vmem [shape: f32[6,9,32], index: 10, kind: input, shape index: {}]   ;;  %s6539_s11 = inlined_call_operand.vmem [shape: f32[6,1,2048], index: 11, kind: input, shape index: {}]   ;;  %s6540_s12 = inlined_call_operand.vmem [shape: f32[16,32], index: 12, kind: output, shape index: {}]  }
   0x1 LB: > { %6542 = sst [smem:[#allocation2_spill]] %s5774_s21  ;;  %s5853_s22 = sadd.s32 4294967295, %s5774_s21   ;;  %s5774_s21 = sphi %s5847_s21, %s22_s21  }
   0x2   : > { %p4922_p0 = scmp.ge.s32.totalorder %s5774_s21, 1  ;;  %p396_p1 = scmp.lt.s32.totalorder %s5774_s21, 7 }
   0x4   : > { %p397_p2 = pnand %p4922_p0, %p396_p1 }
   0x5   : > { %p452_p3 = scmp.lt.s32.totalorder (!%p397_p2), %s5853_s22, 5  ;;  %p4932_p4 = scmp.ne.s32.totalorder (!%p397_p2), %s5853_s22, 0 }
   0x6   : > { %400 = sbr.rel (%p397_p2) target bundleno = 5627 (0x15fb), region = 68 }
   0xd   : > { %s453_s23 = scalar_select %p452_p3, %s5853_s22, 5 }
   0xe   : > { %480 = sbr.rel (%p4932_p4) target bundleno = 235 (0xeb), region = 72  ;;  %v483_v0 = vld [vmem:[%s6529_s1] sm:$0x7] (!%p4932_p4)  ;;  %vm498_vm0 = vcmask (!%p4932_p4), 1042432   ;;  %vm491_vm1 = vcmask (!%p4932_p4), 23552   ;;  %v482_v2 = vld [vmem:[%s6528_s0 + $0x8] sm:$0xff] (!%p4932_p4) }
   0xf   : > { %s5151_s24 = sshll.u32 %s453_s23, 6  ;;  %s5152_s25 = sshll.u32 %s453_s23, 8  ;;  %v481_v1 = vld [vmem:[%s6528_s0] sm:$0xff] (!%p4932_p4)  ;;  %5398 = vmatprep.subr.msk.mxu0 (!%p4932_p4), %vm498_vm0, %v483_v0  ;;  %v578_v5 = vld [vmem:[%s6531_s3 + $0x8] sm:$0xff] (!%p4932_p4)  ;;  %vm581_vm2 = vcmask (!%p4932_p4), 261120  }
  0x10   : > { %s5862_s28 = scalar_lea.vmem %s6535_s7, %s5151_s24  ;;  %s5867_s13 = scalar_lea.vmem %s6536_s8, %s5152_s25  ;;  %5400 = vmatprep.mubr.msk.f32.mxu0 (!%p4932_p4), %vm491_vm1, %v481_v1  ;;  %5399 = vmatpush3.msk.msra.mxu0 (!%p4932_p4), %vm498_vm0, %v483_v0  ;;  %v4933_v3 = vld [vmem:[%s6530_s2] ss:$0 sm:$0xff] (!%p4932_p4) }
  0x11   : > { %s5153_s14 = sshll.u32 %s453_s23, 10  ;;  %s5154_s15 = sshll.u32 %s453_s23, 4  ;;  %5401 = vmatmul.mubr.msk.f32.vlgmr.msra.gmra.mrb[0].mxu0 (!%p4932_p4), %vm491_vm1, %v482_v2  ;;  %v577_v8 = vld [vmem:[%s6531_s3] sm:$0xff] (!%p4932_p4) }
  0x12   : > { %s5872_s18 = scalar_lea.vmem %s6537_s9, %s5153_s14  ;;  %s5877_s21 = scalar_lea.vmem %s6538_s10, %s5154_s15 }
  0x13   : > { %s5882_s27 = scalar_lea.vmem %s6539_s11, %s5154_s15 }
  0xe4   : > { %v5402_v4 = vpop.f32.mrb[0].mxu0 }
  0xe5   : > { %v574_v6 = vadd.f32 %v5402_v4, %v4933_v3  ;;  %v568_v7 = vpop.f32.mrb[1].mxu0 }
  0xe6   : > { %v569_v9 = vadd.f32 %v4933_v3, %v568_v7 }
  0xe7   : > { %v580_v10 = vadd.f32 %v578_v5, %v574_v6 }
  0xe8   : > { %v579_v11 = vadd.f32 %v577_v8, %v569_v9 }
  0xe9   : > { %583 = vst.msk [vmem:[%s6540_s12 + $0x8] sm:$0xff] %vm581_vm2, %v580_v10 }
  0xea   : > { %582 = vst.msk [vmem:[%s6540_s12] sm:$0xff] %vm581_vm2, %v579_v11 }
  0xeb PF: > { %v586_v12 = vld [vmem:[%s5862_s28] sm:$0xf]  ;;  %vm610_vm3 = vcmask 261120   ;;  %v590_v13 = vld [vmem:[%s5862_s28 + $0x10] sm:$0xf]  ;;  %v5776_v14 = vmov 0.0   ;;  %v606_v20 = vlaneseq }
  0xec   : > { %5403 = vmatprep.subr.bf16.mxu0 %v5776_v14  ;;  %5409 = vmatprep.subr.bf16.mxu1 %v5776_v14  ;;  %v615_v15 = vsel %vm610_vm3, %v586_v12, 0  ;;  %v663_v16 = vsel %vm610_vm3, %v590_v13, 0  ;;  %vm5777_vm4 = vmmov 0   ;;  %v5943_v23 = vld [vmem:[%s5877_s21] sm:$0xff]  ;;  %vm754_vm5 = vcmask 64512   ;;  %s5778_s26 = smov 120  }
  0xed   : > { %5404 = vmatpush3.bf16.xpose.msra.mxu0 %v615_v15  ;;  %5410 = vmatpush3.bf16.xpose.msra.mxu1 %v663_v16  ;;  %v5937_v21 = vshrl.u32 %v606_v20, 7  ;;  %v594_v39 = vld [vmem:[%s5862_s28 + $0x20] sm:$0xf]  ;;  %v591_v8 = vld [vmem:[%s5862_s28 + $0x14] sm:$0xf]  ;;  %vm1552_vm6 = vcmask 1043456  }
  0xee   : > { %5405 = vmatprep.mubr.msk.bf16.mxu0 %vm5777_vm4, %v5776_v14  ;;  %5411 = vmatprep.mubr.msk.bf16.mxu1 %vm5777_vm4, %v5776_v14  ;;  %v711_v40 = vsel %vm610_vm3, %v594_v39, 0  ;;  %v5980_v47 = vld [vmem:[%s6532_s4] sm:$0xff]  ;;  %v1133_v11 = vsel %vm610_vm3, %v591_v8, 0  ;;  %s5779_s24 = smov 112   ;;  %s5780_s25 = smov 104  }
  0xef   : > { %5421 = vmatprep.subr.mxu1 %v5776_v14  ;;  %5415 = vmatprep.subr.bf16.mxu0 %v5776_v14  ;;  %v5940_v22 = vsub.s32 1, %v5937_v21  ;;  %v5946_v24 = vsub.s32 0, %v5937_v21  ;;  %v5987_v52 = vsub.s32 2, %v5937_v21  ;;  %v587_v12 = vld [vmem:[%s5862_s28 + $0x4] sm:$0xf]  ;;  %p5146_p5 = scmp.ne.s32.totalorder %s5853_s22, 5 }
  0xf0   : > { %v603_v18 = vld [vmem:[%s6540_s12 + $0x8] sm:$0xff]  ;;  %v1085_v16 = vsel %vm610_vm3, %v587_v12, 0 }
  0xf1   : > { %v602_v17 = vld [vmem:[%s6540_s12] sm:$0xff]  ;;  %v5950_v25 = vrot.slane %v5943_v23, %v5940_v22  ;;  %v5954_v26 = vrot.slane %v5943_v23, %v5946_v24  ;;  %v5991_v53 = vrot.slane %v5943_v23, %v5987_v52 }
  0xf2   : > { %v5927_v19 = vpack.c.bf16 %v603_v18, %v602_v17 }
  0xf4   : > { %5406 = vmatmul.mubr.msk.bf16.vlgmr.msra.gmra.mrb[0].mxu0 %vm610_vm3, %v5927_v19  ;;  %5412 = vmatmul.mubr.msk.bf16.vlgmr.msra.gmra.mrb[0].mxu1 %vm610_vm3, %v5927_v19 }
  0xf5   : > { %5423 = vmatprep.mubr.msk.f32.mxu1 %vm5777_vm4, %v5776_v14  ;;  %5417 = vmatprep.mubr.msk.bf16.mxu0 %vm5777_vm4, %v5776_v14 }
  0xf6   : > { %5416 = vmatpush3.bf16.xpose.msra.mxu0 %v711_v40 }
  0xf7   : > { %5431 = vmatprep.subr.mxu0 %v5776_v14 }
  0xfd   : > { %5418 = vmatmul.mubr.msk.bf16.vlgmr.msra.gmra.mrb[4].mxu0 %vm610_vm3, %v5927_v19 }
  0xfe   : > { %5433 = vmatprep.mubr.msk.f32.mxu0 %vm5777_vm4, %v5776_v14 }
 0x1c7   : > { %v651_v27 = vpop.f32.mrb[0].mxu0  ;;  %v699_v28 = vpop.f32.mrb[0].mxu1 }
 0x1c8   : > { %v700_v29 = vadd.f32 %v699_v28, %v5950_v25  ;;  %v5407_v30 = vpop.f32.mrb[1].mxu0  ;;  %v5413_v31 = vpop.f32.mrb[1].mxu1  ;;  %v652_v32 = vadd.f32 %v651_v27, %v5954_v26 }
 0x1c9   : > { %v654_v33 = vpop.f32.mrb[2].mxu0  ;;  %v702_v34 = vpop.f32.mrb[2].mxu1 }
 0x1ca   : > { %v5408_v35 = vpop.f32.mrb[3].mxu0  ;;  %v5414_v36 = vpop.f32.mrb[3].mxu1  ;;  %5422 = vmatpush3.xpose.msk.msra.mxu1 %vm754_vm5, %v700_v29  ;;  %v703_v37 = vadd.f32 %v702_v34, %v5950_v25  ;;  %v655_v38 = vadd.f32 %v654_v33, %v5954_v26 }
 0x1cb   : > { %5426 = vmatprep.subr.mxu1 %v5776_v14 }
 0x1cd   : > { %5424 = vmatmul.mubr.msk.f32.vlgmr.msra.gmra.mrb[4].mxu1 %vm754_vm5, %v652_v32 }
 0x1ce   : > { %5427 = vmatpush3.xpose.msk.msra.mxu1 %vm754_vm5, %v703_v37  ;;  %5428 = vmatprep.mubr.msk.f32.mxu1 %vm5777_vm4, %v5776_v14 }
 0x1cf   : > { %5436 = vmatprep.subr.mxu1 %v5776_v14 }
 0x1d0   : > { %v747_v54 = vpop.f32.mrb[4].mxu0 }
 0x1d1   : > { %5429 = vmatmul.mubr.msk.f32.vlgmr.msra.gmra.mrb[6].mxu1 %vm754_vm5, %v655_v38  ;;  %v748_v55 = vadd.f32 %v747_v54, %v5991_v53  ;;  %v5419_v56 = vpop.f32.mrb[5].mxu0 }
 0x1d2   : > { %5438 = vmatprep.mubr.msk.f32.mxu1 %vm5777_vm4, %v5776_v14  ;;  %v750_v3 = vpop.f32.mrb[6].mxu0 }
 0x1d3   : > { %5432 = vmatpush3.msra.mxu0 %v748_v55  ;;  %v5420_v4 = vpop.f32.mrb[7].mxu0  ;;  %v751_v5 = vadd.f32 %v750_v3, %v5991_v53 }
 0x1d4   : > { %5441 = vmatprep.subr.bf16.mxu0 %v5776_v14 }
 0x1d5   : > { %5437 = vmatpush3.msra.mxu1 %v751_v5 }
 0x1d6   : > { %5447 = vmatprep.subr.bf16.mxu1 %v5776_v14 }
 0x2a0   : > { %v827_v41 = vpop.f32.mrb[4].mxu1 }
 0x2a1   : > { %v5425_v42 = vpop.f32.mrb[5].mxu1  ;;  %v907_v44 = vmul.f32 0.35355338, %v827_v41 }
 0x2a3   : > { %v909_v50 = vadd.f32 %v907_v44, %v5980_v47 }
 0x2a4   : > { %v903_v43 = vpop.f32.mrb[6].mxu1 }
 0x2a5   : > { %v908_v45 = vmul.f32 0.35355338, %v903_v43  ;;  %v5430_v46 = vpop.f32.mrb[7].mxu1  ;;  %v911_v51 = vsel %vm754_vm5, %v909_v50, -inf  ;;  %v595_v43 = vld [vmem:[%s5862_s28 + $0x24] sm:$0xf] }
 0x2a6   : > { %v1181_v44 = vsel %vm610_vm3, %v595_v43, 0 }
 0x2a7   : > { %v910_v48 = vadd.f32 %v908_v45, %v5980_v47 }
 0x2a9   : > { %v914_v49 = vsel %vm754_vm5, %v910_v48, -inf }
 0x2aa   : > { %915 = vmax.xlane.f32.xlu0 %v914_v49 }
 0x2ae   : > { %912 = vmax.xlane.f32.xlu0 %v911_v51 }
 0x2c4   : > { %1129 = vrot.lane.b32.xlu0 %v5950_v25, %s5778_s26 }
 0x337   : > { %v916_v57 = vpop.xlane.xlu0 %915 }
 0x338   : > { %v918_v58 = vsub.f32 %v910_v48, %v916_v57 }
 0x33a   : > { %v921_v59 = vmul.f32 1.442695, %v918_v58 }
 0x33b   : > { %v913_v60 = vpop.xlane.xlu0 %912 }
 0x33c   : > { %5721 = vpow2.f32 %v921_v59  ;;  %v917_v61 = vsub.f32 %v909_v50, %v913_v60 }
 0x33e   : > { %v919_v62 = vmul.f32 1.442695, %v917_v61 }
 0x33f   : > { %v1130_v29 = vpop.permute.xlu0 %1129 }
 0x340   : > { %5723 = vpow2.f32 %v919_v62 }
 0x346   : > { %v5722_v63 = vpop.eup %5721 }
 0x347   : > { %v926_v0 = vsel %vm754_vm5, %v5722_v63, 0.0 }
 0x348   : > { %927 = vadd.xlane.f32.xlu1 %v926_v0 }
 0x34a   : > { %v5724_v1 = vpop.eup %5723 }
 0x34b   : > { %v923_v2 = vsel %vm754_vm5, %v5724_v1, 0.0 }
 0x34c   : > { %924 = vadd.xlane.f32.xlu1 %v923_v2 }
 0x35d   : > { %1081 = vrot.lane.b32.xlu1 %v5954_v26, %s5778_s26 }
 0x3d5   : > { %v928_v6 = vpop.xlane.xlu1 %927 }
 0x3d6   : > { %5725 = vrcp.f32 %v928_v6 }
 0x3d9   : > { %v925_v7 = vpop.xlane.xlu1 %924 }
 0x3da   : > { %5727 = vrcp.f32 %v925_v7 }
 0x3dd   : > { %v1082_v34 = vpop.permute.xlu1 %1081 }
 0x3e0   : > { %v5726_v9 = vpop.eup %5725 }
 0x3e1   : > { %v932_v10 = vmul.f32 %v5726_v9, %v5722_v63 }
 0x3e3   : > { %5439 = vmatmul.mubr.msk.f32.vlgmr.msra.gmra.mrb[8].mxu1 %vm754_vm5, %v932_v10 }
 0x3e4   : > { %v5728_v13 = vpop.eup %5727  ;;  %5448 = vmatpush3.bf16.xpose.msra.mxu1 %v1133_v11  ;;  %5449 = vmatprep.mubr.msk.bf16.mxu1 %vm5777_vm4, %v5776_v14 }
 0x3e5   : > { %v931_v15 = vmul.f32 %v5728_v13, %v5724_v1  ;;  %5459 = vmatprep.subr.mxu1 %v5776_v14  ;;  %v599_v13 = vld [vmem:[%s5862_s28 + $0x34] sm:$0xf] }
 0x3e7   : > { %5434 = vmatmul.mubr.msk.f32.vlgmr.msra.gmra.mrb[8].mxu0 %vm754_vm5, %v931_v15 }
 0x3e8   : > { %5442 = vmatpush3.bf16.xpose.msra.mxu0 %v1085_v16  ;;  %5443 = vmatprep.mubr.msk.bf16.mxu0 %vm5777_vm4, %v5776_v14 }
 0x3e9   : > { %5453 = vmatprep.subr.bf16.mxu0 %v5776_v14 }
 0x3eb   : > { %5450 = vmatmul.mubr.msk.bf16.vlgmr.msra.gmra.mrb[12].mxu1 %vm610_vm3, %v5927_v19 }
 0x3ec   : > { %5461 = vmatprep.mubr.msk.f32.mxu1 %vm5777_vm4, %v5776_v14 }
 0x3ef   : > { %5444 = vmatmul.mubr.msk.bf16.vlgmr.msra.gmra.mrb[12].mxu0 %vm610_vm3, %v5927_v19 }
 0x3f0   : > { %5455 = vmatprep.mubr.msk.bf16.mxu0 %vm5777_vm4, %v5776_v14  ;;  %5454 = vmatpush3.bf16.xpose.msra.mxu0 %v1181_v44 }
 0x3f1   : > { %5469 = vmatprep.subr.mxu0 %v5776_v14 }
 0x3f7   : > { %5456 = vmatmul.mubr.msk.bf16.vlgmr.msra.gmra.mrb[16].mxu0 %vm610_vm3, %v5927_v19 }
 0x3f8   : > { %5471 = vmatprep.mubr.msk.f32.mxu0 %vm5777_vm4, %v5776_v14 }
 0x4b6   : > { %v6023_v17 = vpop.f32.mrb[8].mxu1 }
 0x4b7   : > { %v5440_v18 = vpop.f32.mrb[9].mxu1 }
 0x4b8   : > { %v1554_v18 = vsel %vm1552_vm6, %v599_v13, 0 }
 0x4ba   : > { %v6025_v20 = vpop.f32.mrb[8].mxu0 }
 0x4bb   : > { %v1079_v27 = vpack.c.bf16 %v6023_v17, %v6025_v20  ;;  %v5435_v28 = vpop.f32.mrb[9].mxu0 }
 0x4bc   : > { %v598_v28 = vld [vmem:[%s5862_s28 + $0x30] sm:$0xf] }
 0x4be   : > { %v1169_v30 = vpop.f32.mrb[12].mxu1 }
 0x4bf   : > { %v1170_v31 = vadd.f32 %v1169_v30, %v1130_v29  ;;  %v5451_v32 = vpop.f32.mrb[13].mxu1 }
 0x4c0   : > { %v1172_v33 = vpop.f32.mrb[14].mxu1  ;;  %v592_v32 = vld [vmem:[%s5862_s28 + $0x18] sm:$0xf] }
 0x4c1   : > { %v5452_v35 = vpop.f32.mrb[15].mxu1  ;;  %5460 = vmatpush3.xpose.msk.msra.mxu1 %vm754_vm5, %v1170_v31  ;;  %v1173_v39 = vadd.f32 %v1172_v33, %v1130_v29  ;;  %v1601_v31 = vsel %vm1552_vm6, %v598_v28, 0  ;;  %v1695_v33 = vsel %vm610_vm3, %v592_v32, 0 }
 0x4c2   : > { %v1121_v36 = vpop.f32.mrb[12].mxu0  ;;  %5464 = vmatprep.subr.mxu1 %v5776_v14 }
 0x4c3   : > { %v1122_v37 = vadd.f32 %v1121_v36, %v1082_v34  ;;  %v5445_v38 = vpop.f32.mrb[13].mxu0 }
 0x4c4   : > { %v1124_v40 = vpop.f32.mrb[14].mxu0 }
 0x4c5   : > { %v5446_v41 = vpop.f32.mrb[15].mxu0  ;;  %5462 = vmatmul.mubr.msk.f32.vlgmr.msra.gmra.mrb[10].mxu1 %vm754_vm5, %v1122_v37  ;;  %v1125_v42 = vadd.f32 %v1124_v40, %v1082_v34 }
 0x4c6   : > { %5465 = vmatpush3.xpose.msk.msra.mxu1 %vm754_vm5, %v1173_v39  ;;  %5466 = vmatprep.mubr.msk.f32.mxu1 %vm5777_vm4, %v5776_v14 }
 0x4c7   : > { %5474 = vmatprep.subr.mxu1 %v5776_v14 }
 0x4c9   : > { %5467 = vmatmul.mubr.msk.f32.vlgmr.msra.gmra.mrb[16].mxu1 %vm754_vm5, %v1125_v42 }
 0x4ca   : > { %5476 = vmatprep.mubr.msk.f32.mxu1 %vm5777_vm4, %v5776_v14  ;;  %v1217_v4 = vpop.f32.mrb[16].mxu0 }
 0x4cb   : > { %v5457_v5 = vpop.f32.mrb[17].mxu0 }
 0x4cc   : > { %v1220_v6 = vpop.f32.mrb[18].mxu0 }
 0x4cd   : > { %v5458_v7 = vpop.f32.mrb[19].mxu0 }
 0x598   : > { %v1296_v45 = vpop.f32.mrb[10].mxu1 }
 0x599   : > { %v1376_v46 = vmul.f32 0.35355338, %v1296_v45  ;;  %v5463_v48 = vpop.f32.mrb[11].mxu1 }
 0x59b   : > { %v1378_v49 = vadd.f32 %v1376_v46, %v5980_v47 }
 0x59c   : > { %v1372_v50 = vpop.f32.mrb[16].mxu1 }
 0x59d   : > { %v1377_v51 = vmul.f32 0.35355338, %v1372_v50  ;;  %v5468_v54 = vpop.f32.mrb[17].mxu1  ;;  %v1380_v55 = vsel %vm754_vm5, %v1378_v49, -inf }
 0x59e   : > { %1381 = vmax.xlane.f32.xlu1 %v1380_v55 }
 0x59f   : > { %v1379_v56 = vadd.f32 %v1377_v51, %v5980_v47 }
 0x5a1   : > { %v1383_v57 = vsel %vm754_vm5, %v1379_v56, -inf }
 0x5a2   : > { %1384 = vmax.xlane.f32.xlu0 %v1383_v57 }
 0x62b   : > { %v1382_v58 = vpop.xlane.xlu1 %1381 }
 0x62c   : > { %v1386_v59 = vsub.f32 %v1378_v49, %v1382_v58 }
 0x62e   : > { %v1388_v60 = vmul.f32 1.442695, %v1386_v59 }
 0x62f   : > { %v1385_v61 = vpop.xlane.xlu0 %1384 }
 0x630   : > { %5729 = vpow2.f32 %v1388_v60  ;;  %v1387_v62 = vsub.f32 %v1379_v56, %v1385_v61 }
 0x632   : > { %v1390_v63 = vmul.f32 1.442695, %v1387_v62 }
 0x634   : > { %5731 = vpow2.f32 %v1390_v63 }
 0x63a   : > { %v5730_v0 = vpop.eup %5729 }
 0x63b   : > { %v1392_v1 = vsel %vm754_vm5, %v5730_v0, 0.0 }
 0x63c   : > { %1393 = vadd.xlane.f32.xlu0 %v1392_v1  ;;  %v596_v1 = vld [vmem:[%s5862_s28 + $0x28] sm:$0xf] }
 0x63e   : > { %v5732_v2 = vpop.eup %5731 }
 0x63f   : > { %v1395_v3 = vsel %vm754_vm5, %v5732_v2, 0.0 }
 0x640   : > { %1396 = vadd.xlane.f32.xlu1 %v1395_v3 }
 0x651   : > { %1691 = vrot.lane.b32.xlu1 %v5950_v25, %s5779_s24 }
 0x652   : > { %1177 = vrot.lane.b32.xlu0 %v5991_v53, %s5778_s26 }
 0x655   : > { %1644 = vrot.lane.b32.xlu1 %v5954_v26, %s5779_s24 }
 0x6c9   : > { %v1394_v8 = vpop.xlane.xlu0 %1393 }
 0x6ca   : > { %5733 = vrcp.f32 %v1394_v8 }
 0x6cd   : > { %v1397_v9 = vpop.xlane.xlu1 %1396  ;;  %v1178_v10 = vpop.permute.xlu0 %1177 }
 0x6ce   : > { %5735 = vrcp.f32 %v1397_v9  ;;  %v1218_v11 = vadd.f32 %v1217_v4, %v1178_v10  ;;  %v1221_v12 = vadd.f32 %v1220_v6, %v1178_v10 }
 0x6d0   : > { %5470 = vmatpush3.msra.mxu0 %v1218_v11  ;;  %5475 = vmatpush3.msra.mxu1 %v1221_v12 }
 0x6d1   : > { %5485 = vmatprep.subr.bf16.mxu1 %v5776_v14  ;;  %5479 = vmatprep.subr.bf16.mxu0 %v5776_v14  ;;  %v1692_v43 = vpop.permute.xlu1 %1691 }
 0x6d4   : > { %v5734_v15 = vpop.eup %5733 }
 0x6d5   : > { %v1400_v16 = vmul.f32 %v5734_v15, %v5730_v0  ;;  %v1645_v58 = vpop.permute.xlu1 %1644 }
 0x6d7   : > { %5472 = vmatmul.mubr.msk.f32.vlgmr.msra.gmra.mrb[10].mxu0 %vm754_vm5, %v1400_v16 }
 0x6d8   : > { %v5736_v29 = vpop.eup %5735  ;;  %5480 = vmatpush3.bf16.msra.mxu0 %v1554_v18  ;;  %5481 = vmatprep.mubr.msk.bf16.mxu0 %vm5777_vm4, %v5776_v14 }
 0x6d9   : > { %v1401_v30 = vmul.f32 %v5736_v29, %v5732_v2  ;;  %5491 = vmatprep.subr.bf16.mxu0 %v5776_v14  ;;  %v1742_v2 = vsel %vm610_vm3, %v596_v1, 0 }
 0x6db   : > { %5477 = vmatmul.mubr.msk.f32.vlgmr.msra.gmra.mrb[18].mxu1 %vm754_vm5, %v1401_v30 }
 0x6dc   : > { %5486 = vmatpush3.bf16.msra.mxu1 %v1601_v31  ;;  %5487 = vmatprep.mubr.msk.bf16.mxu1 %vm5777_vm4, %v5776_v14 }
 0x6dd   : > { %5497 = vmatprep.subr.bf16.mxu1 %v5776_v14 }
 0x6df   : > { %5488 = vmatmul.mubr.msk.bf16.vlgmr.msra.gmra.mrb[20].mxu1 %vm754_vm5, %v1079_v27  ;;  %v588_v27 = vld [vmem:[%s5862_s28 + $0x8] sm:$0xf] }
 0x6e0   : > { %5499 = vmatprep.mubr.msk.bf16.mxu1 %vm5777_vm4, %v5776_v14  ;;  %v1648_v37 = vsel %vm610_vm3, %v588_v27, 0 }
 0x6e5   : > { %5498 = vmatpush3.bf16.xpose.msra.mxu1 %v1695_v33 }
 0x6e6   : > { %5509 = vmatprep.subr.mxu1 %v5776_v14 }
 0x6ec   : > { %5500 = vmatmul.mubr.msk.bf16.vlgmr.msra.gmra.mrb[24].mxu1 %vm610_vm3, %v5927_v19 }
 0x6ed   : > { %5511 = vmatprep.mubr.msk.f32.mxu1 %vm5777_vm4, %v5776_v14 }
 0x7aa   : > { %v1471_v17 = vpop.f32.mrb[10].mxu0 }
 0x7ab   : > { %v5473_v20 = vpop.f32.mrb[11].mxu0 }
 0x7ae   : > { %v1544_v34 = vpop.f32.mrb[18].mxu1 }
 0x7af   : > { %v1548_v35 = vpack.c.bf16 %v1544_v34, %v1471_v17  ;;  %v5478_v36 = vpop.f32.mrb[19].mxu1 }
 0x7b1   : > { %5482 = vmatmul.mubr.msk.bf16.vlgmr.msra.gmra.mrb[20].mxu0 %vm754_vm5, %v1548_v35 }
 0x7b2   : > { %v1637_v38 = vpop.f32.mrb[20].mxu1  ;;  %5492 = vmatpush3.bf16.xpose.msra.mxu0 %v1648_v37  ;;  %5493 = vmatprep.mubr.msk.bf16.mxu0 %vm5777_vm4, %v5776_v14 }
 0x7b3   : > { %v5489_v39 = vpop.f32.mrb[21].mxu1  ;;  %5503 = vmatprep.subr.bf16.mxu0 %v5776_v14 }
 0x7b4   : > { %v1640_v40 = vpop.f32.mrb[22].mxu1 }
 0x7b5   : > { %v5490_v41 = vpop.f32.mrb[23].mxu1 }
 0x7b9   : > { %5494 = vmatmul.mubr.msk.bf16.vlgmr.msra.gmra.mrb[24].mxu0 %vm610_vm3, %v5927_v19 }
 0x7ba   : > { %5505 = vmatprep.mubr.msk.bf16.mxu0 %vm5777_vm4, %v5776_v14  ;;  %5504 = vmatpush3.bf16.xpose.msra.mxu0 %v1742_v2 }
 0x7bb   : > { %5519 = vmatprep.subr.mxu0 %v5776_v14 }
 0x7bf   : > { %v1731_v42 = vpop.f32.mrb[24].mxu1 }
 0x7c0   : > { %v5501_v44 = vpop.f32.mrb[25].mxu1  ;;  %v1732_v45 = vadd.f32 %v1731_v42, %v1692_v43 }
 0x7c1   : > { %v1734_v46 = vpop.f32.mrb[26].mxu1  ;;  %5506 = vmatmul.mubr.msk.bf16.vlgmr.msra.gmra.mrb[28].mxu0 %vm610_vm3, %v5927_v19 }
 0x7c2   : > { %v1735_v48 = vadd.f32 %v1734_v46, %v1692_v43  ;;  %v5502_v49 = vpop.f32.mrb[27].mxu1  ;;  %5510 = vmatpush3.xpose.msk.msra.mxu1 %vm754_vm5, %v1732_v45  ;;  %5521 = vmatprep.mubr.msk.f32.mxu0 %vm5777_vm4, %v5776_v14  ;;  %v589_v46 = vld [vmem:[%s5862_s28 + $0xc] sm:$0xf] }
 0x7c3   : > { %5514 = vmatprep.subr.mxu1 %v5776_v14 }
 0x884   : > { %v1590_v50 = vpop.f32.mrb[20].mxu0 }
 0x885   : > { %v6097_v51 = vadd.f32 %v1637_v38, %v1590_v50  ;;  %v5483_v54 = vpop.f32.mrb[21].mxu0 }
 0x886   : > { %v1593_v55 = vpop.f32.mrb[22].mxu0  ;;  %v593_v54 = vld [vmem:[%s5862_s28 + $0x1c] sm:$0xf] }
 0x887   : > { %v6099_v56 = vadd.f32 %v1640_v40, %v1593_v55  ;;  %v5484_v57 = vpop.f32.mrb[23].mxu0  ;;  %v600_v40 = vld [vmem:[%s5862_s28 + $0x38] sm:$0xf] }
 0x888   : > { %v2114_v43 = vsel %vm1552_vm6, %v600_v40, 0 }
 0x88c   : > { %v1684_v59 = vpop.f32.mrb[24].mxu0 }
 0x88d   : > { %v1685_v60 = vadd.f32 %v1684_v59, %v1645_v58  ;;  %v5495_v61 = vpop.f32.mrb[25].mxu0  ;;  %v2210_v59 = vsel %vm610_vm3, %v593_v54, 0 }
 0x88e   : > { %v1687_v62 = vpop.f32.mrb[26].mxu0 }
 0x88f   : > { %v5496_v63 = vpop.f32.mrb[27].mxu0  ;;  %5512 = vmatmul.mubr.msk.f32.vlgmr.msra.gmra.mrb[28].mxu1 %vm754_vm5, %v1685_v60  ;;  %v1688_v0 = vadd.f32 %v1687_v62, %v1645_v58 }
 0x890   : > { %5515 = vmatpush3.xpose.msk.msra.mxu1 %vm754_vm5, %v1735_v48  ;;  %5516 = vmatprep.mubr.msk.f32.mxu1 %vm5777_vm4, %v5776_v14  ;;  %v2163_v48 = vsel %vm610_vm3, %v589_v46, 0 }
 0x891   : > { %5524 = vmatprep.subr.mxu1 %v5776_v14 }
 0x893   : > { %5517 = vmatmul.mubr.msk.f32.vlgmr.msra.gmra.mrb[30].mxu1 %vm754_vm5, %v1688_v0 }
 0x894   : > { %5526 = vmatprep.mubr.msk.f32.mxu1 %vm5777_vm4, %v5776_v14  ;;  %v1778_v17 = vpop.f32.mrb[28].mxu0 }
 0x895   : > { %v5507_v20 = vpop.f32.mrb[29].mxu0 }
 0x896   : > { %v1781_v35 = vpop.f32.mrb[30].mxu0 }
 0x897   : > { %v5508_v36 = vpop.f32.mrb[31].mxu0 }
 0x962   : > { %v1857_v3 = vpop.f32.mrb[28].mxu1 }
 0x963   : > { %v1937_v4 = vmul.f32 0.35355338, %v1857_v3  ;;  %v5513_v5 = vpop.f32.mrb[29].mxu1 }
 0x965   : > { %v1939_v6 = vadd.f32 %v1937_v4, %v5980_v47 }
 0x966   : > { %v1933_v7 = vpop.f32.mrb[30].mxu1 }
 0x967   : > { %v1938_v8 = vmul.f32 0.35355338, %v1933_v7  ;;  %v5518_v9 = vpop.f32.mrb[31].mxu1  ;;  %v1941_v10 = vsel %vm754_vm5, %v1939_v6, -inf }
 0x968   : > { %1942 = vmax.xlane.f32.xlu1 %v1941_v10 }
 0x969   : > { %v1940_v11 = vadd.f32 %v1938_v8, %v5980_v47 }
 0x96b   : > { %v1944_v12 = vsel %vm754_vm5, %v1940_v11, -inf }
 0x96c   : > { %1945 = vmax.xlane.f32.xlu0 %v1944_v12  ;;  %v597_v12 = vld [vmem:[%s5862_s28 + $0x2c] sm:$0xf] }
 0x979   : > { %1738 = vrot.lane.b32.xlu1 %v5991_v53, %s5779_s24 }
 0x97d   : > { %2159 = vrot.lane.b32.xlu1 %v5954_v26, %s5780_s25 }
 0x9f5   : > { %v1943_v13 = vpop.xlane.xlu1 %1942 }
 0x9f6   : > { %v1947_v15 = vsub.f32 %v1939_v6, %v1943_v13  ;;  %v2257_v13 = vsel %vm610_vm3, %v597_v12, 0 }
 0x9f8   : > { %v1949_v16 = vmul.f32 1.442695, %v1947_v15 }
 0x9f9   : > { %v1946_v18 = vpop.xlane.xlu0 %1945  ;;  %v1739_v27 = vpop.permute.xlu1 %1738 }
 0x9fa   : > { %5737 = vpow2.f32 %v1949_v16  ;;  %v1948_v28 = vsub.f32 %v1940_v11, %v1946_v18  ;;  %v1779_v34 = vadd.f32 %v1778_v17, %v1739_v27  ;;  %v1782_v37 = vadd.f32 %v1781_v35, %v1739_v27 }
 0x9fc   : > { %v1951_v29 = vmul.f32 1.442695, %v1948_v28  ;;  %5520 = vmatpush3.msra.mxu0 %v1779_v34  ;;  %5525 = vmatpush3.msra.mxu1 %v1782_v37 }
 0x9fd   : > { %5529 = vmatprep.subr.bf16.mxu0 %v5776_v14  ;;  %5535 = vmatprep.subr.bf16.mxu1 %v5776_v14  ;;  %v2160_v5 = vpop.permute.xlu1 %2159 }
 0x9fe   : > { %5739 = vpow2.f32 %v1951_v29 }
 0xa04   : > { %v5738_v30 = vpop.eup %5737 }
 0xa05   : > { %v1953_v31 = vsel %vm754_vm5, %v5738_v30, 0.0 }
 0xa06   : > { %1954 = vadd.xlane.f32.xlu0 %v1953_v31 }
 0xa08   : > { %v5740_v32 = vpop.eup %5739 }
 0xa09   : > { %v1956_v33 = vsel %vm754_vm5, %v5740_v32, 0.0 }
 0xa0a   : > { %1957 = vadd.xlane.f32.xlu0 %v1956_v33 }
 0xa20   : > { %2206 = vrot.lane.b32.xlu0 %v5950_v25, %s5780_s25 }
 0xa93   : > { %v1955_v38 = vpop.xlane.xlu0 %1954 }
 0xa94   : > { %5741 = vrcp.f32 %v1955_v38 }
 0xa97   : > { %v1958_v39 = vpop.xlane.xlu0 %1957 }
 0xa98   : > { %5743 = vrcp.f32 %v1958_v39 }
 0xa9b   : > { %v2207_v4 = vpop.permute.xlu0 %2206 }
 0xa9e   : > { %v5742_v41 = vpop.eup %5741 }
 0xa9f   : > { %v1961_v42 = vmul.f32 %v5742_v41, %v5738_v30 }
 0xaa1   : > { %5522 = vmatmul.mubr.msk.f32.vlgmr.msra.gmra.mrb[32].mxu0 %vm754_vm5, %v1961_v42 }
 0xaa2   : > { %v5744_v44 = vpop.eup %5743  ;;  %5530 = vmatpush3.bf16.msra.mxu0 %v2114_v43  ;;  %5531 = vmatprep.mubr.msk.bf16.mxu0 %vm5777_vm4, %v5776_v14 }
 0xaa3   : > { %v1962_v45 = vmul.f32 %v5744_v44, %v5740_v32  ;;  %5541 = vmatprep.subr.bf16.mxu0 %v5776_v14 }
 0xaa5   : > { %5527 = vmatmul.mubr.msk.f32.vlgmr.msra.gmra.mrb[32].mxu1 %vm754_vm5, %v1962_v45 }
 0xaa6   : > { %5537 = vmatprep.mubr.msk.bf16.mxu1 %vm5777_vm4, %v5776_v14  ;;  %5536 = vmatpush3.bf16.xpose.msra.mxu1 %v2163_v48 }
 0xaa7   : > { %5547 = vmatprep.subr.bf16.mxu1 %v5776_v14 }
 0xaad   : > { %5538 = vmatmul.mubr.msk.bf16.vlgmr.msra.gmra.mrb[36].mxu1 %vm610_vm3, %v5927_v19 }
 0xaae   : > { %5549 = vmatprep.mubr.msk.bf16.mxu1 %vm5777_vm4, %v5776_v14  ;;  %5548 = vmatpush3.bf16.xpose.msra.mxu1 %v2257_v13 }
 0xaaf   : > { %5563 = vmatprep.subr.mxu1 %v5776_v14 }
 0xab5   : > { %5550 = vmatmul.mubr.msk.bf16.vlgmr.msra.gmra.mrb[40].mxu1 %vm610_vm3, %v5927_v19 }
 0xab6   : > { %5565 = vmatprep.mubr.msk.f32.mxu1 %vm5777_vm4, %v5776_v14 }
 0xb74   : > { %v2032_v49 = vpop.f32.mrb[32].mxu0 }
 0xb75   : > { %v5523_v50 = vpop.f32.mrb[33].mxu0 }
 0xb78   : > { %v2105_v55 = vpop.f32.mrb[32].mxu1 }
 0xb79   : > { %v2109_v57 = vpack.c.bf16 %v2105_v55, %v2032_v49  ;;  %v5528_v58 = vpop.f32.mrb[33].mxu1 }
 0xb7b   : > { %5532 = vmatmul.mubr.msk.bf16.vlgmr.msra.gmra.mrb[36].mxu0 %vm754_vm5, %v2109_v57  ;;  %v601_v57 = vld [vmem:[%s5862_s28 + $0x3c] sm:$0xf] }
 0xb7c   : > { %5542 = vmatpush3.bf16.xpose.msra.mxu0 %v2210_v59  ;;  %5543 = vmatprep.mubr.msk.bf16.mxu0 %vm5777_vm4, %v5776_v14  ;;  %v2629_v58 = vsel %vm1552_vm6, %v601_v57, 0 }
 0xb7d   : > { %5553 = vmatprep.subr.mxu0 %v5776_v14 }
 0xb80   : > { %v2199_v25 = vpop.f32.mrb[36].mxu1 }
 0xb81   : > { %v5539_v26 = vpop.f32.mrb[37].mxu1  ;;  %v2200_v10 = vadd.f32 %v2199_v25, %v2160_v5 }
 0xb82   : > { %v2202_v60 = vpop.f32.mrb[38].mxu1 }
 0xb83   : > { %5544 = vmatmul.mubr.msk.bf16.vlgmr.msra.gmra.mrb[40].mxu0 %vm610_vm3, %v5927_v19  ;;  %v5540_v61 = vpop.f32.mrb[39].mxu1 }
 0xb84   : > { %5555 = vmatprep.mubr.msk.f32.mxu0 %vm5777_vm4, %v5776_v14 }
 0xc4e   : > { %v2150_v62 = vpop.f32.mrb[36].mxu0 }
 0xc4f   : > { %v6157_v63 = vadd.f32 %v2150_v62, %v6097_v51  ;;  %v5533_v0 = vpop.f32.mrb[37].mxu0  ;;  %v6196_v62 = vsub.s32 3, %v5937_v21 }
 0xc50   : > { %v2153_v1 = vpop.f32.mrb[38].mxu0 }
 0xc51   : > { %v6160_v2 = vadd.f32 %v2153_v1, %v6099_v56  ;;  %v5534_v3 = vpop.f32.mrb[39].mxu0  ;;  %v2203_v56 = vadd.f32 %v2202_v60, %v2160_v5 }
 0xc56   : > { %v2246_v6 = vpop.f32.mrb[40].mxu0 }
 0xc57   : > { %v2247_v7 = vadd.f32 %v2246_v6, %v2207_v4  ;;  %v5545_v8 = vpop.f32.mrb[41].mxu0 }
 0xc58   : > { %v2249_v9 = vpop.f32.mrb[42].mxu0 }
 0xc59   : > { %v5546_v11 = vpop.f32.mrb[43].mxu0  ;;  %5554 = vmatpush3.xpose.msk.msra.mxu0 %vm754_vm5, %v2247_v7  ;;  %v2250_v51 = vadd.f32 %v2249_v9, %v2207_v4  ;;  %v5761_v9 = vld [vmem:[%s6540_s12] sm:$0xff] }
 0xc5a   : > { %5558 = vmatprep.subr.mxu0 %v5776_v14 }
 0xc5c   : > { %5556 = vmatmul.mubr.msk.f32.vlgmr.msra.gmra.mrb[34].mxu0 %vm754_vm5, %v2200_v10 }
 0xc5d   : > { %5559 = vmatpush3.xpose.msk.msra.mxu0 %vm754_vm5, %v2250_v51  ;;  %5560 = vmatprep.mubr.msk.f32.mxu0 %vm5777_vm4, %v5776_v14  ;;  %v5762_v51 = vld [vmem:[%s6540_s12 + $0x8] sm:$0xff] }
 0xc5e   : > { %5568 = vmatprep.subr.mxu0 %v5776_v14 }
 0xc60   : > { %5561 = vmatmul.mubr.msk.f32.vlgmr.msra.gmra.mrb[44].mxu0 %vm754_vm5, %v2203_v56 }
 0xc61   : > { %5570 = vmatprep.mubr.msk.f32.mxu0 %vm5777_vm4, %v5776_v14 }
 0xd2f   : > { %v2372_v15 = vpop.f32.mrb[34].mxu0 }
 0xd30   : > { %v2452_v16 = vmul.f32 0.35355338, %v2372_v15  ;;  %v5557_v18 = vpop.f32.mrb[35].mxu0 }
 0xd32   : > { %v2454_v28 = vadd.f32 %v2452_v16, %v5980_v47 }
 0xd33   : > { %v2448_v29 = vpop.f32.mrb[44].mxu0 }
 0xd34   : > { %v2453_v30 = vmul.f32 0.35355338, %v2448_v29  ;;  %v5562_v31 = vpop.f32.mrb[45].mxu0  ;;  %v2456_v32 = vsel %vm754_vm5, %v2454_v28, -inf }
 0xd35   : > { %2457 = vmax.xlane.f32.xlu1 %v2456_v32  ;;  %v2722_v32 = vld [vmem:[%s5867_s13] sm:$0xff] }
 0xd36   : > { %v2455_v33 = vadd.f32 %v2453_v30, %v5980_v47  ;;  %v2293_v47 = vpop.f32.mrb[40].mxu1 }
 0xd37   : > { %v5551_v41 = vpop.f32.mrb[41].mxu1 }
 0xd38   : > { %v2459_v17 = vsel %vm754_vm5, %v2455_v33, -inf  ;;  %v2296_v42 = vpop.f32.mrb[42].mxu1 }
 0xd39   : > { %2460 = vmax.xlane.f32.xlu0 %v2459_v17  ;;  %v5552_v43 = vpop.f32.mrb[43].mxu1  ;;  %v2723_v17 = vld [vmem:[%s5867_s13 + $0x8] sm:$0xff] }
 0xd3a   : > { %v2724_v43 = vld [vmem:[%s5867_s13 + $0x10] sm:$0xff] }
 0xdc2   : > { %v2458_v19 = vpop.xlane.xlu1 %2457 }
 0xdc3   : > { %v2462_v20 = vsub.f32 %v2454_v28, %v2458_v19 }
 0xdc5   : > { %v2464_v27 = vmul.f32 1.442695, %v2462_v20  ;;  %v2731_v20 = vld [vmem:[%s5867_s13 + $0x48] sm:$0xff] }
 0xdc6   : > { %v2461_v34 = vpop.xlane.xlu0 %2460 }
 0xdc7   : > { %5745 = vpow2.f32 %v2464_v27  ;;  %v2463_v35 = vsub.f32 %v2455_v33, %v2461_v34  ;;  %v2730_v33 = vld [vmem:[%s5867_s13 + $0x40] sm:$0xff]  ;;  %v4979_v34 = vcombine.low %v2723_v17, %v2731_v20 }
 0xdc8   : > { %v4978_v19 = vcombine.high %v2722_v32, %v2730_v33  ;;  %v4977_v27 = vcombine.low %v2722_v32, %v2730_v33  ;;  %v2750_v32 = vld [vmem:[%s5867_s13 + $0xe0] sm:$0xff]  ;;  %v2743_v33 = vld [vmem:[%s5867_s13 + $0xa8] sm:$0xff] }
 0xdc9   : > { %v2466_v36 = vmul.f32 1.442695, %v2463_v35  ;;  %v4980_v35 = vcombine.high %v2723_v17, %v2731_v20  ;;  %v2751_v17 = vld [vmem:[%s5867_s13 + $0xe8] sm:$0xff] }
 0xdcb   : > { %5747 = vpow2.f32 %v2466_v36  ;;  %v2738_v36 = vld [vmem:[%s5867_s13 + $0x80] sm:$0xff] }
 0xdd1   : > { %v5746_v37 = vpop.eup %5745 }
 0xdd2   : > { %v2468_v38 = vsel %vm754_vm5, %v5746_v37, 0.0 }
 0xdd3   : > { %2469 = vadd.xlane.f32.xlu0 %v2468_v38  ;;  %v2739_v38 = vld [vmem:[%s5867_s13 + $0x88] sm:$0xff] }
 0xdd5   : > { %v5748_v39 = vpop.eup %5747 }
 0xdd6   : > { %v2471_v40 = vsel %vm754_vm5, %v5748_v39, 0.0 }
 0xdd7   : > { %2472 = vadd.xlane.f32.xlu1 %v2471_v40  ;;  %v2747_v40 = vld [vmem:[%s5867_s13 + $0xc8] sm:$0xff] }
 0xdd8   : > { %v4995_v41 = vcombine.low %v2739_v38, %v2747_v40 }
 0xde9   : > { %2253 = vrot.lane.b32.xlu0 %v5991_v53, %s5780_s25 }
 0xe60   : > { %v2470_v44 = vpop.xlane.xlu0 %2469 }
 0xe61   : > { %5749 = vrcp.f32 %v2470_v44  ;;  %v2732_v44 = vld [vmem:[%s5867_s13 + $0x50] sm:$0xff] }
 0xe64   : > { %v2473_v45 = vpop.xlane.xlu1 %2472  ;;  %v2254_v46 = vpop.permute.xlu0 %2253 }
 0xe65   : > { %5751 = vrcp.f32 %v2473_v45  ;;  %v2294_v48 = vadd.f32 %v2293_v47, %v2254_v46  ;;  %v2297_v49 = vadd.f32 %v2296_v42, %v2254_v46  ;;  %v4996_v42 = vcombine.high %v2739_v38, %v2747_v40  ;;  %v2725_v45 = vld [vmem:[%s5867_s13 + $0x18] sm:$0xff] }
 0xe66   : > { %v5781_v46 = vmov 0   ;;  %v2737_v38 = vld [vmem:[%s5867_s13 + $0x78] sm:$0xff]  ;;  %v5003_v40 = vcombine.low %v2743_v33, %v2751_v17 }
 0xe67   : > { %5564 = vmatpush3.msra.mxu1 %v2294_v48  ;;  %5569 = vmatpush3.msra.mxu0 %v2297_v49  ;;  %v4982_v48 = vcombine.high %v2724_v43, %v2732_v44  ;;  %v2733_v49 = vld [vmem:[%s5867_s13 + $0x58] sm:$0xff] }
 0xe68   : > { %5573 = vmatprep.subr.bf16.mxu1 %v5776_v14  ;;  %3001 = vmatprep.subr.bf16.mxu0 %v4978_v19 }
 0xe6b   : > { %v5750_v50 = vpop.eup %5749 }
 0xe6c   : > { %v2476_v54 = vmul.f32 %v5750_v50, %v5746_v37  ;;  %v2746_v37 = vld [vmem:[%s5867_s13 + $0xc0] sm:$0xff]  ;;  %v4981_v50 = vcombine.low %v2724_v43, %v2732_v44  ;;  %v2752_v43 = vld [vmem:[%s5867_s13 + $0xf0] sm:$0xff]  ;;  %v2745_v44 = vld [vmem:[%s5867_s13 + $0xb8] sm:$0xff] }
 0xe6d   : > { %v4993_v47 = vcombine.low %v2738_v36, %v2746_v37 }
 0xe6e   : > { %5566 = vmatmul.mubr.msk.f32.vlgmr.msra.gmra.mrb[34].mxu1 %vm754_vm5, %v2476_v54  ;;  %v4983_v54 = vcombine.low %v2725_v45, %v2733_v49 }
 0xe6f   : > { %v5752_v53 = vpop.eup %5751  ;;  %5575 = vmatprep.mubr.msk.bf16.mxu1 %vm5777_vm4, %v5776_v14  ;;  %5574 = vmatpush3.bf16.msra.mxu1 %v2629_v58  ;;  %v2677_v14 = vrot.slane %v5943_v23, %v6196_v62 }
 0xe70   : > { %v2477_v55 = vmul.f32 %v5752_v53, %v5748_v39  ;;  %3044 = vmatprep.subr.bf16.mxu1 %v4980_v35  ;;  %v4994_v39 = vcombine.high %v2738_v36, %v2746_v37  ;;  %v4984_v53 = vcombine.high %v2725_v45, %v2733_v49  ;;  %v2728_v35 = vld [vmem:[%s5867_s13 + $0x30] sm:$0xff]  ;;  %v2729_v37 = vld [vmem:[%s5867_s13 + $0x38] sm:$0xff] }
 0xe71   : > { %v2736_v36 = vld [vmem:[%s5867_s13 + $0x70] sm:$0xff]  ;;  %v2753_v45 = vld [vmem:[%s5867_s13 + $0xf8] sm:$0xff]  ;;  %v4991_v49 = vcombine.low %v2729_v37, %v2737_v38 }
 0xe72   : > { %5571 = vmatmul.mubr.msk.f32.vlgmr.msra.gmra.mrb[46].mxu0 %vm754_vm5, %v2477_v55 }
 0xe73   : > { %3002 = vmatpush1.bf16.msra.mxu0 %v4977_v27  ;;  %3033 = vmatprep.mubr.bf16.mxu0 %v5781_v46 }
 0xe74   : > { %3003 = vmatprep.subr.bf16.mxu0 %v4994_v39 }
 0xe77   : > { %3004 = vmatpush1.bf16.msra.mxu0 %v4993_v47  ;;  %v4990_v47 = vcombine.high %v2728_v35, %v2736_v36 }
 0xe78   : > { %3087 = vmatprep.subr.bf16.mxu0 %v4982_v48  ;;  %v4989_v48 = vcombine.low %v2728_v35, %v2736_v36 }
 0xf41   : > { %v2547_v59 = vpop.f32.mrb[34].mxu1 }
 0xf42   : > { %v5567_v25 = vpop.f32.mrb[35].mxu1 }
 0xf45   : > { %v2620_v26 = vpop.f32.mrb[46].mxu0 }
 0xf46   : > { %v2624_v60 = vpack.c.bf16 %v2620_v26, %v2547_v59  ;;  %v5572_v61 = vpop.f32.mrb[47].mxu0 }
 0xf48   : > { %5576 = vmatmul.mubr.msk.bf16.vlgmr.msra.gmra.mrb[44].mxu1 %vm754_vm5, %v2624_v60  ;;  %v6227_v60 = vsub.s32 4, %v5937_v21 }
 0xf49   : > { %3045 = vmatpush1.bf16.msra.mxu1 %v4979_v34  ;;  %3076 = vmatprep.mubr.bf16.mxu1 %v5781_v46  ;;  %v5004_v34 = vcombine.high %v2743_v33, %v2751_v17  ;;  %v5624_v33 = vld [vmem:[%s5872_s18 + $0xb8] sm:$0xff]   ;;  %v5625_v17 = vld [vmem:[%s5872_s18 + $0x140] sm:$0xff]  }
 0xf4a   : > { %3046 = vmatprep.subr.bf16.mxu1 %v4996_v42  ;;  %v2744_v42 = vld [vmem:[%s5867_s13 + $0xb0] sm:$0xff] }
 0xf4d   : > { %3047 = vmatpush1.bf16.msra.mxu1 %v4995_v41  ;;  %v4992_v41 = vcombine.high %v2729_v37, %v2737_v38  ;;  %v6326_v37 = vsub.s32 6, %v5937_v21 }
 0xf4e   : > { %3130 = vmatprep.subr.bf16.mxu1 %v4984_v53  ;;  %v5005_v53 = vcombine.low %v2744_v42, %v2752_v43 }
0x101b   : > { %v2665_v0 = vpop.f32.mrb[44].mxu1 }
0x101c   : > { %v2672_v1 = vadd.f32 %v2665_v0, %v6157_v63  ;;  %v5577_v3 = vpop.f32.mrb[45].mxu1  ;;  %v6232_v0 = vsub.s32 5, %v5937_v21 }
0x101d   : > { %v2668_v4 = vpop.f32.mrb[46].mxu1 }
0x101e   : > { %v2678_v5 = vadd.f32 %v2677_v14, %v2672_v1  ;;  %v2673_v6 = vadd.f32 %v2668_v4, %v6160_v2  ;;  %v5578_v7 = vpop.f32.mrb[47].mxu1  ;;  %v2718_v4 = vrot.slane %v5943_v23, %v6232_v0 }
0x1020   : > { %v2679_v8 = vadd.f32 %v2677_v14, %v2673_v6  ;;  %v2680_v10 = vadd.f32 %v5761_v9, %v2678_v5  ;;  %v2712_v14 = vrot.slane %v5943_v23, %v6227_v60  ;;  %v2748_v9 = vld [vmem:[%s5867_s13 + $0xd0] sm:$0xff]  ;;  %v2726_v23 = vld [vmem:[%s5867_s13 + $0x20] sm:$0xff] }
0x1022   : > { %v2682_v11 = vsel %vm610_vm3, %v2680_v10, 0.0  ;;  %v2681_v56 = vadd.f32 %v5762_v51, %v2679_v8  ;;  %v2740_v8 = vld [vmem:[%s5867_s13 + $0x90] sm:$0xff] }
0x1023   : > { %2683 = vadd.xlane.f32.xlu1 %v2682_v11  ;;  %v2749_v11 = vld [vmem:[%s5867_s13 + $0xd8] sm:$0xff] }
0x1024   : > { %v2685_v63 = vsel %vm610_vm3, %v2681_v56, 0.0 }
0x1027   : > { %2686 = vadd.xlane.f32.xlu1 %v2685_v63 }
0x10b0   : > { %v2684_v2 = vpop.xlane.xlu1 %2683 }
0x10b1   : > { %v2689_v12 = vmul.f32 0.03125, %v2684_v2  ;;  %v4998_v2 = vcombine.high %v2740_v8, %v2748_v9 }
0x10b3   : > { %v2691_v13 = vsub.f32 %v2680_v10, %v2689_v12  ;;  %v2741_v10 = vld [vmem:[%s5867_s13 + $0x98] sm:$0xff] }
0x10b4   : > { %v2687_v15 = vpop.xlane.xlu1 %2686  ;;  %v5000_v12 = vcombine.high %v2741_v10, %v2749_v11 }
0x10b5   : > { %v2690_v16 = vmul.f32 0.03125, %v2687_v15  ;;  %v2693_v18 = vmul.f32 %v2691_v13, %v2691_v13  ;;  %v2727_v15 = vld [vmem:[%s5867_s13 + $0x28] sm:$0xff] }
0x10b7   : > { %v2692_v28 = vsub.f32 %v2681_v56, %v2690_v16  ;;  %v2695_v29 = vsel %vm610_vm3, %v2693_v18, 0.0  ;;  %v2735_v16 = vld [vmem:[%s5867_s13 + $0x68] sm:$0xff]  ;;  %v4997_v18 = vcombine.low %v2740_v8, %v2748_v9  ;;  %v5607_v8 = vld [vmem:[%s5872_s18 + $0x18] sm:$0xff]  }
0x10b8   : > { %2696 = vadd.xlane.f32.xlu1 %v2695_v29  ;;  %v4987_v20 = vcombine.low %v2727_v15, %v2735_v16  ;;  %v5608_v9 = vld [vmem:[%s5872_s18 + $0x98] sm:$0xff]  }
0x10b9   : > { %v2694_v30 = vmul.f32 %v2692_v28, %v2692_v28 }
0x10bb   : > { %v2698_v31 = vsel %vm610_vm3, %v2694_v30, 0.0  ;;  %v4988_v30 = vcombine.high %v2727_v15, %v2735_v16  ;;  %v5616_v15 = vld [vmem:[%s5872_s18 + $0xa8] sm:$0xff]   ;;  %v5617_v16 = vld [vmem:[%s5872_s18 + $0x70] sm:$0xff]  }
0x10bc   : > { %2699 = vadd.xlane.f32.xlu1 %v2698_v31  ;;  %v2742_v31 = vld [vmem:[%s5867_s13 + $0xa0] sm:$0xff] }
0x10bd   : > { %v5002_v27 = vcombine.high %v2742_v31, %v2750_v32  ;;  %v5001_v39 = vcombine.low %v2742_v31, %v2750_v32  ;;  %v5622_v31 = vld [vmem:[%s5872_s18 + $0xf8] sm:$0xff]  }
0x10be   : > { %v5623_v32 = vld [vmem:[%s5872_s18 + $0x38] sm:$0xff]  }
0x1145   : > { %v2697_v55 = vpop.xlane.xlu1 %2696 }
0x1146   : > { %v2701_v57 = vmul.f32 0.03125, %v2697_v55  ;;  %v5007_v55 = vcombine.low %v2745_v44, %v2753_v45 }
0x1148   : > { %v2703_v58 = vadd.f32 1e-05, %v2701_v57  ;;  %v5593_v57 = vld [vmem:[%s5872_s18 + $0x40] sm:$0xff]  }
0x1149   : > { %v2700_v59 = vpop.xlane.xlu1 %2699 }
0x114a   : > { %5753 = vrsqrt.f32 %v2703_v58  ;;  %v2702_v25 = vmul.f32 0.03125, %v2700_v59  ;;  %v5594_v58 = vld [vmem:[%s5872_s18 + $0xc0] sm:$0xff]  }
0x114b   : > { %v5595_v59 = vld [vmem:[%s5872_s18] sm:$0xff]  }
0x114c   : > { %v2704_v26 = vadd.f32 1e-05, %v2702_v25  ;;  %v5596_v25 = vld [vmem:[%s5872_s18 + $0x80] sm:$0xff]  }
0x114e   : > { %5755 = vrsqrt.f32 %v2704_v26  ;;  %v5597_v26 = vld [vmem:[%s5872_s18 + $0x48] sm:$0xff]  }
0x1154   : > { %v5754_v61 = vpop.eup %5753 }
0x1155   : > { %v2707_v1 = vmul.f32 %v5754_v61, %v2691_v13  ;;  %v2734_v13 = vld [vmem:[%s5867_s13 + $0x60] sm:$0xff]  ;;  %v5598_v61 = vld [vmem:[%s5872_s18 + $0xc8] sm:$0xff]  }
0x1156   : > { %v4986_v29 = vcombine.high %v2726_v23, %v2734_v13  ;;  %v4985_v19 = vcombine.low %v2726_v23, %v2734_v13  ;;  %v5614_v23 = vld [vmem:[%s5872_s18 + $0xe8] sm:$0xff]  }
0x1157   : > { %v2713_v5 = vmul.f32 %v2712_v14, %v2707_v1  ;;  %v5601_v1 = vld [vmem:[%s5872_s18 + $0x50] sm:$0xff]   ;;  %v5615_v13 = vld [vmem:[%s5872_s18 + $0x28] sm:$0xff]  }
0x1158   : > { %v5756_v3 = vpop.eup %5755 }
0x1159   : > { %v2708_v6 = vmul.f32 %v5756_v3, %v2692_v28  ;;  %v6240_v51 = vadd.f32 %v2718_v4, %v2713_v5  ;;  %v4999_v28 = vcombine.low %v2741_v10, %v2749_v11  ;;  %v5602_v3 = vld [vmem:[%s5872_s18 + $0xd0] sm:$0xff]   ;;  %v5609_v10 = vld [vmem:[%s5872_s18 + $0x60] sm:$0xff]  }
0x115a   : > { %v5604_v5 = vld [vmem:[%s5872_s18 + $0x90] sm:$0xff]   ;;  %v5610_v11 = vld [vmem:[%s5872_s18 + $0xe0] sm:$0xff]  }
0x115b   : > { %v2714_v7 = vmul.f32 %v2712_v14, %v2708_v6  ;;  %v5600_v14 = vld [vmem:[%s5872_s18 + $0x88] sm:$0xff]   ;;  %v5605_v6 = vld [vmem:[%s5872_s18 + $0x58] sm:$0xff]  }
0x115d   : > { %v6242_v56 = vadd.f32 %v2718_v4, %v2714_v7  ;;  %v5603_v4 = vld [vmem:[%s5872_s18 + $0x10] sm:$0xff]   ;;  %v5606_v7 = vld [vmem:[%s5872_s18 + $0xd8] sm:$0xff]  }
0x115f   : > { %v6246_v63 = vpack.c.bf16 %v6242_v56, %v6240_v51 }
0x1161   : > { %5009 = vmatmul.mubr.msk.bf16.vlgmr.msra.gmra.mrb[48].mxu0 %vm610_vm3, %v6246_v63  ;;  %5010 = vmatmul.mubr.msk.bf16.vlgmr.msra.gmra.mrb[48].mxu1 %vm610_vm3, %v6246_v63 }
0x1162   : > { %3088 = vmatpush1.bf16.msra.mxu0 %v4981_v50  ;;  %3131 = vmatpush1.bf16.msra.mxu1 %v4983_v54  ;;  %v5006_v50 = vcombine.high %v2744_v42, %v2752_v43  ;;  %v5008_v54 = vcombine.high %v2745_v44, %v2753_v45 }
0x1163   : > { %3089 = vmatprep.subr.bf16.mxu0 %v4998_v2  ;;  %3132 = vmatprep.subr.bf16.mxu1 %v5000_v12  ;;  %v5612_v2 = vld [vmem:[%s5872_s18 + $0xa0] sm:$0xff]   ;;  %v5613_v12 = vld [vmem:[%s5872_s18 + $0x68] sm:$0xff]  }
0x1164   : > { %3119 = vmatprep.mubr.bf16.mxu0 %v5781_v46  ;;  %3162 = vmatprep.mubr.bf16.mxu1 %v5781_v46 }
0x1166   : > { %3090 = vmatpush1.bf16.msra.mxu0 %v4997_v18  ;;  %3133 = vmatpush1.bf16.msra.mxu1 %v4999_v28  ;;  %v5618_v18 = vld [vmem:[%s5872_s18 + $0xf0] sm:$0xff]  }
0x1167   : > { %3173 = vmatprep.subr.bf16.mxu0 %v4986_v29  ;;  %3216 = vmatprep.subr.bf16.mxu1 %v4988_v30  ;;  %v5619_v28 = vld [vmem:[%s5872_s18 + $0x30] sm:$0xff]   ;;  %v5621_v30 = vld [vmem:[%s5872_s18 + $0x78] sm:$0xff]  }
0x1168   : > { %v5620_v29 = vld [vmem:[%s5872_s18 + $0xb0] sm:$0xff]  }
0x1169   : > { %5011 = vmatmul.mubr.msk.bf16.vlgmr.msra.gmra.mrb[52].mxu0 %vm610_vm3, %v6246_v63  ;;  %5012 = vmatmul.mubr.msk.bf16.vlgmr.msra.gmra.mrb[52].mxu1 %vm610_vm3, %v6246_v63 }
0x116a   : > { %3174 = vmatpush1.bf16.msra.mxu0 %v4985_v19  ;;  %3217 = vmatpush1.bf16.msra.mxu1 %v4987_v20  ;;  %v5626_v19 = vld [vmem:[%s5872_s18 + $0x1c0] sm:$0xff]  }
0x116b   : > { %3175 = vmatprep.subr.bf16.mxu0 %v5002_v27  ;;  %3218 = vmatprep.subr.bf16.mxu1 %v5004_v34  ;;  %v2754_v20 = vld [vmem:[%s5882_s27] sm:$0xff] }
0x116c   : > { %3205 = vmatprep.mubr.bf16.mxu0 %v5781_v46  ;;  %3248 = vmatprep.mubr.bf16.mxu1 %v5781_v46  ;;  %v2761_v27 = vrot.slane %v2754_v20, %v5946_v24  ;;  %v2769_v34 = vrot.slane %v2754_v20, %v5987_v52  ;;  %v2765_v35 = vrot.slane %v2754_v20, %v5940_v22 }
0x116d   : > { %v2773_v36 = vrot.slane %v2754_v20, %v6196_v62 }
0x116e   : > { %3176 = vmatpush1.bf16.msra.mxu0 %v5001_v39  ;;  %3219 = vmatpush1.bf16.msra.mxu1 %v5003_v40  ;;  %v6329_v40 = vsub.s32 7, %v5937_v21 }
0x116f   : > { %3259 = vmatprep.subr.bf16.mxu0 %v4990_v47  ;;  %3302 = vmatprep.subr.bf16.mxu1 %v4992_v41 }
0x1171   : > { %5013 = vmatmul.mubr.msk.bf16.vlgmr.msra.gmra.mrb[56].mxu0 %vm610_vm3, %v6246_v63  ;;  %5014 = vmatmul.mubr.msk.bf16.vlgmr.msra.gmra.mrb[56].mxu1 %vm610_vm3, %v6246_v63 }
0x1172   : > { %3260 = vmatpush1.bf16.msra.mxu0 %v4989_v48  ;;  %3303 = vmatpush1.bf16.msra.mxu1 %v4991_v49 }
0x1173   : > { %3261 = vmatprep.subr.bf16.mxu0 %v5006_v50  ;;  %3304 = vmatprep.subr.bf16.mxu1 %v5008_v54 }
0x1174   : > { %3291 = vmatprep.mubr.bf16.mxu0 %v5781_v46  ;;  %3334 = vmatprep.mubr.bf16.mxu1 %v5781_v46  ;;  %v5599_v46 = vld [vmem:[%s5872_s18 + $0x8] sm:$0xff]  }
0x1176   : > { %3262 = vmatpush1.bf16.msra.mxu0 %v5005_v53  ;;  %3305 = vmatpush1.bf16.msra.mxu1 %v5007_v55 }
0x1177   : > { %5222 = vmatprep.subr.bf16.mxu0 %v5593_v57  ;;  %5244 = vmatprep.subr.bf16.mxu1 %v5594_v58  ;;  %v2777_v57 = vrot.slane %v2754_v20, %v6227_v60  ;;  %v2785_v58 = vrot.slane %v2754_v20, %v6326_v37 }
0x1179   : > { %5015 = vmatmul.mubr.msk.bf16.vlgmr.msra.gmra.mrb[60].mxu0 %vm610_vm3, %v6246_v63  ;;  %5016 = vmatmul.mubr.msk.bf16.vlgmr.msra.gmra.mrb[60].mxu1 %vm610_vm3, %v6246_v63  ;;  %v5611_v63 = vld [vmem:[%s5872_s18 + $0x20] sm:$0xff]  }
0x117a   : > { %5223 = vmatpush3.bf16.msra.mxu0 %v5595_v59  ;;  %5245 = vmatpush3.bf16.msra.mxu1 %v5596_v25  ;;  %v2781_v25 = vrot.slane %v2754_v20, %v6232_v0 }
0x117b   : > { %5224 = vmatprep.subr.bf16.mxu0 %v5597_v26  ;;  %5246 = vmatprep.subr.bf16.mxu1 %v5598_v61  ;;  %v2789_v26 = vrot.slane %v2754_v20, %v6329_v40 }
0x117e   : > { %5225 = vmatpush3.bf16.msra.mxu0 %v5599_v46  ;;  %5247 = vmatpush3.bf16.msra.mxu1 %v5600_v14 }
0x117f   : > { %5226 = vmatprep.subr.bf16.mxu0 %v5601_v1  ;;  %5248 = vmatprep.subr.bf16.mxu1 %v5602_v3 }
0x1182   : > { %5227 = vmatpush3.bf16.msra.mxu0 %v5603_v4  ;;  %5249 = vmatpush3.bf16.msra.mxu1 %v5604_v5 }
0x1183   : > { %5228 = vmatprep.subr.bf16.mxu0 %v5605_v6  ;;  %5250 = vmatprep.subr.bf16.mxu1 %v5606_v7  ;;  %v6336_v7 = vld [vmem:[%s5882_s27 + $0x8] sm:$0xff] }
0x1186   : > { %5229 = vmatpush3.bf16.msra.mxu0 %v5607_v8  ;;  %5251 = vmatpush3.bf16.msra.mxu1 %v5608_v9 }
0x1187   : > { %5230 = vmatprep.subr.bf16.mxu0 %v5609_v10  ;;  %5252 = vmatprep.subr.bf16.mxu1 %v5610_v11 }
0x118a   : > { %5231 = vmatpush3.bf16.msra.mxu0 %v5611_v63  ;;  %5253 = vmatpush3.bf16.msra.mxu1 %v5612_v2 }
0x118b   : > { %5232 = vmatprep.subr.bf16.mxu0 %v5613_v12  ;;  %5254 = vmatprep.subr.bf16.mxu1 %v5614_v23  ;;  %v5627_v12 = vld [vmem:[%s5872_s18 + $0x100] sm:$0xff]  }
0x118c   : > { %v5628_v23 = vld [vmem:[%s5872_s18 + $0x180] sm:$0xff]  }
0x118e   : > { %5233 = vmatpush3.bf16.msra.mxu0 %v5615_v13  ;;  %5255 = vmatpush3.bf16.msra.mxu1 %v5616_v15 }
0x118f   : > { %5234 = vmatprep.subr.bf16.mxu0 %v5617_v16  ;;  %5256 = vmatprep.subr.bf16.mxu1 %v5618_v18 }
0x1192   : > { %5235 = vmatpush3.bf16.msra.mxu0 %v5619_v28  ;;  %5257 = vmatpush3.bf16.msra.mxu1 %v5620_v29  ;;  %v5629_v28 = vld [vmem:[%s5872_s18 + $0x148] sm:$0xff]  }
0x1193   : > { %5236 = vmatprep.subr.bf16.mxu0 %v5621_v30  ;;  %5258 = vmatprep.subr.bf16.mxu1 %v5622_v31  ;;  %v5630_v29 = vld [vmem:[%s5872_s18 + $0x1c8] sm:$0xff]   ;;  %v2793_v30 = vrot.slane %v6336_v7, %v5946_v24  ;;  %v2797_v24 = vrot.slane %v6336_v7, %v5940_v22 }
0x1196   : > { %5237 = vmatpush3.bf16.msra.mxu0 %v5623_v32  ;;  %5259 = vmatpush3.bf16.msra.mxu1 %v5624_v33 }
0x1197   : > { %5266 = vmatprep.subr.bf16.mxu0 %v5625_v17  ;;  %5288 = vmatprep.subr.bf16.mxu1 %v5626_v19  ;;  %v2801_v19 = vrot.slane %v6336_v7, %v5987_v52  ;;  %v2805_v52 = vrot.slane %v6336_v7, %v6196_v62 }
0x1234   : > { %v3035_v38 = vpop.f32.mrb[48].mxu0  ;;  %v3078_v39 = vpop.f32.mrb[48].mxu1 }
0x1235   : > { %v3036_v47 = vadd.f32 %v3035_v38, %v2761_v27  ;;  %v3079_v41 = vadd.f32 %v3078_v39, %v2769_v34  ;;  %v3037_v42 = vpop.f32.mrb[49].mxu0  ;;  %v3080_v43 = vpop.f32.mrb[49].mxu1  ;;  %v5631_v39 = vld [vmem:[%s5872_s18 + $0x108] sm:$0xff]  }
0x1236   : > { %v3038_v44 = vadd.f32 %v3037_v42, %v2765_v35  ;;  %v3081_v45 = vadd.f32 %v3080_v43, %v2773_v36  ;;  %v3039_v48 = vpop.f32.mrb[50].mxu0  ;;  %v3082_v49 = vpop.f32.mrb[50].mxu1 }
0x1237   : > { %v3040_v50 = vadd.f32 %v3039_v48, %v2761_v27  ;;  %v3083_v54 = vadd.f32 %v3082_v49, %v2769_v34  ;;  %v3041_v53 = vpop.f32.mrb[51].mxu0  ;;  %v3084_v55 = vpop.f32.mrb[51].mxu1  ;;  %v3345_v61 = vmax.f32 %v3036_v47, 0.0  ;;  %v3347_v46 = vmax.f32 %v3079_v41, 0.0  ;;  %v5632_v47 = vld [vmem:[%s5872_s18 + $0x188] sm:$0xff]   ;;  %v5634_v48 = vld [vmem:[%s5872_s18 + $0x1d0] sm:$0xff]  }
0x1238   : > { %v3042_v59 = vadd.f32 %v3041_v53, %v2765_v35  ;;  %v3085_v21 = vadd.f32 %v3084_v55, %v2773_v36  ;;  %v3346_v3 = vmax.f32 %v3038_v44, 0.0  ;;  %v3348_v4 = vmax.f32 %v3081_v45, 0.0  ;;  %v5633_v45 = vld [vmem:[%s5872_s18 + $0x150] sm:$0xff]  }
0x1239   : > { %v3361_v14 = vmax.f32 %v3040_v50, 0.0  ;;  %v3363_v1 = vmax.f32 %v3083_v54, 0.0 }
0x123a   : > { %v3362_v5 = vmax.f32 %v3042_v59, 0.0  ;;  %v3364_v6 = vmax.f32 %v3085_v21, 0.0  ;;  %v5635_v21 = vld [vmem:[%s5872_s18 + $0x110] sm:$0xff]  }
0x123b   : > { %v3377_v8 = vpack.c.bf16 %v3361_v14, %v3345_v61  ;;  %v3379_v9 = vpack.c.bf16 %v3363_v1, %v3347_v46  ;;  %v5637_v1 = vld [vmem:[%s5872_s18 + $0x158] sm:$0xff]  }
0x123c   : > { %v3378_v10 = vpack.c.bf16 %v3362_v5, %v3346_v3  ;;  %v3380_v11 = vpack.c.bf16 %v3364_v6, %v3348_v4  ;;  %v3121_v63 = vpop.f32.mrb[52].mxu0  ;;  %v3164_v2 = vpop.f32.mrb[52].mxu1  ;;  %v5638_v3 = vld [vmem:[%s5872_s18 + $0x1d8] sm:$0xff]  }
0x123d   : > { %v3122_v13 = vadd.f32 %v3121_v63, %v2777_v57  ;;  %v3165_v15 = vadd.f32 %v3164_v2, %v2785_v58  ;;  %v3123_v16 = vpop.f32.mrb[53].mxu0  ;;  %v3166_v18 = vpop.f32.mrb[53].mxu1 }
0x123e   : > { %v3124_v31 = vadd.f32 %v3123_v16, %v2781_v25  ;;  %v3167_v32 = vadd.f32 %v3166_v18, %v2789_v26  ;;  %v3125_v33 = vpop.f32.mrb[54].mxu0  ;;  %v3168_v17 = vpop.f32.mrb[54].mxu1  ;;  %4453 = vmatprep.mubr.bf16.mxu0 %v3378_v10  ;;  %4494 = vmatprep.mubr.bf16.mxu1 %v3380_v11  ;;  %v5639_v16 = vld [vmem:[%s5872_s18 + $0x118] sm:$0xff]  }
0x123f   : > { %v3126_v20 = vadd.f32 %v3125_v33, %v2777_v57  ;;  %v3169_v27 = vadd.f32 %v3168_v17, %v2785_v58  ;;  %v3127_v34 = vpop.f32.mrb[55].mxu0  ;;  %v3170_v35 = vpop.f32.mrb[55].mxu1  ;;  %4454 = vmatmul.mubr.bf16.vlgmr.msra.gmra.mrb[64].mxu0 %v3377_v8  ;;  %4495 = vmatmul.mubr.bf16.vlgmr.msra.gmra.mrb[64].mxu1 %v3379_v9  ;;  %v3349_v41 = vmax.f32 %v3122_v13, 0.0  ;;  %v3351_v42 = vmax.f32 %v3165_v15, 0.0  ;;  %v5640_v18 = vld [vmem:[%s5872_s18 + $0x198] sm:$0xff]   ;;  %v5642_v33 = vld [vmem:[%s5872_s18 + $0x1e0] sm:$0xff]  }
0x1240   : > { %v3128_v36 = vadd.f32 %v3127_v34, %v2781_v25  ;;  %v3171_v38 = vadd.f32 %v3170_v35, %v2789_v26  ;;  %5267 = vmatpush3.bf16.msra.mxu0 %v5627_v12  ;;  %5289 = vmatpush3.bf16.msra.mxu1 %v5628_v23  ;;  %v3350_v22 = vmax.f32 %v3124_v31, 0.0  ;;  %v3352_v49 = vmax.f32 %v3167_v32, 0.0  ;;  %v5636_v25 = vld [vmem:[%s5872_s18 + $0x190] sm:$0xff]   ;;  %v5641_v32 = vld [vmem:[%s5872_s18 + $0x160] sm:$0xff]  }
0x1241   : > { %v3365_v43 = vmax.f32 %v3126_v20, 0.0  ;;  %v3367_v44 = vmax.f32 %v3169_v27, 0.0  ;;  %5268 = vmatprep.subr.bf16.mxu0 %v5629_v28  ;;  %5290 = vmatprep.subr.bf16.mxu1 %v5630_v29  ;;  %v2809_v9 = vrot.slane %v6336_v7, %v6227_v60  ;;  %v2817_v12 = vrot.slane %v6336_v7, %v6326_v37 }
0x1242   : > { %v3366_v50 = vmax.f32 %v3128_v36, 0.0  ;;  %v3368_v54 = vmax.f32 %v3171_v38, 0.0  ;;  %v2813_v23 = vrot.slane %v6336_v7, %v6232_v0  ;;  %v2821_v60 = vrot.slane %v6336_v7, %v6329_v40  ;;  %v5643_v38 = vld [vmem:[%s5872_s18 + $0x120] sm:$0xff]  }
0x1243   : > { %v6354_v53 = vpack.c.bf16 %v3365_v43, %v3349_v41  ;;  %v6356_v55 = vpack.c.bf16 %v3367_v44, %v3351_v42  ;;  %v5645_v43 = vld [vmem:[%s5872_s18 + $0x168] sm:$0xff]  }
0x1244   : > { %v3382_v62 = vpack.c.bf16 %v3366_v50, %v3350_v22  ;;  %v3384_v57 = vpack.c.bf16 %v3368_v54, %v3352_v49  ;;  %5269 = vmatpush3.bf16.msra.mxu0 %v5631_v39  ;;  %5291 = vmatpush3.bf16.msra.mxu1 %v5632_v47  ;;  %v3207_v58 = vpop.f32.mrb[56].mxu0  ;;  %v3250_v59 = vpop.f32.mrb[56].mxu1  ;;  %v5644_v39 = vld [vmem:[%s5872_s18 + $0x1a0] sm:$0xff]   ;;  %v5646_v44 = vld [vmem:[%s5872_s18 + $0x1e8] sm:$0xff]  }
0x1245   : > { %v3208_v26 = vadd.f32 %v3207_v58, %v2793_v30  ;;  %v3251_v61 = vadd.f32 %v3250_v59, %v2801_v19  ;;  %v3209_v46 = vpop.f32.mrb[57].mxu0  ;;  %v3252_v14 = vpop.f32.mrb[57].mxu1  ;;  %5270 = vmatprep.subr.bf16.mxu0 %v5633_v45  ;;  %5292 = vmatprep.subr.bf16.mxu1 %v5634_v48 }
0x1246   : > { %v3210_v4 = vadd.f32 %v3209_v46, %v2797_v24  ;;  %v3253_v5 = vadd.f32 %v3252_v14, %v2805_v52  ;;  %v3211_v6 = vpop.f32.mrb[58].mxu0  ;;  %v3254_v8 = vpop.f32.mrb[58].mxu1  ;;  %4535 = vmatprep.mubr.bf16.mxu0 %v3382_v62  ;;  %4576 = vmatprep.mubr.bf16.mxu1 %v3384_v57 }
0x1247   : > { %v3212_v10 = vadd.f32 %v3211_v6, %v2793_v30  ;;  %v3255_v11 = vadd.f32 %v3254_v8, %v2801_v19  ;;  %v3213_v63 = vpop.f32.mrb[59].mxu0  ;;  %v3256_v2 = vpop.f32.mrb[59].mxu1  ;;  %v3353_v28 = vmax.f32 %v3208_v26, 0.0  ;;  %v3355_v29 = vmax.f32 %v3251_v61, 0.0 }
0x1248   : > { %v3214_v13 = vadd.f32 %v3213_v63, %v2797_v24  ;;  %v3257_v15 = vadd.f32 %v3256_v2, %v2805_v52  ;;  %5271 = vmatpush3.bf16.msra.mxu0 %v5635_v21  ;;  %5293 = vmatpush3.bf16.msra.mxu1 %v5636_v25  ;;  %v3354_v0 = vmax.f32 %v3210_v4, 0.0  ;;  %v3356_v17 = vmax.f32 %v3253_v5, 0.0  ;;  %v5647_v21 = vld [vmem:[%s5872_s18 + $0x128] sm:$0xff]   ;;  %v5651_v2 = vld [vmem:[%s5872_s18 + $0x130] sm:$0xff]  }
0x1249   : > { %v3369_v30 = vmax.f32 %v3212_v10, 0.0  ;;  %v3371_v31 = vmax.f32 %v3255_v11, 0.0  ;;  %5272 = vmatprep.subr.bf16.mxu0 %v5637_v1  ;;  %5294 = vmatprep.subr.bf16.mxu1 %v5638_v3  ;;  %v5648_v25 = vld [vmem:[%s5872_s18 + $0x1a8] sm:$0xff]   ;;  %v5649_v1 = vld [vmem:[%s5872_s18 + $0x170] sm:$0xff]  }
0x124a   : > { %v3370_v19 = vmax.f32 %v3214_v13, 0.0  ;;  %v3372_v20 = vmax.f32 %v3257_v15, 0.0  ;;  %v5650_v3 = vld [vmem:[%s5872_s18 + $0x1f0] sm:$0xff]   ;;  %v5654_v13 = vld [vmem:[%s5872_s18 + $0x1f8] sm:$0xff]  }
0x124b   : > { %v6374_v27 = vpack.c.bf16 %v3369_v30, %v3353_v28  ;;  %v6376_v34 = vpack.c.bf16 %v3371_v31, %v3355_v29  ;;  %v5655_v15 = vld [vmem:[%s5872_s18 + $0x138] sm:$0xff]   ;;  %v5659_v28 = vld [vmem:[%s5872_s18 + $0x200] sm:$0xff]   ;;  %v5661_v30 = vld [vmem:[%s5872_s18 + $0x248] sm:$0xff]  }
0x124c   : > { %v6378_v7 = vpack.c.bf16 %v3370_v19, %v3354_v0  ;;  %v6380_v35 = vpack.c.bf16 %v3372_v20, %v3356_v17  ;;  %5273 = vmatpush3.bf16.msra.mxu0 %v5639_v16  ;;  %5295 = vmatpush3.bf16.msra.mxu1 %v5640_v18  ;;  %v3293_v24 = vpop.f32.mrb[60].mxu0  ;;  %v3336_v36 = vpop.f32.mrb[60].mxu1  ;;  %v5656_v16 = vld [vmem:[%s5872_s18 + $0x1b8] sm:$0xff]   ;;  %v5657_v18 = vld [vmem:[%s5872_s18 + $0x240] sm:$0xff]   ;;  %v5662_v31 = vld [vmem:[%s5872_s18 + $0x2c8] sm:$0xff]  }
0x124d   : > { %v3294_v47 = vadd.f32 %v3293_v24, %v2809_v9  ;;  %v3337_v52 = vadd.f32 %v3336_v36, %v2817_v12  ;;  %v3295_v41 = vpop.f32.mrb[61].mxu0  ;;  %v3338_v42 = vpop.f32.mrb[61].mxu1  ;;  %5274 = vmatprep.subr.bf16.mxu0 %v5641_v32  ;;  %5296 = vmatprep.subr.bf16.mxu1 %v5642_v33  ;;  %v5660_v29 = vld [vmem:[%s5872_s18 + $0x280] sm:$0xff]   ;;  %v5663_v32 = vld [vmem:[%s5872_s18 + $0x208] sm:$0xff]   ;;  %v5665_v0 = vld [vmem:[%s5872_s18 + $0x250] sm:$0xff]  }
0x124e   : > { %v3296_v45 = vadd.f32 %v3295_v41, %v2813_v23  ;;  %v3339_v48 = vadd.f32 %v3338_v42, %v2821_v60  ;;  %v3297_v22 = vpop.f32.mrb[62].mxu0  ;;  %v3340_v49 = vpop.f32.mrb[62].mxu1  ;;  %v5664_v33 = vld [vmem:[%s5872_s18 + $0x288] sm:$0xff]   ;;  %v5668_v17 = vld [vmem:[%s5872_s18 + $0x290] sm:$0xff]   ;;  %v5669_v19 = vld [vmem:[%s5872_s18 + $0x258] sm:$0xff]  }
0x124f   : > { %v3298_v50 = vadd.f32 %v3297_v22, %v2809_v9  ;;  %v3341_v54 = vadd.f32 %v3340_v49, %v2817_v12  ;;  %v3299_v62 = vpop.f32.mrb[63].mxu0  ;;  %v3342_v57 = vpop.f32.mrb[63].mxu1  ;;  %v3357_v26 = vmax.f32 %v3294_v47, 0.0  ;;  %v3359_v61 = vmax.f32 %v3337_v52, 0.0  ;;  %v5652_v12 = vld [vmem:[%s5872_s18 + $0x1b0] sm:$0xff]   ;;  %v5670_v20 = vld [vmem:[%s5872_s18 + $0x2d8] sm:$0xff]  }
0x1250   : > { %v3300_v58 = vadd.f32 %v3299_v62, %v2813_v23  ;;  %v3343_v59 = vadd.f32 %v3342_v57, %v2821_v60  ;;  %5275 = vmatpush3.bf16.msra.mxu0 %v5643_v38  ;;  %5297 = vmatpush3.bf16.msra.mxu1 %v5644_v39  ;;  %v3358_v4 = vmax.f32 %v3296_v45, 0.0  ;;  %v3360_v5 = vmax.f32 %v3339_v48, 0.0  ;;  %v5653_v23 = vld [vmem:[%s5872_s18 + $0x178] sm:$0xff]   ;;  %v5658_v60 = vld [vmem:[%s5872_s18 + $0x2c0] sm:$0xff]   ;;  %v5677_v47 = vld [vmem:[%s5872_s18 + $0x268] sm:$0xff]  }
0x1251   : > { %v3373_v46 = vmax.f32 %v3298_v50, 0.0  ;;  %v3375_v14 = vmax.f32 %v3341_v54, 0.0  ;;  %5276 = vmatprep.subr.bf16.mxu0 %v5645_v43  ;;  %5298 = vmatprep.subr.bf16.mxu1 %v5646_v44  ;;  %v5673_v24 = vld [vmem:[%s5872_s18 + $0x260] sm:$0xff]   ;;  %v5678_v52 = vld [vmem:[%s5872_s18 + $0x2e8] sm:$0xff]   ;;  %v5681_v43 = vld [vmem:[%s5872_s18 + $0x270] sm:$0xff]  }
0x1252   : > { %v3374_v6 = vmax.f32 %v3300_v58, 0.0  ;;  %v3376_v8 = vmax.f32 %v3343_v59, 0.0  ;;  %v5674_v36 = vld [vmem:[%s5872_s18 + $0x2e0] sm:$0xff]   ;;  %v5679_v41 = vld [vmem:[%s5872_s18 + $0x228] sm:$0xff]   ;;  %v5682_v44 = vld [vmem:[%s5872_s18 + $0x2f0] sm:$0xff]  }
0x1253   : > { %v6390_v9 = vpack.c.bf16 %v3373_v46, %v3357_v26  ;;  %v6392_v10 = vpack.c.bf16 %v3375_v14, %v3359_v61  ;;  %v5675_v38 = vld [vmem:[%s5872_s18 + $0x220] sm:$0xff]   ;;  %v5680_v42 = vld [vmem:[%s5872_s18 + $0x2a8] sm:$0xff]   ;;  %v5683_v45 = vld [vmem:[%s5872_s18 + $0x230] sm:$0xff]  }
0x1254   : > { %v6394_v11 = vpack.c.bf16 %v3374_v6, %v3358_v4  ;;  %v6396_v63 = vpack.c.bf16 %v3376_v8, %v3360_v5  ;;  %5277 = vmatpush3.bf16.msra.mxu0 %v5647_v21  ;;  %5299 = vmatpush3.bf16.msra.mxu1 %v5648_v25  ;;  %v5676_v39 = vld [vmem:[%s5872_s18 + $0x2a0] sm:$0xff]   ;;  %v5684_v48 = vld [vmem:[%s5872_s18 + $0x2b0] sm:$0xff]   ;;  %v5685_v22 = vld [vmem:[%s5872_s18 + $0x278] sm:$0xff]  }
0x1255   : > { %5278 = vmatprep.subr.bf16.mxu0 %v5649_v1  ;;  %5300 = vmatprep.subr.bf16.mxu1 %v5650_v3  ;;  %v5686_v49 = vld [vmem:[%s5872_s18 + $0x2f8] sm:$0xff]   ;;  %v5689_v62 = vld [vmem:[%s5872_s18 + $0x340] sm:$0xff]   ;;  %v5693_v21 = vld [vmem:[%s5872_s18 + $0x348] sm:$0xff]  }
0x1256   : > { %v5687_v50 = vld [vmem:[%s5872_s18 + $0x238] sm:$0xff]   ;;  %v5690_v57 = vld [vmem:[%s5872_s18 + $0x3c0] sm:$0xff]   ;;  %v5694_v25 = vld [vmem:[%s5872_s18 + $0x3c8] sm:$0xff]  }
0x1257   : > { %v5688_v54 = vld [vmem:[%s5872_s18 + $0x2b8] sm:$0xff]   ;;  %v5691_v58 = vld [vmem:[%s5872_s18 + $0x300] sm:$0xff]   ;;  %v5695_v26 = vld [vmem:[%s5872_s18 + $0x308] sm:$0xff]  }
0x1258   : > { %5279 = vmatpush3.bf16.msra.mxu0 %v5651_v2  ;;  %5301 = vmatpush3.bf16.msra.mxu1 %v5652_v12  ;;  %v5692_v59 = vld [vmem:[%s5872_s18 + $0x380] sm:$0xff]   ;;  %v5696_v61 = vld [vmem:[%s5872_s18 + $0x388] sm:$0xff]   ;;  %v5697_v46 = vld [vmem:[%s5872_s18 + $0x350] sm:$0xff]  }
0x1259   : > { %5280 = vmatprep.subr.bf16.mxu0 %v5653_v23  ;;  %5302 = vmatprep.subr.bf16.mxu1 %v5654_v13  ;;  %v5700_v14 = vld [vmem:[%s5872_s18 + $0x390] sm:$0xff]   ;;  %v5701_v1 = vld [vmem:[%s5872_s18 + $0x358] sm:$0xff]   ;;  %v5705_v6 = vld [vmem:[%s5872_s18 + $0x360] sm:$0xff]  }
0x125a   : > { %v5702_v3 = vld [vmem:[%s5872_s18 + $0x3d8] sm:$0xff]   ;;  %v5706_v8 = vld [vmem:[%s5872_s18 + $0x3e0] sm:$0xff]   ;;  %v5709_v2 = vld [vmem:[%s5872_s18 + $0x368] sm:$0xff]  }
0x125b   : > { %v5703_v4 = vld [vmem:[%s5872_s18 + $0x318] sm:$0xff]   ;;  %v5710_v12 = vld [vmem:[%s5872_s18 + $0x3e8] sm:$0xff]  }
0x125c   : > { %5281 = vmatpush3.bf16.msra.mxu0 %v5655_v15  ;;  %5303 = vmatpush3.bf16.msra.mxu1 %v5656_v16  ;;  %v5704_v5 = vld [vmem:[%s5872_s18 + $0x398] sm:$0xff]   ;;  %v5711_v23 = vld [vmem:[%s5872_s18 + $0x328] sm:$0xff]   ;;  %v5713_v15 = vld [vmem:[%s5872_s18 + $0x370] sm:$0xff]  }
0x125d   : > { %5310 = vmatprep.subr.bf16.mxu0 %v5657_v18  ;;  %5332 = vmatprep.subr.bf16.mxu1 %v5658_v60  ;;  %v5712_v13 = vld [vmem:[%s5872_s18 + $0x3a8] sm:$0xff]   ;;  %v5714_v16 = vld [vmem:[%s5872_s18 + $0x3f0] sm:$0xff]  }
0x125e   : > { %v5715_v18 = vld [vmem:[%s5872_s18 + $0x330] sm:$0xff]  }
0x125f   : > { %4536 = vmatmul.mubr.bf16.vlgmr.msra.gmra.mrb[68].mxu0 %v6354_v53  ;;  %4577 = vmatmul.mubr.bf16.vlgmr.msra.gmra.mrb[68].mxu1 %v6356_v55  ;;  %v5666_v53 = vld [vmem:[%s5872_s18 + $0x2d0] sm:$0xff]  }
0x1260   : > { %5311 = vmatpush3.bf16.msra.mxu0 %v5659_v28  ;;  %4617 = vmatprep.mubr.bf16.mxu0 %v6378_v7  ;;  %v5667_v55 = vld [vmem:[%s5872_s18 + $0x210] sm:$0xff]   ;;  %v5671_v7 = vld [vmem:[%s5872_s18 + $0x218] sm:$0xff]  }
0x1261   : > { %5333 = vmatpush3.bf16.msra.mxu1 %v5660_v29  ;;  %4658 = vmatprep.mubr.bf16.mxu1 %v6380_v35  ;;  %v5672_v35 = vld [vmem:[%s5872_s18 + $0x298] sm:$0xff]   ;;  %v5716_v60 = vld [vmem:[%s5872_s18 + $0x3b0] sm:$0xff]  }
0x1262   : > { %5312 = vmatprep.subr.bf16.mxu0 %v5661_v30  ;;  %5334 = vmatprep.subr.bf16.mxu1 %v5662_v31  ;;  %v5717_v28 = vld [vmem:[%s5872_s18 + $0x378] sm:$0xff]  }
0x1263   : > { %v5718_v29 = vld [vmem:[%s5872_s18 + $0x3f8] sm:$0xff]  }
0x1264   : > { %5313 = vmatpush3.bf16.msra.mxu0 %v5663_v32  ;;  %v5719_v30 = vld [vmem:[%s5872_s18 + $0x338] sm:$0xff]  }
0x1265   : > { %5335 = vmatpush3.bf16.msra.mxu1 %v5664_v33  ;;  %5314 = vmatprep.subr.bf16.mxu0 %v5665_v0  ;;  %v5720_v31 = vld [vmem:[%s5872_s18 + $0x3b8] sm:$0xff]   ;;  %v6479_v0 = vld [vmem:[%s5877_s21] sm:$0xff] }
0x1266   : > { %5336 = vmatprep.subr.bf16.mxu1 %v5666_v53  ;;  %v3652_v53 = vrot.slane %v6479_v0, %v6326_v37 }
0x1268   : > { %5315 = vmatpush3.bf16.msra.mxu0 %v5667_v55 }
0x1269   : > { %5337 = vmatpush3.bf16.msra.mxu1 %v5668_v17  ;;  %5316 = vmatprep.subr.bf16.mxu0 %v5669_v19 }
0x126a   : > { %5338 = vmatprep.subr.bf16.mxu1 %v5670_v20 }
0x126c   : > { %5317 = vmatpush3.bf16.msra.mxu0 %v5671_v7 }
0x126d   : > { %5339 = vmatpush3.bf16.msra.mxu1 %v5672_v35  ;;  %5318 = vmatprep.subr.bf16.mxu0 %v5673_v24 }
0x126e   : > { %5340 = vmatprep.subr.bf16.mxu1 %v5674_v36 }
0x1270   : > { %5319 = vmatpush3.bf16.msra.mxu0 %v5675_v38 }
0x1271   : > { %5341 = vmatpush3.bf16.msra.mxu1 %v5676_v39  ;;  %5320 = vmatprep.subr.bf16.mxu0 %v5677_v47 }
0x1272   : > { %5342 = vmatprep.subr.bf16.mxu1 %v5678_v52 }
0x1274   : > { %5321 = vmatpush3.bf16.msra.mxu0 %v5679_v41 }
0x1275   : > { %5343 = vmatpush3.bf16.msra.mxu1 %v5680_v42  ;;  %5322 = vmatprep.subr.bf16.mxu0 %v5681_v43 }
0x1276   : > { %5344 = vmatprep.subr.bf16.mxu1 %v5682_v44 }
0x1278   : > { %5323 = vmatpush3.bf16.msra.mxu0 %v5683_v45 }
0x1279   : > { %5345 = vmatpush3.bf16.msra.mxu1 %v5684_v48  ;;  %5324 = vmatprep.subr.bf16.mxu0 %v5685_v22 }
0x127a   : > { %5346 = vmatprep.subr.bf16.mxu1 %v5686_v49 }
0x127c   : > { %5325 = vmatpush3.bf16.msra.mxu0 %v5687_v50 }
0x127d   : > { %5347 = vmatpush3.bf16.msra.mxu1 %v5688_v54  ;;  %5354 = vmatprep.subr.bf16.mxu0 %v5689_v62 }
0x127e   : > { %5376 = vmatprep.subr.bf16.mxu1 %v5690_v57 }
0x127f   : > { %4618 = vmatmul.mubr.bf16.vlgmr.msra.gmra.mrb[72].mxu0 %v6374_v27  ;;  %v5698_v27 = vld [vmem:[%s5872_s18 + $0x3d0] sm:$0xff]  }
0x1280   : > { %4659 = vmatmul.mubr.bf16.vlgmr.msra.gmra.mrb[72].mxu1 %v6376_v34  ;;  %5355 = vmatpush3.bf16.msra.mxu0 %v5691_v58  ;;  %v5699_v34 = vld [vmem:[%s5872_s18 + $0x310] sm:$0xff]  }
0x1281   : > { %4699 = vmatprep.mubr.bf16.mxu0 %v6394_v11  ;;  %5377 = vmatpush3.bf16.msra.mxu1 %v5692_v59  ;;  %v5707_v11 = vld [vmem:[%s5872_s18 + $0x320] sm:$0xff]  }
0x1282   : > { %4740 = vmatprep.mubr.bf16.mxu1 %v6396_v63  ;;  %5356 = vmatprep.subr.bf16.mxu0 %v5693_v21  ;;  %v5708_v63 = vld [vmem:[%s5872_s18 + $0x3a0] sm:$0xff]  }
0x1283   : > { %5378 = vmatprep.subr.bf16.mxu1 %v5694_v25 }
0x1284   : > { %5357 = vmatpush3.bf16.msra.mxu0 %v5695_v26 }
0x1285   : > { %5379 = vmatpush3.bf16.msra.mxu1 %v5696_v61  ;;  %5358 = vmatprep.subr.bf16.mxu0 %v5697_v46 }
0x1286   : > { %5380 = vmatprep.subr.bf16.mxu1 %v5698_v27 }
0x1288   : > { %5359 = vmatpush3.bf16.msra.mxu0 %v5699_v34 }
0x1289   : > { %5381 = vmatpush3.bf16.msra.mxu1 %v5700_v14  ;;  %5360 = vmatprep.subr.bf16.mxu0 %v5701_v1 }
0x128a   : > { %5382 = vmatprep.subr.bf16.mxu1 %v5702_v3 }
0x128c   : > { %5361 = vmatpush3.bf16.msra.mxu0 %v5703_v4 }
0x128d   : > { %5383 = vmatpush3.bf16.msra.mxu1 %v5704_v5  ;;  %5362 = vmatprep.subr.bf16.mxu0 %v5705_v6 }
0x128e   : > { %5384 = vmatprep.subr.bf16.mxu1 %v5706_v8 }
0x1290   : > { %5363 = vmatpush3.bf16.msra.mxu0 %v5707_v11 }
0x1291   : > { %5385 = vmatpush3.bf16.msra.mxu1 %v5708_v63  ;;  %5364 = vmatprep.subr.bf16.mxu0 %v5709_v2 }
0x1292   : > { %5386 = vmatprep.subr.bf16.mxu1 %v5710_v12 }
0x1294   : > { %5365 = vmatpush3.bf16.msra.mxu0 %v5711_v23 }
0x1295   : > { %5387 = vmatpush3.bf16.msra.mxu1 %v5712_v13  ;;  %5366 = vmatprep.subr.bf16.mxu0 %v5713_v15 }
0x1296   : > { %5388 = vmatprep.subr.bf16.mxu1 %v5714_v16 }
0x1298   : > { %5367 = vmatpush3.bf16.msra.mxu0 %v5715_v18 }
0x1299   : > { %5389 = vmatpush3.bf16.msra.mxu1 %v5716_v60  ;;  %5368 = vmatprep.subr.bf16.mxu0 %v5717_v28 }
0x129a   : > { %5390 = vmatprep.subr.bf16.mxu1 %v5718_v29 }
0x129c   : > { %5369 = vmatpush3.bf16.msra.mxu0 %v5719_v30 }
0x129d   : > { %5391 = vmatpush3.bf16.msra.mxu1 %v5720_v31 }
0x129f   : > { %4700 = vmatmul.mubr.bf16.vlgmr.msra.gmra.mrb[76].mxu0 %v6390_v9 }
0x12a0   : > { %4741 = vmatmul.mubr.bf16.vlgmr.msra.gmra.mrb[76].mxu1 %v6392_v10 }
0x1312   : > { %v5238_v32 = vpop.f32.mrb[64].mxu0  ;;  %v5260_v33 = vpop.f32.mrb[64].mxu1 }
0x1313   : > { %v5239_v55 = vpop.f32.mrb[65].mxu0  ;;  %v5261_v17 = vpop.f32.mrb[65].mxu1 }
0x1314   : > { %v5240_v19 = vadd.f32 %v5239_v55, %v5238_v32  ;;  %v5262_v20 = vadd.f32 %v5261_v17, %v5260_v33  ;;  %v5241_v7 = vpop.f32.mrb[66].mxu0  ;;  %v5263_v35 = vpop.f32.mrb[66].mxu1 }
0x1315   : > { %v5242_v24 = vpop.f32.mrb[67].mxu0  ;;  %v5264_v36 = vpop.f32.mrb[67].mxu1 }
0x1316   : > { %v4456_v38 = vadd.f32 %v5240_v19, %v3652_v53  ;;  %v5243_v39 = vadd.f32 %v5242_v24, %v5241_v7  ;;  %v5265_v9 = vadd.f32 %v5264_v36, %v5263_v35 }
0x1318   : > { %v4497_v47 = vadd.f32 %v5262_v20, %v4456_v38  ;;  %v4459_v10 = vadd.f32 %v5243_v39, %v3652_v53 }
0x131a   : > { %v4500_v52 = vadd.f32 %v5265_v9, %v4459_v10 }
0x1332   : > { %v5282_v41 = vpop.f32.mrb[68].mxu0  ;;  %v5304_v42 = vpop.f32.mrb[68].mxu1 }
0x1333   : > { %v5283_v43 = vpop.f32.mrb[69].mxu0  ;;  %v5305_v44 = vpop.f32.mrb[69].mxu1 }
0x1334   : > { %v5284_v45 = vadd.f32 %v5283_v43, %v5282_v41  ;;  %v5306_v37 = vadd.f32 %v5305_v44, %v5304_v42  ;;  %v5285_v48 = vpop.f32.mrb[70].mxu0  ;;  %v5307_v22 = vpop.f32.mrb[70].mxu1 }
0x1335   : > { %v5286_v49 = vpop.f32.mrb[71].mxu0  ;;  %v5308_v50 = vpop.f32.mrb[71].mxu1 }
0x1336   : > { %v4538_v54 = vadd.f32 %v5284_v45, %v4497_v47  ;;  %v5287_v62 = vadd.f32 %v5286_v49, %v5285_v48  ;;  %v5309_v57 = vadd.f32 %v5308_v50, %v5307_v22  ;;  %v4780_v48 = vrot.slane %v6479_v0, %v6329_v40  ;;  %v5145_v50 = vld [vmem:[%s5877_s21 + $0x8] ss:$0 sm:$0xff] }
0x1338   : > { %v4579_v58 = vadd.f32 %v5306_v37, %v4538_v54  ;;  %v4541_v59 = vadd.f32 %v5287_v62, %v4500_v52 }
0x133a   : > { %v4582_v21 = vadd.f32 %v5309_v57, %v4541_v59 }
0x1352   : > { %v5326_v25 = vpop.f32.mrb[72].mxu0 }
0x1353   : > { %v5348_v26 = vpop.f32.mrb[72].mxu1  ;;  %v5327_v61 = vpop.f32.mrb[73].mxu0 }
0x1354   : > { %v5328_v46 = vadd.f32 %v5327_v61, %v5326_v25  ;;  %v5349_v27 = vpop.f32.mrb[73].mxu1  ;;  %v5329_v34 = vpop.f32.mrb[74].mxu0 }
0x1355   : > { %v5350_v14 = vadd.f32 %v5349_v27, %v5348_v26  ;;  %v5351_v1 = vpop.f32.mrb[74].mxu1  ;;  %v5330_v3 = vpop.f32.mrb[75].mxu0 }
0x1356   : > { %v4620_v4 = vadd.f32 %v5328_v46, %v4579_v58  ;;  %v5331_v5 = vadd.f32 %v5330_v3, %v5329_v34  ;;  %v5352_v6 = vpop.f32.mrb[75].mxu1 }
0x1357   : > { %v5353_v8 = vadd.f32 %v5352_v6, %v5351_v1 }
0x1358   : > { %v4661_v11 = vadd.f32 %v5350_v14, %v4620_v4  ;;  %v4623_v63 = vadd.f32 %v5331_v5, %v4582_v21 }
0x135a   : > { %v4664_v2 = vadd.f32 %v5353_v8, %v4623_v63 }
0x1372   : > { %v5370_v12 = vpop.f32.mrb[76].mxu0 }
0x1373   : > { %v5392_v23 = vpop.f32.mrb[76].mxu1  ;;  %v5371_v13 = vpop.f32.mrb[77].mxu0 }
0x1374   : > { %v5372_v15 = vadd.f32 %v5371_v13, %v5370_v12  ;;  %v5393_v16 = vpop.f32.mrb[77].mxu1  ;;  %v5373_v18 = vpop.f32.mrb[78].mxu0 }
0x1375   : > { %v5394_v60 = vadd.f32 %v5393_v16, %v5392_v23  ;;  %v5395_v28 = vpop.f32.mrb[78].mxu1  ;;  %v5374_v29 = vpop.f32.mrb[79].mxu0 }
0x1376   : > { %v4702_v30 = vadd.f32 %v5372_v15, %v4661_v11  ;;  %v5375_v31 = vadd.f32 %v5374_v29, %v5373_v18  ;;  %v5396_v32 = vpop.f32.mrb[79].mxu1  ;;  %v5147_v15 = vld [vmem:[%s6533_s5] ss:$0 sm:$0xff] (!%p5146_p5) }
0x1377   : > { %v5397_v33 = vadd.f32 %v5396_v32, %v5395_v28  ;;  %v5148_v18 = vld [vmem:[%s6534_s6] ss:$0 sm:$0xff] (!%p5146_p5) }
0x1378   : > { %v4743_v53 = vadd.f32 %v5394_v60, %v4702_v30  ;;  %v4705_v55 = vadd.f32 %v5375_v31, %v4664_v2 }
0x137a   : > { %v4746_v17 = vadd.f32 %v5397_v33, %v4705_v55  ;;  %v4749_v19 = vadd.f32 %v4743_v53, %v6240_v51 }
0x137c   : > { %v4751_v20 = vsel %vm610_vm3, %v4749_v19, 0.0  ;;  %v4750_v7 = vadd.f32 %v4746_v17, %v6242_v56 }
0x137d   : > { %4752 = vadd.xlane.f32.xlu1 %v4751_v20 }
0x137e   : > { %v4754_v35 = vsel %vm610_vm3, %v4750_v7, 0.0 }
0x1381   : > { %4755 = vadd.xlane.f32.xlu1 %v4754_v35 }
0x140a   : > { %v4753_v24 = vpop.xlane.xlu1 %4752 }
0x140b   : > { %v4757_v36 = vmul.f32 0.03125, %v4753_v24 }
0x140d   : > { %v4759_v38 = vsub.f32 %v4749_v19, %v4757_v36 }
0x140e   : > { %v4756_v39 = vpop.xlane.xlu1 %4755 }
0x140f   : > { %v4758_v9 = vmul.f32 0.03125, %v4756_v39  ;;  %v4761_v47 = vmul.f32 %v4759_v38, %v4759_v38 }
0x1411   : > { %v4760_v10 = vsub.f32 %v4750_v7, %v4758_v9  ;;  %v4763_v52 = vsel %vm610_vm3, %v4761_v47, 0.0 }
0x1412   : > { %4764 = vadd.xlane.f32.xlu0 %v4763_v52 }
0x1413   : > { %v4762_v51 = vmul.f32 %v4760_v10, %v4760_v10 }
0x1415   : > { %v4766_v41 = vsel %vm610_vm3, %v4762_v51, 0.0 }
0x1416   : > { %4767 = vadd.xlane.f32.xlu1 %v4766_v41 }
0x149f   : > { %v4765_v56 = vpop.xlane.xlu0 %4764 }
0x14a0   : > { %v4769_v42 = vmul.f32 0.03125, %v4765_v56 }
0x14a2   : > { %v4771_v43 = vadd.f32 1e-05, %v4769_v42 }
0x14a3   : > { %v4768_v44 = vpop.xlane.xlu1 %4767 }
0x14a4   : > { %5757 = vrsqrt.f32 %v4771_v43  ;;  %v4770_v45 = vmul.f32 0.03125, %v4768_v44 }
0x14a6   : > { %v4772_v37 = vadd.f32 1e-05, %v4770_v45 }
0x14a8   : > { %5759 = vrsqrt.f32 %v4772_v37 }
0x14ae   : > { %v5758_v22 = vpop.eup %5757 }
0x14af   : > { %v4775_v49 = vmul.f32 %v5758_v22, %v4759_v38 }
0x14b1   : > { %v4781_v54 = vmul.f32 %v4780_v48, %v4775_v49 }
0x14b2   : > { %v5760_v62 = vpop.eup %5759 }
0x14b3   : > { %v4787_v57 = vadd.f32 %v5145_v50, %v4781_v54  ;;  %v4776_v58 = vmul.f32 %v5760_v62, %v4760_v10  ;;  %4794 = sbr.rel (%p5146_p5) target bundleno = 5627 (0x15fb), region = 76 }
0x14b5   : > { %4789 = vst.msk [vmem:[%s6540_s12] sm:$0xff] %vm610_vm3, %v4787_v57  ;;  %v4782_v59 = vmul.f32 %v4780_v48, %v4776_v58 }
0x14b7   : > { %v4788_v21 = vadd.f32 %v5145_v50, %v4782_v59 }
0x14b9   : > { %4790 = vst.msk [vmem:[%s6540_s12 + $0x8] sm:$0xff] %vm610_vm3, %v4788_v21 }
0x14bc   : > { %v4795_v40 = vld [vmem:[%s6540_s12] sm:$0xff] }
0x14bd   : > { %v4799_v25 = vsel %vm610_vm3, %v4795_v40, 0.0 }
0x14be   : > { %4800 = vadd.xlane.f32.xlu0 %v4799_v25 }
0x14c0   : > { %v4796_v0 = vld [vmem:[%s6540_s12 + $0x8] sm:$0xff] }
0x14c1   : > { %v4802_v26 = vsel %vm610_vm3, %v4796_v0, 0.0 }
0x14c2   : > { %4803 = vadd.xlane.f32.xlu0 %v4802_v26 }
0x154b   : > { %v4801_v61 = vpop.xlane.xlu0 %4800 }
0x154c   : > { %v4805_v46 = vmul.f32 0.03125, %v4801_v61 }
0x154e   : > { %v4807_v27 = vsub.f32 %v4795_v40, %v4805_v46 }
0x154f   : > { %v4804_v34 = vpop.xlane.xlu0 %4803 }
0x1550   : > { %v4806_v14 = vmul.f32 0.03125, %v4804_v34  ;;  %v4809_v1 = vmul.f32 %v4807_v27, %v4807_v27 }
0x1552   : > { %v4808_v3 = vsub.f32 %v4796_v0, %v4806_v14  ;;  %v4811_v4 = vsel %vm610_vm3, %v4809_v1, 0.0 }
0x1553   : > { %4812 = vadd.xlane.f32.xlu1 %v4811_v4 }
0x1554   : > { %v4810_v5 = vmul.f32 %v4808_v3, %v4808_v3 }
0x1556   : > { %v4814_v6 = vsel %vm610_vm3, %v4810_v5, 0.0 }
0x1557   : > { %4815 = vadd.xlane.f32.xlu1 %v4814_v6 }
0x15e0   : > { %v4813_v8 = vpop.xlane.xlu1 %4812 }
0x15e1   : > { %v4817_v11 = vmul.f32 0.03125, %v4813_v8 }
0x15e3   : > { %v4819_v63 = vadd.f32 1e-05, %v4817_v11 }
0x15e4   : > { %v4816_v2 = vpop.xlane.xlu1 %4815 }
0x15e5   : > { %5764 = vrsqrt.f32 %v4819_v63  ;;  %v4818_v12 = vmul.f32 0.03125, %v4816_v2 }
0x15e7   : > { %v4820_v23 = vadd.f32 1e-05, %v4818_v12 }
0x15e9   : > { %5766 = vrsqrt.f32 %v4820_v23 }
0x15ef   : > { %v5765_v13 = vpop.eup %5764 }
0x15f0   : > { %v4823_v16 = vmul.f32 %v5765_v13, %v4807_v27 }
0x15f2   : > { %v4831_v60 = vmul.f32 %v5147_v15, %v4823_v16 }
0x15f3   : > { %v5767_v28 = vpop.eup %5766 }
0x15f4   : > { %v4839_v29 = vadd.f32 %v5148_v18, %v4831_v60  ;;  %v4824_v30 = vmul.f32 %v5767_v28, %v4808_v3 }
0x15f6   : > { %4841 = vst.msk [vmem:[%s6540_s12] sm:$0xff] %vm610_vm3, %v4839_v29  ;;  %v4832_v31 = vmul.f32 %v5147_v15, %v4824_v30 }
0x15f8   : > { %v4840_v32 = vadd.f32 %v5148_v18, %v4832_v31 }
0x15fa   : > { %4842 = vst.msk [vmem:[%s6540_s12 + $0x8] sm:$0xff] %vm610_vm3, %v4840_v32 }
0x15fb PF: > { %s6543_s29 = sld [smem:[#allocation2_spill]] }
0x1601   : > { %s22_s21 = sadd.s32 1, %s6543_s29  }
0x1602   : > { %p19_p6 = scmp.ge.s32.totalorder %s22_s21, 8  }
0x1604   :  { %21 = sbr.rel (!%p19_p6) target bundleno = 1 (0x1), region = 114 }

// kernel: model_forward.3
= control target key start
LH: loop header
LB: loop body
LE: loop exit
PB: predicated region body
PF: predicated region fallthrough
CT: control target
= control target key end

     0   :  { %s8428_s18 = smov 0   ;;  %s9412_s0 = inlined_call_operand.vmem [shape: f32[16,3], index: 0, kind: input, shape index: {}]   ;;  %s9413_s1 = inlined_call_operand.vmem [shape: f32[3,32], index: 1, kind: input, shape index: {}]   ;;  %s9414_s2 = inlined_call_operand.vmem [shape: f32[1,32], index: 2, kind: input, shape index: {}]   ;;  %s9415_s3 = inlined_call_operand.vmem [shape: f32[16,32], index: 3, kind: input, shape index: {}]   ;;  %s9416_s4 = inlined_call_operand.vmem [shape: f32[16,32], index: 4, kind: input, shape index: {}]   ;;  %s9417_s5 = inlined_call_operand.vmem [shape: f32[8,8], index: 5, kind: input, shape index: {}]   ;;  %s9418_s6 = inlined_call_operand.vmem [shape: f32[8,8], index: 6, kind: input, shape index: {}]   ;;  %s9419_s7 = inlined_call_operand.vmem [shape: f32[1,32], index: 7, kind: input, shape index: {}]   ;;  %s9420_s8 = inlined_call_operand.vmem [shape: f32[1,32], index: 8, kind: input, shape index: {}]   ;;  %s9421_s9 = inlined_call_operand.vmem [shape: bf16[6,16,8,32], index: 9, kind: input, shape index: {}]   ;;  %s9422_s10 = inlined_call_operand.vmem [shape: bf16[6,16,8,32], index: 10, kind: input, shape index: {}]   ;;  %s9423_s11 = inlined_call_operand.vmem [shape: bf16[6,32,2048], index: 11, kind: input, shape index: {}]   ;;  %s9424_s12 = inlined_call_operand.vmem [shape: bf16[6,2048,32], index: 12, kind: input, shape index: {}]   ;;  %s9425_s13 = inlined_call_operand.vmem [shape: f32[6,15,32], index: 13, kind: input, shape index: {}]   ;;  %s9426_s14 = inlined_call_operand.vmem [shape: f32[6,1,2048], index: 14, kind: input, shape index: {}]   ;;  %s9427_s15 = inlined_call_operand.vmem [shape: f32[16,32], index: 15, kind: output, shape index: {}]  }
   0x1   :  { %9429 = sst [smem:[#allocation3_spill]] %s9418_s6 }
   0x2   :  { %9430 = sst [smem:[#allocation4_spill]] %s9419_s7 }
   0x3   :  { %9431 = sst [smem:[#allocation5_spill]] %s9420_s8 }
   0x4   :  { %9432 = sst [smem:[#allocation6_spill]] %s9421_s9 }
   0x5 LB: > { %9433 = sst [smem:[#allocation2_spill]] %s8340_s18  ;;  %s8434_s19 = sadd.s32 4294967295, %s8340_s18   ;;  %s8340_s18 = sphi %s8428_s18, %s25_s18  }
   0x6   : > { %p7170_p0 = scmp.ge.s32.totalorder %s8340_s18, 1  ;;  %p481_p1 = scmp.lt.s32.totalorder %s8340_s18, 7 }
   0x8   : > { %p482_p2 = pnand %p7170_p0, %p481_p1 }
   0x9   : > { %p548_p3 = scmp.lt.s32.totalorder (!%p482_p2), %s8434_s19, 5  ;;  %s9434_s9 = sld [smem:[#allocation6_spill]] (!%p482_p2) }
   0xa   : > { %485 = sbr.rel (%p482_p2) target bundleno = 9833 (0x2669), region = 80  ;;  %p7182_p4 = scmp.ne.s32.totalorder (!%p482_p2), %s8434_s19, 0 }
  0x11   : > { %s549_s20 = scalar_select %p548_p3, %s8434_s19, 5 }
  0x12   : > { %581 = sbr.rel (%p7182_p4) target bundleno = 239 (0xef), region = 84  ;;  %v584_v0 = vld [vmem:[%s9413_s1] sm:$0x7] (!%p7182_p4)  ;;  %vm599_vm0 = vcmask (!%p7182_p4), 1042432   ;;  %vm592_vm1 = vcmask (!%p7182_p4), 23552   ;;  %v583_v2 = vld [vmem:[%s9412_s0 + $0x8] sm:$0xff] (!%p7182_p4) }
  0x13   : > { %s7440_s21 = sshll.u32 %s549_s20, 6  ;;  %s7442_s22 = sshll.u32 %s549_s20, 8  ;;  %v582_v1 = vld [vmem:[%s9412_s0] sm:$0xff] (!%p7182_p4)  ;;  %7752 = vmatprep.subr.msk.mxu0 (!%p7182_p4), %vm599_vm0, %v584_v0  ;;  %v679_v5 = vld [vmem:[%s9415_s3 + $0x8] sm:$0xff] (!%p7182_p4)  ;;  %vm682_vm2 = vcmask (!%p7182_p4), 261120  }
  0x14   : > { %s8443_s25 = scalar_lea.vmem %s9434_s9, %s7440_s21  ;;  %s8448_s28 = scalar_lea.vmem %s9422_s10, %s7440_s21  ;;  %7754 = vmatprep.mubr.msk.f32.mxu0 (!%p7182_p4), %vm592_vm1, %v582_v1  ;;  %7753 = vmatpush3.msk.msra.mxu0 (!%p7182_p4), %vm599_vm0, %v584_v0  ;;  %v7183_v3 = vld [vmem:[%s9414_s2] ss:$0 sm:$0xff] (!%p7182_p4) }
  0x15   : > { %s8453_s16 = scalar_lea.vmem %s9423_s11, %s7442_s22  ;;  %s7443_s17 = sshll.u32 %s549_s20, 10  ;;  %7755 = vmatmul.mubr.msk.f32.vlgmr.msra.gmra.mrb[0].mxu0 (!%p7182_p4), %vm592_vm1, %v583_v2  ;;  %v678_v8 = vld [vmem:[%s9415_s3] sm:$0xff] (!%p7182_p4) }
  0x16   : > { %s8458_s7 = scalar_lea.vmem %s9424_s12, %s7443_s17  ;;  %s7444_s6 = sshll.u32 %s549_s20, 4 }
  0x17   : > { %s8463_s9 = scalar_lea.vmem %s9425_s13, %s7444_s6  ;;  %s8468_s27 = scalar_lea.vmem %s9426_s14, %s7444_s6 }
  0xe8   : > { %v7756_v4 = vpop.f32.mrb[0].mxu0 }
  0xe9   : > { %v675_v6 = vadd.f32 %v7756_v4, %v7183_v3  ;;  %v669_v7 = vpop.f32.mrb[1].mxu0 }
  0xea   : > { %v670_v9 = vadd.f32 %v7183_v3, %v669_v7 }
  0xeb   : > { %v681_v10 = vadd.f32 %v679_v5, %v675_v6 }
  0xec   : > { %v680_v11 = vadd.f32 %v678_v8, %v670_v9 }
  0xed   : > { %684 = vst.msk [vmem:[%s9427_s15 + $0x8] sm:$0xff] %vm682_vm2, %v681_v10 }
  0xee   : > { %683 = vst.msk [vmem:[%s9427_s15] sm:$0xff] %vm682_vm2, %v680_v11 }
  0xef PF: > { %v687_v12 = vld [vmem:[%s8443_s25] sm:$0xf]  ;;  %vm727_vm3 = vcmask 261120   ;;  %v691_v13 = vld [vmem:[%s8443_s25 + $0x10] sm:$0xf]  ;;  %v8342_v14 = vmov 0.0   ;;  %v723_v20 = vlaneseq }
  0xf0   : > { %7757 = vmatprep.subr.bf16.mxu0 %v8342_v14  ;;  %7763 = vmatprep.subr.bf16.mxu1 %v8342_v14  ;;  %v732_v15 = vsel %vm727_vm3, %v687_v12, 0  ;;  %v780_v16 = vsel %vm727_vm3, %v691_v13, 0  ;;  %vm8343_vm4 = vmmov 0   ;;  %v8529_v23 = vld [vmem:[%s8463_s9] sm:$0xff]  ;;  %vm871_vm5 = vcmask 64512   ;;  %s8344_s26 = smov 120  }
  0xf1   : > { %7758 = vmatpush3.bf16.xpose.msra.mxu0 %v732_v15  ;;  %7764 = vmatpush3.bf16.xpose.msra.mxu1 %v780_v16  ;;  %v8523_v21 = vshrl.u32 %v723_v20, 7  ;;  %v695_v39 = vld [vmem:[%s8443_s25 + $0x20] sm:$0xf]  ;;  %v692_v8 = vld [vmem:[%s8443_s25 + $0x14] sm:$0xf]  ;;  %vm1669_vm6 = vcmask 1043456  }
  0xf2   : > { %7759 = vmatprep.mubr.msk.bf16.mxu0 %vm8343_vm4, %v8342_v14  ;;  %7765 = vmatprep.mubr.msk.bf16.mxu1 %vm8343_vm4, %v8342_v14  ;;  %v828_v40 = vsel %vm727_vm3, %v695_v39, 0  ;;  %v8566_v47 = vld [vmem:[%s9417_s5] sm:$0xff]  ;;  %v1250_v11 = vsel %vm727_vm3, %v692_v8, 0  ;;  %s8345_s21 = smov 112   ;;  %s8346_s22 = smov 104  }
  0xf3   : > { %7775 = vmatprep.subr.mxu1 %v8342_v14  ;;  %7769 = vmatprep.subr.bf16.mxu0 %v8342_v14  ;;  %v8526_v22 = vsub.s32 1, %v8523_v21  ;;  %v8532_v24 = vsub.s32 0, %v8523_v21  ;;  %v8573_v52 = vsub.s32 2, %v8523_v21  ;;  %v688_v12 = vld [vmem:[%s8443_s25 + $0x4] sm:$0xf]  ;;  %p7435_p5 = scmp.ne.s32.totalorder %s8434_s19, 5 }
  0xf4   : > { %v720_v18 = vld [vmem:[%s9427_s15 + $0x8] sm:$0xff]  ;;  %v1202_v16 = vsel %vm727_vm3, %v688_v12, 0  ;;  %s9436_s8 = sld [smem:[#allocation4_spill]] (!%p7435_p5)  ;;  %s9437_s30 = sld [smem:[#allocation5_spill]] (!%p7435_p5) }
  0xf5   : > { %v719_v17 = vld [vmem:[%s9427_s15] sm:$0xff]  ;;  %v8536_v25 = vrot.slane %v8529_v23, %v8526_v22  ;;  %v8540_v26 = vrot.slane %v8529_v23, %v8532_v24  ;;  %v8577_v53 = vrot.slane %v8529_v23, %v8573_v52 }
  0xf6   : > { %v8513_v19 = vpack.c.bf16 %v720_v18, %v719_v17 }
  0xf8   : > { %7760 = vmatmul.mubr.msk.bf16.vlgmr.msra.gmra.mrb[0].mxu0 %vm727_vm3, %v8513_v19  ;;  %7766 = vmatmul.mubr.msk.bf16.vlgmr.msra.gmra.mrb[0].mxu1 %vm727_vm3, %v8513_v19 }
  0xf9   : > { %7777 = vmatprep.mubr.msk.f32.mxu1 %vm8343_vm4, %v8342_v14  ;;  %7771 = vmatprep.mubr.msk.bf16.mxu0 %vm8343_vm4, %v8342_v14 }
  0xfa   : > { %7770 = vmatpush3.bf16.xpose.msra.mxu0 %v828_v40 }
  0xfb   : > { %7785 = vmatprep.subr.mxu0 %v8342_v14 }
 0x101   : > { %7772 = vmatmul.mubr.msk.bf16.vlgmr.msra.gmra.mrb[4].mxu0 %vm727_vm3, %v8513_v19 }
 0x102   : > { %7787 = vmatprep.mubr.msk.f32.mxu0 %vm8343_vm4, %v8342_v14 }
 0x1cb   : > { %v768_v27 = vpop.f32.mrb[0].mxu0  ;;  %v816_v28 = vpop.f32.mrb[0].mxu1 }
 0x1cc   : > { %v817_v29 = vadd.f32 %v816_v28, %v8536_v25  ;;  %v7761_v30 = vpop.f32.mrb[1].mxu0  ;;  %v7767_v31 = vpop.f32.mrb[1].mxu1  ;;  %v769_v32 = vadd.f32 %v768_v27, %v8540_v26 }
 0x1cd   : > { %v771_v33 = vpop.f32.mrb[2].mxu0  ;;  %v819_v34 = vpop.f32.mrb[2].mxu1 }
 0x1ce   : > { %v7762_v35 = vpop.f32.mrb[3].mxu0  ;;  %v7768_v36 = vpop.f32.mrb[3].mxu1  ;;  %7776 = vmatpush3.xpose.msk.msra.mxu1 %vm871_vm5, %v817_v29  ;;  %v820_v37 = vadd.f32 %v819_v34, %v8536_v25  ;;  %v772_v38 = vadd.f32 %v771_v33, %v8540_v26 }
 0x1cf   : > { %7780 = vmatprep.subr.mxu1 %v8342_v14 }
 0x1d1   : > { %7778 = vmatmul.mubr.msk.f32.vlgmr.msra.gmra.mrb[4].mxu1 %vm871_vm5, %v769_v32 }
 0x1d2   : > { %7781 = vmatpush3.xpose.msk.msra.mxu1 %vm871_vm5, %v820_v37  ;;  %7782 = vmatprep.mubr.msk.f32.mxu1 %vm8343_vm4, %v8342_v14 }
 0x1d3   : > { %7790 = vmatprep.subr.mxu1 %v8342_v14 }
 0x1d4   : > { %v864_v54 = vpop.f32.mrb[4].mxu0 }
 0x1d5   : > { %7783 = vmatmul.mubr.msk.f32.vlgmr.msra.gmra.mrb[6].mxu1 %vm871_vm5, %v772_v38  ;;  %v865_v55 = vadd.f32 %v864_v54, %v8577_v53  ;;  %v7773_v56 = vpop.f32.mrb[5].mxu0 }
 0x1d6   : > { %7792 = vmatprep.mubr.msk.f32.mxu1 %vm8343_vm4, %v8342_v14  ;;  %v867_v3 = vpop.f32.mrb[6].mxu0 }
 0x1d7   : > { %7786 = vmatpush3.msra.mxu0 %v865_v55  ;;  %v7774_v4 = vpop.f32.mrb[7].mxu0  ;;  %v868_v5 = vadd.f32 %v867_v3, %v8577_v53 }
 0x1d8   : > { %7795 = vmatprep.subr.bf16.mxu0 %v8342_v14 }
 0x1d9   : > { %7791 = vmatpush3.msra.mxu1 %v868_v5 }
 0x1da   : > { %7801 = vmatprep.subr.bf16.mxu1 %v8342_v14 }
 0x2a4   : > { %v944_v41 = vpop.f32.mrb[4].mxu1 }
 0x2a5   : > { %v7779_v42 = vpop.f32.mrb[5].mxu1  ;;  %v1024_v44 = vmul.f32 0.35355338, %v944_v41 }
 0x2a7   : > { %v1026_v50 = vadd.f32 %v1024_v44, %v8566_v47 }
 0x2a8   : > { %v1020_v43 = vpop.f32.mrb[6].mxu1 }
 0x2a9   : > { %v1025_v45 = vmul.f32 0.35355338, %v1020_v43  ;;  %v7784_v46 = vpop.f32.mrb[7].mxu1  ;;  %v1028_v51 = vsel %vm871_vm5, %v1026_v50, -inf  ;;  %v696_v43 = vld [vmem:[%s8443_s25 + $0x24] sm:$0xf] }
 0x2aa   : > { %v1298_v44 = vsel %vm727_vm3, %v696_v43, 0 }
 0x2ab   : > { %v1027_v48 = vadd.f32 %v1025_v45, %v8566_v47 }
 0x2ad   : > { %v1031_v49 = vsel %vm871_vm5, %v1027_v48, -inf }
 0x2ae   : > { %1032 = vmax.xlane.f32.xlu0 %v1031_v49 }
 0x2b2   : > { %1029 = vmax.xlane.f32.xlu0 %v1028_v51 }
 0x2c8   : > { %1246 = vrot.lane.b32.xlu0 %v8536_v25, %s8344_s26 }
 0x33b   : > { %v1033_v57 = vpop.xlane.xlu0 %1032 }
 0x33c   : > { %v1035_v58 = vsub.f32 %v1027_v48, %v1033_v57 }
 0x33e   : > { %v1038_v59 = vmul.f32 1.442695, %v1035_v58 }
 0x33f   : > { %v1030_v60 = vpop.xlane.xlu0 %1029 }
 0x340   : > { %8251 = vpow2.f32 %v1038_v59  ;;  %v1034_v61 = vsub.f32 %v1026_v50, %v1030_v60 }
 0x342   : > { %v1036_v62 = vmul.f32 1.442695, %v1034_v61 }
 0x343   : > { %v1247_v29 = vpop.permute.xlu0 %1246 }
 0x344   : > { %8253 = vpow2.f32 %v1036_v62 }
 0x34a   : > { %v8252_v63 = vpop.eup %8251 }
 0x34b   : > { %v1043_v0 = vsel %vm871_vm5, %v8252_v63, 0.0 }
 0x34c   : > { %1044 = vadd.xlane.f32.xlu1 %v1043_v0 }
 0x34e   : > { %v8254_v1 = vpop.eup %8253 }
 0x34f   : > { %v1040_v2 = vsel %vm871_vm5, %v8254_v1, 0.0 }
 0x350   : > { %1041 = vadd.xlane.f32.xlu1 %v1040_v2 }
 0x361   : > { %1198 = vrot.lane.b32.xlu1 %v8540_v26, %s8344_s26 }
 0x3d9   : > { %v1045_v6 = vpop.xlane.xlu1 %1044 }
 0x3da   : > { %8255 = vrcp.f32 %v1045_v6 }
 0x3dd   : > { %v1042_v7 = vpop.xlane.xlu1 %1041 }
 0x3de   : > { %8257 = vrcp.f32 %v1042_v7 }
 0x3e1   : > { %v1199_v34 = vpop.permute.xlu1 %1198 }
 0x3e4   : > { %v8256_v9 = vpop.eup %8255 }
 0x3e5   : > { %v1049_v10 = vmul.f32 %v8256_v9, %v8252_v63 }
 0x3e7   : > { %7793 = vmatmul.mubr.msk.f32.vlgmr.msra.gmra.mrb[8].mxu1 %vm871_vm5, %v1049_v10 }
 0x3e8   : > { %v8258_v13 = vpop.eup %8257  ;;  %7802 = vmatpush3.bf16.xpose.msra.mxu1 %v1250_v11  ;;  %7803 = vmatprep.mubr.msk.bf16.mxu1 %vm8343_vm4, %v8342_v14 }
 0x3e9   : > { %v1048_v15 = vmul.f32 %v8258_v13, %v8254_v1  ;;  %7813 = vmatprep.subr.mxu1 %v8342_v14  ;;  %v700_v13 = vld [vmem:[%s8443_s25 + $0x34] sm:$0xf] }
 0x3eb   : > { %7788 = vmatmul.mubr.msk.f32.vlgmr.msra.gmra.mrb[8].mxu0 %vm871_vm5, %v1048_v15 }
 0x3ec   : > { %7796 = vmatpush3.bf16.xpose.msra.mxu0 %v1202_v16  ;;  %7797 = vmatprep.mubr.msk.bf16.mxu0 %vm8343_vm4, %v8342_v14 }
 0x3ed   : > { %7807 = vmatprep.subr.bf16.mxu0 %v8342_v14 }
 0x3ef   : > { %7804 = vmatmul.mubr.msk.bf16.vlgmr.msra.gmra.mrb[12].mxu1 %vm727_vm3, %v8513_v19 }
 0x3f0   : > { %7815 = vmatprep.mubr.msk.f32.mxu1 %vm8343_vm4, %v8342_v14 }
 0x3f3   : > { %7798 = vmatmul.mubr.msk.bf16.vlgmr.msra.gmra.mrb[12].mxu0 %vm727_vm3, %v8513_v19 }
 0x3f4   : > { %7809 = vmatprep.mubr.msk.bf16.mxu0 %vm8343_vm4, %v8342_v14  ;;  %7808 = vmatpush3.bf16.xpose.msra.mxu0 %v1298_v44 }
 0x3f5   : > { %7823 = vmatprep.subr.mxu0 %v8342_v14 }
 0x3fb   : > { %7810 = vmatmul.mubr.msk.bf16.vlgmr.msra.gmra.mrb[16].mxu0 %vm727_vm3, %v8513_v19 }
 0x3fc   : > { %7825 = vmatprep.mubr.msk.f32.mxu0 %vm8343_vm4, %v8342_v14 }
 0x4ba   : > { %v8609_v17 = vpop.f32.mrb[8].mxu1 }
 0x4bb   : > { %v7794_v18 = vpop.f32.mrb[9].mxu1 }
 0x4bc   : > { %v1671_v18 = vsel %vm1669_vm6, %v700_v13, 0 }
 0x4be   : > { %v8611_v20 = vpop.f32.mrb[8].mxu0 }
 0x4bf   : > { %v1196_v27 = vpack.c.bf16 %v8609_v17, %v8611_v20  ;;  %v7789_v28 = vpop.f32.mrb[9].mxu0 }
 0x4c0   : > { %v699_v28 = vld [vmem:[%s8443_s25 + $0x30] sm:$0xf] }
 0x4c2   : > { %v1286_v30 = vpop.f32.mrb[12].mxu1 }
 0x4c3   : > { %v1287_v31 = vadd.f32 %v1286_v30, %v1247_v29  ;;  %v7805_v32 = vpop.f32.mrb[13].mxu1 }
 0x4c4   : > { %v1289_v33 = vpop.f32.mrb[14].mxu1  ;;  %v693_v32 = vld [vmem:[%s8443_s25 + $0x18] sm:$0xf] }
 0x4c5   : > { %v7806_v35 = vpop.f32.mrb[15].mxu1  ;;  %7814 = vmatpush3.xpose.msk.msra.mxu1 %vm871_vm5, %v1287_v31  ;;  %v1290_v39 = vadd.f32 %v1289_v33, %v1247_v29  ;;  %v1718_v31 = vsel %vm1669_vm6, %v699_v28, 0  ;;  %v1812_v33 = vsel %vm727_vm3, %v693_v32, 0 }
 0x4c6   : > { %v1238_v36 = vpop.f32.mrb[12].mxu0  ;;  %7818 = vmatprep.subr.mxu1 %v8342_v14 }
 0x4c7   : > { %v1239_v37 = vadd.f32 %v1238_v36, %v1199_v34  ;;  %v7799_v38 = vpop.f32.mrb[13].mxu0 }
 0x4c8   : > { %v1241_v40 = vpop.f32.mrb[14].mxu0 }
 0x4c9   : > { %v7800_v41 = vpop.f32.mrb[15].mxu0  ;;  %7816 = vmatmul.mubr.msk.f32.vlgmr.msra.gmra.mrb[10].mxu1 %vm871_vm5, %v1239_v37  ;;  %v1242_v42 = vadd.f32 %v1241_v40, %v1199_v34 }
 0x4ca   : > { %7819 = vmatpush3.xpose.msk.msra.mxu1 %vm871_vm5, %v1290_v39  ;;  %7820 = vmatprep.mubr.msk.f32.mxu1 %vm8343_vm4, %v8342_v14 }
 0x4cb   : > { %7828 = vmatprep.subr.mxu1 %v8342_v14 }
 0x4cd   : > { %7821 = vmatmul.mubr.msk.f32.vlgmr.msra.gmra.mrb[16].mxu1 %vm871_vm5, %v1242_v42 }
 0x4ce   : > { %7830 = vmatprep.mubr.msk.f32.mxu1 %vm8343_vm4, %v8342_v14  ;;  %v1334_v4 = vpop.f32.mrb[16].mxu0 }
 0x4cf   : > { %v7811_v5 = vpop.f32.mrb[17].mxu0 }
 0x4d0   : > { %v1337_v6 = vpop.f32.mrb[18].mxu0 }
 0x4d1   : > { %v7812_v7 = vpop.f32.mrb[19].mxu0 }
 0x59c   : > { %v1413_v45 = vpop.f32.mrb[10].mxu1 }
 0x59d   : > { %v1493_v46 = vmul.f32 0.35355338, %v1413_v45  ;;  %v7817_v48 = vpop.f32.mrb[11].mxu1 }
 0x59f   : > { %v1495_v49 = vadd.f32 %v1493_v46, %v8566_v47 }
 0x5a0   : > { %v1489_v50 = vpop.f32.mrb[16].mxu1 }
 0x5a1   : > { %v1494_v51 = vmul.f32 0.35355338, %v1489_v50  ;;  %v7822_v54 = vpop.f32.mrb[17].mxu1  ;;  %v1497_v55 = vsel %vm871_vm5, %v1495_v49, -inf }
 0x5a2   : > { %1498 = vmax.xlane.f32.xlu1 %v1497_v55 }
 0x5a3   : > { %v1496_v56 = vadd.f32 %v1494_v51, %v8566_v47 }
 0x5a5   : > { %v1500_v57 = vsel %vm871_vm5, %v1496_v56, -inf }
 0x5a6   : > { %1501 = vmax.xlane.f32.xlu0 %v1500_v57 }
 0x62f   : > { %v1499_v58 = vpop.xlane.xlu1 %1498 }
 0x630   : > { %v1503_v59 = vsub.f32 %v1495_v49, %v1499_v58 }
 0x632   : > { %v1505_v60 = vmul.f32 1.442695, %v1503_v59 }
 0x633   : > { %v1502_v61 = vpop.xlane.xlu0 %1501 }
 0x634   : > { %8259 = vpow2.f32 %v1505_v60  ;;  %v1504_v62 = vsub.f32 %v1496_v56, %v1502_v61 }
 0x636   : > { %v1507_v63 = vmul.f32 1.442695, %v1504_v62 }
 0x638   : > { %8261 = vpow2.f32 %v1507_v63 }
 0x63e   : > { %v8260_v0 = vpop.eup %8259 }
 0x63f   : > { %v1509_v1 = vsel %vm871_vm5, %v8260_v0, 0.0 }
 0x640   : > { %1510 = vadd.xlane.f32.xlu0 %v1509_v1  ;;  %v697_v1 = vld [vmem:[%s8443_s25 + $0x28] sm:$0xf] }
 0x642   : > { %v8262_v2 = vpop.eup %8261 }
 0x643   : > { %v1512_v3 = vsel %vm871_vm5, %v8262_v2, 0.0 }
 0x644   : > { %1513 = vadd.xlane.f32.xlu1 %v1512_v3 }
 0x655   : > { %1808 = vrot.lane.b32.xlu1 %v8536_v25, %s8345_s21 }
 0x656   : > { %1294 = vrot.lane.b32.xlu0 %v8577_v53, %s8344_s26 }
 0x659   : > { %1761 = vrot.lane.b32.xlu1 %v8540_v26, %s8345_s21 }
 0x6cd   : > { %v1511_v8 = vpop.xlane.xlu0 %1510 }
 0x6ce   : > { %8263 = vrcp.f32 %v1511_v8 }
 0x6d1   : > { %v1514_v9 = vpop.xlane.xlu1 %1513  ;;  %v1295_v10 = vpop.permute.xlu0 %1294 }
 0x6d2   : > { %8265 = vrcp.f32 %v1514_v9  ;;  %v1335_v11 = vadd.f32 %v1334_v4, %v1295_v10  ;;  %v1338_v12 = vadd.f32 %v1337_v6, %v1295_v10 }
 0x6d4   : > { %7824 = vmatpush3.msra.mxu0 %v1335_v11  ;;  %7829 = vmatpush3.msra.mxu1 %v1338_v12 }
 0x6d5   : > { %7839 = vmatprep.subr.bf16.mxu1 %v8342_v14  ;;  %7833 = vmatprep.subr.bf16.mxu0 %v8342_v14  ;;  %v1809_v43 = vpop.permute.xlu1 %1808 }
 0x6d8   : > { %v8264_v15 = vpop.eup %8263 }
 0x6d9   : > { %v1517_v16 = vmul.f32 %v8264_v15, %v8260_v0  ;;  %v1762_v58 = vpop.permute.xlu1 %1761 }
 0x6db   : > { %7826 = vmatmul.mubr.msk.f32.vlgmr.msra.gmra.mrb[10].mxu0 %vm871_vm5, %v1517_v16 }
 0x6dc   : > { %v8266_v29 = vpop.eup %8265  ;;  %7834 = vmatpush3.bf16.msra.mxu0 %v1671_v18  ;;  %7835 = vmatprep.mubr.msk.bf16.mxu0 %vm8343_vm4, %v8342_v14 }
 0x6dd   : > { %v1518_v30 = vmul.f32 %v8266_v29, %v8262_v2  ;;  %7845 = vmatprep.subr.bf16.mxu0 %v8342_v14  ;;  %v1859_v2 = vsel %vm727_vm3, %v697_v1, 0 }
 0x6df   : > { %7831 = vmatmul.mubr.msk.f32.vlgmr.msra.gmra.mrb[18].mxu1 %vm871_vm5, %v1518_v30 }
 0x6e0   : > { %7840 = vmatpush3.bf16.msra.mxu1 %v1718_v31  ;;  %7841 = vmatprep.mubr.msk.bf16.mxu1 %vm8343_vm4, %v8342_v14 }
 0x6e1   : > { %7851 = vmatprep.subr.bf16.mxu1 %v8342_v14 }
 0x6e3   : > { %7842 = vmatmul.mubr.msk.bf16.vlgmr.msra.gmra.mrb[20].mxu1 %vm871_vm5, %v1196_v27  ;;  %v689_v27 = vld [vmem:[%s8443_s25 + $0x8] sm:$0xf] }
 0x6e4   : > { %7853 = vmatprep.mubr.msk.bf16.mxu1 %vm8343_vm4, %v8342_v14  ;;  %v1765_v37 = vsel %vm727_vm3, %v689_v27, 0 }
 0x6e9   : > { %7852 = vmatpush3.bf16.xpose.msra.mxu1 %v1812_v33 }
 0x6ea   : > { %7863 = vmatprep.subr.mxu1 %v8342_v14 }
 0x6f0   : > { %7854 = vmatmul.mubr.msk.bf16.vlgmr.msra.gmra.mrb[24].mxu1 %vm727_vm3, %v8513_v19 }
 0x6f1   : > { %7865 = vmatprep.mubr.msk.f32.mxu1 %vm8343_vm4, %v8342_v14 }
 0x7ae   : > { %v1588_v17 = vpop.f32.mrb[10].mxu0 }
 0x7af   : > { %v7827_v20 = vpop.f32.mrb[11].mxu0 }
 0x7b2   : > { %v1661_v34 = vpop.f32.mrb[18].mxu1 }
 0x7b3   : > { %v1665_v35 = vpack.c.bf16 %v1661_v34, %v1588_v17  ;;  %v7832_v36 = vpop.f32.mrb[19].mxu1 }
 0x7b5   : > { %7836 = vmatmul.mubr.msk.bf16.vlgmr.msra.gmra.mrb[20].mxu0 %vm871_vm5, %v1665_v35 }
 0x7b6   : > { %v1754_v38 = vpop.f32.mrb[20].mxu1  ;;  %7846 = vmatpush3.bf16.xpose.msra.mxu0 %v1765_v37  ;;  %7847 = vmatprep.mubr.msk.bf16.mxu0 %vm8343_vm4, %v8342_v14 }
 0x7b7   : > { %v7843_v39 = vpop.f32.mrb[21].mxu1  ;;  %7857 = vmatprep.subr.bf16.mxu0 %v8342_v14 }
 0x7b8   : > { %v1757_v40 = vpop.f32.mrb[22].mxu1 }
 0x7b9   : > { %v7844_v41 = vpop.f32.mrb[23].mxu1 }
 0x7bd   : > { %7848 = vmatmul.mubr.msk.bf16.vlgmr.msra.gmra.mrb[24].mxu0 %vm727_vm3, %v8513_v19 }
 0x7be   : > { %7859 = vmatprep.mubr.msk.bf16.mxu0 %vm8343_vm4, %v8342_v14  ;;  %7858 = vmatpush3.bf16.xpose.msra.mxu0 %v1859_v2 }
 0x7bf   : > { %7873 = vmatprep.subr.mxu0 %v8342_v14 }
 0x7c3   : > { %v1848_v42 = vpop.f32.mrb[24].mxu1 }
 0x7c4   : > { %v7855_v44 = vpop.f32.mrb[25].mxu1  ;;  %v1849_v45 = vadd.f32 %v1848_v42, %v1809_v43 }
 0x7c5   : > { %v1851_v46 = vpop.f32.mrb[26].mxu1  ;;  %7860 = vmatmul.mubr.msk.bf16.vlgmr.msra.gmra.mrb[28].mxu0 %vm727_vm3, %v8513_v19 }
 0x7c6   : > { %v1852_v48 = vadd.f32 %v1851_v46, %v1809_v43  ;;  %v7856_v49 = vpop.f32.mrb[27].mxu1  ;;  %7864 = vmatpush3.xpose.msk.msra.mxu1 %vm871_vm5, %v1849_v45  ;;  %7875 = vmatprep.mubr.msk.f32.mxu0 %vm8343_vm4, %v8342_v14  ;;  %v690_v46 = vld [vmem:[%s8443_s25 + $0xc] sm:$0xf] }
 0x7c7   : > { %7868 = vmatprep.subr.mxu1 %v8342_v14 }
 0x888   : > { %v1707_v50 = vpop.f32.mrb[20].mxu0 }
 0x889   : > { %v8683_v51 = vadd.f32 %v1754_v38, %v1707_v50  ;;  %v7837_v54 = vpop.f32.mrb[21].mxu0 }
 0x88a   : > { %v1710_v55 = vpop.f32.mrb[22].mxu0  ;;  %v694_v54 = vld [vmem:[%s8443_s25 + $0x1c] sm:$0xf] }
 0x88b   : > { %v8685_v56 = vadd.f32 %v1757_v40, %v1710_v55  ;;  %v7838_v57 = vpop.f32.mrb[23].mxu0  ;;  %v701_v40 = vld [vmem:[%s8443_s25 + $0x38] sm:$0xf] }
 0x88c   : > { %v2231_v43 = vsel %vm1669_vm6, %v701_v40, 0 }
 0x890   : > { %v1801_v59 = vpop.f32.mrb[24].mxu0 }
 0x891   : > { %v1802_v60 = vadd.f32 %v1801_v59, %v1762_v58  ;;  %v7849_v61 = vpop.f32.mrb[25].mxu0  ;;  %v2327_v59 = vsel %vm727_vm3, %v694_v54, 0 }
 0x892   : > { %v1804_v62 = vpop.f32.mrb[26].mxu0 }
 0x893   : > { %v7850_v63 = vpop.f32.mrb[27].mxu0  ;;  %7866 = vmatmul.mubr.msk.f32.vlgmr.msra.gmra.mrb[28].mxu1 %vm871_vm5, %v1802_v60  ;;  %v1805_v0 = vadd.f32 %v1804_v62, %v1762_v58 }
 0x894   : > { %7869 = vmatpush3.xpose.msk.msra.mxu1 %vm871_vm5, %v1852_v48  ;;  %7870 = vmatprep.mubr.msk.f32.mxu1 %vm8343_vm4, %v8342_v14  ;;  %v2280_v48 = vsel %vm727_vm3, %v690_v46, 0 }
 0x895   : > { %7878 = vmatprep.subr.mxu1 %v8342_v14 }
 0x897   : > { %7871 = vmatmul.mubr.msk.f32.vlgmr.msra.gmra.mrb[30].mxu1 %vm871_vm5, %v1805_v0 }
 0x898   : > { %7880 = vmatprep.mubr.msk.f32.mxu1 %vm8343_vm4, %v8342_v14  ;;  %v1895_v17 = vpop.f32.mrb[28].mxu0 }
 0x899   : > { %v7861_v20 = vpop.f32.mrb[29].mxu0 }
 0x89a   : > { %v1898_v35 = vpop.f32.mrb[30].mxu0 }
 0x89b   : > { %v7862_v36 = vpop.f32.mrb[31].mxu0 }
 0x966   : > { %v1974_v3 = vpop.f32.mrb[28].mxu1 }
 0x967   : > { %v2054_v4 = vmul.f32 0.35355338, %v1974_v3  ;;  %v7867_v5 = vpop.f32.mrb[29].mxu1 }
 0x969   : > { %v2056_v6 = vadd.f32 %v2054_v4, %v8566_v47 }
 0x96a   : > { %v2050_v7 = vpop.f32.mrb[30].mxu1 }
 0x96b   : > { %v2055_v8 = vmul.f32 0.35355338, %v2050_v7  ;;  %v7872_v9 = vpop.f32.mrb[31].mxu1  ;;  %v2058_v10 = vsel %vm871_vm5, %v2056_v6, -inf }
 0x96c   : > { %2059 = vmax.xlane.f32.xlu1 %v2058_v10 }
 0x96d   : > { %v2057_v11 = vadd.f32 %v2055_v8, %v8566_v47 }
 0x96f   : > { %v2061_v12 = vsel %vm871_vm5, %v2057_v11, -inf }
 0x970   : > { %2062 = vmax.xlane.f32.xlu0 %v2061_v12  ;;  %v698_v12 = vld [vmem:[%s8443_s25 + $0x2c] sm:$0xf] }
 0x97d   : > { %1855 = vrot.lane.b32.xlu1 %v8577_v53, %s8345_s21 }
 0x981   : > { %2276 = vrot.lane.b32.xlu1 %v8540_v26, %s8346_s22 }
 0x9f9   : > { %v2060_v13 = vpop.xlane.xlu1 %2059 }
 0x9fa   : > { %v2064_v15 = vsub.f32 %v2056_v6, %v2060_v13  ;;  %v2374_v13 = vsel %vm727_vm3, %v698_v12, 0 }
 0x9fc   : > { %v2066_v16 = vmul.f32 1.442695, %v2064_v15 }
 0x9fd   : > { %v2063_v18 = vpop.xlane.xlu0 %2062  ;;  %v1856_v27 = vpop.permute.xlu1 %1855 }
 0x9fe   : > { %8267 = vpow2.f32 %v2066_v16  ;;  %v2065_v28 = vsub.f32 %v2057_v11, %v2063_v18  ;;  %v1896_v34 = vadd.f32 %v1895_v17, %v1856_v27  ;;  %v1899_v37 = vadd.f32 %v1898_v35, %v1856_v27 }
 0xa00   : > { %v2068_v29 = vmul.f32 1.442695, %v2065_v28  ;;  %7874 = vmatpush3.msra.mxu0 %v1896_v34  ;;  %7879 = vmatpush3.msra.mxu1 %v1899_v37 }
 0xa01   : > { %7883 = vmatprep.subr.bf16.mxu0 %v8342_v14  ;;  %7889 = vmatprep.subr.bf16.mxu1 %v8342_v14  ;;  %v2277_v5 = vpop.permute.xlu1 %2276 }
 0xa02   : > { %8269 = vpow2.f32 %v2068_v29 }
 0xa08   : > { %v8268_v30 = vpop.eup %8267 }
 0xa09   : > { %v2070_v31 = vsel %vm871_vm5, %v8268_v30, 0.0 }
 0xa0a   : > { %2071 = vadd.xlane.f32.xlu0 %v2070_v31 }
 0xa0c   : > { %v8270_v32 = vpop.eup %8269 }
 0xa0d   : > { %v2073_v33 = vsel %vm871_vm5, %v8270_v32, 0.0 }
 0xa0e   : > { %2074 = vadd.xlane.f32.xlu0 %v2073_v33 }
 0xa24   : > { %2323 = vrot.lane.b32.xlu0 %v8536_v25, %s8346_s22 }
 0xa97   : > { %v2072_v38 = vpop.xlane.xlu0 %2071 }
 0xa98   : > { %8271 = vrcp.f32 %v2072_v38 }
 0xa9b   : > { %v2075_v39 = vpop.xlane.xlu0 %2074 }
 0xa9c   : > { %8273 = vrcp.f32 %v2075_v39 }
 0xa9f   : > { %v2324_v4 = vpop.permute.xlu0 %2323 }
 0xaa2   : > { %v8272_v41 = vpop.eup %8271 }
 0xaa3   : > { %v2078_v42 = vmul.f32 %v8272_v41, %v8268_v30 }
 0xaa5   : > { %7876 = vmatmul.mubr.msk.f32.vlgmr.msra.gmra.mrb[32].mxu0 %vm871_vm5, %v2078_v42 }
 0xaa6   : > { %v8274_v44 = vpop.eup %8273  ;;  %7884 = vmatpush3.bf16.msra.mxu0 %v2231_v43  ;;  %7885 = vmatprep.mubr.msk.bf16.mxu0 %vm8343_vm4, %v8342_v14 }
 0xaa7   : > { %v2079_v45 = vmul.f32 %v8274_v44, %v8270_v32  ;;  %7895 = vmatprep.subr.bf16.mxu0 %v8342_v14 }
 0xaa9   : > { %7881 = vmatmul.mubr.msk.f32.vlgmr.msra.gmra.mrb[32].mxu1 %vm871_vm5, %v2079_v45 }
 0xaaa   : > { %7891 = vmatprep.mubr.msk.bf16.mxu1 %vm8343_vm4, %v8342_v14  ;;  %7890 = vmatpush3.bf16.xpose.msra.mxu1 %v2280_v48 }
 0xaab   : > { %7901 = vmatprep.subr.bf16.mxu1 %v8342_v14 }
 0xab1   : > { %7892 = vmatmul.mubr.msk.bf16.vlgmr.msra.gmra.mrb[36].mxu1 %vm727_vm3, %v8513_v19 }
 0xab2   : > { %7903 = vmatprep.mubr.msk.bf16.mxu1 %vm8343_vm4, %v8342_v14  ;;  %7902 = vmatpush3.bf16.xpose.msra.mxu1 %v2374_v13 }
 0xab3   : > { %7917 = vmatprep.subr.mxu1 %v8342_v14 }
 0xab9   : > { %7904 = vmatmul.mubr.msk.bf16.vlgmr.msra.gmra.mrb[40].mxu1 %vm727_vm3, %v8513_v19 }
 0xaba   : > { %7919 = vmatprep.mubr.msk.f32.mxu1 %vm8343_vm4, %v8342_v14 }
 0xb78   : > { %v2149_v49 = vpop.f32.mrb[32].mxu0 }
 0xb79   : > { %v7877_v50 = vpop.f32.mrb[33].mxu0 }
 0xb7c   : > { %v2222_v55 = vpop.f32.mrb[32].mxu1 }
 0xb7d   : > { %v2226_v57 = vpack.c.bf16 %v2222_v55, %v2149_v49  ;;  %v7882_v58 = vpop.f32.mrb[33].mxu1 }
 0xb7f   : > { %7886 = vmatmul.mubr.msk.bf16.vlgmr.msra.gmra.mrb[36].mxu0 %vm871_vm5, %v2226_v57  ;;  %v702_v57 = vld [vmem:[%s8443_s25 + $0x3c] sm:$0xf]  ;;  %s9435_s25 = sld [smem:[#allocation3_spill]] }
 0xb80   : > { %7896 = vmatpush3.bf16.xpose.msra.mxu0 %v2327_v59  ;;  %7897 = vmatprep.mubr.msk.bf16.mxu0 %vm8343_vm4, %v8342_v14  ;;  %v2746_v58 = vsel %vm1669_vm6, %v702_v57, 0 }
 0xb81   : > { %7907 = vmatprep.subr.mxu0 %v8342_v14 }
 0xb84   : > { %v2316_v25 = vpop.f32.mrb[36].mxu1 }
 0xb85   : > { %v7893_v26 = vpop.f32.mrb[37].mxu1  ;;  %v2317_v10 = vadd.f32 %v2316_v25, %v2277_v5 }
 0xb86   : > { %v2319_v60 = vpop.f32.mrb[38].mxu1 }
 0xb87   : > { %7898 = vmatmul.mubr.msk.bf16.vlgmr.msra.gmra.mrb[40].mxu0 %vm727_vm3, %v8513_v19  ;;  %v7894_v61 = vpop.f32.mrb[39].mxu1 }
 0xb88   : > { %7909 = vmatprep.mubr.msk.f32.mxu0 %vm8343_vm4, %v8342_v14 }
 0xc52   : > { %v2267_v62 = vpop.f32.mrb[36].mxu0 }
 0xc53   : > { %v8743_v63 = vadd.f32 %v2267_v62, %v8683_v51  ;;  %v7887_v0 = vpop.f32.mrb[37].mxu0  ;;  %v8788_v62 = vsub.s32 3, %v8523_v21 }
 0xc54   : > { %v2270_v1 = vpop.f32.mrb[38].mxu0 }
 0xc55   : > { %v8746_v2 = vadd.f32 %v2270_v1, %v8685_v56  ;;  %v7888_v3 = vpop.f32.mrb[39].mxu0  ;;  %v2320_v56 = vadd.f32 %v2319_v60, %v2277_v5  ;;  %v2794_v0 = vrot.slane %v8529_v23, %v8788_v62 }
 0xc5a   : > { %v2363_v6 = vpop.f32.mrb[40].mxu0 }
 0xc5b   : > { %v2364_v7 = vadd.f32 %v2363_v6, %v2324_v4  ;;  %v7899_v8 = vpop.f32.mrb[41].mxu0 }
 0xc5c   : > { %v2366_v9 = vpop.f32.mrb[42].mxu0 }
 0xc5d   : > { %v7900_v11 = vpop.f32.mrb[43].mxu0  ;;  %7908 = vmatpush3.xpose.msk.msra.mxu0 %vm871_vm5, %v2364_v7  ;;  %v2367_v51 = vadd.f32 %v2366_v9, %v2324_v4 }
 0xc5e   : > { %7912 = vmatprep.subr.mxu0 %v8342_v14 }
 0xc60   : > { %7910 = vmatmul.mubr.msk.f32.vlgmr.msra.gmra.mrb[34].mxu0 %vm871_vm5, %v2317_v10  ;;  %v8327_v10 = vld [vmem:[%s9427_s15] sm:$0xff] }
 0xc61   : > { %7913 = vmatpush3.xpose.msk.msra.mxu0 %vm871_vm5, %v2367_v51  ;;  %7914 = vmatprep.mubr.msk.f32.mxu0 %vm8343_vm4, %v8342_v14 }
 0xc62   : > { %7922 = vmatprep.subr.mxu0 %v8342_v14 }
 0xc64   : > { %7915 = vmatmul.mubr.msk.f32.vlgmr.msra.gmra.mrb[44].mxu0 %vm871_vm5, %v2320_v56  ;;  %v8328_v56 = vld [vmem:[%s9427_s15 + $0x8] sm:$0xff] }
 0xc65   : > { %7924 = vmatprep.mubr.msk.f32.mxu0 %vm8343_vm4, %v8342_v14 }
 0xd33   : > { %v2489_v15 = vpop.f32.mrb[34].mxu0 }
 0xd34   : > { %v2569_v16 = vmul.f32 0.35355338, %v2489_v15  ;;  %v7911_v18 = vpop.f32.mrb[35].mxu0 }
 0xd36   : > { %v2571_v28 = vadd.f32 %v2569_v16, %v8566_v47 }
 0xd37   : > { %v2565_v29 = vpop.f32.mrb[44].mxu0 }
 0xd38   : > { %v2570_v30 = vmul.f32 0.35355338, %v2565_v29  ;;  %v7916_v31 = vpop.f32.mrb[45].mxu0  ;;  %v2573_v32 = vsel %vm871_vm5, %v2571_v28, -inf }
 0xd39   : > { %2574 = vmax.xlane.f32.xlu1 %v2573_v32 }
 0xd3a   : > { %v2572_v33 = vadd.f32 %v2570_v30, %v8566_v47  ;;  %v2410_v47 = vpop.f32.mrb[40].mxu1 }
 0xd3b   : > { %v7905_v41 = vpop.f32.mrb[41].mxu1 }
 0xd3c   : > { %v2576_v17 = vsel %vm871_vm5, %v2572_v33, -inf  ;;  %v2413_v42 = vpop.f32.mrb[42].mxu1  ;;  %v8823_v41 = vsub.s32 4, %v8523_v21 }
 0xd3d   : > { %2577 = vmax.xlane.f32.xlu0 %v2576_v17  ;;  %v7906_v43 = vpop.f32.mrb[43].mxu1 }
 0xd3e   : > { %v2829_v43 = vrot.slane %v8529_v23, %v8823_v41 }
 0xdc6   : > { %v2575_v19 = vpop.xlane.xlu1 %2574 }
 0xdc7   : > { %v2579_v20 = vsub.f32 %v2571_v28, %v2575_v19  ;;  %v703_v19 = vld [vmem:[%s8448_s28] sm:$0xf] }
 0xdc9   : > { %v2581_v27 = vmul.f32 1.442695, %v2579_v20  ;;  %v2838_v20 = vld [vmem:[%s9416_s4] sm:$0xff] }
 0xdca   : > { %v2578_v34 = vpop.xlane.xlu0 %2577 }
 0xdcb   : > { %8275 = vpow2.f32 %v2581_v27  ;;  %v2580_v35 = vsub.f32 %v2572_v33, %v2578_v34  ;;  %v707_v33 = vld [vmem:[%s8448_s28 + $0x10] sm:$0xf]  ;;  %v2839_v27 = vld [vmem:[%s9416_s4 + $0x8] sm:$0xff]  ;;  %v2851_v34 = vsel %vm727_vm3, %v703_v19, 0 }
 0xdcc   : > { %v2902_v17 = vsel %vm727_vm3, %v707_v33, 0 }
 0xdcd   : > { %v2583_v36 = vmul.f32 1.442695, %v2580_v35  ;;  %v8815_v35 = vpack.c.bf16 %v2839_v27, %v2838_v20 }
 0xdcf   : > { %8277 = vpow2.f32 %v2583_v36 }
 0xdd5   : > { %v8276_v37 = vpop.eup %8275 }
 0xdd6   : > { %v2585_v38 = vsel %vm871_vm5, %v8276_v37, 0.0 }
 0xdd7   : > { %2586 = vadd.xlane.f32.xlu0 %v2585_v38 }
 0xdd9   : > { %v8278_v39 = vpop.eup %8277 }
 0xdda   : > { %v2588_v40 = vsel %vm871_vm5, %v8278_v39, 0.0 }
 0xddb   : > { %2589 = vadd.xlane.f32.xlu1 %v2588_v40 }
 0xded   : > { %2370 = vrot.lane.b32.xlu0 %v8577_v53, %s8346_s22 }
 0xe64   : > { %v2587_v44 = vpop.xlane.xlu0 %2586 }
 0xe65   : > { %8279 = vrcp.f32 %v2587_v44 }
 0xe68   : > { %v2590_v45 = vpop.xlane.xlu1 %2589  ;;  %v2371_v46 = vpop.permute.xlu0 %2370 }
 0xe69   : > { %8281 = vrcp.f32 %v2590_v45  ;;  %v2411_v48 = vadd.f32 %v2410_v47, %v2371_v46  ;;  %v2414_v49 = vadd.f32 %v2413_v42, %v2371_v46  ;;  %v8828_v45 = vsub.s32 5, %v8523_v21 }
 0xe6b   : > { %7918 = vmatpush3.msra.mxu1 %v2411_v48  ;;  %7923 = vmatpush3.msra.mxu0 %v2414_v49 }
 0xe6c   : > { %7927 = vmatprep.subr.bf16.mxu1 %v8342_v14  ;;  %7933 = vmatprep.subr.bf16.mxu0 %v8342_v14 }
 0xe6f   : > { %v8280_v50 = vpop.eup %8279 }
 0xe70   : > { %v2593_v53 = vmul.f32 %v8280_v50, %v8276_v37  ;;  %v2835_v50 = vrot.slane %v8529_v23, %v8828_v45 }
 0xe72   : > { %7920 = vmatmul.mubr.msk.f32.vlgmr.msra.gmra.mrb[34].mxu1 %vm871_vm5, %v2593_v53 }
 0xe73   : > { %v8282_v54 = vpop.eup %8281  ;;  %7929 = vmatprep.mubr.msk.bf16.mxu1 %vm8343_vm4, %v8342_v14  ;;  %7928 = vmatpush3.bf16.msra.mxu1 %v2746_v58  ;;  %v8845_v58 = vsub.s32 7, %v8523_v21 }
 0xe74   : > { %v2594_v55 = vmul.f32 %v8282_v54, %v8278_v39  ;;  %7939 = vmatprep.subr.bf16.mxu1 %v8342_v14 }
 0xe76   : > { %7925 = vmatmul.mubr.msk.f32.vlgmr.msra.gmra.mrb[46].mxu0 %vm871_vm5, %v2594_v55 }
 0xe77   : > { %7935 = vmatprep.mubr.msk.bf16.mxu0 %vm8343_vm4, %v8342_v14  ;;  %7934 = vmatpush3.bf16.xpose.msra.mxu0 %v2851_v34 }
 0xe78   : > { %7945 = vmatprep.subr.bf16.mxu0 %v8342_v14 }
 0xf45   : > { %v2664_v59 = vpop.f32.mrb[34].mxu1 }
 0xf46   : > { %v7921_v25 = vpop.f32.mrb[35].mxu1 }
 0xf49   : > { %v2737_v26 = vpop.f32.mrb[46].mxu0 }
 0xf4a   : > { %v2741_v60 = vpack.c.bf16 %v2737_v26, %v2664_v59  ;;  %v7926_v61 = vpop.f32.mrb[47].mxu0  ;;  %v8849_v59 = vrot.slane %v8529_v23, %v8845_v58 }
 0xf4c   : > { %7930 = vmatmul.mubr.msk.bf16.vlgmr.msra.gmra.mrb[44].mxu1 %vm871_vm5, %v2741_v60 }
 0xf4d   : > { %7941 = vmatprep.mubr.msk.bf16.mxu1 %vm8343_vm4, %v8342_v14  ;;  %7940 = vmatpush3.bf16.xpose.msra.mxu1 %v2902_v17 }
 0xf4e   : > { %7951 = vmatprep.subr.mxu1 %v8342_v14 }
 0xf54   : > { %7942 = vmatmul.mubr.msk.bf16.vlgmr.msra.gmra.mrb[48].mxu1 %vm727_vm3, %v8815_v35 }
 0xf55   : > { %7953 = vmatprep.mubr.msk.f32.mxu1 %vm8343_vm4, %v8342_v14 }
0x101f   : > { %v2782_v1 = vpop.f32.mrb[44].mxu1 }
0x1020   : > { %v2789_v3 = vadd.f32 %v2782_v1, %v8743_v63  ;;  %v7931_v4 = vpop.f32.mrb[45].mxu1  ;;  %v8855_v1 = vsub.s32 6, %v8523_v21 }
0x1021   : > { %v2785_v5 = vpop.f32.mrb[46].mxu1 }
0x1022   : > { %v2795_v6 = vadd.f32 %v2794_v0, %v2789_v3  ;;  %v2790_v7 = vadd.f32 %v2785_v5, %v8746_v2  ;;  %v7932_v8 = vpop.f32.mrb[47].mxu1  ;;  %v8859_v3 = vrot.slane %v8529_v23, %v8855_v1  ;;  %v711_v23 = vld [vmem:[%s8448_s28 + $0x20] sm:$0xf] }
0x1024   : > { %v2796_v9 = vadd.f32 %v2794_v0, %v2790_v7  ;;  %v2797_v11 = vadd.f32 %v8327_v10, %v2795_v6  ;;  %v2950_v10 = vsel %vm727_vm3, %v711_v23, 0 }
0x1026   : > { %v2799_v51 = vsel %vm727_vm3, %v2797_v11, 0.0  ;;  %v2798_v12 = vadd.f32 %v8328_v56, %v2796_v9 }
0x1027   : > { %2800 = vadd.xlane.f32.xlu1 %v2799_v51  ;;  %v2938_v25 = vpop.f32.mrb[48].mxu1 }
0x1028   : > { %v2802_v63 = vsel %vm727_vm3, %v2798_v12, 0.0  ;;  %v2939_v26 = vadd.f32 %v2938_v25, %v8849_v59  ;;  %v7943_v60 = vpop.f32.mrb[49].mxu1  ;;  %v704_v25 = vld [vmem:[%s8448_s28 + $0x4] sm:$0xf] }
0x1029   : > { %v2941_v61 = vpop.f32.mrb[50].mxu1 }
0x102a   : > { %v7944_v0 = vpop.f32.mrb[51].mxu1  ;;  %7952 = vmatpush3.xpose.msk.msra.mxu1 %vm871_vm5, %v2939_v26  ;;  %v2942_v7 = vadd.f32 %v2941_v61, %v8849_v59  ;;  %v3323_v61 = vsel %vm727_vm3, %v704_v25, 0 }
0x102b   : > { %2803 = vadd.xlane.f32.xlu1 %v2802_v63  ;;  %7956 = vmatprep.subr.mxu1 %v8342_v14 }
0x10b4   : > { %v2801_v2 = vpop.xlane.xlu1 %2800 }
0x10b5   : > { %v2806_v13 = vmul.f32 0.03125, %v2801_v2 }
0x10b7   : > { %v2808_v15 = vsub.f32 %v2797_v11, %v2806_v13  ;;  %v8882_v13 = vld [vmem:[%s9435_s25] sm:$0xff] }
0x10b8   : > { %v2804_v16 = vpop.xlane.xlu1 %2803 }
0x10b9   : > { %v2807_v18 = vmul.f32 0.03125, %v2804_v16  ;;  %v2810_v28 = vmul.f32 %v2808_v15, %v2808_v15 }
0x10bb   : > { %v2809_v29 = vsub.f32 %v2798_v12, %v2807_v18  ;;  %v2812_v30 = vsel %vm727_vm3, %v2810_v28, 0.0 }
0x10bc   : > { %2813 = vadd.xlane.f32.xlu1 %v2812_v30 }
0x10bd   : > { %v2811_v31 = vmul.f32 %v2809_v29, %v2809_v29 }
0x10bf   : > { %v2815_v32 = vsel %vm727_vm3, %v2811_v31, 0.0 }
0x10c0   : > { %2816 = vadd.xlane.f32.xlu1 %v2815_v32 }
0x1149   : > { %v2814_v36 = vpop.xlane.xlu1 %2813 }
0x114a   : > { %v2818_v37 = vmul.f32 0.03125, %v2814_v36 }
0x114c   : > { %v2820_v38 = vadd.f32 1e-05, %v2818_v37 }
0x114d   : > { %v2817_v39 = vpop.xlane.xlu1 %2816 }
0x114e   : > { %8283 = vrsqrt.f32 %v2820_v38  ;;  %v2819_v40 = vmul.f32 0.03125, %v2817_v39 }
0x1150   : > { %v2821_v47 = vadd.f32 1e-05, %v2819_v40 }
0x1152   : > { %8285 = vrsqrt.f32 %v2821_v47 }
0x1158   : > { %v8284_v42 = vpop.eup %8283 }
0x1159   : > { %v2824_v44 = vmul.f32 %v8284_v42, %v2808_v15 }
0x115b   : > { %v2830_v48 = vmul.f32 %v2829_v43, %v2824_v44 }
0x115c   : > { %v8286_v46 = vpop.eup %8285 }
0x115d   : > { %v2825_v49 = vmul.f32 %v8286_v46, %v2809_v29  ;;  %v8832_v54 = vadd.f32 %v2835_v50, %v2830_v48  ;;  %v8889_v29 = vld [vmem:[%s8463_s9 + $0x8] sm:$0x7f]  ;;  %v708_v48 = vld [vmem:[%s8448_s28 + $0x14] sm:$0xf] }
0x115e   : > { %v8893_v30 = vrot.slane %v8889_v29, %v8532_v24 }
0x115f   : > { %v2831_v53 = vmul.f32 %v2829_v43, %v2825_v49 }
0x1161   : > { %v8834_v55 = vadd.f32 %v2835_v50, %v2831_v53  ;;  %v3371_v53 = vsel %vm727_vm3, %v708_v48, 0 }
0x1163   : > { %v8838_v57 = vpack.c.bf16 %v8834_v55, %v8832_v54 }
0x1165   : > { %7936 = vmatmul.mubr.msk.bf16.vlgmr.msra.gmra.mrb[48].mxu0 %vm727_vm3, %v8838_v57 }
0x1166   : > { %7947 = vmatprep.mubr.msk.bf16.mxu0 %vm8343_vm4, %v8342_v14  ;;  %7946 = vmatpush3.bf16.xpose.msra.mxu0 %v2950_v10 }
0x1167   : > { %7961 = vmatprep.subr.mxu0 %v8342_v14 }
0x116d   : > { %7948 = vmatmul.mubr.msk.bf16.vlgmr.msra.gmra.mrb[52].mxu0 %vm727_vm3, %v8815_v35 }
0x116e   : > { %7963 = vmatprep.mubr.msk.f32.mxu0 %vm8343_vm4, %v8342_v14 }
0x1238   : > { %v2887_v4 = vpop.f32.mrb[48].mxu0 }
0x1239   : > { %v2888_v5 = vadd.f32 %v2887_v4, %v8859_v3  ;;  %v7937_v6 = vpop.f32.mrb[49].mxu0 }
0x123a   : > { %v2890_v8 = vpop.f32.mrb[50].mxu0 }
0x123b   : > { %v7938_v9 = vpop.f32.mrb[51].mxu0  ;;  %7954 = vmatmul.mubr.msk.f32.vlgmr.msra.gmra.mrb[52].mxu1 %vm871_vm5, %v2888_v5  ;;  %v2891_v21 = vadd.f32 %v2890_v8, %v8859_v3 }
0x123c   : > { %7957 = vmatpush3.xpose.msk.msra.mxu1 %vm871_vm5, %v2942_v7  ;;  %7958 = vmatprep.mubr.msk.f32.mxu1 %vm8343_vm4, %v8342_v14 }
0x123d   : > { %7966 = vmatprep.subr.mxu1 %v8342_v14 }
0x123f   : > { %7959 = vmatmul.mubr.msk.f32.vlgmr.msra.gmra.mrb[54].mxu1 %vm871_vm5, %v2891_v21 }
0x1240   : > { %7968 = vmatprep.mubr.msk.f32.mxu1 %vm8343_vm4, %v8342_v14  ;;  %v2986_v31 = vpop.f32.mrb[52].mxu0 }
0x1241   : > { %v2987_v32 = vadd.f32 %v2986_v31, %v8893_v30  ;;  %v7949_v33 = vpop.f32.mrb[53].mxu0 }
0x1242   : > { %v2989_v47 = vpop.f32.mrb[54].mxu0 }
0x1243   : > { %7962 = vmatpush3.msra.mxu0 %v2987_v32  ;;  %v7950_v42 = vpop.f32.mrb[55].mxu0  ;;  %v2990_v43 = vadd.f32 %v2989_v47, %v8893_v30 }
0x1244   : > { %7971 = vmatprep.subr.bf16.mxu0 %v8342_v14 }
0x1245   : > { %7967 = vmatpush3.msra.mxu1 %v2990_v43 }
0x1246   : > { %7977 = vmatprep.subr.bf16.mxu1 %v8342_v14 }
0x130e   : > { %v3065_v11 = vpop.f32.mrb[52].mxu1 }
0x130f   : > { %v7955_v51 = vpop.f32.mrb[53].mxu1  ;;  %v3145_v12 = vmul.f32 0.35355338, %v3065_v11 }
0x1311   : > { %v3147_v18 = vadd.f32 %v3145_v12, %v8882_v13 }
0x1312   : > { %v3141_v56 = vpop.f32.mrb[54].mxu1 }
0x1313   : > { %v3146_v63 = vmul.f32 0.35355338, %v3141_v56  ;;  %v7960_v2 = vpop.f32.mrb[55].mxu1  ;;  %v3149_v28 = vsel %vm871_vm5, %v3147_v18, -inf }
0x1315   : > { %v3148_v15 = vadd.f32 %v3146_v63, %v8882_v13 }
0x1317   : > { %v3152_v16 = vsel %vm871_vm5, %v3148_v15, -inf }
0x1318   : > { %3153 = vmax.xlane.f32.xlu1 %v3152_v16 }
0x131c   : > { %3150 = vmax.xlane.f32.xlu1 %v3149_v28  ;;  %v712_v28 = vld [vmem:[%s8448_s28 + $0x24] sm:$0xf] }
0x131d   : > { %v3419_v31 = vsel %vm727_vm3, %v712_v28, 0 }
0x13a5   : > { %v3154_v17 = vpop.xlane.xlu1 %3153 }
0x13a6   : > { %v3156_v19 = vsub.f32 %v3148_v15, %v3154_v17 }
0x13a8   : > { %v3159_v20 = vmul.f32 1.442695, %v3156_v19 }
0x13a9   : > { %v3151_v27 = vpop.xlane.xlu1 %3150 }
0x13aa   : > { %8287 = vpow2.f32 %v3159_v20  ;;  %v3155_v34 = vsub.f32 %v3147_v18, %v3151_v27 }
0x13ac   : > { %v3157_v36 = vmul.f32 1.442695, %v3155_v34 }
0x13ae   : > { %8289 = vpow2.f32 %v3157_v36 }
0x13b4   : > { %v8288_v37 = vpop.eup %8287 }
0x13b5   : > { %v3164_v38 = vsel %vm871_vm5, %v8288_v37, 0.0 }
0x13b6   : > { %3165 = vadd.xlane.f32.xlu0 %v3164_v38 }
0x13b8   : > { %v8290_v39 = vpop.eup %8289 }
0x13b9   : > { %v3161_v40 = vsel %vm871_vm5, %v8290_v39, 0.0 }
0x13ba   : > { %3162 = vadd.xlane.f32.xlu1 %v3161_v40 }
0x13cb   : > { %3367 = vrot.lane.b32.xlu1 %v8849_v59, %s8344_s26 }
0x13cf   : > { %3319 = vrot.lane.b32.xlu1 %v8859_v3, %s8344_s26 }
0x1443   : > { %v3166_v44 = vpop.xlane.xlu0 %3165 }
0x1444   : > { %8291 = vrcp.f32 %v3166_v44 }
0x1447   : > { %v3163_v46 = vpop.xlane.xlu1 %3162 }
0x1448   : > { %8293 = vrcp.f32 %v3163_v46 }
0x144b   : > { %v3368_v6 = vpop.permute.xlu1 %3367 }
0x144e   : > { %v8292_v49 = vpop.eup %8291 }
0x144f   : > { %v3170_v50 = vmul.f32 %v8292_v49, %v8288_v37  ;;  %v3320_v11 = vpop.permute.xlu1 %3319 }
0x1451   : > { %7969 = vmatmul.mubr.msk.f32.vlgmr.msra.gmra.mrb[56].mxu1 %vm871_vm5, %v3170_v50 }
0x1452   : > { %v8294_v26 = vpop.eup %8293  ;;  %7978 = vmatpush3.bf16.xpose.msra.mxu1 %v3371_v53  ;;  %7979 = vmatprep.mubr.msk.bf16.mxu1 %vm8343_vm4, %v8342_v14 }
0x1453   : > { %v3169_v60 = vmul.f32 %v8294_v26, %v8290_v39  ;;  %7989 = vmatprep.subr.mxu1 %v8342_v14 }
0x1455   : > { %7964 = vmatmul.mubr.msk.f32.vlgmr.msra.gmra.mrb[56].mxu0 %vm871_vm5, %v3169_v60 }
0x1456   : > { %7972 = vmatpush3.bf16.xpose.msra.mxu0 %v3323_v61  ;;  %7973 = vmatprep.mubr.msk.bf16.mxu0 %vm8343_vm4, %v8342_v14 }
0x1457   : > { %7983 = vmatprep.subr.bf16.mxu0 %v8342_v14 }
0x1459   : > { %7980 = vmatmul.mubr.msk.bf16.vlgmr.msra.gmra.mrb[60].mxu1 %vm727_vm3, %v8815_v35 }
0x145a   : > { %7991 = vmatprep.mubr.msk.f32.mxu1 %vm8343_vm4, %v8342_v14 }
0x145d   : > { %7974 = vmatmul.mubr.msk.bf16.vlgmr.msra.gmra.mrb[60].mxu0 %vm727_vm3, %v8838_v57 }
0x145e   : > { %7985 = vmatprep.mubr.msk.bf16.mxu0 %vm8343_vm4, %v8342_v14  ;;  %7984 = vmatpush3.bf16.xpose.msra.mxu0 %v3419_v31 }
0x145f   : > { %7999 = vmatprep.subr.mxu0 %v8342_v14 }
0x1465   : > { %7986 = vmatmul.mubr.msk.bf16.vlgmr.msra.gmra.mrb[64].mxu0 %vm727_vm3, %v8815_v35 }
0x1466   : > { %8001 = vmatprep.mubr.msk.f32.mxu0 %vm8343_vm4, %v8342_v14 }
0x1524   : > { %v8925_v0 = vpop.f32.mrb[56].mxu1 }
0x1525   : > { %v7970_v4 = vpop.f32.mrb[57].mxu1 }
0x1528   : > { %v8927_v5 = vpop.f32.mrb[56].mxu0 }
0x1529   : > { %v3317_v7 = vpack.c.bf16 %v8925_v0, %v8927_v5  ;;  %v7965_v8 = vpop.f32.mrb[57].mxu0  ;;  %v705_v0 = vld [vmem:[%s8448_s28 + $0x8] sm:$0xf] }
0x152a   : > { %v3885_v31 = vsel %vm727_vm3, %v705_v0, 0 }
0x152c   : > { %v3407_v9 = vpop.f32.mrb[60].mxu1 }
0x152d   : > { %v3408_v21 = vadd.f32 %v3407_v9, %v3368_v6  ;;  %v7981_v23 = vpop.f32.mrb[61].mxu1 }
0x152e   : > { %v3410_v10 = vpop.f32.mrb[62].mxu1 }
0x152f   : > { %v7982_v51 = vpop.f32.mrb[63].mxu1  ;;  %7990 = vmatpush3.xpose.msk.msra.mxu1 %vm871_vm5, %v3408_v21  ;;  %v3411_v2 = vadd.f32 %v3410_v10, %v3368_v6  ;;  %v716_v21 = vld [vmem:[%s8448_s28 + $0x34] sm:$0xf] }
0x1530   : > { %v3359_v56 = vpop.f32.mrb[60].mxu0  ;;  %7994 = vmatprep.subr.mxu1 %v8342_v14  ;;  %v715_v51 = vld [vmem:[%s8448_s28 + $0x30] sm:$0xf] }
0x1531   : > { %v3360_v12 = vadd.f32 %v3359_v56, %v3320_v11  ;;  %v7975_v63 = vpop.f32.mrb[61].mxu0 }
0x1532   : > { %v3362_v15 = vpop.f32.mrb[62].mxu0  ;;  %v3838_v63 = vsel %vm1669_vm6, %v715_v51, 0 }
0x1533   : > { %v7976_v16 = vpop.f32.mrb[63].mxu0  ;;  %7992 = vmatmul.mubr.msk.f32.vlgmr.msra.gmra.mrb[58].mxu1 %vm871_vm5, %v3360_v12  ;;  %v3363_v18 = vadd.f32 %v3362_v15, %v3320_v11  ;;  %v3791_v11 = vsel %vm1669_vm6, %v716_v21, 0 }
0x1534   : > { %7995 = vmatpush3.xpose.msk.msra.mxu1 %vm871_vm5, %v3411_v2  ;;  %7996 = vmatprep.mubr.msk.f32.mxu1 %vm8343_vm4, %v8342_v14  ;;  %v709_v2 = vld [vmem:[%s8448_s28 + $0x18] sm:$0xf] }
0x1535   : > { %8004 = vmatprep.subr.mxu1 %v8342_v14  ;;  %v3932_v15 = vsel %vm727_vm3, %v709_v2, 0 }
0x1537   : > { %7997 = vmatmul.mubr.msk.f32.vlgmr.msra.gmra.mrb[64].mxu1 %vm871_vm5, %v3363_v18 }
0x1538   : > { %8006 = vmatprep.mubr.msk.f32.mxu1 %vm8343_vm4, %v8342_v14  ;;  %v3455_v53 = vpop.f32.mrb[64].mxu0 }
0x1539   : > { %v7987_v25 = vpop.f32.mrb[65].mxu0 }
0x153a   : > { %v3458_v26 = vpop.f32.mrb[66].mxu0 }
0x153b   : > { %v7988_v60 = vpop.f32.mrb[67].mxu0 }
0x1606   : > { %v3534_v32 = vpop.f32.mrb[58].mxu1 }
0x1607   : > { %v3614_v33 = vmul.f32 0.35355338, %v3534_v32  ;;  %v7993_v17 = vpop.f32.mrb[59].mxu1 }
0x1609   : > { %v3616_v19 = vadd.f32 %v3614_v33, %v8882_v13 }
0x160a   : > { %v3610_v20 = vpop.f32.mrb[64].mxu1 }
0x160b   : > { %v3615_v27 = vmul.f32 0.35355338, %v3610_v20  ;;  %v7998_v34 = vpop.f32.mrb[65].mxu1  ;;  %v3618_v36 = vsel %vm871_vm5, %v3616_v19, -inf }
0x160c   : > { %3619 = vmax.xlane.f32.xlu1 %v3618_v36 }
0x160d   : > { %v3617_v37 = vadd.f32 %v3615_v27, %v8882_v13 }
0x160f   : > { %v3621_v38 = vsel %vm871_vm5, %v3617_v37, -inf }
0x1610   : > { %3622 = vmax.xlane.f32.xlu0 %v3621_v38 }
0x161d   : > { %3928 = vrot.lane.b32.xlu1 %v8849_v59, %s8345_s21 }
0x1699   : > { %v3620_v39 = vpop.xlane.xlu1 %3619 }
0x169a   : > { %v3624_v40 = vsub.f32 %v3616_v19, %v3620_v39 }
0x169c   : > { %v3626_v47 = vmul.f32 1.442695, %v3624_v40 }
0x169d   : > { %v3623_v42 = vpop.xlane.xlu0 %3622  ;;  %v3929_v27 = vpop.permute.xlu1 %3928 }
0x169e   : > { %8295 = vpow2.f32 %v3626_v47  ;;  %v3625_v43 = vsub.f32 %v3617_v37, %v3623_v42 }
0x16a0   : > { %v3628_v44 = vmul.f32 1.442695, %v3625_v43 }
0x16a2   : > { %8297 = vpow2.f32 %v3628_v44 }
0x16a8   : > { %v8296_v46 = vpop.eup %8295 }
0x16a9   : > { %v3630_v48 = vsel %vm871_vm5, %v8296_v46, 0.0 }
0x16aa   : > { %3631 = vadd.xlane.f32.xlu0 %v3630_v48 }
0x16ac   : > { %v8298_v49 = vpop.eup %8297 }
0x16ad   : > { %v3633_v50 = vsel %vm871_vm5, %v8298_v49, 0.0 }
0x16ae   : > { %3634 = vadd.xlane.f32.xlu0 %v3633_v50 }
0x16c4   : > { %3415 = vrot.lane.b32.xlu0 %v8893_v30, %s8344_s26 }
0x16c8   : > { %3881 = vrot.lane.b32.xlu0 %v8859_v3, %s8345_s21 }
0x1737   : > { %v3632_v61 = vpop.xlane.xlu0 %3631 }
0x1738   : > { %8299 = vrcp.f32 %v3632_v61  ;;  %v713_v61 = vld [vmem:[%s8448_s28 + $0x28] sm:$0xf] }
0x173b   : > { %v3635_v4 = vpop.xlane.xlu0 %3634 }
0x173c   : > { %8301 = vrcp.f32 %v3635_v4  ;;  %v3979_v4 = vsel %vm727_vm3, %v713_v61, 0 }
0x173f   : > { %v3416_v6 = vpop.permute.xlu0 %3415 }
0x1740   : > { %v3456_v8 = vadd.f32 %v3455_v53, %v3416_v6  ;;  %v3459_v9 = vadd.f32 %v3458_v26, %v3416_v6 }
0x1742   : > { %v8300_v23 = vpop.eup %8299  ;;  %8000 = vmatpush3.msra.mxu0 %v3456_v8  ;;  %8005 = vmatpush3.msra.mxu1 %v3459_v9 }
0x1743   : > { %v3638_v10 = vmul.f32 %v8300_v23, %v8296_v46  ;;  %8015 = vmatprep.subr.bf16.mxu1 %v8342_v14  ;;  %8009 = vmatprep.subr.bf16.mxu0 %v8342_v14  ;;  %v3882_v46 = vpop.permute.xlu0 %3881 }
0x1745   : > { %8002 = vmatmul.mubr.msk.f32.vlgmr.msra.gmra.mrb[58].mxu0 %vm871_vm5, %v3638_v10 }
0x1746   : > { %v8302_v56 = vpop.eup %8301  ;;  %8010 = vmatpush3.bf16.msra.mxu0 %v3791_v11  ;;  %8011 = vmatprep.mubr.msk.bf16.mxu0 %vm8343_vm4, %v8342_v14 }
0x1747   : > { %v3639_v12 = vmul.f32 %v8302_v56, %v8298_v49  ;;  %8021 = vmatprep.subr.bf16.mxu0 %v8342_v14 }
0x1749   : > { %8007 = vmatmul.mubr.msk.f32.vlgmr.msra.gmra.mrb[66].mxu1 %vm871_vm5, %v3639_v12 }
0x174a   : > { %8016 = vmatpush3.bf16.msra.mxu1 %v3838_v63  ;;  %8017 = vmatprep.mubr.msk.bf16.mxu1 %vm8343_vm4, %v8342_v14 }
0x174b   : > { %8027 = vmatprep.subr.bf16.mxu1 %v8342_v14 }
0x174d   : > { %8018 = vmatmul.mubr.msk.bf16.vlgmr.msra.gmra.mrb[68].mxu1 %vm871_vm5, %v3317_v7 }
0x174e   : > { %8029 = vmatprep.mubr.msk.bf16.mxu1 %vm8343_vm4, %v8342_v14 }
0x1753   : > { %8028 = vmatpush3.bf16.xpose.msra.mxu1 %v3932_v15 }
0x1754   : > { %8039 = vmatprep.subr.mxu1 %v8342_v14 }
0x175a   : > { %8030 = vmatmul.mubr.msk.bf16.vlgmr.msra.gmra.mrb[72].mxu1 %vm727_vm3, %v8815_v35 }
0x175b   : > { %8041 = vmatprep.mubr.msk.f32.mxu1 %vm8343_vm4, %v8342_v14 }
0x1818   : > { %v3709_v16 = vpop.f32.mrb[58].mxu0 }
0x1819   : > { %v8003_v18 = vpop.f32.mrb[59].mxu0 }
0x181c   : > { %v3782_v5 = vpop.f32.mrb[66].mxu1 }
0x181d   : > { %v3786_v7 = vpack.c.bf16 %v3782_v5, %v3709_v16  ;;  %v8008_v28 = vpop.f32.mrb[67].mxu1 }
0x181f   : > { %8012 = vmatmul.mubr.msk.bf16.vlgmr.msra.gmra.mrb[68].mxu0 %vm871_vm5, %v3786_v7 }
0x1820   : > { %v3874_v32 = vpop.f32.mrb[68].mxu1  ;;  %8022 = vmatpush3.bf16.xpose.msra.mxu0 %v3885_v31  ;;  %8023 = vmatprep.mubr.msk.bf16.mxu0 %vm8343_vm4, %v8342_v14 }
0x1821   : > { %v8019_v33 = vpop.f32.mrb[69].mxu1  ;;  %8033 = vmatprep.subr.bf16.mxu0 %v8342_v14 }
0x1822   : > { %v3877_v17 = vpop.f32.mrb[70].mxu1 }
0x1823   : > { %v8020_v19 = vpop.f32.mrb[71].mxu1 }
0x1827   : > { %8024 = vmatmul.mubr.msk.bf16.vlgmr.msra.gmra.mrb[72].mxu0 %vm727_vm3, %v8838_v57 }
0x1828   : > { %8035 = vmatprep.mubr.msk.bf16.mxu0 %vm8343_vm4, %v8342_v14  ;;  %8034 = vmatpush3.bf16.xpose.msra.mxu0 %v3979_v4 }
0x1829   : > { %8049 = vmatprep.subr.mxu0 %v8342_v14 }
0x182d   : > { %v3968_v20 = vpop.f32.mrb[72].mxu1 }
0x182e   : > { %v8031_v34 = vpop.f32.mrb[73].mxu1  ;;  %v3969_v36 = vadd.f32 %v3968_v20, %v3929_v27 }
0x182f   : > { %v3971_v37 = vpop.f32.mrb[74].mxu1  ;;  %8036 = vmatmul.mubr.msk.bf16.vlgmr.msra.gmra.mrb[76].mxu0 %vm727_vm3, %v8815_v35 }
0x1830   : > { %v8032_v38 = vpop.f32.mrb[75].mxu1  ;;  %8040 = vmatpush3.xpose.msk.msra.mxu1 %vm871_vm5, %v3969_v36  ;;  %v3972_v53 = vadd.f32 %v3971_v37, %v3929_v27  ;;  %8051 = vmatprep.mubr.msk.f32.mxu0 %vm8343_vm4, %v8342_v14  ;;  %v717_v37 = vld [vmem:[%s8448_s28 + $0x38] sm:$0xf] }
0x1831   : > { %8044 = vmatprep.subr.mxu1 %v8342_v14 }
0x18f2   : > { %v3827_v39 = vpop.f32.mrb[68].mxu0 }
0x18f3   : > { %v8999_v40 = vadd.f32 %v3874_v32, %v3827_v39  ;;  %v8013_v47 = vpop.f32.mrb[69].mxu0 }
0x18f4   : > { %v3830_v42 = vpop.f32.mrb[70].mxu0  ;;  %v4351_v47 = vsel %vm1669_vm6, %v717_v37, 0 }
0x18f5   : > { %v9001_v43 = vadd.f32 %v3877_v17, %v3830_v42  ;;  %v8014_v44 = vpop.f32.mrb[71].mxu0 }
0x18fa   : > { %v3921_v48 = vpop.f32.mrb[72].mxu0 }
0x18fb   : > { %v3922_v49 = vadd.f32 %v3921_v48, %v3882_v46  ;;  %v8025_v50 = vpop.f32.mrb[73].mxu0 }
0x18fc   : > { %v3924_v25 = vpop.f32.mrb[74].mxu0  ;;  %v710_v50 = vld [vmem:[%s8448_s28 + $0x1c] sm:$0xf] }
0x18fd   : > { %v8026_v26 = vpop.f32.mrb[75].mxu0  ;;  %8042 = vmatmul.mubr.msk.f32.vlgmr.msra.gmra.mrb[76].mxu1 %vm871_vm5, %v3922_v49  ;;  %v3925_v60 = vadd.f32 %v3924_v25, %v3882_v46 }
0x18fe   : > { %8045 = vmatpush3.xpose.msk.msra.mxu1 %vm871_vm5, %v3972_v53  ;;  %8046 = vmatprep.mubr.msk.f32.mxu1 %vm8343_vm4, %v8342_v14 }
0x18ff   : > { %8054 = vmatprep.subr.mxu1 %v8342_v14 }
0x1901   : > { %8047 = vmatmul.mubr.msk.f32.vlgmr.msra.gmra.mrb[78].mxu1 %vm871_vm5, %v3925_v60  ;;  %v4447_v60 = vsel %vm727_vm3, %v710_v50, 0 }
0x1902   : > { %8056 = vmatprep.mubr.msk.f32.mxu1 %vm8343_vm4, %v8342_v14  ;;  %v4015_v32 = vpop.f32.mrb[76].mxu0 }
0x1903   : > { %v8037_v33 = vpop.f32.mrb[77].mxu0 }
0x19d0   : > { %v4094_v6 = vpop.f32.mrb[76].mxu1 }
0x19d1   : > { %v4174_v8 = vmul.f32 0.35355338, %v4094_v6  ;;  %v8043_v9 = vpop.f32.mrb[77].mxu1 }
0x19d3   : > { %v4176_v21 = vadd.f32 %v4174_v8, %v8882_v13 }
0x19d4   : > { %v4170_v23 = vpop.f32.mrb[78].mxu1 }
0x19d5   : > { %v4175_v10 = vmul.f32 0.35355338, %v4170_v23  ;;  %v8048_v11 = vpop.f32.mrb[79].mxu1  ;;  %v4178_v51 = vsel %vm871_vm5, %v4176_v21, -inf }
0x19d6   : > { %4179 = vmax.xlane.f32.xlu0 %v4178_v51 }
0x19d7   : > { %v4177_v56 = vadd.f32 %v4175_v10, %v8882_v13 }
0x19d9   : > { %v4181_v12 = vsel %vm871_vm5, %v4177_v56, -inf }
0x19da   : > { %4182 = vmax.xlane.f32.xlu1 %v4181_v12 }
0x19eb   : > { %4443 = vrot.lane.b32.xlu1 %v8849_v59, %s8346_s22  ;;  %v4018_v59 = vpop.f32.mrb[78].mxu0 }
0x19ec   : > { %v8038_v17 = vpop.f32.mrb[79].mxu0 }
0x1a63   : > { %v4180_v63 = vpop.xlane.xlu0 %4179 }
0x1a64   : > { %v4184_v2 = vsub.f32 %v4176_v21, %v4180_v63 }
0x1a66   : > { %v4186_v15 = vmul.f32 1.442695, %v4184_v2 }
0x1a67   : > { %v4183_v16 = vpop.xlane.xlu1 %4182 }
0x1a68   : > { %8303 = vpow2.f32 %v4186_v15  ;;  %v4185_v18 = vsub.f32 %v4177_v56, %v4183_v16 }
0x1a6a   : > { %v4188_v0 = vmul.f32 1.442695, %v4185_v18 }
0x1a6b   : > { %v4444_v51 = vpop.permute.xlu1 %4443 }
0x1a6c   : > { %8305 = vpow2.f32 %v4188_v0  ;;  %v714_v0 = vld [vmem:[%s8448_s28 + $0x2c] sm:$0xf] }
0x1a72   : > { %v8304_v5 = vpop.eup %8303 }
0x1a73   : > { %v4190_v7 = vsel %vm871_vm5, %v8304_v5, 0.0 }
0x1a74   : > { %4191 = vadd.xlane.f32.xlu0 %v4190_v7 }
0x1a76   : > { %v8306_v28 = vpop.eup %8305 }
0x1a77   : > { %v4193_v31 = vsel %vm871_vm5, %v8306_v28, 0.0 }
0x1a78   : > { %4194 = vadd.xlane.f32.xlu0 %v4193_v31 }
0x1a8e   : > { %3975 = vrot.lane.b32.xlu0 %v8893_v30, %s8345_s21 }
0x1a92   : > { %4396 = vrot.lane.b32.xlu0 %v8859_v3, %s8346_s22  ;;  %v706_v3 = vld [vmem:[%s8448_s28 + $0xc] sm:$0xf] }
0x1a93   : > { %v4400_v46 = vsel %vm727_vm3, %v706_v3, 0 }
0x1b01   : > { %v4192_v19 = vpop.xlane.xlu0 %4191 }
0x1b02   : > { %8307 = vrcp.f32 %v4192_v19 }
0x1b05   : > { %v4195_v20 = vpop.xlane.xlu0 %4194 }
0x1b06   : > { %8309 = vrcp.f32 %v4195_v20 }
0x1b09   : > { %v3976_v27 = vpop.permute.xlu0 %3975 }
0x1b0a   : > { %v4016_v34 = vadd.f32 %v4015_v32, %v3976_v27  ;;  %v4019_v36 = vadd.f32 %v4018_v59, %v3976_v27 }
0x1b0c   : > { %v8308_v38 = vpop.eup %8307  ;;  %8055 = vmatpush3.msra.mxu1 %v4019_v36  ;;  %8050 = vmatpush3.msra.mxu0 %v4016_v34 }
0x1b0d   : > { %v4198_v39 = vmul.f32 %v8308_v38, %v8304_v5  ;;  %8065 = vmatprep.subr.bf16.mxu1 %v8342_v14  ;;  %8059 = vmatprep.subr.bf16.mxu0 %v8342_v14  ;;  %v4397_v12 = vpop.permute.xlu0 %4396  ;;  %v4494_v5 = vsel %vm727_vm3, %v714_v0, 0 }
0x1b0f   : > { %8052 = vmatmul.mubr.msk.f32.vlgmr.msra.gmra.mrb[80].mxu0 %vm871_vm5, %v4198_v39 }
0x1b10   : > { %v8310_v42 = vpop.eup %8309  ;;  %8060 = vmatpush3.bf16.msra.mxu0 %v4351_v47  ;;  %8061 = vmatprep.mubr.msk.bf16.mxu0 %vm8343_vm4, %v8342_v14 }
0x1b11   : > { %v4199_v44 = vmul.f32 %v8310_v42, %v8306_v28  ;;  %8071 = vmatprep.subr.bf16.mxu0 %v8342_v14 }
0x1b13   : > { %8057 = vmatmul.mubr.msk.f32.vlgmr.msra.gmra.mrb[80].mxu1 %vm871_vm5, %v4199_v44 }
0x1b14   : > { %8066 = vmatpush3.bf16.xpose.msra.mxu1 %v4400_v46  ;;  %8067 = vmatprep.mubr.msk.bf16.mxu1 %vm8343_vm4, %v8342_v14 }
0x1b15   : > { %8077 = vmatprep.subr.bf16.mxu1 %v8342_v14 }
0x1b1b   : > { %8068 = vmatmul.mubr.msk.bf16.vlgmr.msra.gmra.mrb[84].mxu1 %vm727_vm3, %v8838_v57 }
0x1b1c   : > { %8079 = vmatprep.mubr.msk.bf16.mxu1 %vm8343_vm4, %v8342_v14  ;;  %8078 = vmatpush3.bf16.xpose.msra.mxu1 %v4494_v5 }
0x1b1d   : > { %8093 = vmatprep.subr.mxu1 %v8342_v14 }
0x1b23   : > { %8080 = vmatmul.mubr.msk.bf16.vlgmr.msra.gmra.mrb[88].mxu1 %vm727_vm3, %v8815_v35 }
0x1b24   : > { %8095 = vmatprep.mubr.msk.f32.mxu1 %vm8343_vm4, %v8342_v14 }
0x1be2   : > { %v4269_v48 = vpop.f32.mrb[80].mxu0 }
0x1be3   : > { %v8053_v49 = vpop.f32.mrb[81].mxu0 }
0x1be6   : > { %v4342_v53 = vpop.f32.mrb[80].mxu1 }
0x1be7   : > { %v4346_v25 = vpack.c.bf16 %v4342_v53, %v4269_v48  ;;  %v8058_v26 = vpop.f32.mrb[81].mxu1 }
0x1be9   : > { %8062 = vmatmul.mubr.msk.bf16.vlgmr.msra.gmra.mrb[84].mxu0 %vm871_vm5, %v4346_v25 }
0x1bea   : > { %8072 = vmatpush3.bf16.xpose.msra.mxu0 %v4447_v60  ;;  %8073 = vmatprep.mubr.msk.bf16.mxu0 %vm8343_vm4, %v8342_v14 }
0x1beb   : > { %8083 = vmatprep.subr.mxu0 %v8342_v14 }
0x1bee   : > { %v4436_v57 = vpop.f32.mrb[84].mxu1 }
0x1bef   : > { %v8069_v61 = vpop.f32.mrb[85].mxu1  ;;  %v4437_v18 = vadd.f32 %v4436_v57, %v4397_v12 }
0x1bf0   : > { %v4439_v4 = vpop.f32.mrb[86].mxu1 }
0x1bf1   : > { %v8070_v6 = vpop.f32.mrb[87].mxu1  ;;  %8074 = vmatmul.mubr.msk.bf16.vlgmr.msra.gmra.mrb[88].mxu0 %vm727_vm3, %v8815_v35 }
0x1bf2   : > { %8085 = vmatprep.mubr.msk.f32.mxu0 %vm8343_vm4, %v8342_v14  ;;  %v718_v6 = vld [vmem:[%s8448_s28 + $0x3c] sm:$0xf] }
0x1bf6   : > { %v4530_v44 = vpop.f32.mrb[88].mxu1 }
0x1bf7   : > { %v8081_v48 = vpop.f32.mrb[89].mxu1 }
0x1bf8   : > { %v4533_v49 = vpop.f32.mrb[90].mxu1 }
0x1bf9   : > { %v8082_v50 = vpop.f32.mrb[91].mxu1 }
0x1bfa   : > { %v4968_v50 = vld [vmem:[%s8453_s16 + $0x50] sm:$0xff] }
0x1cbc   : > { %v4387_v8 = vpop.f32.mrb[84].mxu0 }
0x1cbd   : > { %v9059_v9 = vadd.f32 %v4387_v8, %v8999_v40  ;;  %v8063_v21 = vpop.f32.mrb[85].mxu0  ;;  %v4866_v8 = vsel %vm1669_vm6, %v718_v6, 0 }
0x1cbe   : > { %v4390_v23 = vpop.f32.mrb[86].mxu0 }
0x1cbf   : > { %v9062_v10 = vadd.f32 %v4390_v23, %v9001_v43  ;;  %v8064_v11 = vpop.f32.mrb[87].mxu0  ;;  %v4440_v43 = vadd.f32 %v4439_v4, %v4397_v12  ;;  %v4914_v12 = vrot.slane %v8889_v29, %v8526_v22 }
0x1cc4   : > { %v4483_v56 = vpop.f32.mrb[88].mxu0 }
0x1cc5   : > { %v4484_v63 = vadd.f32 %v4483_v56, %v4444_v51  ;;  %v8075_v2 = vpop.f32.mrb[89].mxu0 }
0x1cc6   : > { %v4486_v15 = vpop.f32.mrb[90].mxu0 }
0x1cc7   : > { %v8076_v16 = vpop.f32.mrb[91].mxu0  ;;  %8084 = vmatpush3.xpose.msk.msra.mxu0 %vm871_vm5, %v4484_v63  ;;  %v4487_v40 = vadd.f32 %v4486_v15, %v4444_v51 }
0x1cc8   : > { %8088 = vmatprep.subr.mxu0 %v8342_v14 }
0x1cca   : > { %8086 = vmatmul.mubr.msk.f32.vlgmr.msra.gmra.mrb[82].mxu0 %vm871_vm5, %v4437_v18 }
0x1ccb   : > { %8089 = vmatpush3.xpose.msk.msra.mxu0 %vm871_vm5, %v4487_v40  ;;  %8090 = vmatprep.mubr.msk.f32.mxu0 %vm8343_vm4, %v8342_v14 }
0x1ccc   : > { %8098 = vmatprep.subr.mxu0 %v8342_v14 }
0x1cce   : > { %8091 = vmatmul.mubr.msk.f32.vlgmr.msra.gmra.mrb[92].mxu0 %vm871_vm5, %v4440_v43 }
0x1ccf   : > { %8100 = vmatprep.mubr.msk.f32.mxu0 %vm8343_vm4, %v8342_v14 }
0x1d9d   : > { %v4609_v7 = vpop.f32.mrb[82].mxu0 }
0x1d9e   : > { %v4689_v28 = vmul.f32 0.35355338, %v4609_v7  ;;  %v8087_v31 = vpop.f32.mrb[83].mxu0 }
0x1da0   : > { %v4691_v32 = vadd.f32 %v4689_v28, %v8882_v13 }
0x1da1   : > { %v4685_v33 = vpop.f32.mrb[92].mxu0 }
0x1da2   : > { %v4690_v59 = vmul.f32 0.35355338, %v4685_v33  ;;  %v8092_v17 = vpop.f32.mrb[93].mxu0  ;;  %v4693_v19 = vsel %vm871_vm5, %v4691_v32, -inf }
0x1da3   : > { %4694 = vmax.xlane.f32.xlu1 %v4693_v19 }
0x1da4   : > { %v4692_v20 = vadd.f32 %v4690_v59, %v8882_v13 }
0x1da6   : > { %v4696_v27 = vsel %vm871_vm5, %v4692_v20, -inf }
0x1da7   : > { %4697 = vmax.xlane.f32.xlu0 %v4696_v27  ;;  %v4966_v27 = vld [vmem:[%s8453_s16 + $0x40] sm:$0xff] }
0x1db4   : > { %4490 = vrot.lane.b32.xlu1 %v8893_v30, %s8346_s22 }
0x1e30   : > { %v4695_v35 = vpop.xlane.xlu1 %4694 }
0x1e31   : > { %v4699_v34 = vsub.f32 %v4691_v32, %v4695_v35  ;;  %v4959_v35 = vld [vmem:[%s8453_s16 + $0x8] sm:$0xff] }
0x1e33   : > { %v4701_v36 = vmul.f32 1.442695, %v4699_v34 }
0x1e34   : > { %v4698_v37 = vpop.xlane.xlu0 %4697  ;;  %v4491_v46 = vpop.permute.xlu1 %4490 }
0x1e35   : > { %8311 = vpow2.f32 %v4701_v36  ;;  %v4700_v38 = vsub.f32 %v4692_v20, %v4698_v37  ;;  %v4531_v30 = vadd.f32 %v4530_v44, %v4491_v46  ;;  %v4534_v53 = vadd.f32 %v4533_v49, %v4491_v46  ;;  %v4958_v20 = vld [vmem:[%s8453_s16] sm:$0xff]  ;;  %v4967_v36 = vld [vmem:[%s8453_s16 + $0x48] sm:$0xff]  ;;  %v4960_v49 = vld [vmem:[%s8453_s16 + $0x10] sm:$0xff] }
0x1e36   : > { %v7268_v34 = vcombine.high %v4958_v20, %v4966_v27  ;;  %v7267_v37 = vcombine.low %v4958_v20, %v4966_v27  ;;  %v4983_v44 = vld [vmem:[%s8453_s16 + $0xc8] sm:$0xff]  ;;  %v4978_v20 = vld [vmem:[%s8453_s16 + $0xa0] sm:$0xff] }
0x1e37   : > { %v4703_v39 = vmul.f32 1.442695, %v4700_v38  ;;  %8094 = vmatpush3.msra.mxu1 %v4531_v30  ;;  %8099 = vmatpush3.msra.mxu0 %v4534_v53  ;;  %v7269_v38 = vcombine.low %v4959_v35, %v4967_v36  ;;  %v4961_v53 = vld [vmem:[%s8453_s16 + $0x18] sm:$0xff]  ;;  %v4986_v27 = vld [vmem:[%s8453_s16 + $0xe0] sm:$0xff] }
0x1e38   : > { %8103 = vmatprep.subr.bf16.mxu1 %v8342_v14  ;;  %5237 = vmatprep.subr.bf16.mxu0 %v7268_v34  ;;  %v4987_v34 = vld [vmem:[%s8453_s16 + $0xe8] sm:$0xff] }
0x1e39   : > { %8313 = vpow2.f32 %v4703_v39  ;;  %v7270_v39 = vcombine.high %v4959_v35, %v4967_v36  ;;  %v4979_v35 = vld [vmem:[%s8453_s16 + $0xa8] sm:$0xff] }
0x1e3f   : > { %v8312_v47 = vpop.eup %8311 }
0x1e40   : > { %v4705_v3 = vsel %vm871_vm5, %v8312_v47, 0.0 }
0x1e41   : > { %4706 = vadd.xlane.f32.xlu0 %v4705_v3  ;;  %v4982_v3 = vld [vmem:[%s8453_s16 + $0xc0] sm:$0xff] }
0x1e43   : > { %v8314_v42 = vpop.eup %8313 }
0x1e44   : > { %v4708_v13 = vsel %vm871_vm5, %v8314_v42, 0.0 }
0x1e45   : > { %4709 = vadd.xlane.f32.xlu0 %v4708_v13 }
0x1ece   : > { %v4707_v25 = vpop.xlane.xlu0 %4706 }
0x1ecf   : > { %8315 = vrcp.f32 %v4707_v25  ;;  %v8347_v25 = vmov 0  }
0x1ed2   : > { %v4710_v26 = vpop.xlane.xlu0 %4709 }
0x1ed3   : > { %8317 = vrcp.f32 %v4710_v26  ;;  %v7272_v26 = vcombine.high %v4960_v49, %v4968_v50 }
0x1ed9   : > { %v8316_v60 = vpop.eup %8315 }
0x1eda   : > { %v4713_v57 = vmul.f32 %v8316_v60, %v8312_v47  ;;  %v4974_v47 = vld [vmem:[%s8453_s16 + $0x80] sm:$0xff]  ;;  %v4969_v60 = vld [vmem:[%s8453_s16 + $0x58] sm:$0xff] }
0x1edb   : > { %v7284_v13 = vcombine.high %v4974_v47, %v4982_v3  ;;  %v7283_v46 = vcombine.low %v4974_v47, %v4982_v3  ;;  %v4964_v47 = vld [vmem:[%s8453_s16 + $0x30] sm:$0xff] }
0x1edc   : > { %8096 = vmatmul.mubr.msk.f32.vlgmr.msra.gmra.mrb[82].mxu1 %vm871_vm5, %v4713_v57  ;;  %v7271_v57 = vcombine.low %v4960_v49, %v4968_v50  ;;  %v4972_v3 = vld [vmem:[%s8453_s16 + $0x70] sm:$0xff] }
0x1edd   : > { %v8318_v61 = vpop.eup %8317  ;;  %8105 = vmatprep.mubr.msk.bf16.mxu1 %vm8343_vm4, %v8342_v14  ;;  %8104 = vmatpush3.bf16.msra.mxu1 %v4866_v8  ;;  %v4980_v49 = vld [vmem:[%s8453_s16 + $0xb0] sm:$0xff] }
0x1ede   : > { %v4714_v4 = vmul.f32 %v8318_v61, %v8314_v42  ;;  %5280 = vmatprep.subr.bf16.mxu1 %v7270_v39  ;;  %v4975_v42 = vld [vmem:[%s8453_s16 + $0x88] sm:$0xff]  ;;  %v7273_v61 = vcombine.low %v4961_v53, %v4969_v60  ;;  %v7294_v39 = vcombine.high %v4979_v35, %v4987_v34  ;;  %v4988_v50 = vld [vmem:[%s8453_s16 + $0xf0] sm:$0xff] }
0x1edf   : > { %v7285_v48 = vcombine.low %v4975_v42, %v4983_v44  ;;  %v7286_v30 = vcombine.high %v4975_v42, %v4983_v44  ;;  %v4965_v42 = vld [vmem:[%s8453_s16 + $0x38] sm:$0xff]  ;;  %v7291_v44 = vcombine.low %v4978_v20, %v4986_v27 }
0x1ee0   : > { %8101 = vmatmul.mubr.msk.f32.vlgmr.msra.gmra.mrb[94].mxu0 %vm871_vm5, %v4714_v4  ;;  %v7274_v4 = vcombine.high %v4961_v53, %v4969_v60  ;;  %v4981_v53 = vld [vmem:[%s8453_s16 + $0xb8] sm:$0xff]  ;;  %v7279_v60 = vcombine.low %v4964_v47, %v4972_v3 }
0x1ee1   : > { %5238 = vmatpush1.bf16.msra.mxu0 %v7267_v37  ;;  %5269 = vmatprep.mubr.bf16.mxu0 %v8347_v25 }
0x1ee2   : > { %5239 = vmatprep.subr.bf16.mxu0 %v7284_v13  ;;  %v4973_v13 = vld [vmem:[%s8453_s16 + $0x78] sm:$0xff] }
0x1ee5   : > { %5240 = vmatpush1.bf16.msra.mxu0 %v7283_v46  ;;  %v7293_v46 = vcombine.low %v4979_v35, %v4987_v34  ;;  %v8153_v35 = vld [vmem:[%s8458_s7 + $0x38] sm:$0xff]  }
0x1ee6   : > { %5323 = vmatprep.subr.bf16.mxu0 %v7272_v26  ;;  %v4989_v26 = vld [vmem:[%s8453_s16 + $0xf8] sm:$0xff] }
0x1ee7   : > { %v8154_v34 = vld [vmem:[%s8458_s7 + $0xb8] sm:$0xff]  }
0x1faf   : > { %v4784_v21 = vpop.f32.mrb[82].mxu1 }
0x1fb0   : > { %v8097_v23 = vpop.f32.mrb[83].mxu1 }
0x1fb3   : > { %v4857_v11 = vpop.f32.mrb[94].mxu0 }
0x1fb4   : > { %v4861_v51 = vpack.c.bf16 %v4857_v11, %v4784_v21  ;;  %v8102_v56 = vpop.f32.mrb[95].mxu0 }
0x1fb6   : > { %8106 = vmatmul.mubr.msk.bf16.vlgmr.msra.gmra.mrb[92].mxu1 %vm871_vm5, %v4861_v51 }
0x1fb7   : > { %5281 = vmatpush1.bf16.msra.mxu1 %v7269_v38  ;;  %5312 = vmatprep.mubr.bf16.mxu1 %v8347_v25  ;;  %v7292_v38 = vcombine.high %v4978_v20, %v4986_v27  ;;  %v8151_v20 = vld [vmem:[%s8458_s7 + $0x78] sm:$0xff]  }
0x1fb8   : > { %5282 = vmatprep.subr.bf16.mxu1 %v7286_v30  ;;  %v7282_v30 = vcombine.high %v4965_v42, %v4973_v13  ;;  %v8152_v27 = vld [vmem:[%s8458_s7 + $0xf8] sm:$0xff]  }
0x1fbb   : > { %5283 = vmatpush1.bf16.msra.mxu1 %v7285_v48  ;;  %v7280_v48 = vcombine.high %v4964_v47, %v4972_v3 }
0x1fbc   : > { %5366 = vmatprep.subr.bf16.mxu1 %v7274_v4  ;;  %v7298_v4 = vcombine.high %v4981_v53, %v4989_v26 }
0x2089   : > { %v4902_v63 = vpop.f32.mrb[92].mxu1 }
0x208a   : > { %v4909_v14 = vadd.f32 %v4902_v63, %v9059_v9  ;;  %v8107_v2 = vpop.f32.mrb[93].mxu1 }
0x208b   : > { %v4905_v15 = vpop.f32.mrb[94].mxu1  ;;  %v4954_v2 = vrot.slane %v8889_v29, %v8788_v62 }
0x208c   : > { %v4915_v16 = vadd.f32 %v4914_v12, %v4909_v14  ;;  %v4910_v18 = vadd.f32 %v4905_v15, %v9062_v10  ;;  %v8108_v40 = vpop.f32.mrb[95].mxu1 }
0x208d   : > { %v4976_v40 = vld [vmem:[%s8453_s16 + $0x90] sm:$0xff] }
0x208e   : > { %v4916_v43 = vadd.f32 %v4914_v12, %v4910_v18  ;;  %v4917_v0 = vadd.f32 %v4915_v16, %v8832_v54  ;;  %v4948_v12 = vrot.slane %v8889_v29, %v8573_v52  ;;  %v4962_v29 = vld [vmem:[%s8453_s16 + $0x20] sm:$0xff] }
0x2090   : > { %v4919_v5 = vsel %vm727_vm3, %v4917_v0, 0.0  ;;  %v4918_v7 = vadd.f32 %v4916_v43, %v8834_v55  ;;  %v4984_v43 = vld [vmem:[%s8453_s16 + $0xd0] sm:$0xff] }
0x2091   : > { %4920 = vadd.xlane.f32.xlu0 %v4919_v5  ;;  %v4985_v5 = vld [vmem:[%s8453_s16 + $0xd8] sm:$0xff] }
0x2092   : > { %v4922_v28 = vsel %vm727_vm3, %v4918_v7, 0.0 }
0x2095   : > { %4923 = vadd.xlane.f32.xlu0 %v4922_v28 }
0x211e   : > { %v4921_v9 = vpop.xlane.xlu0 %4920 }
0x211f   : > { %v4925_v31 = vmul.f32 0.03125, %v4921_v9 }
0x2121   : > { %v4927_v32 = vsub.f32 %v4917_v0, %v4925_v31  ;;  %v4977_v0 = vld [vmem:[%s8453_s16 + $0x98] sm:$0xff]  ;;  %v7288_v31 = vcombine.high %v4976_v40, %v4984_v43 }
0x2122   : > { %v4924_v10 = vpop.xlane.xlu0 %4923 }
0x2123   : > { %v4926_v33 = vmul.f32 0.03125, %v4924_v10  ;;  %v4929_v59 = vmul.f32 %v4927_v32, %v4927_v32  ;;  %v4970_v10 = vld [vmem:[%s8453_s16 + $0x60] sm:$0xff] }
0x2124   : > { %v7275_v36 = vcombine.low %v4962_v29, %v4970_v10 }
0x2125   : > { %v4928_v17 = vsub.f32 %v4918_v7, %v4926_v33  ;;  %v4931_v54 = vsel %vm727_vm3, %v4929_v59, 0.0  ;;  %v4963_v33 = vld [vmem:[%s8453_s16 + $0x28] sm:$0xff] }
0x2126   : > { %4932 = vadd.xlane.f32.xlu0 %v4931_v54  ;;  %v4971_v59 = vld [vmem:[%s8453_s16 + $0x68] sm:$0xff]  ;;  %v7289_v54 = vcombine.low %v4977_v0, %v4985_v5 }
0x2127   : > { %v4930_v55 = vmul.f32 %v4928_v17, %v4928_v17  ;;  %v7277_v37 = vcombine.low %v4963_v33, %v4971_v59 }
0x2129   : > { %v4934_v19 = vsel %vm727_vm3, %v4930_v55, 0.0  ;;  %v7276_v55 = vcombine.high %v4962_v29, %v4970_v10  ;;  %v8143_v29 = vld [vmem:[%s8458_s7 + $0x68] sm:$0xff]  }
0x212a   : > { %4935 = vadd.xlane.f32.xlu0 %v4934_v19  ;;  %v7278_v19 = vcombine.high %v4963_v33, %v4971_v59  ;;  %v8144_v10 = vld [vmem:[%s8458_s7 + $0xe8] sm:$0xff]  }
0x212b   : > { %v8145_v33 = vld [vmem:[%s8458_s7 + $0x28] sm:$0xff]  }
0x212c   : > { %v8146_v59 = vld [vmem:[%s8458_s7 + $0xa8] sm:$0xff]  }
0x21b3   : > { %v4933_v6 = vpop.xlane.xlu0 %4932 }
0x21b4   : > { %v4937_v8 = vmul.f32 0.03125, %v4933_v6  ;;  %v7295_v6 = vcombine.low %v4980_v49, %v4988_v50 }
0x21b6   : > { %v4939_v21 = vadd.f32 1e-05, %v4937_v8  ;;  %v7297_v8 = vcombine.low %v4981_v53, %v4989_v26 }
0x21b7   : > { %v4936_v23 = vpop.xlane.xlu0 %4935 }
0x21b8   : > { %8319 = vrsqrt.f32 %v4939_v21  ;;  %v4938_v11 = vmul.f32 0.03125, %v4936_v23  ;;  %v8123_v21 = vld [vmem:[%s8458_s7 + $0x40] sm:$0xff]  }
0x21b9   : > { %v8124_v23 = vld [vmem:[%s8458_s7 + $0xc0] sm:$0xff]  }
0x21ba   : > { %v4940_v51 = vadd.f32 1e-05, %v4938_v11  ;;  %v8125_v11 = vld [vmem:[%s8458_s7] sm:$0xff]  }
0x21bc   : > { %8321 = vrsqrt.f32 %v4940_v51  ;;  %v8126_v51 = vld [vmem:[%s8458_s7 + $0x80] sm:$0xff]  }
0x21c2   : > { %v8320_v56 = vpop.eup %8319 }
0x21c3   : > { %v4943_v63 = vmul.f32 %v8320_v56, %v4927_v32  ;;  %v7290_v32 = vcombine.high %v4977_v0, %v4985_v5  ;;  %v8127_v56 = vld [vmem:[%s8458_s7 + $0x48] sm:$0xff]   ;;  %v8138_v0 = vld [vmem:[%s8458_s7 + $0x98] sm:$0xff]   ;;  %v8139_v5 = vld [vmem:[%s8458_s7 + $0x60] sm:$0xff]  }
0x21c5   : > { %v4949_v15 = vmul.f32 %v4948_v12, %v4943_v63  ;;  %v8130_v63 = vld [vmem:[%s8458_s7 + $0x88] sm:$0xff]  }
0x21c6   : > { %v8322_v14 = vpop.eup %8321 }
0x21c7   : > { %v4944_v16 = vmul.f32 %v8322_v14, %v4928_v17  ;;  %v9129_v7 = vadd.f32 %v4954_v2, %v4949_v15  ;;  %v7287_v17 = vcombine.low %v4976_v40, %v4984_v43  ;;  %v8131_v14 = vld [vmem:[%s8458_s7 + $0x50] sm:$0xff]   ;;  %v8136_v40 = vld [vmem:[%s8458_s7 + $0xd8] sm:$0xff]  }
0x21c8   : > { %v8133_v15 = vld [vmem:[%s8458_s7 + $0x10] sm:$0xff]   ;;  %v8137_v43 = vld [vmem:[%s8458_s7 + $0x18] sm:$0xff]  }
0x21c9   : > { %v4950_v18 = vmul.f32 %v4948_v12, %v4944_v16  ;;  %v8128_v12 = vld [vmem:[%s8458_s7 + $0xc8] sm:$0xff]   ;;  %v8134_v16 = vld [vmem:[%s8458_s7 + $0x90] sm:$0xff]  }
0x21cb   : > { %v9131_v28 = vadd.f32 %v4954_v2, %v4950_v18  ;;  %v8132_v2 = vld [vmem:[%s8458_s7 + $0xd0] sm:$0xff]   ;;  %v8135_v18 = vld [vmem:[%s8458_s7 + $0x58] sm:$0xff]  }
0x21cd   : > { %v9135_v9 = vpack.c.bf16 %v9131_v28, %v9129_v7 }
0x21cf   : > { %7299 = vmatmul.mubr.msk.bf16.vlgmr.msra.gmra.mrb[96].mxu0 %vm727_vm3, %v9135_v9  ;;  %7300 = vmatmul.mubr.msk.bf16.vlgmr.msra.gmra.mrb[96].mxu1 %vm727_vm3, %v9135_v9 }
0x21d0   : > { %5324 = vmatpush1.bf16.msra.mxu0 %v7271_v57  ;;  %5367 = vmatpush1.bf16.msra.mxu1 %v7273_v61  ;;  %v7281_v57 = vcombine.low %v4965_v42, %v4973_v13  ;;  %v7296_v61 = vcombine.high %v4980_v49, %v4988_v50 }
0x21d1   : > { %5325 = vmatprep.subr.bf16.mxu0 %v7288_v31  ;;  %5368 = vmatprep.subr.bf16.mxu1 %v7290_v32  ;;  %v8141_v31 = vld [vmem:[%s8458_s7 + $0x20] sm:$0xff]  }
0x21d2   : > { %5355 = vmatprep.mubr.bf16.mxu0 %v8347_v25  ;;  %5398 = vmatprep.mubr.bf16.mxu1 %v8347_v25  ;;  %v8142_v32 = vld [vmem:[%s8458_s7 + $0xa0] sm:$0xff]  }
0x21d4   : > { %5326 = vmatpush1.bf16.msra.mxu0 %v7287_v17  ;;  %5369 = vmatpush1.bf16.msra.mxu1 %v7289_v54  ;;  %v8147_v17 = vld [vmem:[%s8458_s7 + $0x70] sm:$0xff]  }
0x21d5   : > { %5409 = vmatprep.subr.bf16.mxu0 %v7276_v55  ;;  %5452 = vmatprep.subr.bf16.mxu1 %v7278_v19  ;;  %v8148_v54 = vld [vmem:[%s8458_s7 + $0xf0] sm:$0xff]  }
0x21d6   : > { %v8149_v55 = vld [vmem:[%s8458_s7 + $0x30] sm:$0xff]  }
0x21d7   : > { %7301 = vmatmul.mubr.msk.bf16.vlgmr.msra.gmra.mrb[100].mxu0 %vm727_vm3, %v9135_v9  ;;  %7302 = vmatmul.mubr.msk.bf16.vlgmr.msra.gmra.mrb[100].mxu1 %vm727_vm3, %v9135_v9  ;;  %v8150_v19 = vld [vmem:[%s8458_s7 + $0xb0] sm:$0xff]  }
0x21d8   : > { %5410 = vmatpush1.bf16.msra.mxu0 %v7275_v36  ;;  %5453 = vmatpush1.bf16.msra.mxu1 %v7277_v37  ;;  %v8155_v36 = vld [vmem:[%s8458_s7 + $0x140] sm:$0xff]  }
0x21d9   : > { %5411 = vmatprep.subr.bf16.mxu0 %v7292_v38  ;;  %5454 = vmatprep.subr.bf16.mxu1 %v7294_v39  ;;  %v8156_v37 = vld [vmem:[%s8458_s7 + $0x1c0] sm:$0xff]  }
0x21da   : > { %5441 = vmatprep.mubr.bf16.mxu0 %v8347_v25  ;;  %5484 = vmatprep.mubr.bf16.mxu1 %v8347_v25  ;;  %v4990_v38 = vld [vmem:[%s8468_s27] sm:$0xff] }
0x21db   : > { %v4997_v39 = vrot.slane %v4990_v38, %v8532_v24  ;;  %v5005_v47 = vrot.slane %v4990_v38, %v8573_v52  ;;  %v5001_v3 = vrot.slane %v4990_v38, %v8526_v22  ;;  %v5009_v42 = vrot.slane %v4990_v38, %v8788_v62 }
0x21dc   : > { %5412 = vmatpush1.bf16.msra.mxu0 %v7291_v44  ;;  %5455 = vmatpush1.bf16.msra.mxu1 %v7293_v46 }
0x21dd   : > { %5495 = vmatprep.subr.bf16.mxu0 %v7280_v48  ;;  %5538 = vmatprep.subr.bf16.mxu1 %v7282_v30 }
0x21df   : > { %7303 = vmatmul.mubr.msk.bf16.vlgmr.msra.gmra.mrb[104].mxu0 %vm727_vm3, %v9135_v9  ;;  %7304 = vmatmul.mubr.msk.bf16.vlgmr.msra.gmra.mrb[104].mxu1 %vm727_vm3, %v9135_v9 }
0x21e0   : > { %5496 = vmatpush1.bf16.msra.mxu0 %v7279_v60  ;;  %5539 = vmatpush1.bf16.msra.mxu1 %v7281_v57 }
0x21e1   : > { %5497 = vmatprep.subr.bf16.mxu0 %v7296_v61  ;;  %5540 = vmatprep.subr.bf16.mxu1 %v7298_v4 }
0x21e2   : > { %5527 = vmatprep.mubr.bf16.mxu0 %v8347_v25  ;;  %5570 = vmatprep.mubr.bf16.mxu1 %v8347_v25  ;;  %v8129_v25 = vld [vmem:[%s8458_s7 + $0x8] sm:$0xff]  }
0x21e4   : > { %5498 = vmatpush1.bf16.msra.mxu0 %v7295_v6  ;;  %5541 = vmatpush1.bf16.msra.mxu1 %v7297_v8  ;;  %v5013_v8 = vrot.slane %v4990_v38, %v8823_v41 }
0x21e5   : > { %7576 = vmatprep.subr.bf16.mxu0 %v8123_v21  ;;  %7598 = vmatprep.subr.bf16.mxu1 %v8124_v23  ;;  %v5021_v21 = vrot.slane %v4990_v38, %v8855_v1 }
0x21e7   : > { %7305 = vmatmul.mubr.msk.bf16.vlgmr.msra.gmra.mrb[108].mxu0 %vm727_vm3, %v9135_v9  ;;  %7306 = vmatmul.mubr.msk.bf16.vlgmr.msra.gmra.mrb[108].mxu1 %vm727_vm3, %v9135_v9  ;;  %v8140_v9 = vld [vmem:[%s8458_s7 + $0xe0] sm:$0xff]  }
0x21e8   : > { %7577 = vmatpush3.bf16.msra.mxu0 %v8125_v11  ;;  %7599 = vmatpush3.bf16.msra.mxu1 %v8126_v51  ;;  %v5017_v51 = vrot.slane %v4990_v38, %v8828_v45 }
0x21e9   : > { %7578 = vmatprep.subr.bf16.mxu0 %v8127_v56  ;;  %7600 = vmatprep.subr.bf16.mxu1 %v8128_v12  ;;  %v5025_v56 = vrot.slane %v4990_v38, %v8845_v58 }
0x21ec   : > { %7579 = vmatpush3.bf16.msra.mxu0 %v8129_v25  ;;  %7601 = vmatpush3.bf16.msra.mxu1 %v8130_v63 }
0x21ed   : > { %7580 = vmatprep.subr.bf16.mxu0 %v8131_v14  ;;  %7602 = vmatprep.subr.bf16.mxu1 %v8132_v2 }
0x21f0   : > { %7581 = vmatpush3.bf16.msra.mxu0 %v8133_v15  ;;  %7603 = vmatpush3.bf16.msra.mxu1 %v8134_v16 }
0x21f1   : > { %7582 = vmatprep.subr.bf16.mxu0 %v8135_v18  ;;  %7604 = vmatprep.subr.bf16.mxu1 %v8136_v40  ;;  %v9219_v40 = vld [vmem:[%s8468_s27 + $0x8] sm:$0xff] }
0x21f4   : > { %7583 = vmatpush3.bf16.msra.mxu0 %v8137_v43  ;;  %7605 = vmatpush3.bf16.msra.mxu1 %v8138_v0 }
0x21f5   : > { %7584 = vmatprep.subr.bf16.mxu0 %v8139_v5  ;;  %7606 = vmatprep.subr.bf16.mxu1 %v8140_v9 }
0x21f8   : > { %7585 = vmatpush3.bf16.msra.mxu0 %v8141_v31  ;;  %7607 = vmatpush3.bf16.msra.mxu1 %v8142_v32 }
0x21f9   : > { %7586 = vmatprep.subr.bf16.mxu0 %v8143_v29  ;;  %7608 = vmatprep.subr.bf16.mxu1 %v8144_v10  ;;  %v8157_v29 = vld [vmem:[%s8458_s7 + $0x100] sm:$0xff]  }
0x21fa   : > { %v8158_v10 = vld [vmem:[%s8458_s7 + $0x180] sm:$0xff]  }
0x21fc   : > { %7587 = vmatpush3.bf16.msra.mxu0 %v8145_v33  ;;  %7609 = vmatpush3.bf16.msra.mxu1 %v8146_v59 }
0x21fd   : > { %7588 = vmatprep.subr.bf16.mxu0 %v8147_v17  ;;  %7610 = vmatprep.subr.bf16.mxu1 %v8148_v54 }
0x2200   : > { %7589 = vmatpush3.bf16.msra.mxu0 %v8149_v55  ;;  %7611 = vmatpush3.bf16.msra.mxu1 %v8150_v19  ;;  %v8159_v55 = vld [vmem:[%s8458_s7 + $0x148] sm:$0xff]  }
0x2201   : > { %7590 = vmatprep.subr.bf16.mxu0 %v8151_v20  ;;  %7612 = vmatprep.subr.bf16.mxu1 %v8152_v27  ;;  %v8160_v19 = vld [vmem:[%s8458_s7 + $0x1c8] sm:$0xff]   ;;  %v5029_v20 = vrot.slane %v9219_v40, %v8532_v24  ;;  %v5033_v24 = vrot.slane %v9219_v40, %v8526_v22 }
0x2204   : > { %7591 = vmatpush3.bf16.msra.mxu0 %v8153_v35  ;;  %7613 = vmatpush3.bf16.msra.mxu1 %v8154_v34 }
0x2205   : > { %7620 = vmatprep.subr.bf16.mxu0 %v8155_v36  ;;  %7642 = vmatprep.subr.bf16.mxu1 %v8156_v37  ;;  %v5037_v37 = vrot.slane %v9219_v40, %v8573_v52  ;;  %v5041_v52 = vrot.slane %v9219_v40, %v8788_v62 }
0x22a2   : > { %v5271_v13 = vpop.f32.mrb[96].mxu0  ;;  %v5314_v44 = vpop.f32.mrb[96].mxu1 }
0x22a3   : > { %v5272_v46 = vadd.f32 %v5271_v13, %v4997_v39  ;;  %v5315_v48 = vadd.f32 %v5314_v44, %v5005_v47  ;;  %v5273_v30 = vpop.f32.mrb[97].mxu0  ;;  %v5316_v49 = vpop.f32.mrb[97].mxu1  ;;  %v8161_v44 = vld [vmem:[%s8458_s7 + $0x108] sm:$0xff]  }
0x22a4   : > { %v5274_v50 = vadd.f32 %v5273_v30, %v5001_v3  ;;  %v5317_v53 = vadd.f32 %v5316_v49, %v5009_v42  ;;  %v5275_v26 = vpop.f32.mrb[98].mxu0  ;;  %v5318_v60 = vpop.f32.mrb[98].mxu1 }
0x22a5   : > { %v5276_v57 = vadd.f32 %v5275_v26, %v4997_v39  ;;  %v5319_v61 = vadd.f32 %v5318_v60, %v5005_v47  ;;  %v5277_v4 = vpop.f32.mrb[99].mxu0  ;;  %v5320_v6 = vpop.f32.mrb[99].mxu1  ;;  %v5581_v12 = vmax.f32 %v5272_v46, 0.0  ;;  %v5583_v25 = vmax.f32 %v5315_v48, 0.0  ;;  %v8162_v46 = vld [vmem:[%s8458_s7 + $0x188] sm:$0xff]   ;;  %v8164_v26 = vld [vmem:[%s8458_s7 + $0x1d0] sm:$0xff]  }
0x22a6   : > { %v5278_v23 = vadd.f32 %v5277_v4, %v5001_v3  ;;  %v5321_v11 = vadd.f32 %v5320_v6, %v5009_v42  ;;  %v5582_v2 = vmax.f32 %v5274_v50, 0.0  ;;  %v5584_v15 = vmax.f32 %v5317_v53, 0.0  ;;  %v8163_v53 = vld [vmem:[%s8458_s7 + $0x150] sm:$0xff]  }
0x22a7   : > { %v5597_v63 = vmax.f32 %v5276_v57, 0.0  ;;  %v5599_v14 = vmax.f32 %v5319_v61, 0.0 }
0x22a8   : > { %v5598_v16 = vmax.f32 %v5278_v23, 0.0  ;;  %v5600_v18 = vmax.f32 %v5321_v11, 0.0  ;;  %v8165_v11 = vld [vmem:[%s8458_s7 + $0x110] sm:$0xff]  }
0x22a9   : > { %v5613_v43 = vpack.c.bf16 %v5597_v63, %v5581_v12  ;;  %v5615_v0 = vpack.c.bf16 %v5599_v14, %v5583_v25  ;;  %v8167_v14 = vld [vmem:[%s8458_s7 + $0x158] sm:$0xff]  }
0x22aa   : > { %v5614_v5 = vpack.c.bf16 %v5598_v16, %v5582_v2  ;;  %v5616_v9 = vpack.c.bf16 %v5600_v18, %v5584_v15  ;;  %v5357_v31 = vpop.f32.mrb[100].mxu0  ;;  %v5400_v32 = vpop.f32.mrb[100].mxu1  ;;  %v8168_v2 = vld [vmem:[%s8458_s7 + $0x1d8] sm:$0xff]  }
0x22ab   : > { %v5358_v33 = vadd.f32 %v5357_v31, %v5013_v8  ;;  %v5401_v59 = vadd.f32 %v5400_v32, %v5021_v21  ;;  %v5359_v17 = vpop.f32.mrb[101].mxu0  ;;  %v5402_v54 = vpop.f32.mrb[101].mxu1 }
0x22ac   : > { %v5360_v27 = vadd.f32 %v5359_v17, %v5017_v51  ;;  %v5403_v35 = vadd.f32 %v5402_v54, %v5025_v56  ;;  %v5361_v34 = vpop.f32.mrb[102].mxu0  ;;  %v5404_v36 = vpop.f32.mrb[102].mxu1  ;;  %6689 = vmatprep.mubr.bf16.mxu0 %v5614_v5  ;;  %6730 = vmatprep.mubr.bf16.mxu1 %v5616_v9  ;;  %v8169_v17 = vld [vmem:[%s8458_s7 + $0x118] sm:$0xff]  }
0x22ad   : > { %v5362_v38 = vadd.f32 %v5361_v34, %v5013_v8  ;;  %v5405_v39 = vadd.f32 %v5404_v36, %v5021_v21  ;;  %v5363_v47 = vpop.f32.mrb[103].mxu0  ;;  %v5406_v3 = vpop.f32.mrb[103].mxu1  ;;  %6690 = vmatmul.mubr.bf16.vlgmr.msra.gmra.mrb[112].mxu0 %v5613_v43  ;;  %6731 = vmatmul.mubr.bf16.vlgmr.msra.gmra.mrb[112].mxu1 %v5615_v0  ;;  %v5585_v48 = vmax.f32 %v5358_v33, 0.0  ;;  %v5587_v30 = vmax.f32 %v5401_v59, 0.0  ;;  %v8170_v54 = vld [vmem:[%s8458_s7 + $0x198] sm:$0xff]   ;;  %v8171_v34 = vld [vmem:[%s8458_s7 + $0x160] sm:$0xff]  }
0x22ae   : > { %v5364_v42 = vadd.f32 %v5363_v47, %v5017_v51  ;;  %v5407_v13 = vadd.f32 %v5406_v3, %v5025_v56  ;;  %7621 = vmatpush3.bf16.msra.mxu0 %v8157_v29  ;;  %7643 = vmatpush3.bf16.msra.mxu1 %v8158_v10  ;;  %v5586_v22 = vmax.f32 %v5360_v27, 0.0  ;;  %v5588_v60 = vmax.f32 %v5403_v35, 0.0  ;;  %v8166_v51 = vld [vmem:[%s8458_s7 + $0x190] sm:$0xff]   ;;  %v8172_v36 = vld [vmem:[%s8458_s7 + $0x1e0] sm:$0xff]  }
0x22af   : > { %v5601_v49 = vmax.f32 %v5362_v38, 0.0  ;;  %v5603_v50 = vmax.f32 %v5405_v39, 0.0  ;;  %7622 = vmatprep.subr.bf16.mxu0 %v8159_v55  ;;  %7644 = vmatprep.subr.bf16.mxu1 %v8160_v19  ;;  %v5045_v0 = vrot.slane %v9219_v40, %v8823_v41  ;;  %v5053_v29 = vrot.slane %v9219_v40, %v8855_v1 }
0x22b0   : > { %v5602_v57 = vmax.f32 %v5364_v42, 0.0  ;;  %v5604_v61 = vmax.f32 %v5407_v13, 0.0  ;;  %v5049_v10 = vrot.slane %v9219_v40, %v8828_v45  ;;  %v5057_v55 = vrot.slane %v9219_v40, %v8845_v58 }
0x22b1   : > { %v9237_v4 = vpack.c.bf16 %v5601_v49, %v5585_v48  ;;  %v9239_v6 = vpack.c.bf16 %v5603_v50, %v5587_v30  ;;  %v8175_v50 = vld [vmem:[%s8458_s7 + $0x168] sm:$0xff]  }
0x22b2   : > { %v5618_v62 = vpack.c.bf16 %v5602_v57, %v5586_v22  ;;  %v5620_v8 = vpack.c.bf16 %v5604_v61, %v5588_v60  ;;  %7623 = vmatpush3.bf16.msra.mxu0 %v8161_v44  ;;  %7645 = vmatpush3.bf16.msra.mxu1 %v8162_v46  ;;  %v5443_v21 = vpop.f32.mrb[104].mxu0  ;;  %v5486_v23 = vpop.f32.mrb[104].mxu1  ;;  %v8173_v44 = vld [vmem:[%s8458_s7 + $0x120] sm:$0xff]  }
0x22b3   : > { %v5444_v56 = vadd.f32 %v5443_v21, %v5029_v20  ;;  %v5487_v12 = vadd.f32 %v5486_v23, %v5037_v37  ;;  %v5445_v25 = vpop.f32.mrb[105].mxu0  ;;  %v5488_v63 = vpop.f32.mrb[105].mxu1  ;;  %7624 = vmatprep.subr.bf16.mxu0 %v8163_v53  ;;  %7646 = vmatprep.subr.bf16.mxu1 %v8164_v26  ;;  %v8174_v46 = vld [vmem:[%s8458_s7 + $0x1a0] sm:$0xff]   ;;  %v8176_v53 = vld [vmem:[%s8458_s7 + $0x1e8] sm:$0xff]  }
0x22b4   : > { %v5446_v15 = vadd.f32 %v5445_v25, %v5033_v24  ;;  %v5489_v16 = vadd.f32 %v5488_v63, %v5041_v52  ;;  %v5447_v18 = vpop.f32.mrb[106].mxu0  ;;  %v5490_v43 = vpop.f32.mrb[106].mxu1  ;;  %6771 = vmatprep.mubr.bf16.mxu0 %v5618_v62  ;;  %6812 = vmatprep.mubr.bf16.mxu1 %v5620_v8 }
0x22b5   : > { %v5448_v5 = vadd.f32 %v5447_v18, %v5029_v20  ;;  %v5491_v9 = vadd.f32 %v5490_v43, %v5037_v37  ;;  %v5449_v31 = vpop.f32.mrb[107].mxu0  ;;  %v5492_v32 = vpop.f32.mrb[107].mxu1  ;;  %v5589_v19 = vmax.f32 %v5444_v56, 0.0  ;;  %v5591_v20 = vmax.f32 %v5487_v12, 0.0  ;;  %v8178_v56 = vld [vmem:[%s8458_s7 + $0x1a8] sm:$0xff]  }
0x22b6   : > { %v5450_v33 = vadd.f32 %v5449_v31, %v5033_v24  ;;  %v5493_v59 = vadd.f32 %v5492_v32, %v5041_v52  ;;  %7625 = vmatpush3.bf16.msra.mxu0 %v8165_v11  ;;  %7647 = vmatpush3.bf16.msra.mxu1 %v8166_v51  ;;  %v5590_v37 = vmax.f32 %v5446_v15, 0.0  ;;  %v5592_v38 = vmax.f32 %v5489_v16, 0.0  ;;  %v8177_v51 = vld [vmem:[%s8458_s7 + $0x128] sm:$0xff]   ;;  %v8180_v15 = vld [vmem:[%s8458_s7 + $0x1f0] sm:$0xff]  }
0x22b7   : > { %v5605_v27 = vmax.f32 %v5448_v5, 0.0  ;;  %v5607_v35 = vmax.f32 %v5491_v9, 0.0  ;;  %7626 = vmatprep.subr.bf16.mxu0 %v8167_v14  ;;  %7648 = vmatprep.subr.bf16.mxu1 %v8168_v2  ;;  %v8179_v2 = vld [vmem:[%s8458_s7 + $0x170] sm:$0xff]  }
0x22b8   : > { %v5606_v39 = vmax.f32 %v5450_v33, 0.0  ;;  %v5608_v47 = vmax.f32 %v5493_v59, 0.0  ;;  %v8183_v33 = vld [vmem:[%s8458_s7 + $0x178] sm:$0xff]  }
0x22b9   : > { %v9257_v3 = vpack.c.bf16 %v5605_v27, %v5589_v19  ;;  %v9259_v24 = vpack.c.bf16 %v5607_v35, %v5591_v20  ;;  %v8184_v59 = vld [vmem:[%s8458_s7 + $0x1f8] sm:$0xff]   ;;  %v8188_v19 = vld [vmem:[%s8458_s7 + $0x2c0] sm:$0xff]   ;;  %v8191_v35 = vld [vmem:[%s8458_s7 + $0x248] sm:$0xff]  }
0x22ba   : > { %v9261_v58 = vpack.c.bf16 %v5606_v39, %v5590_v37  ;;  %v9263_v40 = vpack.c.bf16 %v5608_v47, %v5592_v38  ;;  %7627 = vmatpush3.bf16.msra.mxu0 %v8169_v17  ;;  %7649 = vmatpush3.bf16.msra.mxu1 %v8170_v54  ;;  %v5529_v42 = vpop.f32.mrb[108].mxu0  ;;  %v5572_v13 = vpop.f32.mrb[108].mxu1  ;;  %v8185_v17 = vld [vmem:[%s8458_s7 + $0x138] sm:$0xff]   ;;  %v8189_v20 = vld [vmem:[%s8458_s7 + $0x200] sm:$0xff]   ;;  %v8194_v37 = vld [vmem:[%s8458_s7 + $0x288] sm:$0xff]  }
0x22bb   : > { %v5530_v52 = vadd.f32 %v5529_v42, %v5045_v0  ;;  %v5573_v48 = vadd.f32 %v5572_v13, %v5053_v29  ;;  %v5531_v30 = vpop.f32.mrb[109].mxu0  ;;  %v5574_v49 = vpop.f32.mrb[109].mxu1  ;;  %7628 = vmatprep.subr.bf16.mxu0 %v8171_v34  ;;  %7650 = vmatprep.subr.bf16.mxu1 %v8172_v36  ;;  %v8186_v54 = vld [vmem:[%s8458_s7 + $0x1b8] sm:$0xff]   ;;  %v8190_v27 = vld [vmem:[%s8458_s7 + $0x280] sm:$0xff]   ;;  %v8192_v34 = vld [vmem:[%s8458_s7 + $0x2c8] sm:$0xff]  }
0x22bc   : > { %v5532_v26 = vadd.f32 %v5531_v30, %v5049_v10  ;;  %v5575_v22 = vadd.f32 %v5574_v49, %v5057_v55  ;;  %v5533_v60 = vpop.f32.mrb[110].mxu0  ;;  %v5576_v57 = vpop.f32.mrb[110].mxu1  ;;  %v8193_v36 = vld [vmem:[%s8458_s7 + $0x208] sm:$0xff]   ;;  %v8195_v38 = vld [vmem:[%s8458_s7 + $0x250] sm:$0xff]   ;;  %v8199_v47 = vld [vmem:[%s8458_s7 + $0x258] sm:$0xff]  }
0x22bd   : > { %v5534_v61 = vadd.f32 %v5533_v60, %v5045_v0  ;;  %v5577_v62 = vadd.f32 %v5576_v57, %v5053_v29  ;;  %v5535_v8 = vpop.f32.mrb[111].mxu0  ;;  %v5578_v21 = vpop.f32.mrb[111].mxu1  ;;  %v5593_v12 = vmax.f32 %v5530_v52, 0.0  ;;  %v5595_v25 = vmax.f32 %v5573_v48, 0.0  ;;  %v8181_v29 = vld [vmem:[%s8458_s7 + $0x130] sm:$0xff]   ;;  %v8202_v42 = vld [vmem:[%s8458_s7 + $0x298] sm:$0xff]  }
0x22be   : > { %v5536_v23 = vadd.f32 %v5535_v8, %v5049_v10  ;;  %v5579_v11 = vadd.f32 %v5578_v21, %v5057_v55  ;;  %7629 = vmatpush3.bf16.msra.mxu0 %v8173_v44  ;;  %7651 = vmatpush3.bf16.msra.mxu1 %v8174_v46  ;;  %v5594_v16 = vmax.f32 %v5532_v26, 0.0  ;;  %v5596_v18 = vmax.f32 %v5575_v22, 0.0  ;;  %v8182_v10 = vld [vmem:[%s8458_s7 + $0x1b0] sm:$0xff]   ;;  %v8187_v55 = vld [vmem:[%s8458_s7 + $0x240] sm:$0xff]   ;;  %v8207_v48 = vld [vmem:[%s8458_s7 + $0x268] sm:$0xff]  }
0x22bf   : > { %v5609_v63 = vmax.f32 %v5534_v61, 0.0  ;;  %v5611_v14 = vmax.f32 %v5577_v62, 0.0  ;;  %7630 = vmatprep.subr.bf16.mxu0 %v8175_v50  ;;  %7652 = vmatprep.subr.bf16.mxu1 %v8176_v53  ;;  %v8198_v39 = vld [vmem:[%s8458_s7 + $0x290] sm:$0xff]   ;;  %v8203_v13 = vld [vmem:[%s8458_s7 + $0x260] sm:$0xff]   ;;  %v8208_v30 = vld [vmem:[%s8458_s7 + $0x2e8] sm:$0xff]  }
0x22c0   : > { %v5610_v43 = vmax.f32 %v5536_v23, 0.0  ;;  %v5612_v0 = vmax.f32 %v5579_v11, 0.0  ;;  %v8204_v44 = vld [vmem:[%s8458_s7 + $0x2e0] sm:$0xff]   ;;  %v8209_v49 = vld [vmem:[%s8458_s7 + $0x228] sm:$0xff]   ;;  %v8211_v53 = vld [vmem:[%s8458_s7 + $0x270] sm:$0xff]  }
0x22c1   : > { %v9273_v5 = vpack.c.bf16 %v5609_v63, %v5593_v12  ;;  %v9275_v9 = vpack.c.bf16 %v5611_v14, %v5595_v25  ;;  %v8205_v46 = vld [vmem:[%s8458_s7 + $0x220] sm:$0xff]   ;;  %v8210_v50 = vld [vmem:[%s8458_s7 + $0x2a8] sm:$0xff]   ;;  %v8212_v26 = vld [vmem:[%s8458_s7 + $0x2f0] sm:$0xff]  }
0x22c2   : > { %v9277_v31 = vpack.c.bf16 %v5610_v43, %v5594_v16  ;;  %v9279_v32 = vpack.c.bf16 %v5612_v0, %v5596_v18  ;;  %7631 = vmatpush3.bf16.msra.mxu0 %v8177_v51  ;;  %7653 = vmatpush3.bf16.msra.mxu1 %v8178_v56  ;;  %v8206_v52 = vld [vmem:[%s8458_s7 + $0x2a0] sm:$0xff]   ;;  %v8213_v22 = vld [vmem:[%s8458_s7 + $0x230] sm:$0xff]   ;;  %v8215_v57 = vld [vmem:[%s8458_s7 + $0x278] sm:$0xff]  }
0x22c3   : > { %7632 = vmatprep.subr.bf16.mxu0 %v8179_v2  ;;  %7654 = vmatprep.subr.bf16.mxu1 %v8180_v15  ;;  %v8214_v60 = vld [vmem:[%s8458_s7 + $0x2b0] sm:$0xff]   ;;  %v8216_v61 = vld [vmem:[%s8458_s7 + $0x2f8] sm:$0xff]   ;;  %v8219_v21 = vld [vmem:[%s8458_s7 + $0x340] sm:$0xff]  }
0x22c4   : > { %v8217_v62 = vld [vmem:[%s8458_s7 + $0x238] sm:$0xff]   ;;  %v8220_v23 = vld [vmem:[%s8458_s7 + $0x3c0] sm:$0xff]   ;;  %v8223_v56 = vld [vmem:[%s8458_s7 + $0x348] sm:$0xff]  }
0x22c5   : > { %v8218_v8 = vld [vmem:[%s8458_s7 + $0x2b8] sm:$0xff]   ;;  %v8221_v11 = vld [vmem:[%s8458_s7 + $0x300] sm:$0xff]   ;;  %v8224_v12 = vld [vmem:[%s8458_s7 + $0x3c8] sm:$0xff]  }
0x22c6   : > { %7633 = vmatpush3.bf16.msra.mxu0 %v8181_v29  ;;  %7655 = vmatpush3.bf16.msra.mxu1 %v8182_v10  ;;  %v8222_v51 = vld [vmem:[%s8458_s7 + $0x380] sm:$0xff]   ;;  %v8225_v25 = vld [vmem:[%s8458_s7 + $0x308] sm:$0xff]   ;;  %v8227_v14 = vld [vmem:[%s8458_s7 + $0x350] sm:$0xff]  }
0x22c7   : > { %7634 = vmatprep.subr.bf16.mxu0 %v8183_v33  ;;  %7656 = vmatprep.subr.bf16.mxu1 %v8184_v59  ;;  %v8226_v63 = vld [vmem:[%s8458_s7 + $0x388] sm:$0xff]   ;;  %v8230_v2 = vld [vmem:[%s8458_s7 + $0x390] sm:$0xff]   ;;  %v8231_v15 = vld [vmem:[%s8458_s7 + $0x358] sm:$0xff]  }
0x22c8   : > { %v8232_v16 = vld [vmem:[%s8458_s7 + $0x3d8] sm:$0xff]   ;;  %v8235_v0 = vld [vmem:[%s8458_s7 + $0x360] sm:$0xff]   ;;  %v8239_v10 = vld [vmem:[%s8458_s7 + $0x368] sm:$0xff]  }
0x22c9   : > { %v8233_v18 = vld [vmem:[%s8458_s7 + $0x318] sm:$0xff]   ;;  %v8238_v29 = vld [vmem:[%s8458_s7 + $0x3a0] sm:$0xff]   ;;  %v8240_v33 = vld [vmem:[%s8458_s7 + $0x3e8] sm:$0xff]  }
0x22ca   : > { %7635 = vmatpush3.bf16.msra.mxu0 %v8185_v17  ;;  %7657 = vmatpush3.bf16.msra.mxu1 %v8186_v54  ;;  %v8234_v43 = vld [vmem:[%s8458_s7 + $0x398] sm:$0xff]   ;;  %v8241_v59 = vld [vmem:[%s8458_s7 + $0x328] sm:$0xff]   ;;  %v8243_v54 = vld [vmem:[%s8458_s7 + $0x370] sm:$0xff]  }
0x22cb   : > { %7664 = vmatprep.subr.bf16.mxu0 %v8187_v55  ;;  %7686 = vmatprep.subr.bf16.mxu1 %v8188_v19  ;;  %v8242_v17 = vld [vmem:[%s8458_s7 + $0x3a8] sm:$0xff]   ;;  %v8244_v55 = vld [vmem:[%s8458_s7 + $0x3f0] sm:$0xff]  }
0x22cc   : > { %v8245_v19 = vld [vmem:[%s8458_s7 + $0x330] sm:$0xff]  }
0x22cd   : > { %6772 = vmatmul.mubr.bf16.vlgmr.msra.gmra.mrb[116].mxu0 %v9237_v4  ;;  %6813 = vmatmul.mubr.bf16.vlgmr.msra.gmra.mrb[116].mxu1 %v9239_v6  ;;  %v8196_v4 = vld [vmem:[%s8458_s7 + $0x2d0] sm:$0xff]  }
0x22ce   : > { %7665 = vmatpush3.bf16.msra.mxu0 %v8189_v20  ;;  %6853 = vmatprep.mubr.bf16.mxu0 %v9261_v58  ;;  %v8197_v6 = vld [vmem:[%s8458_s7 + $0x210] sm:$0xff]   ;;  %v8200_v58 = vld [vmem:[%s8458_s7 + $0x2d8] sm:$0xff]  }
0x22cf   : > { %7687 = vmatpush3.bf16.msra.mxu1 %v8190_v27  ;;  %6894 = vmatprep.mubr.bf16.mxu1 %v9263_v40  ;;  %v8201_v40 = vld [vmem:[%s8458_s7 + $0x218] sm:$0xff]   ;;  %v8246_v20 = vld [vmem:[%s8458_s7 + $0x3b0] sm:$0xff]  }
0x22d0   : > { %7666 = vmatprep.subr.bf16.mxu0 %v8191_v35  ;;  %7688 = vmatprep.subr.bf16.mxu1 %v8192_v34  ;;  %v8247_v27 = vld [vmem:[%s8458_s7 + $0x378] sm:$0xff]  }
0x22d1   : > { %v8248_v35 = vld [vmem:[%s8458_s7 + $0x3f8] sm:$0xff]  }
0x22d2   : > { %7667 = vmatpush3.bf16.msra.mxu0 %v8193_v36  ;;  %v8249_v34 = vld [vmem:[%s8458_s7 + $0x338] sm:$0xff]  }
0x22d3   : > { %7689 = vmatpush3.bf16.msra.mxu1 %v8194_v37  ;;  %7668 = vmatprep.subr.bf16.mxu0 %v8195_v38  ;;  %v8250_v36 = vld [vmem:[%s8458_s7 + $0x3b8] sm:$0xff]  }
0x22d4   : > { %7690 = vmatprep.subr.bf16.mxu1 %v8196_v4  ;;  %v9362_v4 = vld [vmem:[%s8463_s9 + $0x8] sm:$0x7f] }
0x22d6   : > { %7669 = vmatpush3.bf16.msra.mxu0 %v8197_v6  ;;  %v5888_v6 = vrot.slane %v9362_v4, %v8823_v41 }
0x22d7   : > { %7691 = vmatpush3.bf16.msra.mxu1 %v8198_v39  ;;  %7670 = vmatprep.subr.bf16.mxu0 %v8199_v47 }
0x22d8   : > { %7692 = vmatprep.subr.bf16.mxu1 %v8200_v58 }
0x22da   : > { %7671 = vmatpush3.bf16.msra.mxu0 %v8201_v40 }
0x22db   : > { %7693 = vmatpush3.bf16.msra.mxu1 %v8202_v42  ;;  %7672 = vmatprep.subr.bf16.mxu0 %v8203_v13 }
0x22dc   : > { %7694 = vmatprep.subr.bf16.mxu1 %v8204_v44 }
0x22de   : > { %7673 = vmatpush3.bf16.msra.mxu0 %v8205_v46 }
0x22df   : > { %7695 = vmatpush3.bf16.msra.mxu1 %v8206_v52  ;;  %7674 = vmatprep.subr.bf16.mxu0 %v8207_v48 }
0x22e0   : > { %7696 = vmatprep.subr.bf16.mxu1 %v8208_v30 }
0x22e2   : > { %7675 = vmatpush3.bf16.msra.mxu0 %v8209_v49 }
0x22e3   : > { %7697 = vmatpush3.bf16.msra.mxu1 %v8210_v50  ;;  %7676 = vmatprep.subr.bf16.mxu0 %v8211_v53 }
0x22e4   : > { %7698 = vmatprep.subr.bf16.mxu1 %v8212_v26 }
0x22e6   : > { %7677 = vmatpush3.bf16.msra.mxu0 %v8213_v22 }
0x22e7   : > { %7699 = vmatpush3.bf16.msra.mxu1 %v8214_v60  ;;  %7678 = vmatprep.subr.bf16.mxu0 %v8215_v57 }
0x22e8   : > { %7700 = vmatprep.subr.bf16.mxu1 %v8216_v61 }
0x22ea   : > { %7679 = vmatpush3.bf16.msra.mxu0 %v8217_v62 }
0x22eb   : > { %7701 = vmatpush3.bf16.msra.mxu1 %v8218_v8  ;;  %7708 = vmatprep.subr.bf16.mxu0 %v8219_v21 }
0x22ec   : > { %7730 = vmatprep.subr.bf16.mxu1 %v8220_v23 }
0x22ed   : > { %6854 = vmatmul.mubr.bf16.vlgmr.msra.gmra.mrb[120].mxu0 %v9257_v3  ;;  %v8228_v3 = vld [vmem:[%s8458_s7 + $0x3d0] sm:$0xff]  }
0x22ee   : > { %6895 = vmatmul.mubr.bf16.vlgmr.msra.gmra.mrb[120].mxu1 %v9259_v24  ;;  %7709 = vmatpush3.bf16.msra.mxu0 %v8221_v11  ;;  %v8229_v24 = vld [vmem:[%s8458_s7 + $0x310] sm:$0xff]  }
0x22ef   : > { %6935 = vmatprep.mubr.bf16.mxu0 %v9277_v31  ;;  %7731 = vmatpush3.bf16.msra.mxu1 %v8222_v51  ;;  %v8236_v31 = vld [vmem:[%s8458_s7 + $0x3e0] sm:$0xff]  }
0x22f0   : > { %6976 = vmatprep.mubr.bf16.mxu1 %v9279_v32  ;;  %7710 = vmatprep.subr.bf16.mxu0 %v8223_v56  ;;  %v8237_v32 = vld [vmem:[%s8458_s7 + $0x320] sm:$0xff]  }
0x22f1   : > { %7732 = vmatprep.subr.bf16.mxu1 %v8224_v12 }
0x22f2   : > { %7711 = vmatpush3.bf16.msra.mxu0 %v8225_v25 }
0x22f3   : > { %7733 = vmatpush3.bf16.msra.mxu1 %v8226_v63  ;;  %7712 = vmatprep.subr.bf16.mxu0 %v8227_v14 }
0x22f4   : > { %7734 = vmatprep.subr.bf16.mxu1 %v8228_v3 }
0x22f6   : > { %7713 = vmatpush3.bf16.msra.mxu0 %v8229_v24 }
0x22f7   : > { %7735 = vmatpush3.bf16.msra.mxu1 %v8230_v2  ;;  %7714 = vmatprep.subr.bf16.mxu0 %v8231_v15 }
0x22f8   : > { %7736 = vmatprep.subr.bf16.mxu1 %v8232_v16 }
0x22fa   : > { %7715 = vmatpush3.bf16.msra.mxu0 %v8233_v18 }
0x22fb   : > { %7737 = vmatpush3.bf16.msra.mxu1 %v8234_v43  ;;  %7716 = vmatprep.subr.bf16.mxu0 %v8235_v0 }
0x22fc   : > { %7738 = vmatprep.subr.bf16.mxu1 %v8236_v31 }
0x22fe   : > { %7717 = vmatpush3.bf16.msra.mxu0 %v8237_v32 }
0x22ff   : > { %7739 = vmatpush3.bf16.msra.mxu1 %v8238_v29  ;;  %7718 = vmatprep.subr.bf16.mxu0 %v8239_v10 }
0x2300   : > { %7740 = vmatprep.subr.bf16.mxu1 %v8240_v33 }
0x2302   : > { %7719 = vmatpush3.bf16.msra.mxu0 %v8241_v59 }
0x2303   : > { %7741 = vmatpush3.bf16.msra.mxu1 %v8242_v17  ;;  %7720 = vmatprep.subr.bf16.mxu0 %v8243_v54 }
0x2304   : > { %7742 = vmatprep.subr.bf16.mxu1 %v8244_v55 }
0x2306   : > { %7721 = vmatpush3.bf16.msra.mxu0 %v8245_v19 }
0x2307   : > { %7743 = vmatpush3.bf16.msra.mxu1 %v8246_v20  ;;  %7722 = vmatprep.subr.bf16.mxu0 %v8247_v27 }
0x2308   : > { %7744 = vmatprep.subr.bf16.mxu1 %v8248_v35 }
0x230a   : > { %7723 = vmatpush3.bf16.msra.mxu0 %v8249_v34 }
0x230b   : > { %7745 = vmatpush3.bf16.msra.mxu1 %v8250_v36 }
0x230d   : > { %6936 = vmatmul.mubr.bf16.vlgmr.msra.gmra.mrb[124].mxu0 %v9273_v5 }
0x230e   : > { %6977 = vmatmul.mubr.bf16.vlgmr.msra.gmra.mrb[124].mxu1 %v9275_v9 }
0x2380   : > { %v7592_v37 = vpop.f32.mrb[112].mxu0  ;;  %v7614_v38 = vpop.f32.mrb[112].mxu1 }
0x2381   : > { %v7593_v39 = vpop.f32.mrb[113].mxu0  ;;  %v7615_v47 = vpop.f32.mrb[113].mxu1 }
0x2382   : > { %v7594_v58 = vadd.f32 %v7593_v39, %v7592_v37  ;;  %v7616_v40 = vadd.f32 %v7615_v47, %v7614_v38  ;;  %v7595_v42 = vpop.f32.mrb[114].mxu0  ;;  %v7617_v13 = vpop.f32.mrb[114].mxu1 }
0x2383   : > { %v7596_v44 = vpop.f32.mrb[115].mxu0  ;;  %v7618_v46 = vpop.f32.mrb[115].mxu1 }
0x2384   : > { %v6692_v52 = vadd.f32 %v7594_v58, %v5888_v6  ;;  %v7597_v48 = vadd.f32 %v7596_v44, %v7595_v42  ;;  %v7619_v5 = vadd.f32 %v7618_v46, %v7617_v13 }
0x2386   : > { %v6733_v30 = vadd.f32 %v7616_v40, %v6692_v52  ;;  %v6695_v9 = vadd.f32 %v7597_v48, %v5888_v6 }
0x2388   : > { %v6736_v49 = vadd.f32 %v7619_v5, %v6695_v9 }
0x23a0   : > { %v7636_v50 = vpop.f32.mrb[116].mxu0  ;;  %v7658_v53 = vpop.f32.mrb[116].mxu1 }
0x23a1   : > { %v7637_v26 = vpop.f32.mrb[117].mxu0  ;;  %v7659_v22 = vpop.f32.mrb[117].mxu1 }
0x23a2   : > { %v7638_v60 = vadd.f32 %v7637_v26, %v7636_v50  ;;  %v7660_v41 = vadd.f32 %v7659_v22, %v7658_v53  ;;  %v7639_v57 = vpop.f32.mrb[118].mxu0  ;;  %v7661_v61 = vpop.f32.mrb[118].mxu1 }
0x23a3   : > { %v7640_v62 = vpop.f32.mrb[119].mxu0  ;;  %v7662_v8 = vpop.f32.mrb[119].mxu1 }
0x23a4   : > { %v6774_v21 = vadd.f32 %v7638_v60, %v6733_v30  ;;  %v7641_v23 = vadd.f32 %v7640_v62, %v7639_v57  ;;  %v7663_v11 = vadd.f32 %v7662_v8, %v7661_v61  ;;  %v7016_v61 = vrot.slane %v9362_v4, %v8828_v45 }
0x23a5   : > { %v7022_v8 = vrot.slane %v9362_v4, %v8855_v1 }
0x23a6   : > { %v6815_v51 = vadd.f32 %v7660_v41, %v6774_v21  ;;  %v6777_v56 = vadd.f32 %v7641_v23, %v6736_v49 }
0x23a8   : > { %v6818_v12 = vadd.f32 %v7663_v11, %v6777_v56 }
0x23c0   : > { %v7680_v25 = vpop.f32.mrb[120].mxu0 }
0x23c1   : > { %v7702_v63 = vpop.f32.mrb[120].mxu1  ;;  %v7681_v14 = vpop.f32.mrb[121].mxu0 }
0x23c2   : > { %v7682_v3 = vadd.f32 %v7681_v14, %v7680_v25  ;;  %v7703_v24 = vpop.f32.mrb[121].mxu1  ;;  %v7683_v2 = vpop.f32.mrb[122].mxu0 }
0x23c3   : > { %v7704_v15 = vadd.f32 %v7703_v24, %v7702_v63  ;;  %v7705_v16 = vpop.f32.mrb[122].mxu1  ;;  %v7684_v18 = vpop.f32.mrb[123].mxu0 }
0x23c4   : > { %v6856_v43 = vadd.f32 %v7682_v3, %v6815_v51  ;;  %v7685_v0 = vadd.f32 %v7684_v18, %v7683_v2  ;;  %v7706_v31 = vpop.f32.mrb[123].mxu1 }
0x23c5   : > { %v7707_v32 = vadd.f32 %v7706_v31, %v7705_v16 }
0x23c6   : > { %v6897_v29 = vadd.f32 %v7704_v15, %v6856_v43  ;;  %v6859_v10 = vadd.f32 %v7685_v0, %v6818_v12 }
0x23c8   : > { %v6900_v33 = vadd.f32 %v7707_v32, %v6859_v10 }
0x23e0   : > { %v7724_v59 = vpop.f32.mrb[124].mxu0 }
0x23e1   : > { %v7746_v17 = vpop.f32.mrb[124].mxu1  ;;  %v7725_v54 = vpop.f32.mrb[125].mxu0 }
0x23e2   : > { %v7726_v55 = vadd.f32 %v7725_v54, %v7724_v59  ;;  %v7747_v19 = vpop.f32.mrb[125].mxu1  ;;  %v7727_v20 = vpop.f32.mrb[126].mxu0 }
0x23e3   : > { %v7748_v27 = vadd.f32 %v7747_v19, %v7746_v17  ;;  %v7749_v35 = vpop.f32.mrb[126].mxu1  ;;  %v7728_v34 = vpop.f32.mrb[127].mxu0 }
0x23e4   : > { %v6938_v36 = vadd.f32 %v7726_v55, %v6897_v29  ;;  %v7729_v37 = vadd.f32 %v7728_v34, %v7727_v20  ;;  %v7750_v38 = vpop.f32.mrb[127].mxu1  ;;  %v7436_v55 = vld [vmem:[%s9436_s8] ss:$0 sm:$0xff] (!%p7435_p5) }
0x23e5   : > { %v7751_v6 = vadd.f32 %v7750_v38, %v7749_v35  ;;  %v7437_v20 = vld [vmem:[%s9437_s30] ss:$0 sm:$0xff] (!%p7435_p5) }
0x23e6   : > { %v6979_v39 = vadd.f32 %v7748_v27, %v6938_v36  ;;  %v6941_v47 = vadd.f32 %v7729_v37, %v6900_v33 }
0x23e8   : > { %v6982_v58 = vadd.f32 %v7751_v6, %v6941_v47  ;;  %v6985_v40 = vadd.f32 %v6979_v39, %v9129_v7 }
0x23ea   : > { %v6987_v42 = vsel %vm727_vm3, %v6985_v40, 0.0  ;;  %v6986_v13 = vadd.f32 %v6982_v58, %v9131_v28 }
0x23eb   : > { %6988 = vadd.xlane.f32.xlu1 %v6987_v42 }
0x23ec   : > { %v6990_v44 = vsel %vm727_vm3, %v6986_v13, 0.0 }
0x23ed   : > { %6991 = vadd.xlane.f32.xlu0 %v6990_v44 }
0x2478   : > { %v6989_v46 = vpop.xlane.xlu1 %6988 }
0x2479   : > { %v6993_v52 = vmul.f32 0.03125, %v6989_v46 }
0x247a   : > { %v6992_v48 = vpop.xlane.xlu0 %6991 }
0x247b   : > { %v6995_v5 = vsub.f32 %v6985_v40, %v6993_v52  ;;  %v6994_v30 = vmul.f32 0.03125, %v6992_v48 }
0x247d   : > { %v6996_v9 = vsub.f32 %v6986_v13, %v6994_v30  ;;  %v6997_v49 = vmul.f32 %v6995_v5, %v6995_v5 }
0x247f   : > { %v6999_v50 = vsel %vm727_vm3, %v6997_v49, 0.0  ;;  %v6998_v53 = vmul.f32 %v6996_v9, %v6996_v9 }
0x2480   : > { %7000 = vadd.xlane.f32.xlu0 %v6999_v50 }
0x2481   : > { %v7002_v7 = vsel %vm727_vm3, %v6998_v53, 0.0 }
0x2484   : > { %7003 = vadd.xlane.f32.xlu0 %v7002_v7 }
0x250d   : > { %v7001_v26 = vpop.xlane.xlu0 %7000 }
0x250e   : > { %v7005_v28 = vmul.f32 0.03125, %v7001_v26 }
0x2510   : > { %v7007_v22 = vadd.f32 1e-05, %v7005_v28 }
0x2511   : > { %v7004_v60 = vpop.xlane.xlu0 %7003 }
0x2512   : > { %8323 = vrsqrt.f32 %v7007_v22  ;;  %v7006_v41 = vmul.f32 0.03125, %v7004_v60 }
0x2514   : > { %v7008_v57 = vadd.f32 1e-05, %v7006_v41 }
0x2516   : > { %8325 = vrsqrt.f32 %v7008_v57 }
0x251c   : > { %v8324_v62 = vpop.eup %8323 }
0x251d   : > { %v7011_v21 = vmul.f32 %v8324_v62, %v6995_v5 }
0x251f   : > { %v7017_v23 = vmul.f32 %v7016_v61, %v7011_v21 }
0x2520   : > { %v8326_v11 = vpop.eup %8325 }
0x2521   : > { %v7023_v51 = vadd.f32 %v7022_v8, %v7017_v23  ;;  %v7012_v56 = vmul.f32 %v8326_v11, %v6996_v9  ;;  %7030 = sbr.rel (%p7435_p5) target bundleno = 9833 (0x2669), region = 88 }
0x2523   : > { %7025 = vst.msk [vmem:[%s9427_s15] sm:$0xff] %vm727_vm3, %v7023_v51  ;;  %v7018_v12 = vmul.f32 %v7016_v61, %v7012_v56 }
0x2525   : > { %v7024_v25 = vadd.f32 %v7022_v8, %v7018_v12 }
0x2527   : > { %7026 = vst.msk [vmem:[%s9427_s15 + $0x8] sm:$0xff] %vm727_vm3, %v7024_v25 }
0x252a   : > { %v7031_v45 = vld [vmem:[%s9427_s15] sm:$0xff] }
0x252b   : > { %v7035_v4 = vsel %vm727_vm3, %v7031_v45, 0.0 }
0x252c   : > { %7036 = vadd.xlane.f32.xlu0 %v7035_v4 }
0x252e   : > { %v7032_v1 = vld [vmem:[%s9427_s15 + $0x8] sm:$0xff] }
0x252f   : > { %v7038_v63 = vsel %vm727_vm3, %v7032_v1, 0.0 }
0x2530   : > { %7039 = vadd.xlane.f32.xlu0 %v7038_v63 }
0x25b9   : > { %v7037_v14 = vpop.xlane.xlu0 %7036 }
0x25ba   : > { %v7041_v3 = vmul.f32 0.03125, %v7037_v14 }
0x25bc   : > { %v7043_v24 = vsub.f32 %v7031_v45, %v7041_v3 }
0x25bd   : > { %v7040_v2 = vpop.xlane.xlu0 %7039 }
0x25be   : > { %v7042_v15 = vmul.f32 0.03125, %v7040_v2  ;;  %v7045_v16 = vmul.f32 %v7043_v24, %v7043_v24 }
0x25c0   : > { %v7044_v18 = vsub.f32 %v7032_v1, %v7042_v15  ;;  %v7047_v43 = vsel %vm727_vm3, %v7045_v16, 0.0 }
0x25c1   : > { %7048 = vadd.xlane.f32.xlu1 %v7047_v43 }
0x25c2   : > { %v7046_v0 = vmul.f32 %v7044_v18, %v7044_v18 }
0x25c4   : > { %v7050_v31 = vsel %vm727_vm3, %v7046_v0, 0.0 }
0x25c5   : > { %7051 = vadd.xlane.f32.xlu1 %v7050_v31 }
0x264e   : > { %v7049_v32 = vpop.xlane.xlu1 %7048 }
0x264f   : > { %v7053_v29 = vmul.f32 0.03125, %v7049_v32 }
0x2651   : > { %v7055_v10 = vadd.f32 1e-05, %v7053_v29 }
0x2652   : > { %v7052_v33 = vpop.xlane.xlu1 %7051 }
0x2653   : > { %8330 = vrsqrt.f32 %v7055_v10  ;;  %v7054_v59 = vmul.f32 0.03125, %v7052_v33 }
0x2655   : > { %v7056_v17 = vadd.f32 1e-05, %v7054_v59 }
0x2657   : > { %8332 = vrsqrt.f32 %v7056_v17 }
0x265d   : > { %v8331_v54 = vpop.eup %8330 }
0x265e   : > { %v7059_v19 = vmul.f32 %v8331_v54, %v7043_v24 }
0x2660   : > { %v7067_v27 = vmul.f32 %v7436_v55, %v7059_v19 }
0x2661   : > { %v8333_v35 = vpop.eup %8332 }
0x2662   : > { %v7075_v34 = vadd.f32 %v7437_v20, %v7067_v27  ;;  %v7060_v36 = vmul.f32 %v8333_v35, %v7044_v18 }
0x2664   : > { %7077 = vst.msk [vmem:[%s9427_s15] sm:$0xff] %vm727_vm3, %v7075_v34  ;;  %v7068_v37 = vmul.f32 %v7436_v55, %v7060_v36 }
0x2666   : > { %v7076_v38 = vadd.f32 %v7437_v20, %v7068_v37 }
0x2668   : > { %7078 = vst.msk [vmem:[%s9427_s15 + $0x8] sm:$0xff] %vm727_vm3, %v7076_v38 }
0x2669 PF: > { %s9438_s25 = sld [smem:[#allocation2_spill]] }
0x266f   : > { %s25_s18 = sadd.s32 1, %s9438_s25  }
0x2670   : > { %p22_p6 = scmp.ge.s32.totalorder %s25_s18, 8  }
0x2672   :  { %24 = sbr.rel (!%p22_p6) target bundleno = 5 (0x5), region = 129 }

</bundles_post_ra>
